<compile_context>
chip_gen: v6e
topology: v6e:2x2x1
jax: 0.10.0
libtpu: 0.0.40
codegen_flags: <defaults>
</compile_context>

<pallas_src>
import functools
import math

import jax
import jax.numpy as jnp
from jax.experimental import pallas as pl
from jax.experimental.pallas import tpu as pltpu


_TM = 8  # batch tile (M is tiny; one f32 sublane group)


def _round_up(n, mult):
    return ((int(n) + int(mult) - 1) // int(mult)) * int(mult)


# ---------------------------------------------------------------------------
# Kernels
# ---------------------------------------------------------------------------
def _linear_kernel_acc(x_ref, w_ref, b_ref, o_ref, acc_ref, *, apply_relu):
    """Multi-K-step fused linear with an f32 VMEM accumulator over the K axis."""
    k = pl.program_id(2)

    @pl.when(k == 0)
    def _():
        acc_ref[...] = jnp.zeros_like(acc_ref)

    acc_ref[...] += jnp.dot(
        x_ref[...].astype(jnp.bfloat16),  # bf16 x bf16 -> f32 on the MXU
        w_ref[...],
        preferred_element_type=jnp.float32,
    )

    @pl.when(k == pl.num_programs(2) - 1)
    def _():
        r = acc_ref[...] + b_ref[...]  # (1, tn) bias broadcasts over rows
        if apply_relu:
            r = jnp.maximum(r, 0.0)
        o_ref[...] = r.astype(o_ref.dtype)


def _linear_kernel_single(x_ref, w_ref, b_ref, o_ref, *, apply_relu):
    """Single-K-step fast path: no accumulator scratch, no phase branches."""
    r = jnp.dot(
        x_ref[...].astype(jnp.bfloat16),
        w_ref[...],
        preferred_element_type=jnp.float32,
    ) + b_ref[...]
    if apply_relu:
        r = jnp.maximum(r, 0.0)
    o_ref[...] = r.astype(o_ref.dtype)


# ---------------------------------------------------------------------------
# Wrapper around pallas_call
# ---------------------------------------------------------------------------
def pallas_linear_padded(x_p, w_blk, b_p, *, apply_relu, tm, tk, vmem_limit_bytes):
    """Fused out = relu?(x_p @ W + b) on pre-padded / pre-blocked operands.

    x_p:   (Mp, Kp) f32.
    w_blk: (Np // tn, Kp, tn) bf16 — pre-blocked so each (tk, tn) tile is a
           contiguous HBM region.
    b_p:   (1, Np) f32.
    """
    Mp, Kp = x_p.shape
    ngrid, Kp_w, tn = w_blk.shape
    Np = ngrid * tn
    assert Kp == Kp_w, (Kp, Kp_w)
    assert b_p.shape == (1, Np), (b_p.shape, Np)
    assert Mp % tm == 0 and Kp % tk == 0, (Mp, Kp, tm, tk)
    mgrid, kgrid = Mp // tm, Kp // tk

    cost = pl.CostEstimate(
        flops=2 * Mp * Kp * Np,
        transcendentals=0,
        bytes_accessed=(Kp * Np * w_blk.dtype.itemsize
                        + Mp * Kp * x_p.dtype.itemsize
                        + Mp * Np * 4 + Np * 4),
    )

    if kgrid == 1:
        grid = (mgrid, ngrid)
        in_specs = [
            pl.BlockSpec((tm, tk), lambda i, j: (i, 0)),
            pl.BlockSpec((None, tk, tn), lambda i, j: (j, 0, 0)),
            pl.BlockSpec((1, tn), lambda i, j: (0, j)),
        ]
        out_specs = pl.BlockSpec((tm, tn), lambda i, j: (i, j))
        kernel = functools.partial(_linear_kernel_single, apply_relu=apply_relu)
        scratch_shapes = ()
        dims = ("parallel", "parallel")
    else:
        grid = (mgrid, ngrid, kgrid)
        in_specs = [
            pl.BlockSpec((tm, tk), lambda i, j, k: (i, k)),
            pl.BlockSpec((None, tk, tn), lambda i, j, k: (j, k, 0)),
            pl.BlockSpec((1, tn), lambda i, j, k: (0, j)),
        ]
        out_specs = pl.BlockSpec((tm, tn), lambda i, j, k: (i, j))
        kernel = functools.partial(_linear_kernel_acc, apply_relu=apply_relu)
        scratch_shapes = (pltpu.VMEM((tm, tn), jnp.float32),)
        dims = ("parallel", "parallel", "arbitrary")

    return pl.pallas_call(
        kernel,
        out_shape=jax.ShapeDtypeStruct((Mp, Np), jnp.float32),
        grid_spec=pltpu.PrefetchScalarGridSpec(
            num_scalar_prefetch=0,
            grid=grid,
            in_specs=in_specs,
            out_specs=out_specs,
            scratch_shapes=scratch_shapes,
        ),
        compiler_params=pltpu.CompilerParams(
            dimension_semantics=dims,
            vmem_limit_bytes=vmem_limit_bytes,
        ),
        cost_estimate=cost,
    )(x_p, w_blk, b_p)


# ---------------------------------------------------------------------------
# Generation-aware tiling plan
# ---------------------------------------------------------------------------
def _tpu_generation_plan(size):
    """Per-layer tile sizes / VMEM limits chosen from the TPU generation."""
    vmem_bytes = None
    try:
        info = pltpu.get_tpu_info()
        vmem_bytes = int(getattr(info, "vmem_capacity_bytes", 0)) or None
    except Exception:
        vmem_bytes = None
    if vmem_bytes is None:
        try:
            kind = jax.devices()[0].device_kind.lower()
        except Exception:
            kind = ""
        if "v5" in kind or "v6" in kind:
            vmem_bytes = 128 * 1024 * 1024
        else:
            vmem_bytes = 64 * 1024 * 1024  # conservative default (v7x-like)

    if vmem_bytes >= 100 * 1024 * 1024:
        # v5e / v6e: 128 MiB VMEM, single TensorCore. Full-row contiguous
        # weight tiles (tn = padded N), deep K tiles -> 4 grid steps for L2.
        l2 = dict(tk=2048, tn=3072, vmem=64 * 1024 * 1024)
    else:
        # v7x: 64 MiB VMEM per core, 2 TensorCores. Keep the N grid at 2
        # ("parallel") so each core streams half of W2; deepen K instead.
        l2 = dict(tk=2048, tn=1536, vmem=40 * 1024 * 1024)

    kp1 = _round_up(2 * size, 16)  # 56 -> 64 (not 128): halves the W1 stream
    return {
        "l1": dict(tk=kp1, tn=8192, vmem=32 * 1024 * 1024),  # single grid step
        "l2": l2,
        "l3": dict(tk=3072, tn=128, vmem=32 * 1024 * 1024),  # single grid step
    }


# ---------------------------------------------------------------------------
# Parameters (mirroring PyTorch FCNet1D.__init__)
# ---------------------------------------------------------------------------
def init_fcnet1d_params(key, size=28):
    h1, h2 = 8000, 3000
    k1, k2, k3, k4, k5 = jax.random.split(key, 5)

    def uniform_init(k, shape, fan_in):
        bound = 1.0 / math.sqrt(fan_in)
        return jax.random.uniform(k, shape, jnp.float32, minval=-bound, maxval=bound)

    return {
        # stored (in, out) so forward is x @ W + b
        "w1": uniform_init(k1, (2 * size, h1), 2 * size),
        "b1": uniform_init(k2, (h1,), 2 * size),
        "w2": uniform_init(k3, (h1, h2), h1),
        "b2": uniform_init(k4, (h2,), h1),
        "w3": jnp.zeros((h2, size), jnp.float32),  # torch.nn.init.zeros_
        "b3": uniform_init(k5, (size,), h2),
    }


def prepare_padded_params(params, plan, size=28):
    """Zero-pad + pre-block + bf16-cast the weights ONCE at prep time."""

    def pad_block(w, b, tk, tn):
        K, N = w.shape
        Kp, Np = _round_up(K, tk), _round_up(N, tn)
        w_p = jnp.zeros((Kp, Np), jnp.float32).at[:K, :N].set(w)
        # (Kp, Np) -> (Np//tn, Kp, tn): each (tk, tn) tile is contiguous in HBM.
        w_blk = jnp.transpose(w_p.reshape(Kp, Np // tn, tn), (1, 0, 2))
        w_blk = w_blk.astype(jnp.bfloat16)
        b_p = jnp.zeros((1, Np), jnp.float32).at[0, :N].set(b)
        return w_blk, b_p

    w1, b1 = pad_block(params["w1"], params["b1"], plan["l1"]["tk"], plan["l1"]["tn"])
    w2, b2 = pad_block(params["w2"], params["b2"], plan["l2"]["tk"], plan["l2"]["tn"])
    w3, b3 = pad_block(params["w3"], params["b3"], plan["l3"]["tk"], plan["l3"]["tn"])

    # Padded dims must chain: layer-i padded N == layer-(i+1) padded K.
    assert w1.shape[0] * w1.shape[2] == w2.shape[1], (w1.shape, w2.shape)
    assert w2.shape[0] * w2.shape[2] == w3.shape[1], (w2.shape, w3.shape)

    return {"w1": w1, "b1": b1, "w2": w2, "b2": b2, "w3": w3, "b3": b3}


# ---------------------------------------------------------------------------
# Forward pass (matches FCNet1D.forward)
# ---------------------------------------------------------------------------
def fcnet1d_forward(padded_params, x, y, *, plan, size=28):
    """x, y: (B, 1, size) in NCL (PyTorch) layout -> (B, 1, size)."""
    B = x.shape[0]
    h = jnp.concatenate([x, y], axis=1).reshape(-1, 2 * size)  # (B, 2*size)

    # Pad only the tiny activation matrix per call.
    Mp = _round_up(B, _TM)
    Kp1 = padded_params["w1"].shape[1]
    h_p = jnp.zeros((Mp, Kp1), jnp.float32).at[:B, : 2 * size].set(h)

    h_p = pallas_linear_padded(
        h_p, padded_params["w1"], padded_params["b1"], apply_relu=True,
        tm=_TM, tk=plan["l1"]["tk"], vmem_limit_bytes=plan["l1"]["vmem"])
    h_p = pallas_linear_padded(
        h_p, padded_params["w2"], padded_params["b2"], apply_relu=True,
        tm=_TM, tk=plan["l2"]["tk"], vmem_limit_bytes=plan["l2"]["vmem"])
    h_p = pallas_linear_padded(
        h_p, padded_params["w3"], padded_params["b3"], apply_relu=False,
        tm=_TM, tk=plan["l3"]["tk"], vmem_limit_bytes=plan["l3"]["vmem"])

    return h_p[:B, :size].reshape(-1, 1, size)  # (B, 1, size)


def _reference_forward(params, x, y, size):
    hp = jax.lax.Precision.HIGHEST
    h = jnp.concatenate([x, y], axis=1).reshape(-1, 2 * size)
    h = jnp.maximum(jnp.dot(h, params["w1"], precision=hp) + params["b1"], 0.0)
    h = jnp.maximum(jnp.dot(h, params["w2"], precision=hp) + params["b2"], 0.0)
    h = jnp.dot(h, params["w3"], precision=hp) + params["b3"]
    return h.reshape(-1, 1, size)


if __name__ == "__main__":
    size = 28
    batch = 4

    key = jax.random.PRNGKey(0)
    kx, ky, kp, kw3 = jax.random.split(key, 4)

    x = jax.random.normal(kx, (batch, 1, size), jnp.float32)
    y = jax.random.normal(ky, (batch, 1, size), jnp.float32)

    plan = _tpu_generation_plan(size)
    params = init_fcnet1d_params(kp, size=size)
    padded_params = prepare_padded_params(params, plan, size=size)

    fwd = jax.jit(functools.partial(fcnet1d_forward, plan=plan, size=size))

    out = jax.block_until_ready(fwd(padded_params, x, y))
    assert out.shape == (batch, 1, size), out.shape

    # Spec-faithful check (dense3.weight is zero-initialised, so the result is
    # exactly the dense3 bias in both implementations).
    ref = _reference_forward(params, x, y, size)
    assert jnp.allclose(out, ref, atol=1e-4, rtol=1e-4), float(
        jnp.max(jnp.abs(out - ref)))

    # Additionally exercise the full bf16-weight matmul path with a non-zero
    # dense3 weight (looser tolerance: bf16 weights, f32 accumulation).
    bound3 = 1.0 / math.sqrt(3000.0)
    params2 = dict(params)
    params2["w3"] = jax.random.uniform(
        kw3, (3000, size), jnp.float32, minval=-bound3, maxval=bound3)
    padded_params2 = prepare_padded_params(params2, plan, size=size)
    out2 = jax.block_until_ready(fwd(padded_params2, x, y))
    ref2 = _reference_forward(params2, x, y, size)
    assert jnp.allclose(out2, ref2, atol=1e-2, rtol=5e-2), float(
        jnp.max(jnp.abs(out2 - ref2)))

    print("KERNEL_OK")
</pallas_src>

<mosaic_0001>
module attributes {stable_mosaic.version = 11 : i64} {
  func.func @_linear_kernel_single(%arg0: i32, %arg1: i32, %arg2: memref<8x64xf32, #tpu.memory_space<vmem>>, %arg3: memref<1x64x8192xbf16, #tpu.memory_space<vmem>>, %arg4: memref<1x8192xf32, #tpu.memory_space<vmem>>, %arg5: memref<8x8192xf32, #tpu.memory_space<vmem>>) attributes {dimension_semantics = [#tpu.dimension_semantics<parallel>, #tpu.dimension_semantics<parallel>], iteration_bounds = array<i64: 1, 1>, scalar_prefetch = 0 : i64, scratch_operands = 0 : i64, tpu.core_type = #tpu.core_type<tc>, window_params = [{transform_indices = @transform_0, window_bounds = array<i64: 8, 64>}, {transform_indices = @transform_1, window_bounds = array<i64: 1, 64, 8192>}, {transform_indices = @transform_2, window_bounds = array<i64: 1, 8192>}, {transform_indices = @transform_3, window_bounds = array<i64: 8, 8192>}]} {
    %c0 = arith.constant 0 : index
    %c0_0 = arith.constant 0 : index
    %0 = vector.load %arg2[%c0, %c0_0] : memref<8x64xf32, #tpu.memory_space<vmem>>, vector<8x64xf32>
    %1 = arith.truncf %0 : vector<8x64xf32> to vector<8x64xbf16>
    %c0_1 = arith.constant 0 : index
    %c0_2 = arith.constant 0 : index
    %c0_3 = arith.constant 0 : index
    %2 = vector.load %arg3[%c0_1, %c0_2, %c0_3] : memref<1x64x8192xbf16, #tpu.memory_space<vmem>>, vector<1x64x8192xbf16>
    %3 = vector.shape_cast %2 : vector<1x64x8192xbf16> to vector<64x8192xbf16>
    %cst = arith.constant dense<0.000000e+00> : vector<8x8192xf32>
    %4 = tpu.matmul %1, %3, %cst {dimension_numbers = #tpu.dot_dimension_numbers<[1], [0], [0], [1], [0, 0, 1, 1], [], []>} : vector<8x64xbf16>, vector<64x8192xbf16>, vector<8x8192xf32> -> vector<8x8192xf32>
    %c0_4 = arith.constant 0 : index
    %c0_5 = arith.constant 0 : index
    %5 = vector.load %arg4[%c0_4, %c0_5] : memref<1x8192xf32, #tpu.memory_space<vmem>>, vector<1x8192xf32>
    %6 = vector.broadcast %5 : vector<1x8192xf32> to vector<8x8192xf32>
    %7 = arith.addf %4, %6 : vector<8x8192xf32>
    %cst_6 = arith.constant 0.000000e+00 : f32
    %8 = vector.broadcast %cst_6 : f32 to vector<8x8192xf32>
    %9 = arith.maximumf %7, %8 : vector<8x8192xf32>
    %c0_7 = arith.constant 0 : index
    %c0_8 = arith.constant 0 : index
    %10 = vector.load %arg5[%c0_7, %c0_8] : memref<8x8192xf32, #tpu.memory_space<vmem>>, vector<8x8192xf32>
    tpu.vector_store %arg5[%c0_7, %c0_8], %9 {strides = array<i32>} : memref<8x8192xf32, #tpu.memory_space<vmem>>, vector<8x8192xf32>,
    return
  }
  func.func @transform_0(%arg0: i32, %arg1: i32) -> (i32, i32) {
    %c0_i32 = arith.constant 0 : i32
    %c0_i32_0 = arith.constant 0 : i32
    return %arg0, %c0_i32 : i32, i32
  }
  func.func @transform_1(%arg0: i32, %arg1: i32) -> (i32, i32, i32) {
    %c0_i32 = arith.constant 0 : i32
    %c0_i32_0 = arith.constant 0 : i32
    %c0_i32_1 = arith.constant 0 : i32
    return %arg1, %c0_i32, %c0_i32_0 : i32, i32, i32
  }
  func.func @transform_2(%arg0: i32, %arg1: i32) -> (i32, i32) {
    %c0_i32 = arith.constant 0 : i32
    %c0_i32_0 = arith.constant 0 : i32
    return %c0_i32, %arg1 : i32, i32
  }
  func.func @transform_3(%arg0: i32, %arg1: i32) -> (i32, i32) {
    %c0_i32 = arith.constant 0 : i32
    return %arg0, %arg1 : i32, i32
  }
}

module attributes {stable_mosaic.version = 11 : i64} {
  func.func @_linear_kernel_acc(%arg0: i32, %arg1: i32, %arg2: i32, %arg3: memref<8x2048xf32, #tpu.memory_space<vmem>>, %arg4: memref<1x2048x1536xbf16, #tpu.memory_space<vmem>>, %arg5: memref<1x1536xf32, #tpu.memory_space<vmem>>, %arg6: memref<8x1536xf32, #tpu.memory_space<vmem>>, %arg7: memref<8x1536xf32, #tpu.memory_space<vmem>>) attributes {dimension_semantics = [#tpu.dimension_semantics<parallel>, #tpu.dimension_semantics<parallel>, #tpu.dimension_semantics<arbitrary>], iteration_bounds = array<i64: 1, 2, 4>, scalar_prefetch = 0 : i64, scratch_operands = 1 : i64, tpu.core_type = #tpu.core_type<tc>, window_params = [{transform_indices = @transform_0, window_bounds = array<i64: 8, 2048>}, {transform_indices = @transform_1, window_bounds = array<i64: 1, 2048, 1536>}, {transform_indices = @transform_2, window_bounds = array<i64: 1, 1536>}, {transform_indices = @transform_3, window_bounds = array<i64: 8, 1536>}]} {
    %c0_i32 = arith.constant 0 : i32
    %0 = arith.cmpi eq, %arg2, %c0_i32 : i32
    %1 = arith.extui %0 : i1 to i32
    %c0_i32_0 = arith.constant 0 : i32
    %2 = arith.cmpi ne, %1, %c0_i32_0 : i32
    scf.if %2 {
      %cst_10 = arith.constant 0.000000e+00 : f32
      %14 = vector.broadcast %cst_10 : f32 to vector<8x1536xf32>
      %c0_11 = arith.constant 0 : index
      %c0_12 = arith.constant 0 : index
      %15 = vector.load %arg7[%c0_11, %c0_12] : memref<8x1536xf32, #tpu.memory_space<vmem>>, vector<8x1536xf32>
      tpu.vector_store %arg7[%c0_11, %c0_12], %14 {strides = array<i32>} : memref<8x1536xf32, #tpu.memory_space<vmem>>, vector<8x1536xf32>,
    } else {
    }
    %c0 = arith.constant 0 : index
    %c0_1 = arith.constant 0 : index
    %3 = vector.load %arg7[%c0, %c0_1] : memref<8x1536xf32, #tpu.memory_space<vmem>>, vector<8x1536xf32>
    %c0_2 = arith.constant 0 : index
    %c0_3 = arith.constant 0 : index
    %4 = vector.load %arg3[%c0_2, %c0_3] : memref<8x2048xf32, #tpu.memory_space<vmem>>, vector<8x2048xf32>
    %5 = arith.truncf %4 : vector<8x2048xf32> to vector<8x2048xbf16>
    %c0_4 = arith.constant 0 : index
    %c0_5 = arith.constant 0 : index
    %c0_6 = arith.constant 0 : index
    %6 = vector.load %arg4[%c0_4, %c0_5, %c0_6] : memref<1x2048x1536xbf16, #tpu.memory_space<vmem>>, vector<1x2048x1536xbf16>
    %7 = vector.shape_cast %6 : vector<1x2048x1536xbf16> to vector<2048x1536xbf16>
    %cst = arith.constant dense<0.000000e+00> : vector<8x1536xf32>
    %8 = tpu.matmul %5, %7, %cst {dimension_numbers = #tpu.dot_dimension_numbers<[1], [0], [0], [1], [0, 0, 1, 1], [], []>} : vector<8x2048xbf16>, vector<2048x1536xbf16>, vector<8x1536xf32> -> vector<8x1536xf32>
    %9 = arith.addf %3, %8 : vector<8x1536xf32>
    %c0_7 = arith.constant 0 : index
    %c0_8 = arith.constant 0 : index
    %10 = vector.load %arg7[%c0_7, %c0_8] : memref<8x1536xf32, #tpu.memory_space<vmem>>, vector<8x1536xf32>
    tpu.vector_store %arg7[%c0_7, %c0_8], %9 {strides = array<i32>} : memref<8x1536xf32, #tpu.memory_space<vmem>>, vector<8x1536xf32>,
    %c3_i32 = arith.constant 3 : i32
    %11 = arith.cmpi eq, %arg2, %c3_i32 : i32
    %12 = arith.extui %11 : i1 to i32
    %c0_i32_9 = arith.constant 0 : i32
    %13 = arith.cmpi ne, %12, %c0_i32_9 : i32
    scf.if %13 {
      %c0_10 = arith.constant 0 : index
      %c0_11 = arith.constant 0 : index
      %14 = vector.load %arg7[%c0_10, %c0_11] : memref<8x1536xf32, #tpu.memory_space<vmem>>, vector<8x1536xf32>
      %c0_12 = arith.constant 0 : index
      %c0_13 = arith.constant 0 : index
      %15 = vector.load %arg5[%c0_12, %c0_13] : memref<1x1536xf32, #tpu.memory_space<vmem>>, vector<1x1536xf32>
      %16 = vector.broadcast %15 : vector<1x1536xf32> to vector<8x1536xf32>
      %17 = arith.addf %14, %16 : vector<8x1536xf32>
      %cst_14 = arith.constant 0.000000e+00 : f32
      %18 = vector.broadcast %cst_14 : f32 to vector<8x1536xf32>
      %19 = arith.maximumf %17, %18 : vector<8x1536xf32>
      %c0_15 = arith.constant 0 : index
      %c0_16 = arith.constant 0 : index
      %20 = vector.load %arg6[%c0_15, %c0_16] : memref<8x1536xf32, #tpu.memory_space<vmem>>, vector<8x1536xf32>
      tpu.vector_store %arg6[%c0_15, %c0_16], %19 {strides = array<i32>} : memref<8x1536xf32, #tpu.memory_space<vmem>>, vector<8x1536xf32>,
    } else {
    }
    return
  }
  func.func @transform_0(%arg0: i32, %arg1: i32, %arg2: i32) -> (i32, i32) {
    %c0_i32 = arith.constant 0 : i32
    return %arg0, %arg2 : i32, i32
  }
  func.func @transform_1(%arg0: i32, %arg1: i32, %arg2: i32) -> (i32, i32, i32) {
    %c0_i32 = arith.constant 0 : i32
    %c0_i32_0 = arith.constant 0 : i32
    return %arg1, %arg2, %c0_i32 : i32, i32, i32
  }
  func.func @transform_2(%arg0: i32, %arg1: i32, %arg2: i32) -> (i32, i32) {
    %c0_i32 = arith.constant 0 : i32
    %c0_i32_0 = arith.constant 0 : i32
    return %c0_i32, %arg1 : i32, i32
  }
  func.func @transform_3(%arg0: i32, %arg1: i32, %arg2: i32) -> (i32, i32) {
    %c0_i32 = arith.constant 0 : i32
    return %arg0, %arg1 : i32, i32
  }
}

module attributes {stable_mosaic.version = 11 : i64} {
  func.func @_linear_kernel_single(%arg0: i32, %arg1: i32, %arg2: memref<8x3072xf32, #tpu.memory_space<vmem>>, %arg3: memref<1x3072x128xbf16, #tpu.memory_space<vmem>>, %arg4: memref<1x128xf32, #tpu.memory_space<vmem>>, %arg5: memref<8x128xf32, #tpu.memory_space<vmem>>) attributes {dimension_semantics = [#tpu.dimension_semantics<parallel>, #tpu.dimension_semantics<parallel>], iteration_bounds = array<i64: 1, 1>, scalar_prefetch = 0 : i64, scratch_operands = 0 : i64, tpu.core_type = #tpu.core_type<tc>, window_params = [{transform_indices = @transform_0, window_bounds = array<i64: 8, 3072>}, {transform_indices = @transform_1, window_bounds = array<i64: 1, 3072, 128>}, {transform_indices = @transform_2, window_bounds = array<i64: 1, 128>}, {transform_indices = @transform_3, window_bounds = array<i64: 8, 128>}]} {
    %c0 = arith.constant 0 : index
    %c0_0 = arith.constant 0 : index
    %0 = vector.load %arg2[%c0, %c0_0] : memref<8x3072xf32, #tpu.memory_space<vmem>>, vector<8x3072xf32>
    %1 = arith.truncf %0 : vector<8x3072xf32> to vector<8x3072xbf16>
    %c0_1 = arith.constant 0 : index
    %c0_2 = arith.constant 0 : index
    %c0_3 = arith.constant 0 : index
    %2 = vector.load %arg3[%c0_1, %c0_2, %c0_3] : memref<1x3072x128xbf16, #tpu.memory_space<vmem>>, vector<1x3072x128xbf16>
    %3 = vector.shape_cast %2 : vector<1x3072x128xbf16> to vector<3072x128xbf16>
    %cst = arith.constant dense<0.000000e+00> : vector<8x128xf32>
    %4 = tpu.matmul %1, %3, %cst {dimension_numbers = #tpu.dot_dimension_numbers<[1], [0], [0], [1], [0, 0, 1, 1], [], []>} : vector<8x3072xbf16>, vector<3072x128xbf16>, vector<8x128xf32> -> vector<8x128xf32>
    %c0_4 = arith.constant 0 : index
    %c0_5 = arith.constant 0 : index
    %5 = vector.load %arg4[%c0_4, %c0_5] : memref<1x128xf32, #tpu.memory_space<vmem>>, vector<1x128xf32>
    %6 = vector.broadcast %5 : vector<1x128xf32> to vector<8x128xf32>
    %7 = arith.addf %4, %6 : vector<8x128xf32>
    %c0_6 = arith.constant 0 : index
    %c0_7 = arith.constant 0 : index
    %8 = vector.load %arg5[%c0_6, %c0_7] : memref<8x128xf32, #tpu.memory_space<vmem>>, vector<8x128xf32>
    tpu.vector_store %arg5[%c0_6, %c0_7], %7 {strides = array<i32>} : memref<8x128xf32, #tpu.memory_space<vmem>>, vector<8x128xf32>,
    return
  }
  func.func @transform_0(%arg0: i32, %arg1: i32) -> (i32, i32) {
    %c0_i32 = arith.constant 0 : i32
    %c0_i32_0 = arith.constant 0 : i32
    return %arg0, %c0_i32 : i32, i32
  }
  func.func @transform_1(%arg0: i32, %arg1: i32) -> (i32, i32, i32) {
    %c0_i32 = arith.constant 0 : i32
    %c0_i32_0 = arith.constant 0 : i32
    %c0_i32_1 = arith.constant 0 : i32
    return %arg1, %c0_i32, %c0_i32_0 : i32, i32, i32
  }
  func.func @transform_2(%arg0: i32, %arg1: i32) -> (i32, i32) {
    %c0_i32 = arith.constant 0 : i32
    %c0_i32_0 = arith.constant 0 : i32
    return %c0_i32, %arg1 : i32, i32
  }
  func.func @transform_3(%arg0: i32, %arg1: i32) -> (i32, i32) {
    %c0_i32 = arith.constant 0 : i32
    return %arg0, %arg1 : i32, i32
  }
}

</mosaic_0001>

<bundles_post_ra>
// kernel: fcnet1d_forward.5
= control target key start
LH: loop header
LB: loop body
LE: loop exit
PB: predicated region body
PF: predicated region fallthrough
CT: control target
= control target key end

     0   :  { %s3414_s1 = inlined_call_operand.vmem [shape: bf16[1,3072,128], index: 1, kind: input, shape index: {}]   ;;  %s3415_s0 = inlined_call_operand.vmem [shape: f32[8,3072], index: 0, kind: input, shape index: {}]   ;;  %s3416_s2 = inlined_call_operand.vmem [shape: f32[1,128], index: 2, kind: input, shape index: {}]   ;;  %s3417_s3 = inlined_call_operand.vmem [shape: f32[8,128], index: 3, kind: output, shape index: {}]  }
   0x1   :  { %v2548_v0 = vld [vmem:[%s3414_s1 + $0x78] sm:$0xff]   ;;  %v2552_v4 = vld [vmem:[%s3414_s1 + $0x70] sm:$0xff]   ;;  %v2556_v8 = vld [vmem:[%s3414_s1 + $0x68] sm:$0xff]  }
   0x2   :  { %v2549_v1 = vld [vmem:[%s3414_s1 + $0xf8] sm:$0xff]   ;;  %2284 = vmatprep.subr.bf16.mxu0 %v2548_v0  ;;  %v2553_v5 = vld [vmem:[%s3414_s1 + $0xf0] sm:$0xff]   ;;  %v2557_v9 = vld [vmem:[%s3414_s1 + $0xe8] sm:$0xff]  }
   0x3   :  { %v2550_v2 = vld [vmem:[%s3414_s1 + $0x38] sm:$0xff]   ;;  %2306 = vmatprep.subr.bf16.mxu1 %v2549_v1  ;;  %v2554_v6 = vld [vmem:[%s3414_s1 + $0x30] sm:$0xff]   ;;  %v2558_v10 = vld [vmem:[%s3414_s1 + $0x28] sm:$0xff]  }
   0x4   :  { %v2551_v3 = vld [vmem:[%s3414_s1 + $0xb8] sm:$0xff]   ;;  %2285 = vmatpush3.bf16.msra.mxu0 %v2550_v2  ;;  %v2555_v7 = vld [vmem:[%s3414_s1 + $0xb0] sm:$0xff]   ;;  %v2559_v11 = vld [vmem:[%s3414_s1 + $0xa8] sm:$0xff]  }
   0x5   :  { %2307 = vmatpush3.bf16.msra.mxu1 %v2551_v3  ;;  %2286 = vmatprep.subr.bf16.mxu0 %v2552_v4  ;;  %v2560_v12 = vld [vmem:[%s3414_s1 + $0x60] sm:$0xff]   ;;  %v2564_v16 = vld [vmem:[%s3414_s1 + $0x58] sm:$0xff]   ;;  %v2568_v20 = vld [vmem:[%s3414_s1 + $0x50] sm:$0xff]  }
   0x6   :  { %2308 = vmatprep.subr.bf16.mxu1 %v2553_v5  ;;  %v2561_v13 = vld [vmem:[%s3414_s1 + $0xe0] sm:$0xff]   ;;  %v2565_v17 = vld [vmem:[%s3414_s1 + $0xd8] sm:$0xff]   ;;  %v2569_v21 = vld [vmem:[%s3414_s1 + $0xd0] sm:$0xff]  }
   0x7   :  { %v2562_v14 = vld [vmem:[%s3414_s1 + $0x20] sm:$0xff]   ;;  %v2566_v18 = vld [vmem:[%s3414_s1 + $0x18] sm:$0xff]   ;;  %v2570_v22 = vld [vmem:[%s3414_s1 + $0x10] sm:$0xff]  }
   0x8   :  { %2287 = vmatpush3.bf16.msra.mxu0 %v2554_v6  ;;  %v2563_v15 = vld [vmem:[%s3414_s1 + $0xa0] sm:$0xff]   ;;  %v2567_v19 = vld [vmem:[%s3414_s1 + $0x98] sm:$0xff]   ;;  %v2571_v23 = vld [vmem:[%s3414_s1 + $0x90] sm:$0xff]  }
   0x9   :  { %2309 = vmatpush3.bf16.msra.mxu1 %v2555_v7  ;;  %2288 = vmatprep.subr.bf16.mxu0 %v2556_v8  ;;  %v2572_v24 = vld [vmem:[%s3414_s1 + $0x48] sm:$0xff]   ;;  %v2576_v28 = vld [vmem:[%s3414_s1 + $0x40] sm:$0xff]   ;;  %v18_v33 = vld [vmem:[%s3415_s0 + $0x18] sm:$0xff] }
   0xa   :  { %2310 = vmatprep.subr.bf16.mxu1 %v2557_v9  ;;  %v2573_v25 = vld [vmem:[%s3414_s1 + $0xc8] sm:$0xff]   ;;  %v2577_v29 = vld [vmem:[%s3414_s1 + $0xc0] sm:$0xff]   ;;  %v42_v36 = vpack.c.bf16 %v18_v33, %v18_v33  ;;  %v17_v38 = vld [vmem:[%s3415_s0 + $0x10] sm:$0xff] }
   0xb   :  { %v2574_v26 = vld [vmem:[%s3414_s1 + $0x8] sm:$0xff]   ;;  %v2578_v30 = vld [vmem:[%s3414_s1] sm:$0xff]   ;;  %v41_v39 = vpack.c.bf16 %v17_v38, %v17_v38  ;;  %v2580_v40 = vld [vmem:[%s3414_s1 + $0x178] sm:$0xff]  }
   0xc   :  { %2289 = vmatpush3.bf16.msra.mxu0 %v2558_v10  ;;  %v2575_v27 = vld [vmem:[%s3414_s1 + $0x88] sm:$0xff]   ;;  %v2579_v31 = vld [vmem:[%s3414_s1 + $0x80] sm:$0xff]   ;;  %1678 = vmatprep.mubr.bf16.mxu1 %v42_v36  ;;  %v2581_v41 = vld [vmem:[%s3414_s1 + $0x1f8] sm:$0xff]  }
   0xd   :  { %2311 = vmatpush3.bf16.msra.mxu1 %v2559_v11  ;;  %2290 = vmatprep.subr.bf16.mxu0 %v2560_v12  ;;  %v16_v32 = vld [vmem:[%s3415_s0 + $0x8] sm:$0xff]  ;;  %v15_v34 = vld [vmem:[%s3415_s0] sm:$0xff]  ;;  %v2582_v42 = vld [vmem:[%s3414_s1 + $0x138] sm:$0xff]  }
   0xe   :  { %2312 = vmatprep.subr.bf16.mxu1 %v2561_v13  ;;  %v40_v35 = vpack.c.bf16 %v16_v32, %v16_v32  ;;  %v39_v37 = vpack.c.bf16 %v15_v34, %v15_v34  ;;  %v2583_v43 = vld [vmem:[%s3414_s1 + $0x1b8] sm:$0xff]   ;;  %v2584_v44 = vld [vmem:[%s3414_s1 + $0x170] sm:$0xff]   ;;  %v2588_v48 = vld [vmem:[%s3414_s1 + $0x168] sm:$0xff]  }
   0xf   :  { %v2585_v45 = vld [vmem:[%s3414_s1 + $0x1f0] sm:$0xff]   ;;  %v2589_v49 = vld [vmem:[%s3414_s1 + $0x1e8] sm:$0xff]   ;;  %v2592_v52 = vld [vmem:[%s3414_s1 + $0x160] sm:$0xff]  }
  0x10   :  { %2291 = vmatpush3.bf16.msra.mxu0 %v2562_v14  ;;  %1638 = vmatprep.mubr.bf16.mxu0 %v40_v35  ;;  %v2586_v46 = vld [vmem:[%s3414_s1 + $0x130] sm:$0xff]   ;;  %v2590_v50 = vld [vmem:[%s3414_s1 + $0x128] sm:$0xff]   ;;  %v2593_v53 = vld [vmem:[%s3414_s1 + $0x1e0] sm:$0xff]  }
  0x11   :  { %2313 = vmatpush3.bf16.msra.mxu1 %v2563_v15  ;;  %2292 = vmatprep.subr.bf16.mxu0 %v2564_v16  ;;  %v2587_v47 = vld [vmem:[%s3414_s1 + $0x1b0] sm:$0xff]   ;;  %v2591_v51 = vld [vmem:[%s3414_s1 + $0x1a8] sm:$0xff]   ;;  %v2594_v54 = vld [vmem:[%s3414_s1 + $0x120] sm:$0xff]  }
  0x12   :  { %2314 = vmatprep.subr.bf16.mxu1 %v2565_v17  ;;  %v2595_v55 = vld [vmem:[%s3414_s1 + $0x1a0] sm:$0xff]   ;;  %v2596_v56 = vld [vmem:[%s3414_s1 + $0x158] sm:$0xff]   ;;  %v2600_v60 = vld [vmem:[%s3414_s1 + $0x150] sm:$0xff]  }
  0x13   :  { %v2597_v57 = vld [vmem:[%s3414_s1 + $0x1d8] sm:$0xff]   ;;  %v2601_v61 = vld [vmem:[%s3414_s1 + $0x1d0] sm:$0xff]   ;;  %v2604_v0 = vld [vmem:[%s3414_s1 + $0x148] sm:$0xff]  }
  0x14   :  { %2293 = vmatpush3.bf16.msra.mxu0 %v2566_v18  ;;  %v2598_v58 = vld [vmem:[%s3414_s1 + $0x118] sm:$0xff]   ;;  %v2602_v62 = vld [vmem:[%s3414_s1 + $0x110] sm:$0xff]   ;;  %v2605_v1 = vld [vmem:[%s3414_s1 + $0x1c8] sm:$0xff]  }
  0x15   :  { %2315 = vmatpush3.bf16.msra.mxu1 %v2567_v19  ;;  %2294 = vmatprep.subr.bf16.mxu0 %v2568_v20  ;;  %v2599_v59 = vld [vmem:[%s3414_s1 + $0x198] sm:$0xff]   ;;  %v2603_v63 = vld [vmem:[%s3414_s1 + $0x190] sm:$0xff]   ;;  %v2606_v2 = vld [vmem:[%s3414_s1 + $0x108] sm:$0xff]  }
  0x16   :  { %2316 = vmatprep.subr.bf16.mxu1 %v2569_v21  ;;  %v2607_v3 = vld [vmem:[%s3414_s1 + $0x188] sm:$0xff]   ;;  %v2608_v4 = vld [vmem:[%s3414_s1 + $0x140] sm:$0xff]   ;;  %v22_v9 = vld [vmem:[%s3415_s0 + $0x38] sm:$0xff] }
  0x17   :  { %v2609_v5 = vld [vmem:[%s3414_s1 + $0x1c0] sm:$0xff]   ;;  %v20_v8 = vld [vmem:[%s3415_s0 + $0x28] sm:$0xff]  ;;  %v46_v11 = vpack.c.bf16 %v22_v9, %v22_v9  ;;  %v21_v13 = vld [vmem:[%s3415_s0 + $0x30] sm:$0xff] }
  0x18   :  { %2295 = vmatpush3.bf16.msra.mxu0 %v2570_v22  ;;  %v2610_v6 = vld [vmem:[%s3414_s1 + $0x100] sm:$0xff]   ;;  %v44_v10 = vpack.c.bf16 %v20_v8, %v20_v8  ;;  %v45_v15 = vpack.c.bf16 %v21_v13, %v21_v13  ;;  %v2612_v16 = vld [vmem:[%s3414_s1 + $0x278] sm:$0xff]   ;;  %v2616_v20 = vld [vmem:[%s3414_s1 + $0x270] sm:$0xff]  }
  0x19   :  { %2317 = vmatpush3.bf16.msra.mxu1 %v2571_v23  ;;  %2296 = vmatprep.subr.bf16.mxu0 %v2572_v24  ;;  %v2611_v7 = vld [vmem:[%s3414_s1 + $0x180] sm:$0xff]   ;;  %v2613_v17 = vld [vmem:[%s3414_s1 + $0x2f8] sm:$0xff]   ;;  %v2617_v21 = vld [vmem:[%s3414_s1 + $0x2f0] sm:$0xff]  }
  0x1a   :  { %2318 = vmatprep.subr.bf16.mxu1 %v2573_v25  ;;  %v19_v12 = vld [vmem:[%s3415_s0 + $0x20] sm:$0xff]  ;;  %v2614_v18 = vld [vmem:[%s3414_s1 + $0x238] sm:$0xff]   ;;  %v2618_v22 = vld [vmem:[%s3414_s1 + $0x230] sm:$0xff]  }
  0x1b   :  { %v43_v14 = vpack.c.bf16 %v19_v12, %v19_v12  ;;  %v2615_v19 = vld [vmem:[%s3414_s1 + $0x2b8] sm:$0xff]   ;;  %v2619_v23 = vld [vmem:[%s3414_s1 + $0x2b0] sm:$0xff]   ;;  %v2620_v24 = vld [vmem:[%s3414_s1 + $0x268] sm:$0xff]  }
  0x1c   :  { %2297 = vmatpush3.bf16.msra.mxu0 %v2574_v26  ;;  %v2621_v25 = vld [vmem:[%s3414_s1 + $0x2e8] sm:$0xff]   ;;  %v2628_v32 = vld [vmem:[%s3414_s1 + $0x258] sm:$0xff]   ;;  %v2632_v36 = vld [vmem:[%s3414_s1 + $0x250] sm:$0xff]  }
  0x1d   :  { %2319 = vmatpush3.bf16.msra.mxu1 %v2575_v27  ;;  %2298 = vmatprep.subr.bf16.mxu0 %v2576_v28  ;;  %v2622_v26 = vld [vmem:[%s3414_s1 + $0x228] sm:$0xff]   ;;  %v2624_v28 = vld [vmem:[%s3414_s1 + $0x260] sm:$0xff]   ;;  %v2629_v33 = vld [vmem:[%s3414_s1 + $0x2d8] sm:$0xff]  }
  0x1e   :  { %2320 = vmatprep.subr.bf16.mxu1 %v2577_v29  ;;  %v2623_v27 = vld [vmem:[%s3414_s1 + $0x2a8] sm:$0xff]   ;;  %v2625_v29 = vld [vmem:[%s3414_s1 + $0x2e0] sm:$0xff]   ;;  %v2630_v34 = vld [vmem:[%s3414_s1 + $0x218] sm:$0xff]  }
  0x1f   :  { %v2631_v35 = vld [vmem:[%s3414_s1 + $0x298] sm:$0xff]   ;;  %v2634_v38 = vld [vmem:[%s3414_s1 + $0x210] sm:$0xff]  }
  0x20   :  { %2299 = vmatpush3.bf16.msra.mxu0 %v2578_v30  ;;  %v2626_v30 = vld [vmem:[%s3414_s1 + $0x220] sm:$0xff]   ;;  %v2660_v8 = vld [vmem:[%s3414_s1 + $0x358] sm:$0xff]   ;;  %v2664_v12 = vld [vmem:[%s3414_s1 + $0x350] sm:$0xff]  }
  0x21   :  { %2321 = vmatpush3.bf16.msra.mxu1 %v2579_v31  ;;  %2328 = vmatprep.subr.bf16.mxu0 %v2580_v40  ;;  %v2627_v31 = vld [vmem:[%s3414_s1 + $0x2a0] sm:$0xff]   ;;  %v2636_v40 = vld [vmem:[%s3414_s1 + $0x248] sm:$0xff]   ;;  %v2661_v9 = vld [vmem:[%s3414_s1 + $0x3d8] sm:$0xff]  }
  0x22   :  { %2350 = vmatprep.subr.bf16.mxu1 %v2581_v41  ;;  %v2637_v41 = vld [vmem:[%s3414_s1 + $0x2c8] sm:$0xff]   ;;  %v2665_v13 = vld [vmem:[%s3414_s1 + $0x3d0] sm:$0xff]  }
  0x23   :  { %1639 = vmatmul.mubr.bf16.vlgmr.msra.gmra.mxu0 %v39_v37  ;;  %v2633_v37 = vld [vmem:[%s3414_s1 + $0x2d0] sm:$0xff]  }
  0x24   :  { %1679 = vmatmul.mubr.bf16.vlgmr.msra.gmra.mxu1 %v41_v39  ;;  %2329 = vmatpush3.bf16.msra.mxu0 %v2582_v42  ;;  %v2635_v39 = vld [vmem:[%s3414_s1 + $0x290] sm:$0xff]   ;;  %v2638_v42 = vld [vmem:[%s3414_s1 + $0x208] sm:$0xff]  }
  0x25   :  { %2351 = vmatpush3.bf16.msra.mxu1 %v2583_v43  ;;  %2330 = vmatprep.subr.bf16.mxu0 %v2584_v44  ;;  %v2639_v43 = vld [vmem:[%s3414_s1 + $0x288] sm:$0xff]   ;;  %v2640_v44 = vld [vmem:[%s3414_s1 + $0x240] sm:$0xff]  }
  0x26   :  { %2352 = vmatprep.subr.bf16.mxu1 %v2585_v45  ;;  %1718 = vmatprep.mubr.bf16.mxu0 %v44_v10  ;;  %v2641_v45 = vld [vmem:[%s3414_s1 + $0x2c0] sm:$0xff]   ;;  %v2662_v10 = vld [vmem:[%s3414_s1 + $0x318] sm:$0xff]  }
  0x27   :  { %1758 = vmatprep.mubr.bf16.mxu1 %v46_v11  ;;  %v2663_v11 = vld [vmem:[%s3414_s1 + $0x398] sm:$0xff]  }
  0x28   :  { %2331 = vmatpush3.bf16.msra.mxu0 %v2586_v46  ;;  %v2642_v46 = vld [vmem:[%s3414_s1 + $0x200] sm:$0xff]  }
  0x29   :  { %2353 = vmatpush3.bf16.msra.mxu1 %v2587_v47  ;;  %2332 = vmatprep.subr.bf16.mxu0 %v2588_v48  ;;  %v2643_v47 = vld [vmem:[%s3414_s1 + $0x280] sm:$0xff]   ;;  %v24_v48 = vld [vmem:[%s3415_s0 + $0x48] sm:$0xff] }
  0x2a   :  { %2354 = vmatprep.subr.bf16.mxu1 %v2589_v49  ;;  %v48_v49 = vpack.c.bf16 %v24_v48, %v24_v48  ;;  %v2692_v48 = vld [vmem:[%s3414_s1 + $0x458] sm:$0xff]  }
  0x2c   :  { %2333 = vmatpush3.bf16.msra.mxu0 %v2590_v50  ;;  %v26_v50 = vld [vmem:[%s3415_s0 + $0x58] sm:$0xff] }
  0x2d   :  { %2355 = vmatpush3.bf16.msra.mxu1 %v2591_v51  ;;  %2334 = vmatprep.subr.bf16.mxu0 %v2592_v52  ;;  %v23_v51 = vld [vmem:[%s3415_s0 + $0x40] sm:$0xff]  ;;  %v25_v52 = vld [vmem:[%s3415_s0 + $0x50] sm:$0xff] }
  0x2e   :  { %2356 = vmatprep.subr.bf16.mxu1 %v2593_v53  ;;  %v50_v53 = vpack.c.bf16 %v26_v50, %v26_v50  ;;  %v2694_v50 = vld [vmem:[%s3414_s1 + $0x418] sm:$0xff]  }
  0x30   :  { %2335 = vmatpush3.bf16.msra.mxu0 %v2594_v54  ;;  %v47_v54 = vpack.c.bf16 %v23_v51, %v23_v51  ;;  %v2695_v51 = vld [vmem:[%s3414_s1 + $0x498] sm:$0xff]  }
  0x31   :  { %2357 = vmatpush3.bf16.msra.mxu1 %v2595_v55  ;;  %2336 = vmatprep.subr.bf16.mxu0 %v2596_v56  ;;  %v49_v55 = vpack.c.bf16 %v25_v52, %v25_v52  ;;  %v2644_v56 = vld [vmem:[%s3414_s1 + $0x378] sm:$0xff]   ;;  %v2696_v52 = vld [vmem:[%s3414_s1 + $0x450] sm:$0xff]  }
  0x32   :  { %2358 = vmatprep.subr.bf16.mxu1 %v2597_v57  ;;  %v2645_v57 = vld [vmem:[%s3414_s1 + $0x3f8] sm:$0xff]  }
  0x34   :  { %2337 = vmatpush3.bf16.msra.mxu0 %v2598_v58  ;;  %v2646_v58 = vld [vmem:[%s3414_s1 + $0x338] sm:$0xff]  }
  0x35   :  { %2359 = vmatpush3.bf16.msra.mxu1 %v2599_v59  ;;  %2338 = vmatprep.subr.bf16.mxu0 %v2600_v60  ;;  %v2647_v59 = vld [vmem:[%s3414_s1 + $0x3b8] sm:$0xff]   ;;  %v2648_v60 = vld [vmem:[%s3414_s1 + $0x370] sm:$0xff]  }
  0x36   :  { %2360 = vmatprep.subr.bf16.mxu1 %v2601_v61  ;;  %v2649_v61 = vld [vmem:[%s3414_s1 + $0x3f0] sm:$0xff]  }
  0x38   :  { %2339 = vmatpush3.bf16.msra.mxu0 %v2602_v62  ;;  %v2650_v62 = vld [vmem:[%s3414_s1 + $0x330] sm:$0xff]  }
  0x39   :  { %2361 = vmatpush3.bf16.msra.mxu1 %v2603_v63  ;;  %2340 = vmatprep.subr.bf16.mxu0 %v2604_v0  ;;  %v2651_v63 = vld [vmem:[%s3414_s1 + $0x3b0] sm:$0xff]   ;;  %v2652_v0 = vld [vmem:[%s3414_s1 + $0x368] sm:$0xff]  }
  0x3a   :  { %2362 = vmatprep.subr.bf16.mxu1 %v2605_v1  ;;  %v2653_v1 = vld [vmem:[%s3414_s1 + $0x3e8] sm:$0xff]  }
  0x3c   :  { %2341 = vmatpush3.bf16.msra.mxu0 %v2606_v2  ;;  %v2654_v2 = vld [vmem:[%s3414_s1 + $0x328] sm:$0xff]  }
  0x3d   :  { %2363 = vmatpush3.bf16.msra.mxu1 %v2607_v3  ;;  %2342 = vmatprep.subr.bf16.mxu0 %v2608_v4  ;;  %v2655_v3 = vld [vmem:[%s3414_s1 + $0x3a8] sm:$0xff]   ;;  %v2656_v4 = vld [vmem:[%s3414_s1 + $0x360] sm:$0xff]  }
  0x3e   :  { %2364 = vmatprep.subr.bf16.mxu1 %v2609_v5  ;;  %v2657_v5 = vld [vmem:[%s3414_s1 + $0x3e0] sm:$0xff]  }
  0x40   :  { %2343 = vmatpush3.bf16.msra.mxu0 %v2610_v6  ;;  %v2658_v6 = vld [vmem:[%s3414_s1 + $0x320] sm:$0xff]  }
  0x41   :  { %2365 = vmatpush3.bf16.msra.mxu1 %v2611_v7  ;;  %2372 = vmatprep.subr.bf16.mxu0 %v2612_v16  ;;  %v2659_v7 = vld [vmem:[%s3414_s1 + $0x3a0] sm:$0xff]   ;;  %v2668_v16 = vld [vmem:[%s3414_s1 + $0x348] sm:$0xff]  }
  0x42   :  { %2394 = vmatprep.subr.bf16.mxu1 %v2613_v17  ;;  %v2669_v17 = vld [vmem:[%s3414_s1 + $0x3c8] sm:$0xff]  }
  0x43   :  { %1719 = vmatmul.mubr.bf16.vlgmr.msra.gmra.mxu0 %v43_v14  ;;  %v2666_v14 = vld [vmem:[%s3414_s1 + $0x310] sm:$0xff]  }
  0x44   :  { %1759 = vmatmul.mubr.bf16.vlgmr.msra.gmra.mxu1 %v45_v15  ;;  %2373 = vmatpush3.bf16.msra.mxu0 %v2614_v18  ;;  %v2667_v15 = vld [vmem:[%s3414_s1 + $0x390] sm:$0xff]   ;;  %v2670_v18 = vld [vmem:[%s3414_s1 + $0x308] sm:$0xff]  }
  0x45   :  { %2395 = vmatpush3.bf16.msra.mxu1 %v2615_v19  ;;  %2374 = vmatprep.subr.bf16.mxu0 %v2616_v20  ;;  %v2671_v19 = vld [vmem:[%s3414_s1 + $0x388] sm:$0xff]   ;;  %v2672_v20 = vld [vmem:[%s3414_s1 + $0x340] sm:$0xff]  }
  0x46   :  { %2396 = vmatprep.subr.bf16.mxu1 %v2617_v21  ;;  %1798 = vmatprep.mubr.bf16.mxu0 %v48_v49  ;;  %v2673_v21 = vld [vmem:[%s3414_s1 + $0x3c0] sm:$0xff]   ;;  %v2693_v49 = vld [vmem:[%s3414_s1 + $0x4d8] sm:$0xff]  }
  0x47   :  { %1838 = vmatprep.mubr.bf16.mxu1 %v50_v53  ;;  %v2697_v53 = vld [vmem:[%s3414_s1 + $0x4d0] sm:$0xff]  }
  0x48   :  { %2375 = vmatpush3.bf16.msra.mxu0 %v2618_v22  ;;  %v2674_v22 = vld [vmem:[%s3414_s1 + $0x300] sm:$0xff]  }
  0x49   :  { %2397 = vmatpush3.bf16.msra.mxu1 %v2619_v23  ;;  %2376 = vmatprep.subr.bf16.mxu0 %v2620_v24  ;;  %v2675_v23 = vld [vmem:[%s3414_s1 + $0x380] sm:$0xff]   ;;  %v28_v24 = vld [vmem:[%s3415_s0 + $0x68] sm:$0xff] }
  0x4a   :  { %2398 = vmatprep.subr.bf16.mxu1 %v2621_v25  ;;  %v30_v25 = vld [vmem:[%s3415_s0 + $0x78] sm:$0xff] }
  0x4c   :  { %2377 = vmatpush3.bf16.msra.mxu0 %v2622_v26  ;;  %v27_v26 = vld [vmem:[%s3415_s0 + $0x60] sm:$0xff] }
  0x4d   :  { %2399 = vmatpush3.bf16.msra.mxu1 %v2623_v27  ;;  %2378 = vmatprep.subr.bf16.mxu0 %v2624_v28  ;;  %v52_v27 = vpack.c.bf16 %v28_v24, %v28_v24  ;;  %v54_v28 = vpack.c.bf16 %v30_v25, %v30_v25  ;;  %v2724_v24 = vld [vmem:[%s3414_s1 + $0x558] sm:$0xff]  }
  0x4e   :  { %2400 = vmatprep.subr.bf16.mxu1 %v2625_v29  ;;  %v51_v29 = vpack.c.bf16 %v27_v26, %v27_v26  ;;  %v2725_v25 = vld [vmem:[%s3414_s1 + $0x5d8] sm:$0xff]  }
  0x4f   :  { %v2726_v26 = vld [vmem:[%s3414_s1 + $0x518] sm:$0xff]  }
  0x50   :  { %2379 = vmatpush3.bf16.msra.mxu0 %v2626_v30  ;;  %v29_v30 = vld [vmem:[%s3415_s0 + $0x70] sm:$0xff] }
  0x51   :  { %2401 = vmatpush3.bf16.msra.mxu1 %v2627_v31  ;;  %2380 = vmatprep.subr.bf16.mxu0 %v2628_v32  ;;  %v53_v31 = vpack.c.bf16 %v29_v30, %v29_v30  ;;  %v2676_v32 = vld [vmem:[%s3414_s1 + $0x478] sm:$0xff]   ;;  %v2730_v30 = vld [vmem:[%s3414_s1 + $0x510] sm:$0xff]  }
  0x52   :  { %2402 = vmatprep.subr.bf16.mxu1 %v2629_v33  ;;  %v2677_v33 = vld [vmem:[%s3414_s1 + $0x4f8] sm:$0xff]  }
  0x54   :  { %2381 = vmatpush3.bf16.msra.mxu0 %v2630_v34  ;;  %v2678_v34 = vld [vmem:[%s3414_s1 + $0x438] sm:$0xff]  }
  0x55   :  { %2403 = vmatpush3.bf16.msra.mxu1 %v2631_v35  ;;  %2382 = vmatprep.subr.bf16.mxu0 %v2632_v36  ;;  %v2679_v35 = vld [vmem:[%s3414_s1 + $0x4b8] sm:$0xff]   ;;  %v2680_v36 = vld [vmem:[%s3414_s1 + $0x470] sm:$0xff]  }
  0x56   :  { %2404 = vmatprep.subr.bf16.mxu1 %v2633_v37  ;;  %v2681_v37 = vld [vmem:[%s3414_s1 + $0x4f0] sm:$0xff]  }
  0x58   :  { %2383 = vmatpush3.bf16.msra.mxu0 %v2634_v38  ;;  %v2682_v38 = vld [vmem:[%s3414_s1 + $0x430] sm:$0xff]  }
  0x59   :  { %2405 = vmatpush3.bf16.msra.mxu1 %v2635_v39  ;;  %2384 = vmatprep.subr.bf16.mxu0 %v2636_v40  ;;  %v2683_v39 = vld [vmem:[%s3414_s1 + $0x4b0] sm:$0xff]   ;;  %v2684_v40 = vld [vmem:[%s3414_s1 + $0x468] sm:$0xff]  }
  0x5a   :  { %2406 = vmatprep.subr.bf16.mxu1 %v2637_v41  ;;  %v2685_v41 = vld [vmem:[%s3414_s1 + $0x4e8] sm:$0xff]  }
  0x5c   :  { %2385 = vmatpush3.bf16.msra.mxu0 %v2638_v42  ;;  %v2686_v42 = vld [vmem:[%s3414_s1 + $0x428] sm:$0xff]  }
  0x5d   :  { %2407 = vmatpush3.bf16.msra.mxu1 %v2639_v43  ;;  %2386 = vmatprep.subr.bf16.mxu0 %v2640_v44  ;;  %v2687_v43 = vld [vmem:[%s3414_s1 + $0x4a8] sm:$0xff]   ;;  %v2688_v44 = vld [vmem:[%s3414_s1 + $0x460] sm:$0xff]  }
  0x5e   :  { %2408 = vmatprep.subr.bf16.mxu1 %v2641_v45  ;;  %v2689_v45 = vld [vmem:[%s3414_s1 + $0x4e0] sm:$0xff]  }
  0x60   :  { %2387 = vmatpush3.bf16.msra.mxu0 %v2642_v46  ;;  %v2690_v46 = vld [vmem:[%s3414_s1 + $0x420] sm:$0xff]  }
  0x61   :  { %2409 = vmatpush3.bf16.msra.mxu1 %v2643_v47  ;;  %2416 = vmatprep.subr.bf16.mxu0 %v2644_v56  ;;  %v2691_v47 = vld [vmem:[%s3414_s1 + $0x4a0] sm:$0xff]   ;;  %v2700_v56 = vld [vmem:[%s3414_s1 + $0x448] sm:$0xff]  }
  0x62   :  { %2438 = vmatprep.subr.bf16.mxu1 %v2645_v57  ;;  %v2701_v57 = vld [vmem:[%s3414_s1 + $0x4c8] sm:$0xff]  }
  0x63   :  { %1799 = vmatmul.mubr.bf16.vlgmr.msra.gmra.mxu0 %v47_v54  ;;  %v2698_v54 = vld [vmem:[%s3414_s1 + $0x410] sm:$0xff]  }
  0x64   :  { %1839 = vmatmul.mubr.bf16.vlgmr.msra.gmra.mxu1 %v49_v55  ;;  %2417 = vmatpush3.bf16.msra.mxu0 %v2646_v58  ;;  %v2699_v55 = vld [vmem:[%s3414_s1 + $0x490] sm:$0xff]   ;;  %v2702_v58 = vld [vmem:[%s3414_s1 + $0x408] sm:$0xff]  }
  0x65   :  { %2439 = vmatpush3.bf16.msra.mxu1 %v2647_v59  ;;  %2418 = vmatprep.subr.bf16.mxu0 %v2648_v60  ;;  %v2703_v59 = vld [vmem:[%s3414_s1 + $0x488] sm:$0xff]   ;;  %v2704_v60 = vld [vmem:[%s3414_s1 + $0x440] sm:$0xff]  }
  0x66   :  { %2440 = vmatprep.subr.bf16.mxu1 %v2649_v61  ;;  %1878 = vmatprep.mubr.bf16.mxu0 %v52_v27  ;;  %v2705_v61 = vld [vmem:[%s3414_s1 + $0x4c0] sm:$0xff]   ;;  %v2727_v27 = vld [vmem:[%s3414_s1 + $0x598] sm:$0xff]  }
  0x67   :  { %1918 = vmatprep.mubr.bf16.mxu1 %v54_v28  ;;  %v2728_v28 = vld [vmem:[%s3414_s1 + $0x550] sm:$0xff]  }
  0x68   :  { %2419 = vmatpush3.bf16.msra.mxu0 %v2650_v62  ;;  %v2706_v62 = vld [vmem:[%s3414_s1 + $0x400] sm:$0xff]  }
  0x69   :  { %2441 = vmatpush3.bf16.msra.mxu1 %v2651_v63  ;;  %2420 = vmatprep.subr.bf16.mxu0 %v2652_v0  ;;  %v2707_v63 = vld [vmem:[%s3414_s1 + $0x480] sm:$0xff]   ;;  %v32_v0 = vld [vmem:[%s3415_s0 + $0x88] sm:$0xff] }
  0x6a   :  { %2442 = vmatprep.subr.bf16.mxu1 %v2653_v1  ;;  %v34_v1 = vld [vmem:[%s3415_s0 + $0x98] sm:$0xff] }
  0x6c   :  { %2421 = vmatpush3.bf16.msra.mxu0 %v2654_v2  ;;  %v56_v2 = vpack.c.bf16 %v32_v0, %v32_v0 }
  0x6d   :  { %2443 = vmatpush3.bf16.msra.mxu1 %v2655_v3  ;;  %2422 = vmatprep.subr.bf16.mxu0 %v2656_v4  ;;  %v58_v3 = vpack.c.bf16 %v34_v1, %v34_v1  ;;  %v31_v4 = vld [vmem:[%s3415_s0 + $0x80] sm:$0xff] }
  0x6e   :  { %2444 = vmatprep.subr.bf16.mxu1 %v2657_v5  ;;  %v33_v5 = vld [vmem:[%s3415_s0 + $0x90] sm:$0xff] }
  0x70   :  { %2423 = vmatpush3.bf16.msra.mxu0 %v2658_v6  ;;  %v55_v6 = vpack.c.bf16 %v31_v4, %v31_v4 }
  0x71   :  { %2445 = vmatpush3.bf16.msra.mxu1 %v2659_v7  ;;  %2424 = vmatprep.subr.bf16.mxu0 %v2660_v8  ;;  %v57_v7 = vpack.c.bf16 %v33_v5, %v33_v5  ;;  %v2708_v8 = vld [vmem:[%s3414_s1 + $0x578] sm:$0xff]  }
  0x72   :  { %2446 = vmatprep.subr.bf16.mxu1 %v2661_v9  ;;  %v2709_v9 = vld [vmem:[%s3414_s1 + $0x5f8] sm:$0xff]  }
  0x74   :  { %2425 = vmatpush3.bf16.msra.mxu0 %v2662_v10  ;;  %v2710_v10 = vld [vmem:[%s3414_s1 + $0x538] sm:$0xff]  }
  0x75   :  { %2447 = vmatpush3.bf16.msra.mxu1 %v2663_v11  ;;  %2426 = vmatprep.subr.bf16.mxu0 %v2664_v12  ;;  %v2711_v11 = vld [vmem:[%s3414_s1 + $0x5b8] sm:$0xff]   ;;  %v2712_v12 = vld [vmem:[%s3414_s1 + $0x570] sm:$0xff]  }
  0x76   :  { %2448 = vmatprep.subr.bf16.mxu1 %v2665_v13  ;;  %v2713_v13 = vld [vmem:[%s3414_s1 + $0x5f0] sm:$0xff]  }
  0x78   :  { %2427 = vmatpush3.bf16.msra.mxu0 %v2666_v14  ;;  %v2714_v14 = vld [vmem:[%s3414_s1 + $0x530] sm:$0xff]  }
  0x79   :  { %2449 = vmatpush3.bf16.msra.mxu1 %v2667_v15  ;;  %2428 = vmatprep.subr.bf16.mxu0 %v2668_v16  ;;  %v2715_v15 = vld [vmem:[%s3414_s1 + $0x5b0] sm:$0xff]   ;;  %v2716_v16 = vld [vmem:[%s3414_s1 + $0x568] sm:$0xff]  }
  0x7a   :  { %2450 = vmatprep.subr.bf16.mxu1 %v2669_v17  ;;  %v2717_v17 = vld [vmem:[%s3414_s1 + $0x5e8] sm:$0xff]  }
  0x7c   :  { %2429 = vmatpush3.bf16.msra.mxu0 %v2670_v18  ;;  %v2718_v18 = vld [vmem:[%s3414_s1 + $0x528] sm:$0xff]  }
  0x7d   :  { %2451 = vmatpush3.bf16.msra.mxu1 %v2671_v19  ;;  %2430 = vmatprep.subr.bf16.mxu0 %v2672_v20  ;;  %v2719_v19 = vld [vmem:[%s3414_s1 + $0x5a8] sm:$0xff]   ;;  %v2720_v20 = vld [vmem:[%s3414_s1 + $0x560] sm:$0xff]  }
  0x7e   :  { %2452 = vmatprep.subr.bf16.mxu1 %v2673_v21  ;;  %v2721_v21 = vld [vmem:[%s3414_s1 + $0x5e0] sm:$0xff]  }
  0x80   :  { %2431 = vmatpush3.bf16.msra.mxu0 %v2674_v22  ;;  %v2722_v22 = vld [vmem:[%s3414_s1 + $0x520] sm:$0xff]  }
  0x81   :  { %2453 = vmatpush3.bf16.msra.mxu1 %v2675_v23  ;;  %2460 = vmatprep.subr.bf16.mxu0 %v2676_v32  ;;  %v2723_v23 = vld [vmem:[%s3414_s1 + $0x5a0] sm:$0xff]   ;;  %v2732_v32 = vld [vmem:[%s3414_s1 + $0x548] sm:$0xff]  }
  0x82   :  { %2482 = vmatprep.subr.bf16.mxu1 %v2677_v33  ;;  %v2733_v33 = vld [vmem:[%s3414_s1 + $0x5c8] sm:$0xff]  }
  0x83   :  { %1879 = vmatmul.mubr.bf16.vlgmr.msra.gmra.mxu0 %v51_v29  ;;  %v2729_v29 = vld [vmem:[%s3414_s1 + $0x5d0] sm:$0xff]  }
  0x84   :  { %1919 = vmatmul.mubr.bf16.vlgmr.msra.gmra.mxu1 %v53_v31  ;;  %2461 = vmatpush3.bf16.msra.mxu0 %v2678_v34  ;;  %v2731_v31 = vld [vmem:[%s3414_s1 + $0x590] sm:$0xff]   ;;  %v2734_v34 = vld [vmem:[%s3414_s1 + $0x508] sm:$0xff]  }
  0x85   :  { %2483 = vmatpush3.bf16.msra.mxu1 %v2679_v35  ;;  %2462 = vmatprep.subr.bf16.mxu0 %v2680_v36  ;;  %v2735_v35 = vld [vmem:[%s3414_s1 + $0x588] sm:$0xff]   ;;  %v2736_v36 = vld [vmem:[%s3414_s1 + $0x540] sm:$0xff]  }
  0x86   :  { %2484 = vmatprep.subr.bf16.mxu1 %v2681_v37  ;;  %1958 = vmatprep.mubr.bf16.mxu0 %v56_v2  ;;  %v2737_v37 = vld [vmem:[%s3414_s1 + $0x5c0] sm:$0xff]  }
  0x87   :  { %1998 = vmatprep.mubr.bf16.mxu1 %v58_v3 }
  0x88   :  { %2463 = vmatpush3.bf16.msra.mxu0 %v2682_v38  ;;  %v2738_v38 = vld [vmem:[%s3414_s1 + $0x500] sm:$0xff]  }
  0x89   :  { %2485 = vmatpush3.bf16.msra.mxu1 %v2683_v39  ;;  %2464 = vmatprep.subr.bf16.mxu0 %v2684_v40  ;;  %v2739_v39 = vld [vmem:[%s3414_s1 + $0x580] sm:$0xff]   ;;  %v36_v40 = vld [vmem:[%s3415_s0 + $0xa8] sm:$0xff] }
  0x8a   :  { %2486 = vmatprep.subr.bf16.mxu1 %v2685_v41  ;;  %v60_v41 = vpack.c.bf16 %v36_v40, %v36_v40 }
  0x8c   :  { %2465 = vmatpush3.bf16.msra.mxu0 %v2686_v42  ;;  %v38_v42 = vld [vmem:[%s3415_s0 + $0xb8] sm:$0xff] }
  0x8d   :  { %2487 = vmatpush3.bf16.msra.mxu1 %v2687_v43  ;;  %2466 = vmatprep.subr.bf16.mxu0 %v2688_v44  ;;  %v35_v43 = vld [vmem:[%s3415_s0 + $0xa0] sm:$0xff]  ;;  %v37_v44 = vld [vmem:[%s3415_s0 + $0xb0] sm:$0xff] }
  0x8e   :  { %2488 = vmatprep.subr.bf16.mxu1 %v2689_v45  ;;  %v62_v45 = vpack.c.bf16 %v38_v42, %v38_v42 }
  0x90   :  { %2467 = vmatpush3.bf16.msra.mxu0 %v2690_v46  ;;  %v59_v46 = vpack.c.bf16 %v35_v43, %v35_v43 }
  0x91   :  { %2489 = vmatpush3.bf16.msra.mxu1 %v2691_v47  ;;  %2468 = vmatprep.subr.bf16.mxu0 %v2692_v48  ;;  %v61_v47 = vpack.c.bf16 %v37_v44, %v37_v44 }
  0x92   :  { %2490 = vmatprep.subr.bf16.mxu1 %v2693_v49 }
  0x94   :  { %2469 = vmatpush3.bf16.msra.mxu0 %v2694_v50  ;;  %v2091_v50 = vld [vmem:[%s3416_s2] ss:$0 sm:$0xff] }
  0x95   :  { %2491 = vmatpush3.bf16.msra.mxu1 %v2695_v51  ;;  %2470 = vmatprep.subr.bf16.mxu0 %v2696_v52 }
  0x96   :  { %2492 = vmatprep.subr.bf16.mxu1 %v2697_v53 }
  0x98   :  { %2471 = vmatpush3.bf16.msra.mxu0 %v2698_v54 }
  0x99   :  { %2493 = vmatpush3.bf16.msra.mxu1 %v2699_v55  ;;  %2472 = vmatprep.subr.bf16.mxu0 %v2700_v56 }
  0x9a   :  { %2494 = vmatprep.subr.bf16.mxu1 %v2701_v57 }
  0x9c   :  { %2473 = vmatpush3.bf16.msra.mxu0 %v2702_v58 }
  0x9d   :  { %2495 = vmatpush3.bf16.msra.mxu1 %v2703_v59  ;;  %2474 = vmatprep.subr.bf16.mxu0 %v2704_v60 }
  0x9e   :  { %2496 = vmatprep.subr.bf16.mxu1 %v2705_v61 }
  0xa0   :  { %2475 = vmatpush3.bf16.msra.mxu0 %v2706_v62 }
  0xa1   :  { %2497 = vmatpush3.bf16.msra.mxu1 %v2707_v63  ;;  %2504 = vmatprep.subr.bf16.mxu0 %v2708_v8 }
  0xa2   :  { %2526 = vmatprep.subr.bf16.mxu1 %v2709_v9 }
  0xa3   :  { %1959 = vmatmul.mubr.bf16.vlgmr.msra.gmra.mxu0 %v55_v6 }
  0xa4   :  { %1999 = vmatmul.mubr.bf16.vlgmr.msra.gmra.mxu1 %v57_v7  ;;  %2505 = vmatpush3.bf16.msra.mxu0 %v2710_v10 }
  0xa5   :  { %2527 = vmatpush3.bf16.msra.mxu1 %v2711_v11  ;;  %2506 = vmatprep.subr.bf16.mxu0 %v2712_v12 }
  0xa6   :  { %2528 = vmatprep.subr.bf16.mxu1 %v2713_v13  ;;  %2038 = vmatprep.mubr.bf16.mxu0 %v60_v41 }
  0xa7   :  { %2078 = vmatprep.mubr.bf16.mxu1 %v62_v45 }
  0xa8   :  { %2507 = vmatpush3.bf16.msra.mxu0 %v2714_v14 }
  0xa9   :  { %2529 = vmatpush3.bf16.msra.mxu1 %v2715_v15  ;;  %2508 = vmatprep.subr.bf16.mxu0 %v2716_v16 }
  0xaa   :  { %2530 = vmatprep.subr.bf16.mxu1 %v2717_v17 }
  0xac   :  { %2509 = vmatpush3.bf16.msra.mxu0 %v2718_v18 }
  0xad   :  { %2531 = vmatpush3.bf16.msra.mxu1 %v2719_v19  ;;  %2510 = vmatprep.subr.bf16.mxu0 %v2720_v20 }
  0xae   :  { %2532 = vmatprep.subr.bf16.mxu1 %v2721_v21 }
  0xb0   :  { %2511 = vmatpush3.bf16.msra.mxu0 %v2722_v22 }
  0xb1   :  { %2533 = vmatpush3.bf16.msra.mxu1 %v2723_v23  ;;  %2512 = vmatprep.subr.bf16.mxu0 %v2724_v24 }
  0xb2   :  { %2534 = vmatprep.subr.bf16.mxu1 %v2725_v25 }
  0xb4   :  { %2513 = vmatpush3.bf16.msra.mxu0 %v2726_v26 }
  0xb5   :  { %2535 = vmatpush3.bf16.msra.mxu1 %v2727_v27  ;;  %2514 = vmatprep.subr.bf16.mxu0 %v2728_v28 }
  0xb6   :  { %2536 = vmatprep.subr.bf16.mxu1 %v2729_v29 }
  0xb8   :  { %2515 = vmatpush3.bf16.msra.mxu0 %v2730_v30 }
  0xb9   :  { %2537 = vmatpush3.bf16.msra.mxu1 %v2731_v31  ;;  %2516 = vmatprep.subr.bf16.mxu0 %v2732_v32 }
  0xba   :  { %2538 = vmatprep.subr.bf16.mxu1 %v2733_v33 }
  0xbc   :  { %2517 = vmatpush3.bf16.msra.mxu0 %v2734_v34 }
  0xbd   :  { %2539 = vmatpush3.bf16.msra.mxu1 %v2735_v35  ;;  %2518 = vmatprep.subr.bf16.mxu0 %v2736_v36 }
  0xbe   :  { %2540 = vmatprep.subr.bf16.mxu1 %v2737_v37 }
  0xc0   :  { %2519 = vmatpush3.bf16.msra.mxu0 %v2738_v38 }
  0xc1   :  { %2541 = vmatpush3.bf16.msra.mxu1 %v2739_v39 }
  0xc3   :  { %2039 = vmatmul.mubr.bf16.vlgmr.msra.gmra.mxu0 %v59_v46 }
  0xc4   :  { %2079 = vmatmul.mubr.bf16.vlgmr.msra.gmra.mxu1 %v61_v47 }
  0xe3   :  { %v2300_v48 = vpop.f32.mrf.mxu0 }
  0xe4   :  { %v2322_v49 = vpop.f32.mrf.mxu1 }
  0xe5   :  { %v2301_v51 = vpop.f32.mrf.mxu0 }
  0xe6   :  { %v2323_v52 = vpop.f32.mrf.mxu1  ;;  %v2302_v53 = vadd.f32 %v2301_v51, %v2300_v48 }
  0xe7   :  { %v2324_v54 = vadd.f32 %v2323_v52, %v2322_v49  ;;  %v2303_v55 = vpop.f32.mrf.mxu0 }
  0xe8   :  { %v2325_v56 = vpop.f32.mrf.mxu1  ;;  %v1641_v57 = vadd.f32 %v2302_v53, %v2091_v50 }
  0xe9   :  { %v2304_v58 = vpop.f32.mrf.mxu0 }
  0xea   :  { %v2326_v59 = vpop.f32.mrf.mxu1  ;;  %v1681_v60 = vadd.f32 %v2324_v54, %v1641_v57 }
 0x103   :  { %v2344_v61 = vpop.f32.mrf.mxu0 }
 0x104   :  { %v2366_v62 = vpop.f32.mrf.mxu1 }
 0x105   :  { %v2345_v63 = vpop.f32.mrf.mxu0 }
 0x106   :  { %v2346_v0 = vadd.f32 %v2345_v63, %v2344_v61  ;;  %v2367_v1 = vpop.f32.mrf.mxu1 }
 0x107   :  { %v2368_v2 = vadd.f32 %v2367_v1, %v2366_v62  ;;  %v2347_v3 = vpop.f32.mrf.mxu0 }
 0x108   :  { %v1721_v4 = vadd.f32 %v2346_v0, %v1681_v60  ;;  %v2369_v5 = vpop.f32.mrf.mxu1 }
 0x109   :  { %v2348_v6 = vpop.f32.mrf.mxu0 }
 0x10a   :  { %v1761_v7 = vadd.f32 %v2368_v2, %v1721_v4  ;;  %v2370_v8 = vpop.f32.mrf.mxu1 }
 0x123   :  { %v2388_v9 = vpop.f32.mrf.mxu0 }
 0x124   :  { %v2410_v10 = vpop.f32.mrf.mxu1 }
 0x125   :  { %v2389_v11 = vpop.f32.mrf.mxu0 }
 0x126   :  { %v2390_v12 = vadd.f32 %v2389_v11, %v2388_v9  ;;  %v2411_v13 = vpop.f32.mrf.mxu1 }
 0x127   :  { %v2412_v14 = vadd.f32 %v2411_v13, %v2410_v10  ;;  %v2391_v15 = vpop.f32.mrf.mxu0 }
 0x128   :  { %v1801_v16 = vadd.f32 %v2390_v12, %v1761_v7  ;;  %v2413_v17 = vpop.f32.mrf.mxu1 }
 0x129   :  { %v2392_v18 = vpop.f32.mrf.mxu0 }
 0x12a   :  { %v1841_v19 = vadd.f32 %v2412_v14, %v1801_v16  ;;  %v2414_v20 = vpop.f32.mrf.mxu1 }
 0x143   :  { %v2432_v21 = vpop.f32.mrf.mxu0 }
 0x144   :  { %v2454_v22 = vpop.f32.mrf.mxu1 }
 0x145   :  { %v2433_v23 = vpop.f32.mrf.mxu0 }
 0x146   :  { %v2455_v24 = vpop.f32.mrf.mxu1  ;;  %v2434_v37 = vadd.f32 %v2433_v23, %v2432_v21 }
 0x147   :  { %v2435_v25 = vpop.f32.mrf.mxu0  ;;  %v2456_v39 = vadd.f32 %v2455_v24, %v2454_v22 }
 0x148   :  { %v2457_v26 = vpop.f32.mrf.mxu1  ;;  %v1881_v38 = vadd.f32 %v2434_v37, %v1841_v19 }
 0x149   :  { %v2436_v27 = vpop.f32.mrf.mxu0 }
 0x14a   :  { %v2458_v28 = vpop.f32.mrf.mxu1  ;;  %v1921_v41 = vadd.f32 %v2456_v39, %v1881_v38 }
 0x163   :  { %v2476_v29 = vpop.f32.mrf.mxu0 }
 0x164   :  { %v2498_v30 = vpop.f32.mrf.mxu1 }
 0x165   :  { %v2477_v31 = vpop.f32.mrf.mxu0 }
 0x166   :  { %v2499_v32 = vpop.f32.mrf.mxu1  ;;  %v2478_v40 = vadd.f32 %v2477_v31, %v2476_v29 }
 0x167   :  { %v2479_v33 = vpop.f32.mrf.mxu0  ;;  %v2500_v43 = vadd.f32 %v2499_v32, %v2498_v30 }
 0x168   :  { %v2501_v34 = vpop.f32.mrf.mxu1  ;;  %v1961_v42 = vadd.f32 %v2478_v40, %v1921_v41 }
 0x169   :  { %v2480_v35 = vpop.f32.mrf.mxu0 }
 0x16a   :  { %v2502_v36 = vpop.f32.mrf.mxu1  ;;  %v2001_v47 = vadd.f32 %v2500_v43, %v1961_v42 }
 0x183   :  { %v2520_v44 = vpop.f32.mrf.mxu0 }
 0x184   :  { %v2542_v45 = vpop.f32.mrf.mxu1 }
 0x185   :  { %v2521_v46 = vpop.f32.mrf.mxu0 }
 0x186   :  { %v2522_v48 = vadd.f32 %v2521_v46, %v2520_v44  ;;  %v2543_v49 = vpop.f32.mrf.mxu1 }
 0x187   :  { %v2523_v50 = vpop.f32.mrf.mxu0  ;;  %v2544_v52 = vadd.f32 %v2543_v49, %v2542_v45 }
 0x188   :  { %v2041_v51 = vadd.f32 %v2522_v48, %v2001_v47  ;;  %v2545_v53 = vpop.f32.mrf.mxu1 }
 0x189   :  { %v2524_v54 = vpop.f32.mrf.mxu0 }
 0x18a   :  { %v2081_v55 = vadd.f32 %v2544_v52, %v2041_v51  ;;  %v2546_v56 = vpop.f32.mrf.mxu1 }
 0x18c   :  { %2086 = vst [vmem:[%s3417_s3] sm:$0xff] %v2081_v55 }

// kernel: fcnet1d_forward.3
= control target key start
LH: loop header
LB: loop body
LE: loop exit
PB: predicated region body
PF: predicated region fallthrough
CT: control target
= control target key end

     0   :  { %8 = vsyncpa [#allocation3], 0  ;;  %s4136_s0 = inlined_call_operand.vmem [shape: f32[8,64], index: 0, kind: input, shape index: {}]   ;;  %s4137_s1 = inlined_call_operand.hbm [shape: bf16[1,64,8192], index: 1, kind: input, shape index: {}]   ;;  %s4138_s2 = inlined_call_operand.hbm [shape: f32[1,8192], index: 2, kind: input, shape index: {}]   ;;  %s4139_s3 = inlined_call_operand.vmem [shape: f32[8,8192], index: 3, kind: output, shape index: {}]  }
   0x1   :  { %9 = vsyncpa [#allocation5], 0  ;;  %s3702_s12 = smov [#allocation2]  }
   0x2   :  { %s17_s13 = sshll.u32 %s3702_s12, 4  ;;  %s18_s13 = int_to_ptr.vmem [resolvable:$true] %s17_s13 }
   0x3   :  { %s3666_s14 = scalar_lea.vmem %s18_s13, 32768  ;;  %p3671_p1 = scmp.lt.s32.totalorder %s18_s13, %s18_s13 }
   0x4   :  { %p3667_p0 = scmp.ne.s32.totalorder %s18_s13, %s3666_s14  ;;  %p3672_p2 = scmp.lt.s32.totalorder %s3666_s14, %s3666_s14 }
   0x6   :  { %p3673_p3 = por %p3672_p2, %p3671_p1 }
   0x8   :  { %p3674_p4 = pnand %p3673_p3, %p3667_p0 }
   0xa   :  { %3677 = shalt.err (!%p3674_p4)
}
   0xb   :  { %s3703_s15 = smov 4096   ;;  %s3704_s16 = smov 256  }
   0xc   :  { %23 = dma.hbm_to_vmem [thread:$0]  %s4137_s1, 32768, %s18_s13, [#allocation3], %s3703_s15, %s3703_s15, %s3704_s16  }
   0xd   :  { %s3705_s19 = smov [#allocation4]  }
   0xe   :  { %s30_s20 = sshll.u32 %s3705_s19, 4  ;;  %s31_s20 = int_to_ptr.vmem [resolvable:$true] %s30_s20 }
   0xf   :  { %s3686_s21 = scalar_lea.vmem %s31_s20, 1024  ;;  %p3691_p6 = scmp.lt.s32.totalorder %s31_s20, %s31_s20 }
  0x10   :  { %p3687_p5 = scmp.ne.s32.totalorder %s31_s20, %s3686_s21  ;;  %p3692_p7 = scmp.lt.s32.totalorder %s3686_s21, %s3686_s21 }
  0x12   :  { %p3693_p8 = por %p3692_p7, %p3691_p6 }
  0x14   :  { %p3694_p9 = pnand %p3693_p8, %p3687_p5 }
  0x16   :  { %3697 = shalt.err (!%p3694_p9)
}
  0x17   :  { %33 = dma.hbm_to_vmem [thread:$0]  %s4138_s2, 1024, %s31_s20, [#allocation5]  }
  0x18   :  { %3698 = dma.done.wait [#allocation3], 32768  }
  0x19   :  { %3699 = vsyncadd [#allocation3], 4294934528 }
  0x1a   :  { %3700 = dma.done.wait [#allocation5], 1024  }
  0x1b   :  { %3701 = vsyncadd [#allocation5], 4294966272  ;;  %v3706_v0 = vmov 0   ;;  %v235_v1 = vld [vmem:[#allocation2 + $0x600] sm:$0xff]  ;;  %v236_v3 = vld [vmem:[#allocation2 + $0x608] sm:$0xff]  ;;  %vm1915_vm0 = vcmask 523264  }
  0x1c   :  { %1951 = vmatprep.mubr.bf16.mxu0 %v3706_v0  ;;  %1992 = vmatprep.mubr.bf16.mxu1 %v3706_v0  ;;  %v267_v2 = vld [vmem:[#allocation2 + $0x700] sm:$0xff]  ;;  %v268_v5 = vld [vmem:[#allocation2 + $0x708] sm:$0xff]  ;;  %v237_v31 = vld [vmem:[#allocation2 + $0x610] sm:$0xff] }
  0x1d   :  { %v3558_v4 = vcombine.high %v235_v1, %v267_v2  ;;  %v3557_v6 = vcombine.low %v235_v1, %v267_v2  ;;  %v171_v7 = vld [vmem:[#allocation2 + $0x400] sm:$0xff]  ;;  %v3560_v9 = vcombine.high %v236_v3, %v268_v5  ;;  %v3559_v10 = vcombine.low %v236_v3, %v268_v5  ;;  %v172_v12 = vld [vmem:[#allocation2 + $0x408] sm:$0xff]  ;;  %v269_v32 = vld [vmem:[#allocation2 + $0x710] sm:$0xff] }
  0x1e   :  { %v203_v8 = vld [vmem:[#allocation2 + $0x500] sm:$0xff]  ;;  %v204_v13 = vld [vmem:[#allocation2 + $0x508] sm:$0xff]  ;;  %v238_v33 = vld [vmem:[#allocation2 + $0x618] sm:$0xff]  ;;  %v3562_v38 = vcombine.high %v237_v31, %v269_v32  ;;  %v3561_v45 = vcombine.low %v237_v31, %v269_v32 }
  0x1f   :  { %v3494_v11 = vcombine.high %v171_v7, %v203_v8  ;;  %v107_v14 = vld [vmem:[#allocation2 + $0x200] sm:$0xff]  ;;  %1927 = vmatprep.subr.bf16.mxu0 %v3558_v4  ;;  %v3496_v15 = vcombine.high %v172_v12, %v204_v13  ;;  %v108_v17 = vld [vmem:[#allocation2 + $0x208] sm:$0xff]  ;;  %1968 = vmatprep.subr.bf16.mxu1 %v3560_v9  ;;  %v3493_v19 = vcombine.low %v171_v7, %v203_v8  ;;  %v270_v34 = vld [vmem:[#allocation2 + $0x718] sm:$0xff] }
  0x20   :  { %v139_v16 = vld [vmem:[#allocation2 + $0x300] sm:$0xff]  ;;  %v140_v18 = vld [vmem:[#allocation2 + $0x308] sm:$0xff]  ;;  %1928 = vmatpush1.bf16.msra.mxu0 %v3557_v6  ;;  %1969 = vmatpush1.bf16.msra.mxu1 %v3559_v10  ;;  %v3495_v20 = vcombine.low %v172_v12, %v204_v13  ;;  %v3564_v39 = vcombine.high %v238_v33, %v270_v34  ;;  %v173_v40 = vld [vmem:[#allocation2 + $0x410] sm:$0xff]  ;;  %v3563_v46 = vcombine.low %v238_v33, %v270_v34 }
  0x21   :  { %1929 = vmatprep.subr.bf16.mxu0 %v3494_v11  ;;  %v3430_v21 = vcombine.high %v107_v14, %v139_v16  ;;  %1970 = vmatprep.subr.bf16.mxu1 %v3496_v15  ;;  %v3432_v22 = vcombine.high %v108_v17, %v140_v18  ;;  %v43_v23 = vld [vmem:[#allocation2] sm:$0xff]  ;;  %v44_v25 = vld [vmem:[#allocation2 + $0x8] sm:$0xff]  ;;  %v3429_v27 = vcombine.low %v107_v14, %v139_v16  ;;  %v205_v41 = vld [vmem:[#allocation2 + $0x510] sm:$0xff] }
  0x22   :  { %v75_v24 = vld [vmem:[#allocation2 + $0x100] sm:$0xff]  ;;  %v76_v26 = vld [vmem:[#allocation2 + $0x108] sm:$0xff]  ;;  %v3431_v28 = vcombine.low %v108_v17, %v140_v18  ;;  %v174_v43 = vld [vmem:[#allocation2 + $0x418] sm:$0xff]  ;;  %v3498_v47 = vcombine.high %v173_v40, %v205_v41  ;;  %v3497_v53 = vcombine.low %v173_v40, %v205_v41 }
  0x23   :  { %v3366_v29 = vcombine.high %v43_v23, %v75_v24  ;;  %v3368_v30 = vcombine.high %v44_v25, %v76_v26  ;;  %v3365_v35 = vcombine.low %v43_v23, %v75_v24  ;;  %v41_v36 = vld [vmem:[%s4136_s0] sm:$0xff]  ;;  %v3367_v37 = vcombine.low %v44_v25, %v76_v26  ;;  %v206_v44 = vld [vmem:[#allocation2 + $0x518] sm:$0xff]  ;;  %v109_v49 = vld [vmem:[#allocation2 + $0x210] sm:$0xff] }
  0x24   :  { %1930 = vmatpush1.bf16.msra.mxu0 %v3493_v19  ;;  %1971 = vmatpush1.bf16.msra.mxu1 %v3495_v20  ;;  %v3738_v42 = vpack.c.bf16 %v41_v36, %v41_v36  ;;  %v3500_v48 = vcombine.high %v174_v43, %v206_v44  ;;  %v141_v50 = vld [vmem:[#allocation2 + $0x310] sm:$0xff]  ;;  %v110_v51 = vld [vmem:[#allocation2 + $0x218] sm:$0xff]  ;;  %v3499_v54 = vcombine.low %v174_v43, %v206_v44  ;;  %v239_v2 = vld [vmem:[#allocation2 + $0x620] sm:$0xff] }
  0x25   :  { %1931 = vmatprep.subr.bf16.mxu0 %v3430_v21  ;;  %1972 = vmatprep.subr.bf16.mxu1 %v3432_v22  ;;  %v142_v52 = vld [vmem:[#allocation2 + $0x318] sm:$0xff]  ;;  %v3434_v55 = vcombine.high %v109_v49, %v141_v50  ;;  %v45_v57 = vld [vmem:[#allocation2 + $0x10] sm:$0xff]  ;;  %v3433_v61 = vcombine.low %v109_v49, %v141_v50  ;;  %v271_v3 = vld [vmem:[#allocation2 + $0x720] sm:$0xff] }
  0x26   :  { %v3436_v56 = vcombine.high %v110_v51, %v142_v52  ;;  %v77_v58 = vld [vmem:[#allocation2 + $0x110] sm:$0xff]  ;;  %v46_v59 = vld [vmem:[#allocation2 + $0x18] sm:$0xff]  ;;  %v3435_v62 = vcombine.low %v110_v51, %v142_v52  ;;  %v240_v4 = vld [vmem:[#allocation2 + $0x628] sm:$0xff]  ;;  %v3566_v8 = vcombine.high %v239_v2, %v271_v3  ;;  %v3565_v14 = vcombine.low %v239_v2, %v271_v3 }
  0x27   :  { %v78_v60 = vld [vmem:[#allocation2 + $0x118] sm:$0xff]  ;;  %v3370_v63 = vcombine.high %v45_v57, %v77_v58  ;;  %v272_v5 = vld [vmem:[#allocation2 + $0x728] sm:$0xff]  ;;  %v3369_v6 = vcombine.low %v45_v57, %v77_v58  ;;  %v175_v10 = vld [vmem:[#allocation2 + $0x420] sm:$0xff] }
  0x28   :  { %1932 = vmatpush1.bf16.msra.mxu0 %v3429_v27  ;;  %1973 = vmatpush1.bf16.msra.mxu1 %v3431_v28  ;;  %v3372_v1 = vcombine.high %v46_v59, %v78_v60  ;;  %v3371_v7 = vcombine.low %v46_v59, %v78_v60  ;;  %v3568_v9 = vcombine.high %v240_v4, %v272_v5  ;;  %v207_v11 = vld [vmem:[#allocation2 + $0x520] sm:$0xff]  ;;  %v176_v12 = vld [vmem:[#allocation2 + $0x428] sm:$0xff]  ;;  %v241_v34 = vld [vmem:[#allocation2 + $0x630] sm:$0xff] }
  0x29   :  { %1933 = vmatprep.subr.bf16.mxu0 %v3366_v29  ;;  %1974 = vmatprep.subr.bf16.mxu1 %v3368_v30  ;;  %v208_v13 = vld [vmem:[#allocation2 + $0x528] sm:$0xff]  ;;  %v3567_v15 = vcombine.low %v240_v4, %v272_v5  ;;  %v3502_v16 = vcombine.high %v175_v10, %v207_v11  ;;  %v111_v18 = vld [vmem:[#allocation2 + $0x220] sm:$0xff]  ;;  %v3501_v22 = vcombine.low %v175_v10, %v207_v11  ;;  %v242_v36 = vld [vmem:[#allocation2 + $0x638] sm:$0xff] }
  0x2a   :  { %v3504_v17 = vcombine.high %v176_v12, %v208_v13  ;;  %v143_v19 = vld [vmem:[#allocation2 + $0x320] sm:$0xff]  ;;  %v112_v20 = vld [vmem:[#allocation2 + $0x228] sm:$0xff]  ;;  %v3503_v23 = vcombine.low %v176_v12, %v208_v13  ;;  %v177_v43 = vld [vmem:[#allocation2 + $0x430] sm:$0xff] }
  0x2b   :  { %v144_v21 = vld [vmem:[#allocation2 + $0x328] sm:$0xff]  ;;  %v3438_v24 = vcombine.high %v111_v18, %v143_v19  ;;  %v47_v26 = vld [vmem:[#allocation2 + $0x20] sm:$0xff]  ;;  %v3437_v30 = vcombine.low %v111_v18, %v143_v19  ;;  %v209_v44 = vld [vmem:[#allocation2 + $0x530] sm:$0xff] }
  0x2c   :  { %1934 = vmatpush1.bf16.msra.mxu0 %v3365_v35  ;;  %1975 = vmatpush1.bf16.msra.mxu1 %v3367_v37  ;;  %v3440_v25 = vcombine.high %v112_v20, %v144_v21  ;;  %v79_v27 = vld [vmem:[#allocation2 + $0x120] sm:$0xff]  ;;  %v48_v28 = vld [vmem:[#allocation2 + $0x28] sm:$0xff]  ;;  %v3439_v31 = vcombine.low %v112_v20, %v144_v21  ;;  %v273_v35 = vld [vmem:[#allocation2 + $0x730] sm:$0xff]  ;;  %v3506_v49 = vcombine.high %v177_v43, %v209_v44 }
  0x2d   :  { %2009 = vmatprep.subr.bf16.mxu0 %v3562_v38  ;;  %2050 = vmatprep.subr.bf16.mxu1 %v3564_v39  ;;  %v80_v29 = vld [vmem:[#allocation2 + $0x128] sm:$0xff]  ;;  %v3374_v32 = vcombine.high %v47_v26, %v79_v27  ;;  %v274_v37 = vld [vmem:[#allocation2 + $0x738] sm:$0xff]  ;;  %v3373_v38 = vcombine.low %v47_v26, %v79_v27  ;;  %v3570_v40 = vcombine.high %v241_v34, %v273_v35  ;;  %v113_v51 = vld [vmem:[#allocation2 + $0x230] sm:$0xff] }
  0x2e   :  { %v3376_v33 = vcombine.high %v48_v28, %v80_v29  ;;  %v3375_v39 = vcombine.low %v48_v28, %v80_v29  ;;  %v3572_v41 = vcombine.high %v242_v36, %v274_v37  ;;  %v145_v52 = vld [vmem:[#allocation2 + $0x330] sm:$0xff]  ;;  %v243_v4 = vld [vmem:[#allocation2 + $0x640] sm:$0xff] }
  0x2f   :  { %3621 = vmatmul.mubr.msk.bf16.vlgmr.msra.gmra.mxu0 %vm1915_vm0, %v3738_v42  ;;  %3622 = vmatmul.mubr.msk.bf16.vlgmr.msra.gmra.mxu1 %vm1915_vm0, %v3738_v42  ;;  %v3442_v57 = vcombine.high %v113_v51, %v145_v52  ;;  %v49_v59 = vld [vmem:[#allocation2 + $0x30] sm:$0xff]  ;;  %v275_v5 = vld [vmem:[#allocation2 + $0x740] sm:$0xff] }
  0x30   :  { %2010 = vmatpush1.bf16.msra.mxu0 %v3561_v45  ;;  %2051 = vmatpush1.bf16.msra.mxu1 %v3563_v46  ;;  %v178_v45 = vld [vmem:[#allocation2 + $0x438] sm:$0xff]  ;;  %v81_v60 = vld [vmem:[#allocation2 + $0x130] sm:$0xff]  ;;  %v3574_v10 = vcombine.high %v243_v4, %v275_v5  ;;  %v179_v12 = vld [vmem:[#allocation2 + $0x440] sm:$0xff] }
  0x31   :  { %2011 = vmatprep.subr.bf16.mxu0 %v3498_v47  ;;  %2052 = vmatprep.subr.bf16.mxu1 %v3500_v48  ;;  %v210_v46 = vld [vmem:[#allocation2 + $0x538] sm:$0xff]  ;;  %v3569_v47 = vcombine.low %v241_v34, %v273_v35  ;;  %v3571_v48 = vcombine.low %v242_v36, %v274_v37  ;;  %v3378_v2 = vcombine.high %v49_v59, %v81_v60  ;;  %v211_v13 = vld [vmem:[#allocation2 + $0x540] sm:$0xff]  ;;  %v245_v36 = vld [vmem:[#allocation2 + $0x650] sm:$0xff] }
  0x32   :  { %2033 = vmatprep.mubr.bf16.mxu0 %v3706_v0  ;;  %2074 = vmatprep.mubr.bf16.mxu1 %v3706_v0  ;;  %v3508_v50 = vcombine.high %v178_v45, %v210_v46  ;;  %v3510_v18 = vcombine.high %v179_v12, %v211_v13  ;;  %v115_v20 = vld [vmem:[#allocation2 + $0x240] sm:$0xff]  ;;  %v277_v37 = vld [vmem:[#allocation2 + $0x750] sm:$0xff] }
  0x33   :  { %v147_v21 = vld [vmem:[#allocation2 + $0x340] sm:$0xff] }
  0x34   :  { %2012 = vmatpush1.bf16.msra.mxu0 %v3497_v53  ;;  %2053 = vmatpush1.bf16.msra.mxu1 %v3499_v54  ;;  %v114_v53 = vld [vmem:[#allocation2 + $0x238] sm:$0xff]  ;;  %v3446_v26 = vcombine.high %v115_v20, %v147_v21  ;;  %v51_v28 = vld [vmem:[#allocation2 + $0x40] sm:$0xff] }
  0x35   :  { %2013 = vmatprep.subr.bf16.mxu0 %v3434_v55  ;;  %2054 = vmatprep.subr.bf16.mxu1 %v3436_v56  ;;  %v146_v54 = vld [vmem:[#allocation2 + $0x338] sm:$0xff]  ;;  %v3505_v55 = vcombine.low %v177_v43, %v209_v44  ;;  %v3507_v56 = vcombine.low %v178_v45, %v210_v46  ;;  %v83_v29 = vld [vmem:[#allocation2 + $0x140] sm:$0xff]  ;;  %v3578_v43 = vcombine.high %v245_v36, %v277_v37  ;;  %v181_v45 = vld [vmem:[#allocation2 + $0x450] sm:$0xff] }
  0x36   :  { %v3444_v58 = vcombine.high %v114_v53, %v146_v54  ;;  %v3382_v34 = vcombine.high %v51_v28, %v83_v29  ;;  %v213_v46 = vld [vmem:[#allocation2 + $0x550] sm:$0xff] }
  0x38   :  { %2014 = vmatpush1.bf16.msra.mxu0 %v3433_v61  ;;  %2055 = vmatpush1.bf16.msra.mxu1 %v3435_v62  ;;  %v50_v61 = vld [vmem:[#allocation2 + $0x38] sm:$0xff] }
  0x39   :  { %2015 = vmatprep.subr.bf16.mxu0 %v3370_v63  ;;  %2056 = vmatprep.subr.bf16.mxu1 %v3372_v1  ;;  %v82_v62 = vld [vmem:[#allocation2 + $0x138] sm:$0xff]  ;;  %v3441_v63 = vcombine.low %v113_v51, %v145_v52  ;;  %v3443_v1 = vcombine.low %v114_v53, %v146_v54  ;;  %v3514_v51 = vcombine.high %v181_v45, %v213_v46  ;;  %v117_v53 = vld [vmem:[#allocation2 + $0x250] sm:$0xff] }
  0x3a   :  { %v3380_v3 = vcombine.high %v50_v61, %v82_v62  ;;  %v149_v54 = vld [vmem:[#allocation2 + $0x350] sm:$0xff] }
  0x3c   :  { %2016 = vmatpush1.bf16.msra.mxu0 %v3369_v6  ;;  %2057 = vmatpush1.bf16.msra.mxu1 %v3371_v7  ;;  %v244_v6 = vld [vmem:[#allocation2 + $0x648] sm:$0xff] }
  0x3d   :  { %2091 = vmatprep.subr.bf16.mxu0 %v3566_v8  ;;  %2132 = vmatprep.subr.bf16.mxu1 %v3568_v9  ;;  %v276_v7 = vld [vmem:[#allocation2 + $0x748] sm:$0xff]  ;;  %v3377_v8 = vcombine.low %v49_v59, %v81_v60  ;;  %v3379_v9 = vcombine.low %v50_v61, %v82_v62  ;;  %v3450_v59 = vcombine.high %v117_v53, %v149_v54  ;;  %v53_v61 = vld [vmem:[#allocation2 + $0x50] sm:$0xff] }
  0x3e   :  { %v3576_v11 = vcombine.high %v244_v6, %v276_v7  ;;  %v85_v62 = vld [vmem:[#allocation2 + $0x150] sm:$0xff] }
  0x3f   :  { %3623 = vmatmul.mubr.msk.bf16.vlgmr.msra.gmra.mxu0 %vm1915_vm0, %v3738_v42  ;;  %3624 = vmatmul.mubr.msk.bf16.vlgmr.msra.gmra.mxu1 %vm1915_vm0, %v3738_v42 }
  0x40   :  { %2092 = vmatpush1.bf16.msra.mxu0 %v3565_v14  ;;  %2133 = vmatpush1.bf16.msra.mxu1 %v3567_v15  ;;  %v180_v14 = vld [vmem:[#allocation2 + $0x448] sm:$0xff] }
  0x41   :  { %2093 = vmatprep.subr.bf16.mxu0 %v3502_v16  ;;  %2134 = vmatprep.subr.bf16.mxu1 %v3504_v17  ;;  %v212_v15 = vld [vmem:[#allocation2 + $0x548] sm:$0xff]  ;;  %v3573_v16 = vcombine.low %v243_v4, %v275_v5  ;;  %v3575_v17 = vcombine.low %v244_v6, %v276_v7  ;;  %v3386_v4 = vcombine.high %v53_v61, %v85_v62  ;;  %v247_v6 = vld [vmem:[#allocation2 + $0x660] sm:$0xff] }
  0x42   :  { %2115 = vmatprep.mubr.bf16.mxu0 %v3706_v0  ;;  %2156 = vmatprep.mubr.bf16.mxu1 %v3706_v0  ;;  %v3512_v19 = vcombine.high %v180_v14, %v212_v15  ;;  %v279_v7 = vld [vmem:[#allocation2 + $0x760] sm:$0xff] }
  0x44   :  { %2094 = vmatpush1.bf16.msra.mxu0 %v3501_v22  ;;  %2135 = vmatpush1.bf16.msra.mxu1 %v3503_v23  ;;  %v116_v22 = vld [vmem:[#allocation2 + $0x248] sm:$0xff] }
  0x45   :  { %2095 = vmatprep.subr.bf16.mxu0 %v3438_v24  ;;  %2136 = vmatprep.subr.bf16.mxu1 %v3440_v25  ;;  %v148_v23 = vld [vmem:[#allocation2 + $0x348] sm:$0xff]  ;;  %v3509_v24 = vcombine.low %v179_v12, %v211_v13  ;;  %v3511_v25 = vcombine.low %v180_v14, %v212_v15  ;;  %v3582_v12 = vcombine.high %v247_v6, %v279_v7  ;;  %v183_v14 = vld [vmem:[#allocation2 + $0x460] sm:$0xff] }
  0x46   :  { %v3448_v27 = vcombine.high %v116_v22, %v148_v23  ;;  %v215_v15 = vld [vmem:[#allocation2 + $0x560] sm:$0xff] }
  0x48   :  { %2096 = vmatpush1.bf16.msra.mxu0 %v3437_v30  ;;  %2137 = vmatpush1.bf16.msra.mxu1 %v3439_v31  ;;  %v52_v30 = vld [vmem:[#allocation2 + $0x48] sm:$0xff] }
  0x49   :  { %2097 = vmatprep.subr.bf16.mxu0 %v3374_v32  ;;  %2138 = vmatprep.subr.bf16.mxu1 %v3376_v33  ;;  %v84_v31 = vld [vmem:[#allocation2 + $0x148] sm:$0xff]  ;;  %v3445_v32 = vcombine.low %v115_v20, %v147_v21  ;;  %v3447_v33 = vcombine.low %v116_v22, %v148_v23  ;;  %v3518_v20 = vcombine.high %v183_v14, %v215_v15  ;;  %v119_v22 = vld [vmem:[#allocation2 + $0x260] sm:$0xff] }
  0x4a   :  { %v3384_v35 = vcombine.high %v52_v30, %v84_v31  ;;  %v151_v23 = vld [vmem:[#allocation2 + $0x360] sm:$0xff] }
  0x4c   :  { %2098 = vmatpush1.bf16.msra.mxu0 %v3373_v38  ;;  %2139 = vmatpush1.bf16.msra.mxu1 %v3375_v39  ;;  %v246_v38 = vld [vmem:[#allocation2 + $0x658] sm:$0xff] }
  0x4d   :  { %2173 = vmatprep.subr.bf16.mxu0 %v3570_v40  ;;  %2214 = vmatprep.subr.bf16.mxu1 %v3572_v41  ;;  %v278_v39 = vld [vmem:[#allocation2 + $0x758] sm:$0xff]  ;;  %v3381_v40 = vcombine.low %v51_v28, %v83_v29  ;;  %v3383_v41 = vcombine.low %v52_v30, %v84_v31  ;;  %v3454_v28 = vcombine.high %v119_v22, %v151_v23  ;;  %v55_v30 = vld [vmem:[#allocation2 + $0x60] sm:$0xff] }
  0x4e   :  { %v3580_v44 = vcombine.high %v246_v38, %v278_v39  ;;  %v87_v31 = vld [vmem:[#allocation2 + $0x160] sm:$0xff] }
  0x4f   :  { %3625 = vmatmul.mubr.msk.bf16.vlgmr.msra.gmra.mxu0 %vm1915_vm0, %v3738_v42  ;;  %3626 = vmatmul.mubr.msk.bf16.vlgmr.msra.gmra.mxu1 %vm1915_vm0, %v3738_v42 }
  0x50   :  { %2174 = vmatpush1.bf16.msra.mxu0 %v3569_v47  ;;  %2215 = vmatpush1.bf16.msra.mxu1 %v3571_v48  ;;  %v182_v47 = vld [vmem:[#allocation2 + $0x458] sm:$0xff] }
  0x51   :  { %2175 = vmatprep.subr.bf16.mxu0 %v3506_v49  ;;  %2216 = vmatprep.subr.bf16.mxu1 %v3508_v50  ;;  %v214_v48 = vld [vmem:[#allocation2 + $0x558] sm:$0xff]  ;;  %v3577_v49 = vcombine.low %v245_v36, %v277_v37  ;;  %v3579_v50 = vcombine.low %v246_v38, %v278_v39  ;;  %v3390_v36 = vcombine.high %v55_v30, %v87_v31  ;;  %v249_v38 = vld [vmem:[#allocation2 + $0x670] sm:$0xff] }
  0x52   :  { %2197 = vmatprep.mubr.bf16.mxu0 %v3706_v0  ;;  %2238 = vmatprep.mubr.bf16.mxu1 %v3706_v0  ;;  %v3516_v52 = vcombine.high %v182_v47, %v214_v48  ;;  %v281_v39 = vld [vmem:[#allocation2 + $0x770] sm:$0xff] }
  0x54   :  { %2176 = vmatpush1.bf16.msra.mxu0 %v3505_v55  ;;  %2217 = vmatpush1.bf16.msra.mxu1 %v3507_v56  ;;  %v118_v55 = vld [vmem:[#allocation2 + $0x258] sm:$0xff] }
  0x55   :  { %2177 = vmatprep.subr.bf16.mxu0 %v3442_v57  ;;  %2218 = vmatprep.subr.bf16.mxu1 %v3444_v58  ;;  %v150_v56 = vld [vmem:[#allocation2 + $0x358] sm:$0xff]  ;;  %v3513_v57 = vcombine.low %v181_v45, %v213_v46  ;;  %v3515_v58 = vcombine.low %v182_v47, %v214_v48  ;;  %v3586_v45 = vcombine.high %v249_v38, %v281_v39  ;;  %v185_v47 = vld [vmem:[#allocation2 + $0x470] sm:$0xff] }
  0x56   :  { %v3452_v60 = vcombine.high %v118_v55, %v150_v56  ;;  %v217_v48 = vld [vmem:[#allocation2 + $0x570] sm:$0xff] }
  0x58   :  { %2178 = vmatpush1.bf16.msra.mxu0 %v3441_v63  ;;  %2219 = vmatpush1.bf16.msra.mxu1 %v3443_v1  ;;  %v54_v63 = vld [vmem:[#allocation2 + $0x58] sm:$0xff] }
  0x59   :  { %2179 = vmatprep.subr.bf16.mxu0 %v3378_v2  ;;  %2220 = vmatprep.subr.bf16.mxu1 %v3380_v3  ;;  %v86_v1 = vld [vmem:[#allocation2 + $0x158] sm:$0xff]  ;;  %v3449_v2 = vcombine.low %v117_v53, %v149_v54  ;;  %v3451_v3 = vcombine.low %v118_v55, %v150_v56  ;;  %v3522_v53 = vcombine.high %v185_v47, %v217_v48  ;;  %v121_v55 = vld [vmem:[#allocation2 + $0x270] sm:$0xff] }
  0x5a   :  { %v3388_v5 = vcombine.high %v54_v63, %v86_v1  ;;  %v153_v56 = vld [vmem:[#allocation2 + $0x370] sm:$0xff] }
  0x5c   :  { %2180 = vmatpush1.bf16.msra.mxu0 %v3377_v8  ;;  %2221 = vmatpush1.bf16.msra.mxu1 %v3379_v9  ;;  %v248_v8 = vld [vmem:[#allocation2 + $0x668] sm:$0xff] }
  0x5d   :  { %2255 = vmatprep.subr.bf16.mxu0 %v3574_v10  ;;  %2296 = vmatprep.subr.bf16.mxu1 %v3576_v11  ;;  %v280_v9 = vld [vmem:[#allocation2 + $0x768] sm:$0xff]  ;;  %v3385_v10 = vcombine.low %v53_v61, %v85_v62  ;;  %v3387_v11 = vcombine.low %v54_v63, %v86_v1  ;;  %v3458_v61 = vcombine.high %v121_v55, %v153_v56  ;;  %v57_v63 = vld [vmem:[#allocation2 + $0x70] sm:$0xff] }
  0x5e   :  { %v3584_v13 = vcombine.high %v248_v8, %v280_v9  ;;  %v89_v1 = vld [vmem:[#allocation2 + $0x170] sm:$0xff] }
  0x5f   :  { %3627 = vmatmul.mubr.msk.bf16.vlgmr.msra.gmra.mxu0 %vm1915_vm0, %v3738_v42  ;;  %3628 = vmatmul.mubr.msk.bf16.vlgmr.msra.gmra.mxu1 %vm1915_vm0, %v3738_v42 }
  0x60   :  { %2256 = vmatpush1.bf16.msra.mxu0 %v3573_v16  ;;  %2297 = vmatpush1.bf16.msra.mxu1 %v3575_v17  ;;  %v184_v16 = vld [vmem:[#allocation2 + $0x468] sm:$0xff] }
  0x61   :  { %2257 = vmatprep.subr.bf16.mxu0 %v3510_v18  ;;  %2298 = vmatprep.subr.bf16.mxu1 %v3512_v19  ;;  %v216_v17 = vld [vmem:[#allocation2 + $0x568] sm:$0xff]  ;;  %v3581_v18 = vcombine.low %v247_v6, %v279_v7  ;;  %v3583_v19 = vcombine.low %v248_v8, %v280_v9  ;;  %v3394_v6 = vcombine.high %v57_v63, %v89_v1  ;;  %v251_v8 = vld [vmem:[#allocation2 + $0x680] sm:$0xff] }
  0x62   :  { %2279 = vmatprep.mubr.bf16.mxu0 %v3706_v0  ;;  %2320 = vmatprep.mubr.bf16.mxu1 %v3706_v0  ;;  %v3520_v21 = vcombine.high %v184_v16, %v216_v17  ;;  %v283_v9 = vld [vmem:[#allocation2 + $0x780] sm:$0xff] }
  0x64   :  { %2258 = vmatpush1.bf16.msra.mxu0 %v3509_v24  ;;  %2299 = vmatpush1.bf16.msra.mxu1 %v3511_v25  ;;  %v120_v24 = vld [vmem:[#allocation2 + $0x268] sm:$0xff] }
  0x65   :  { %2259 = vmatprep.subr.bf16.mxu0 %v3446_v26  ;;  %2300 = vmatprep.subr.bf16.mxu1 %v3448_v27  ;;  %v152_v25 = vld [vmem:[#allocation2 + $0x368] sm:$0xff]  ;;  %v3517_v26 = vcombine.low %v183_v14, %v215_v15  ;;  %v3519_v27 = vcombine.low %v184_v16, %v216_v17  ;;  %v3590_v14 = vcombine.high %v251_v8, %v283_v9  ;;  %v187_v16 = vld [vmem:[#allocation2 + $0x480] sm:$0xff] }
  0x66   :  { %v3456_v29 = vcombine.high %v120_v24, %v152_v25  ;;  %v219_v17 = vld [vmem:[#allocation2 + $0x580] sm:$0xff] }
  0x68   :  { %2260 = vmatpush1.bf16.msra.mxu0 %v3445_v32  ;;  %2301 = vmatpush1.bf16.msra.mxu1 %v3447_v33  ;;  %v56_v32 = vld [vmem:[#allocation2 + $0x68] sm:$0xff] }
  0x69   :  { %2261 = vmatprep.subr.bf16.mxu0 %v3382_v34  ;;  %2302 = vmatprep.subr.bf16.mxu1 %v3384_v35  ;;  %v88_v33 = vld [vmem:[#allocation2 + $0x168] sm:$0xff]  ;;  %v3453_v34 = vcombine.low %v119_v22, %v151_v23  ;;  %v3455_v35 = vcombine.low %v120_v24, %v152_v25  ;;  %v3526_v22 = vcombine.high %v187_v16, %v219_v17  ;;  %v123_v24 = vld [vmem:[#allocation2 + $0x280] sm:$0xff] }
  0x6a   :  { %v3392_v37 = vcombine.high %v56_v32, %v88_v33  ;;  %v155_v25 = vld [vmem:[#allocation2 + $0x380] sm:$0xff] }
  0x6c   :  { %2262 = vmatpush1.bf16.msra.mxu0 %v3381_v40  ;;  %2303 = vmatpush1.bf16.msra.mxu1 %v3383_v41  ;;  %v250_v40 = vld [vmem:[#allocation2 + $0x678] sm:$0xff] }
  0x6d   :  { %2337 = vmatprep.subr.bf16.mxu0 %v3578_v43  ;;  %2378 = vmatprep.subr.bf16.mxu1 %v3580_v44  ;;  %v282_v41 = vld [vmem:[#allocation2 + $0x778] sm:$0xff]  ;;  %v3389_v43 = vcombine.low %v55_v30, %v87_v31  ;;  %v3391_v44 = vcombine.low %v56_v32, %v88_v33  ;;  %v3462_v30 = vcombine.high %v123_v24, %v155_v25  ;;  %v59_v32 = vld [vmem:[#allocation2 + $0x80] sm:$0xff] }
  0x6e   :  { %v3588_v46 = vcombine.high %v250_v40, %v282_v41  ;;  %v91_v33 = vld [vmem:[#allocation2 + $0x180] sm:$0xff] }
  0x6f   :  { %3629 = vmatmul.mubr.msk.bf16.vlgmr.msra.gmra.mxu0 %vm1915_vm0, %v3738_v42  ;;  %3630 = vmatmul.mubr.msk.bf16.vlgmr.msra.gmra.mxu1 %vm1915_vm0, %v3738_v42 }
  0x70   :  { %2338 = vmatpush1.bf16.msra.mxu0 %v3577_v49  ;;  %2379 = vmatpush1.bf16.msra.mxu1 %v3579_v50  ;;  %v186_v49 = vld [vmem:[#allocation2 + $0x478] sm:$0xff] }
  0x71   :  { %2339 = vmatprep.subr.bf16.mxu0 %v3514_v51  ;;  %2380 = vmatprep.subr.bf16.mxu1 %v3516_v52  ;;  %v218_v50 = vld [vmem:[#allocation2 + $0x578] sm:$0xff]  ;;  %v3585_v51 = vcombine.low %v249_v38, %v281_v39  ;;  %v3587_v52 = vcombine.low %v250_v40, %v282_v41  ;;  %v3398_v38 = vcombine.high %v59_v32, %v91_v33  ;;  %v253_v40 = vld [vmem:[#allocation2 + $0x690] sm:$0xff] }
  0x72   :  { %2361 = vmatprep.mubr.bf16.mxu0 %v3706_v0  ;;  %2402 = vmatprep.mubr.bf16.mxu1 %v3706_v0  ;;  %v3524_v54 = vcombine.high %v186_v49, %v218_v50  ;;  %v285_v41 = vld [vmem:[#allocation2 + $0x790] sm:$0xff] }
  0x74   :  { %2340 = vmatpush1.bf16.msra.mxu0 %v3513_v57  ;;  %2381 = vmatpush1.bf16.msra.mxu1 %v3515_v58  ;;  %v122_v57 = vld [vmem:[#allocation2 + $0x278] sm:$0xff] }
  0x75   :  { %2341 = vmatprep.subr.bf16.mxu0 %v3450_v59  ;;  %2382 = vmatprep.subr.bf16.mxu1 %v3452_v60  ;;  %v154_v58 = vld [vmem:[#allocation2 + $0x378] sm:$0xff]  ;;  %v3521_v59 = vcombine.low %v185_v47, %v217_v48  ;;  %v3523_v60 = vcombine.low %v186_v49, %v218_v50  ;;  %v3594_v47 = vcombine.high %v253_v40, %v285_v41  ;;  %v189_v49 = vld [vmem:[#allocation2 + $0x490] sm:$0xff] }
  0x76   :  { %v3460_v62 = vcombine.high %v122_v57, %v154_v58  ;;  %v221_v50 = vld [vmem:[#allocation2 + $0x590] sm:$0xff] }
  0x78   :  { %2342 = vmatpush1.bf16.msra.mxu0 %v3449_v2  ;;  %2383 = vmatpush1.bf16.msra.mxu1 %v3451_v3  ;;  %v58_v2 = vld [vmem:[#allocation2 + $0x78] sm:$0xff] }
  0x79   :  { %2343 = vmatprep.subr.bf16.mxu0 %v3386_v4  ;;  %2384 = vmatprep.subr.bf16.mxu1 %v3388_v5  ;;  %v90_v3 = vld [vmem:[#allocation2 + $0x178] sm:$0xff]  ;;  %v3457_v4 = vcombine.low %v121_v55, %v153_v56  ;;  %v3459_v5 = vcombine.low %v122_v57, %v154_v58  ;;  %v3530_v55 = vcombine.high %v189_v49, %v221_v50  ;;  %v125_v57 = vld [vmem:[#allocation2 + $0x290] sm:$0xff] }
  0x7a   :  { %v3396_v7 = vcombine.high %v58_v2, %v90_v3  ;;  %v157_v58 = vld [vmem:[#allocation2 + $0x390] sm:$0xff] }
  0x7c   :  { %2344 = vmatpush1.bf16.msra.mxu0 %v3385_v10  ;;  %2385 = vmatpush1.bf16.msra.mxu1 %v3387_v11  ;;  %v252_v10 = vld [vmem:[#allocation2 + $0x688] sm:$0xff] }
  0x7d   :  { %2419 = vmatprep.subr.bf16.mxu0 %v3582_v12  ;;  %2460 = vmatprep.subr.bf16.mxu1 %v3584_v13  ;;  %v284_v11 = vld [vmem:[#allocation2 + $0x788] sm:$0xff]  ;;  %v3393_v12 = vcombine.low %v57_v63, %v89_v1  ;;  %v3395_v13 = vcombine.low %v58_v2, %v90_v3  ;;  %v3466_v63 = vcombine.high %v125_v57, %v157_v58  ;;  %v61_v2 = vld [vmem:[#allocation2 + $0x90] sm:$0xff] }
  0x7e   :  { %v3592_v15 = vcombine.high %v252_v10, %v284_v11  ;;  %v93_v3 = vld [vmem:[#allocation2 + $0x190] sm:$0xff] }
  0x7f   :  { %3631 = vmatmul.mubr.msk.bf16.vlgmr.msra.gmra.mxu0 %vm1915_vm0, %v3738_v42  ;;  %3632 = vmatmul.mubr.msk.bf16.vlgmr.msra.gmra.mxu1 %vm1915_vm0, %v3738_v42 }
  0x80   :  { %2420 = vmatpush1.bf16.msra.mxu0 %v3581_v18  ;;  %2461 = vmatpush1.bf16.msra.mxu1 %v3583_v19  ;;  %v188_v18 = vld [vmem:[#allocation2 + $0x488] sm:$0xff] }
  0x81   :  { %2421 = vmatprep.subr.bf16.mxu0 %v3518_v20  ;;  %2462 = vmatprep.subr.bf16.mxu1 %v3520_v21  ;;  %v220_v19 = vld [vmem:[#allocation2 + $0x588] sm:$0xff]  ;;  %v3589_v20 = vcombine.low %v251_v8, %v283_v9  ;;  %v3591_v21 = vcombine.low %v252_v10, %v284_v11  ;;  %v3402_v8 = vcombine.high %v61_v2, %v93_v3  ;;  %v255_v10 = vld [vmem:[#allocation2 + $0x6a0] sm:$0xff] }
  0x82   :  { %2443 = vmatprep.mubr.bf16.mxu0 %v3706_v0  ;;  %2484 = vmatprep.mubr.bf16.mxu1 %v3706_v0  ;;  %v3528_v23 = vcombine.high %v188_v18, %v220_v19  ;;  %v287_v11 = vld [vmem:[#allocation2 + $0x7a0] sm:$0xff] }
  0x84   :  { %2422 = vmatpush1.bf16.msra.mxu0 %v3517_v26  ;;  %2463 = vmatpush1.bf16.msra.mxu1 %v3519_v27  ;;  %v124_v26 = vld [vmem:[#allocation2 + $0x288] sm:$0xff] }
  0x85   :  { %2423 = vmatprep.subr.bf16.mxu0 %v3454_v28  ;;  %2464 = vmatprep.subr.bf16.mxu1 %v3456_v29  ;;  %v156_v27 = vld [vmem:[#allocation2 + $0x388] sm:$0xff]  ;;  %v3525_v28 = vcombine.low %v187_v16, %v219_v17  ;;  %v3527_v29 = vcombine.low %v188_v18, %v220_v19  ;;  %v3598_v16 = vcombine.high %v255_v10, %v287_v11  ;;  %v191_v18 = vld [vmem:[#allocation2 + $0x4a0] sm:$0xff] }
  0x86   :  { %v3464_v31 = vcombine.high %v124_v26, %v156_v27  ;;  %v223_v19 = vld [vmem:[#allocation2 + $0x5a0] sm:$0xff] }
  0x88   :  { %2424 = vmatpush1.bf16.msra.mxu0 %v3453_v34  ;;  %2465 = vmatpush1.bf16.msra.mxu1 %v3455_v35  ;;  %v60_v34 = vld [vmem:[#allocation2 + $0x88] sm:$0xff] }
  0x89   :  { %2425 = vmatprep.subr.bf16.mxu0 %v3390_v36  ;;  %2466 = vmatprep.subr.bf16.mxu1 %v3392_v37  ;;  %v92_v35 = vld [vmem:[#allocation2 + $0x188] sm:$0xff]  ;;  %v3461_v36 = vcombine.low %v123_v24, %v155_v25  ;;  %v3463_v37 = vcombine.low %v124_v26, %v156_v27  ;;  %v3534_v24 = vcombine.high %v191_v18, %v223_v19  ;;  %v127_v26 = vld [vmem:[#allocation2 + $0x2a0] sm:$0xff] }
  0x8a   :  { %v3400_v39 = vcombine.high %v60_v34, %v92_v35  ;;  %v159_v27 = vld [vmem:[#allocation2 + $0x3a0] sm:$0xff] }
  0x8c   :  { %2426 = vmatpush1.bf16.msra.mxu0 %v3389_v43  ;;  %2467 = vmatpush1.bf16.msra.mxu1 %v3391_v44  ;;  %v254_v43 = vld [vmem:[#allocation2 + $0x698] sm:$0xff] }
  0x8d   :  { %2501 = vmatprep.subr.bf16.mxu0 %v3586_v45  ;;  %2542 = vmatprep.subr.bf16.mxu1 %v3588_v46  ;;  %v286_v44 = vld [vmem:[#allocation2 + $0x798] sm:$0xff]  ;;  %v3397_v45 = vcombine.low %v59_v32, %v91_v33  ;;  %v3399_v46 = vcombine.low %v60_v34, %v92_v35  ;;  %v3470_v32 = vcombine.high %v127_v26, %v159_v27  ;;  %v63_v34 = vld [vmem:[#allocation2 + $0xa0] sm:$0xff] }
  0x8e   :  { %v3596_v48 = vcombine.high %v254_v43, %v286_v44  ;;  %v95_v35 = vld [vmem:[#allocation2 + $0x1a0] sm:$0xff] }
  0x8f   :  { %3633 = vmatmul.mubr.msk.bf16.vlgmr.msra.gmra.mxu0 %vm1915_vm0, %v3738_v42  ;;  %3634 = vmatmul.mubr.msk.bf16.vlgmr.msra.gmra.mxu1 %vm1915_vm0, %v3738_v42 }
  0x90   :  { %2502 = vmatpush1.bf16.msra.mxu0 %v3585_v51  ;;  %2543 = vmatpush1.bf16.msra.mxu1 %v3587_v52  ;;  %v190_v51 = vld [vmem:[#allocation2 + $0x498] sm:$0xff] }
  0x91   :  { %2503 = vmatprep.subr.bf16.mxu0 %v3522_v53  ;;  %2544 = vmatprep.subr.bf16.mxu1 %v3524_v54  ;;  %v222_v52 = vld [vmem:[#allocation2 + $0x598] sm:$0xff]  ;;  %v3593_v53 = vcombine.low %v253_v40, %v285_v41  ;;  %v3595_v54 = vcombine.low %v254_v43, %v286_v44  ;;  %v3406_v40 = vcombine.high %v63_v34, %v95_v35  ;;  %v257_v43 = vld [vmem:[#allocation2 + $0x6b0] sm:$0xff] }
  0x92   :  { %2525 = vmatprep.mubr.bf16.mxu0 %v3706_v0  ;;  %2566 = vmatprep.mubr.bf16.mxu1 %v3706_v0  ;;  %v3532_v56 = vcombine.high %v190_v51, %v222_v52  ;;  %v289_v44 = vld [vmem:[#allocation2 + $0x7b0] sm:$0xff] }
  0x94   :  { %2504 = vmatpush1.bf16.msra.mxu0 %v3521_v59  ;;  %2545 = vmatpush1.bf16.msra.mxu1 %v3523_v60  ;;  %v126_v59 = vld [vmem:[#allocation2 + $0x298] sm:$0xff] }
  0x95   :  { %2505 = vmatprep.subr.bf16.mxu0 %v3458_v61  ;;  %2546 = vmatprep.subr.bf16.mxu1 %v3460_v62  ;;  %v158_v60 = vld [vmem:[#allocation2 + $0x398] sm:$0xff]  ;;  %v3529_v61 = vcombine.low %v189_v49, %v221_v50  ;;  %v3531_v62 = vcombine.low %v190_v51, %v222_v52  ;;  %v3602_v49 = vcombine.high %v257_v43, %v289_v44  ;;  %v193_v51 = vld [vmem:[#allocation2 + $0x4b0] sm:$0xff] }
  0x96   :  { %v3468_v1 = vcombine.high %v126_v59, %v158_v60  ;;  %v225_v52 = vld [vmem:[#allocation2 + $0x5b0] sm:$0xff] }
  0x98   :  { %2506 = vmatpush1.bf16.msra.mxu0 %v3457_v4  ;;  %2547 = vmatpush1.bf16.msra.mxu1 %v3459_v5  ;;  %v62_v4 = vld [vmem:[#allocation2 + $0x98] sm:$0xff] }
  0x99   :  { %2507 = vmatprep.subr.bf16.mxu0 %v3394_v6  ;;  %2548 = vmatprep.subr.bf16.mxu1 %v3396_v7  ;;  %v94_v5 = vld [vmem:[#allocation2 + $0x198] sm:$0xff]  ;;  %v3465_v6 = vcombine.low %v125_v57, %v157_v58  ;;  %v3467_v7 = vcombine.low %v126_v59, %v158_v60  ;;  %v3538_v57 = vcombine.high %v193_v51, %v225_v52  ;;  %v129_v59 = vld [vmem:[#allocation2 + $0x2b0] sm:$0xff] }
  0x9a   :  { %v3404_v9 = vcombine.high %v62_v4, %v94_v5  ;;  %v161_v60 = vld [vmem:[#allocation2 + $0x3b0] sm:$0xff] }
  0x9c   :  { %2508 = vmatpush1.bf16.msra.mxu0 %v3393_v12  ;;  %2549 = vmatpush1.bf16.msra.mxu1 %v3395_v13  ;;  %v256_v12 = vld [vmem:[#allocation2 + $0x6a8] sm:$0xff] }
  0x9d   :  { %2583 = vmatprep.subr.bf16.mxu0 %v3590_v14  ;;  %2624 = vmatprep.subr.bf16.mxu1 %v3592_v15  ;;  %v288_v13 = vld [vmem:[#allocation2 + $0x7a8] sm:$0xff]  ;;  %v3401_v14 = vcombine.low %v61_v2, %v93_v3  ;;  %v3403_v15 = vcombine.low %v62_v4, %v94_v5  ;;  %v3474_v2 = vcombine.high %v129_v59, %v161_v60  ;;  %v65_v4 = vld [vmem:[#allocation2 + $0xb0] sm:$0xff] }
  0x9e   :  { %v3600_v17 = vcombine.high %v256_v12, %v288_v13  ;;  %v97_v5 = vld [vmem:[#allocation2 + $0x1b0] sm:$0xff] }
  0x9f   :  { %3635 = vmatmul.mubr.msk.bf16.vlgmr.msra.gmra.mxu0 %vm1915_vm0, %v3738_v42  ;;  %3636 = vmatmul.mubr.msk.bf16.vlgmr.msra.gmra.mxu1 %vm1915_vm0, %v3738_v42 }
  0xa0   :  { %2584 = vmatpush1.bf16.msra.mxu0 %v3589_v20  ;;  %2625 = vmatpush1.bf16.msra.mxu1 %v3591_v21  ;;  %v192_v20 = vld [vmem:[#allocation2 + $0x4a8] sm:$0xff] }
  0xa1   :  { %2585 = vmatprep.subr.bf16.mxu0 %v3526_v22  ;;  %2626 = vmatprep.subr.bf16.mxu1 %v3528_v23  ;;  %v224_v21 = vld [vmem:[#allocation2 + $0x5a8] sm:$0xff]  ;;  %v3597_v22 = vcombine.low %v255_v10, %v287_v11  ;;  %v3599_v23 = vcombine.low %v256_v12, %v288_v13  ;;  %v3410_v10 = vcombine.high %v65_v4, %v97_v5  ;;  %v259_v12 = vld [vmem:[#allocation2 + $0x6c0] sm:$0xff] }
  0xa2   :  { %2607 = vmatprep.mubr.bf16.mxu0 %v3706_v0  ;;  %2648 = vmatprep.mubr.bf16.mxu1 %v3706_v0  ;;  %v3536_v25 = vcombine.high %v192_v20, %v224_v21  ;;  %v291_v13 = vld [vmem:[#allocation2 + $0x7c0] sm:$0xff] }
  0xa4   :  { %2586 = vmatpush1.bf16.msra.mxu0 %v3525_v28  ;;  %2627 = vmatpush1.bf16.msra.mxu1 %v3527_v29  ;;  %v128_v28 = vld [vmem:[#allocation2 + $0x2a8] sm:$0xff] }
  0xa5   :  { %2587 = vmatprep.subr.bf16.mxu0 %v3462_v30  ;;  %2628 = vmatprep.subr.bf16.mxu1 %v3464_v31  ;;  %v160_v29 = vld [vmem:[#allocation2 + $0x3a8] sm:$0xff]  ;;  %v3533_v30 = vcombine.low %v191_v18, %v223_v19  ;;  %v3535_v31 = vcombine.low %v192_v20, %v224_v21  ;;  %v3606_v18 = vcombine.high %v259_v12, %v291_v13  ;;  %v195_v20 = vld [vmem:[#allocation2 + $0x4c0] sm:$0xff] }
  0xa6   :  { %v3472_v33 = vcombine.high %v128_v28, %v160_v29  ;;  %v227_v21 = vld [vmem:[#allocation2 + $0x5c0] sm:$0xff] }
  0xa8   :  { %2588 = vmatpush1.bf16.msra.mxu0 %v3461_v36  ;;  %2629 = vmatpush1.bf16.msra.mxu1 %v3463_v37  ;;  %v64_v36 = vld [vmem:[#allocation2 + $0xa8] sm:$0xff] }
  0xa9   :  { %2589 = vmatprep.subr.bf16.mxu0 %v3398_v38  ;;  %2630 = vmatprep.subr.bf16.mxu1 %v3400_v39  ;;  %v96_v37 = vld [vmem:[#allocation2 + $0x1a8] sm:$0xff]  ;;  %v3469_v38 = vcombine.low %v127_v26, %v159_v27  ;;  %v3471_v39 = vcombine.low %v128_v28, %v160_v29  ;;  %v3542_v26 = vcombine.high %v195_v20, %v227_v21  ;;  %v131_v28 = vld [vmem:[#allocation2 + $0x2c0] sm:$0xff] }
  0xaa   :  { %v3408_v41 = vcombine.high %v64_v36, %v96_v37  ;;  %v163_v29 = vld [vmem:[#allocation2 + $0x3c0] sm:$0xff] }
  0xac   :  { %2590 = vmatpush1.bf16.msra.mxu0 %v3397_v45  ;;  %2631 = vmatpush1.bf16.msra.mxu1 %v3399_v46  ;;  %v258_v45 = vld [vmem:[#allocation2 + $0x6b8] sm:$0xff] }
  0xad   :  { %2665 = vmatprep.subr.bf16.mxu0 %v3594_v47  ;;  %2706 = vmatprep.subr.bf16.mxu1 %v3596_v48  ;;  %v290_v46 = vld [vmem:[#allocation2 + $0x7b8] sm:$0xff]  ;;  %v3405_v47 = vcombine.low %v63_v34, %v95_v35  ;;  %v3407_v48 = vcombine.low %v64_v36, %v96_v37  ;;  %v3478_v35 = vcombine.high %v131_v28, %v163_v29  ;;  %v67_v37 = vld [vmem:[#allocation2 + $0xc0] sm:$0xff] }
  0xae   :  { %v3604_v50 = vcombine.high %v258_v45, %v290_v46 }
  0xaf   :  { %3637 = vmatmul.mubr.msk.bf16.vlgmr.msra.gmra.mxu0 %vm1915_vm0, %v3738_v42  ;;  %3638 = vmatmul.mubr.msk.bf16.vlgmr.msra.gmra.mxu1 %vm1915_vm0, %v3738_v42 }
  0xb0   :  { %2666 = vmatpush1.bf16.msra.mxu0 %v3593_v53  ;;  %2707 = vmatpush1.bf16.msra.mxu1 %v3595_v54  ;;  %v194_v53 = vld [vmem:[#allocation2 + $0x4b8] sm:$0xff] }
  0xb1   :  { %2667 = vmatprep.subr.bf16.mxu0 %v3530_v55  ;;  %2708 = vmatprep.subr.bf16.mxu1 %v3532_v56  ;;  %v226_v54 = vld [vmem:[#allocation2 + $0x5b8] sm:$0xff]  ;;  %v3601_v55 = vcombine.low %v257_v43, %v289_v44  ;;  %v3603_v56 = vcombine.low %v258_v45, %v290_v46 }
  0xb2   :  { %2689 = vmatprep.mubr.bf16.mxu0 %v3706_v0  ;;  %2730 = vmatprep.mubr.bf16.mxu1 %v3706_v0  ;;  %v3540_v58 = vcombine.high %v194_v53, %v226_v54 }
  0xb4   :  { %2668 = vmatpush1.bf16.msra.mxu0 %v3529_v61  ;;  %2709 = vmatpush1.bf16.msra.mxu1 %v3531_v62  ;;  %v130_v61 = vld [vmem:[#allocation2 + $0x2b8] sm:$0xff] }
  0xb5   :  { %2669 = vmatprep.subr.bf16.mxu0 %v3466_v63  ;;  %2710 = vmatprep.subr.bf16.mxu1 %v3468_v1  ;;  %v162_v62 = vld [vmem:[#allocation2 + $0x3b8] sm:$0xff]  ;;  %v3537_v63 = vcombine.low %v193_v51, %v225_v52  ;;  %v3539_v1 = vcombine.low %v194_v53, %v226_v54  ;;  %v3817_v54 = vld [vmem:[#allocation4] sm:$0xff] }
  0xb6   :  { %v3476_v3 = vcombine.high %v130_v61, %v162_v62 }
  0xb8   :  { %2670 = vmatpush1.bf16.msra.mxu0 %v3465_v6  ;;  %2711 = vmatpush1.bf16.msra.mxu1 %v3467_v7  ;;  %v66_v6 = vld [vmem:[#allocation2 + $0xb8] sm:$0xff] }
  0xb9   :  { %2671 = vmatprep.subr.bf16.mxu0 %v3402_v8  ;;  %2712 = vmatprep.subr.bf16.mxu1 %v3404_v9  ;;  %v98_v7 = vld [vmem:[#allocation2 + $0x1b8] sm:$0xff]  ;;  %v3473_v8 = vcombine.low %v129_v59, %v161_v60  ;;  %v3475_v9 = vcombine.low %v130_v61, %v162_v62  ;;  %v197_v59 = vld [vmem:[#allocation2 + $0x4d0] sm:$0xff] }
  0xba   :  { %v3412_v11 = vcombine.high %v66_v6, %v98_v7  ;;  %v229_v60 = vld [vmem:[#allocation2 + $0x5d0] sm:$0xff]  ;;  %v198_v62 = vld [vmem:[#allocation2 + $0x4d8] sm:$0xff] }
  0xbc   :  { %2672 = vmatpush1.bf16.msra.mxu0 %v3401_v14  ;;  %2713 = vmatpush1.bf16.msra.mxu1 %v3403_v15  ;;  %v260_v14 = vld [vmem:[#allocation2 + $0x6c8] sm:$0xff] }
  0xbd   :  { %2747 = vmatprep.subr.bf16.mxu0 %v3598_v16  ;;  %2788 = vmatprep.subr.bf16.mxu1 %v3600_v17  ;;  %v292_v15 = vld [vmem:[#allocation2 + $0x7c8] sm:$0xff]  ;;  %v3409_v16 = vcombine.low %v65_v4, %v97_v5  ;;  %v3411_v17 = vcombine.low %v66_v6, %v98_v7  ;;  %v3546_v5 = vcombine.high %v197_v59, %v229_v60 }
  0xbe   :  { %v3608_v19 = vcombine.high %v260_v14, %v292_v15 }
  0xbf   :  { %3639 = vmatmul.mubr.msk.bf16.vlgmr.msra.gmra.mxu0 %vm1915_vm0, %v3738_v42  ;;  %3640 = vmatmul.mubr.msk.bf16.vlgmr.msra.gmra.mxu1 %vm1915_vm0, %v3738_v42 }
  0xc0   :  { %2748 = vmatpush1.bf16.msra.mxu0 %v3597_v22  ;;  %2789 = vmatpush1.bf16.msra.mxu1 %v3599_v23  ;;  %v196_v22 = vld [vmem:[#allocation2 + $0x4c8] sm:$0xff] }
  0xc1   :  { %2749 = vmatprep.subr.bf16.mxu0 %v3534_v24  ;;  %2790 = vmatprep.subr.bf16.mxu1 %v3536_v25  ;;  %v228_v23 = vld [vmem:[#allocation2 + $0x5c8] sm:$0xff]  ;;  %v3605_v24 = vcombine.low %v259_v12, %v291_v13  ;;  %v3607_v25 = vcombine.low %v260_v14, %v292_v15  ;;  %v134_v12 = vld [vmem:[#allocation2 + $0x2d8] sm:$0xff] }
  0xc2   :  { %2771 = vmatprep.mubr.bf16.mxu0 %v3706_v0  ;;  %2812 = vmatprep.mubr.bf16.mxu1 %v3706_v0  ;;  %v3544_v27 = vcombine.high %v196_v22, %v228_v23  ;;  %v3543_v34 = vcombine.low %v196_v22, %v228_v23  ;;  %v166_v13 = vld [vmem:[#allocation2 + $0x3d8] sm:$0xff] }
  0xc4   :  { %2750 = vmatpush1.bf16.msra.mxu0 %v3533_v30  ;;  %2791 = vmatpush1.bf16.msra.mxu1 %v3535_v31  ;;  %v132_v30 = vld [vmem:[#allocation2 + $0x2c8] sm:$0xff] }
  0xc5   :  { %2751 = vmatprep.subr.bf16.mxu0 %v3470_v32  ;;  %2792 = vmatprep.subr.bf16.mxu1 %v3472_v33  ;;  %v164_v31 = vld [vmem:[#allocation2 + $0x3c8] sm:$0xff]  ;;  %v3541_v32 = vcombine.low %v195_v20, %v227_v21  ;;  %v315_v33 = vlaneseq }
  0xc6   :  { %v3480_v36 = vcombine.high %v132_v30, %v164_v31  ;;  %v3479_v44 = vcombine.low %v132_v30, %v164_v31  ;;  %v70_v30 = vld [vmem:[#allocation2 + $0xd8] sm:$0xff] }
  0xc7   :  { %v3812_v43 = vshrl.u32 %v315_v33, 7  ;;  %v102_v31 = vld [vmem:[#allocation2 + $0x1d8] sm:$0xff] }
  0xc8   :  { %2752 = vmatpush1.bf16.msra.mxu0 %v3469_v38  ;;  %2793 = vmatpush1.bf16.msra.mxu1 %v3471_v39  ;;  %v99_v38 = vld [vmem:[#allocation2 + $0x1c0] sm:$0xff]  ;;  %v68_v39 = vld [vmem:[#allocation2 + $0xc8] sm:$0xff] }
  0xc9   :  { %2753 = vmatprep.subr.bf16.mxu0 %v3406_v40  ;;  %2794 = vmatprep.subr.bf16.mxu1 %v3408_v41  ;;  %v100_v40 = vld [vmem:[#allocation2 + $0x1c8] sm:$0xff]  ;;  %v3477_v41 = vcombine.low %v131_v28, %v163_v29  ;;  %v3414_v45 = vcombine.high %v67_v37, %v99_v38  ;;  %v3413_v51 = vcombine.low %v67_v37, %v99_v38  ;;  %v3815_v52 = vsub.s32 0, %v3812_v43 }
  0xca   :  { %v3416_v46 = vcombine.high %v68_v39, %v100_v40  ;;  %v3415_v53 = vcombine.low %v68_v39, %v100_v40  ;;  %v3826_v61 = vsub.s32 3, %v3812_v43  ;;  %v3483_v37 = vcombine.low %v134_v12, %v166_v13 }
  0xcb   :  { %v3420_v40 = vcombine.high %v70_v30, %v102_v31 }
  0xcc   :  { %2754 = vmatpush1.bf16.msra.mxu0 %v3405_v47  ;;  %2795 = vmatpush1.bf16.msra.mxu1 %v3407_v48  ;;  %v261_v47 = vld [vmem:[#allocation2 + $0x6d0] sm:$0xff] }
  0xcd   :  { %2829 = vmatprep.subr.bf16.mxu0 %v3602_v49  ;;  %2870 = vmatprep.subr.bf16.mxu1 %v3604_v50  ;;  %v293_v48 = vld [vmem:[#allocation2 + $0x7d0] sm:$0xff]  ;;  %v262_v49 = vld [vmem:[#allocation2 + $0x6d8] sm:$0xff] }
  0xce   :  { %v294_v50 = vld [vmem:[#allocation2 + $0x7d8] sm:$0xff] }
  0xcf   :  { %3641 = vmatmul.mubr.msk.bf16.vlgmr.msra.gmra.mxu0 %vm1915_vm0, %v3738_v42  ;;  %3642 = vmatmul.mubr.msk.bf16.vlgmr.msra.gmra.mxu1 %vm1915_vm0, %v3738_v42  ;;  %v3611_v4 = vcombine.low %v262_v49, %v294_v50 }
  0xd0   :  { %2830 = vmatpush1.bf16.msra.mxu0 %v3601_v55  ;;  %2871 = vmatpush1.bf16.msra.mxu1 %v3603_v56  ;;  %v3820_v55 = vsub.s32 2, %v3812_v43  ;;  %v3610_v56 = vcombine.high %v261_v47, %v293_v48 }
  0xd1   :  { %2831 = vmatprep.subr.bf16.mxu0 %v3538_v57  ;;  %2872 = vmatprep.subr.bf16.mxu1 %v3540_v58  ;;  %v3612_v57 = vcombine.high %v262_v49, %v294_v50  ;;  %v3823_v58 = vsub.s32 1, %v3812_v43  ;;  %v3419_v49 = vcombine.low %v70_v30, %v102_v31  ;;  %v3858_v50 = vsub.s32 6, %v3812_v43 }
  0xd2   :  { %2853 = vmatprep.mubr.bf16.mxu0 %v3706_v0  ;;  %2894 = vmatprep.mubr.bf16.mxu1 %v3706_v0 }
  0xd3   :  { %v322_v6 = vrot.slane %v3817_v54, %v3823_v58 }
  0xd4   :  { %2832 = vmatpush1.bf16.msra.mxu0 %v3537_v63  ;;  %2873 = vmatpush1.bf16.msra.mxu1 %v3539_v1  ;;  %v230_v63 = vld [vmem:[#allocation2 + $0x5d8] sm:$0xff]  ;;  %v318_v1 = vrot.slane %v3817_v54, %v3815_v52 }
  0xd5   :  { %2833 = vmatprep.subr.bf16.mxu0 %v3474_v2  ;;  %2874 = vmatprep.subr.bf16.mxu1 %v3476_v3  ;;  %v3609_v2 = vcombine.low %v261_v47, %v293_v48  ;;  %v326_v3 = vrot.slane %v3817_v54, %v3820_v55  ;;  %v3548_v7 = vcombine.high %v198_v62, %v230_v63  ;;  %v3855_v48 = vsub.s32 4, %v3812_v43 }
  0xd8   :  { %2834 = vmatpush1.bf16.msra.mxu0 %v3473_v8  ;;  %2875 = vmatpush1.bf16.msra.mxu1 %v3475_v9  ;;  %v133_v8 = vld [vmem:[#allocation2 + $0x2d0] sm:$0xff] }
  0xd9   :  { %2835 = vmatprep.subr.bf16.mxu0 %v3410_v10  ;;  %2876 = vmatprep.subr.bf16.mxu1 %v3412_v11  ;;  %v165_v9 = vld [vmem:[#allocation2 + $0x3d0] sm:$0xff]  ;;  %v330_v11 = vrot.slane %v3817_v54, %v3826_v61 }
  0xda   :  { %v3482_v20 = vcombine.high %v133_v8, %v165_v9 }
  0xdc   :  { %2836 = vmatpush1.bf16.msra.mxu0 %v3409_v16  ;;  %2877 = vmatpush1.bf16.msra.mxu1 %v3411_v17  ;;  %v3545_v16 = vcombine.low %v197_v59, %v229_v60  ;;  %v231_v59 = vld [vmem:[#allocation2 + $0x5e0] sm:$0xff]  ;;  %v3864_v60 = vsub.s32 7, %v3812_v43 }
  0xdd   :  { %2911 = vmatprep.subr.bf16.mxu0 %v3606_v18  ;;  %2952 = vmatprep.subr.bf16.mxu1 %v3608_v19  ;;  %v3547_v19 = vcombine.low %v198_v62, %v230_v63  ;;  %v200_v62 = vld [vmem:[#allocation2 + $0x4e8] sm:$0xff] }
  0xde   :  { %v232_v63 = vld [vmem:[#allocation2 + $0x5e8] sm:$0xff] }
  0xdf   :  { %3643 = vmatmul.mubr.msk.bf16.vlgmr.msra.gmra.mxu0 %vm1915_vm0, %v3738_v42  ;;  %3644 = vmatmul.mubr.msk.bf16.vlgmr.msra.gmra.mxu1 %vm1915_vm0, %v3738_v42 }
  0xe0   :  { %2912 = vmatpush1.bf16.msra.mxu0 %v3605_v24  ;;  %2953 = vmatpush1.bf16.msra.mxu1 %v3607_v25  ;;  %v3484_v24 = vcombine.high %v134_v12, %v166_v13  ;;  %v69_v25 = vld [vmem:[#allocation2 + $0xd0] sm:$0xff]  ;;  %v168_v12 = vld [vmem:[#allocation2 + $0x3e8] sm:$0xff] }
  0xe1   :  { %2913 = vmatprep.subr.bf16.mxu0 %v3542_v26  ;;  %2954 = vmatprep.subr.bf16.mxu1 %v3544_v27  ;;  %v101_v26 = vld [vmem:[#allocation2 + $0x1d0] sm:$0xff] }
  0xe2   :  { %2935 = vmatprep.mubr.bf16.mxu0 %v3706_v0  ;;  %2976 = vmatprep.mubr.bf16.mxu1 %v3706_v0  ;;  %v3418_v38 = vcombine.high %v69_v25, %v101_v26  ;;  %v3417_v47 = vcombine.low %v69_v25, %v101_v26 }
  0xe4   :  { %2914 = vmatpush1.bf16.msra.mxu0 %v3541_v32  ;;  %2955 = vmatpush1.bf16.msra.mxu1 %v3543_v34  ;;  %v3481_v34 = vcombine.low %v133_v8, %v165_v9  ;;  %v167_v8 = vld [vmem:[#allocation2 + $0x3e0] sm:$0xff] }
  0xe5   :  { %2915 = vmatprep.subr.bf16.mxu0 %v3478_v35  ;;  %2956 = vmatprep.subr.bf16.mxu1 %v3480_v36 }
  0xe8   :  { %2916 = vmatpush1.bf16.msra.mxu0 %v3477_v41  ;;  %2957 = vmatpush1.bf16.msra.mxu1 %v3479_v44  ;;  %v263_v41 = vld [vmem:[#allocation2 + $0x6e0] sm:$0xff] }
  0xe9   :  { %2917 = vmatprep.subr.bf16.mxu0 %v3414_v45  ;;  %2958 = vmatprep.subr.bf16.mxu1 %v3416_v46  ;;  %v295_v44 = vld [vmem:[#allocation2 + $0x7e0] sm:$0xff]  ;;  %v264_v45 = vld [vmem:[#allocation2 + $0x6e8] sm:$0xff] }
  0xea   :  { %v296_v46 = vld [vmem:[#allocation2 + $0x7e8] sm:$0xff] }
  0xec   :  { %2918 = vmatpush1.bf16.msra.mxu0 %v3413_v51  ;;  %2959 = vmatpush1.bf16.msra.mxu1 %v3415_v53  ;;  %v3614_v51 = vcombine.high %v263_v41, %v295_v44  ;;  %v3616_v53 = vcombine.high %v264_v45, %v296_v46 }
  0xed   :  { %2993 = vmatprep.subr.bf16.mxu0 %v3610_v56  ;;  %3034 = vmatprep.subr.bf16.mxu1 %v3612_v57  ;;  %v3861_v56 = vsub.s32 5, %v3812_v43  ;;  %v199_v57 = vld [vmem:[#allocation2 + $0x4e0] sm:$0xff]  ;;  %v3552_v43 = vcombine.high %v200_v62, %v232_v63 }
  0xef   :  { %v1953_v10 = vpop.f32.mrf.mxu0  ;;  %3645 = vmatmul.mubr.msk.bf16.vlgmr.msra.gmra.mxu0 %vm1915_vm0, %v3738_v42  ;;  %v1994_v15 = vpop.f32.mrf.mxu1  ;;  %3646 = vmatmul.mubr.msk.bf16.vlgmr.msra.gmra.mxu1 %vm1915_vm0, %v3738_v42 }
  0xf0   :  { %v1954_v14 = vadd.f32 %v1953_v10, %v318_v1  ;;  %2994 = vmatpush1.bf16.msra.mxu0 %v3609_v2  ;;  %v1995_v17 = vadd.f32 %v1994_v15, %v326_v3  ;;  %3035 = vmatpush1.bf16.msra.mxu1 %v3611_v4  ;;  %v334_v1 = vrot.slane %v3817_v54, %v3855_v48 }
  0xf1   :  { %v1955_v18 = vpop.f32.mrf.mxu0  ;;  %2995 = vmatprep.subr.bf16.mxu0 %v3546_v5  ;;  %v1996_v23 = vpop.f32.mrf.mxu1  ;;  %3036 = vmatprep.subr.bf16.mxu1 %v3548_v7  ;;  %v3613_v2 = vcombine.low %v263_v41, %v295_v44  ;;  %v342_v3 = vrot.slane %v3817_v54, %v3858_v50  ;;  %v3615_v4 = vcombine.low %v264_v45, %v296_v46  ;;  %v135_v7 = vld [vmem:[#allocation2 + $0x2e0] sm:$0xff]  ;;  %v266_v41 = vld [vmem:[#allocation2 + $0x6f8] sm:$0xff] }
  0xf2   :  { %v3231_v21 = vmax.f32 %v1954_v14, 0.0  ;;  %v1956_v22 = vadd.f32 %v1955_v18, %v322_v6  ;;  %3017 = vmatprep.mubr.bf16.mxu0 %v3706_v0  ;;  %v3233_v27 = vmax.f32 %v1995_v17, 0.0  ;;  %v1997_v28 = vadd.f32 %v1996_v23, %v330_v11  ;;  %3058 = vmatprep.mubr.bf16.mxu1 %v3706_v0  ;;  %v136_v11 = vld [vmem:[#allocation2 + $0x2e8] sm:$0xff]  ;;  %v71_v23 = vld [vmem:[#allocation2 + $0xe0] sm:$0xff]  ;;  %v298_v44 = vld [vmem:[#allocation2 + $0x7f8] sm:$0xff] }
  0xf3   :  { %v1957_v29 = vpop.f32.mrf.mxu0  ;;  %v1998_v33 = vpop.f32.mrf.mxu1  ;;  %v3550_v5 = vcombine.high %v199_v57, %v231_v59  ;;  %v338_v6 = vrot.slane %v3817_v54, %v3861_v56  ;;  %v346_v10 = vrot.slane %v3817_v54, %v3864_v60  ;;  %v3549_v15 = vcombine.low %v199_v57, %v231_v59  ;;  %v233_v57 = vld [vmem:[#allocation2 + $0x5f0] sm:$0xff]  ;;  %v202_v59 = vld [vmem:[#allocation2 + $0x4f8] sm:$0xff] }
  0xf4   :  { %3295 = vst [vmem:[%s4139_s3] sm:$0xff] %v3231_v21  ;;  %v3232_v32 = vmax.f32 %v1956_v22, 0.0  ;;  %2996 = vmatpush1.bf16.msra.mxu0 %v3545_v16  ;;  %3297 = vst [vmem:[%s4139_s3 + $0x10] sm:$0xff] %v3233_v27  ;;  %v3234_v35 = vmax.f32 %v1997_v28, 0.0  ;;  %3037 = vmatpush1.bf16.msra.mxu1 %v3547_v19  ;;  %v3551_v18 = vcombine.low %v200_v62, %v232_v63  ;;  %v72_v28 = vld [vmem:[#allocation2 + $0xe8] sm:$0xff]  ;;  %v234_v62 = vld [vmem:[#allocation2 + $0x5f8] sm:$0xff] }
  0xf5   :  { %v1958_v36 = vpop.f32.mrf.mxu0  ;;  %2997 = vmatprep.subr.bf16.mxu0 %v3482_v20  ;;  %v1999_v39 = vpop.f32.mrf.mxu1  ;;  %3038 = vmatprep.subr.bf16.mxu1 %v3484_v24  ;;  %v3486_v19 = vcombine.high %v135_v7, %v167_v8  ;;  %v3488_v54 = vcombine.high %v136_v11, %v168_v12  ;;  %v103_v24 = vld [vmem:[#allocation2 + $0x1e0] sm:$0xff]  ;;  %v104_v29 = vld [vmem:[#allocation2 + $0x1e8] sm:$0xff] }
  0xf6   :  { %3296 = vst [vmem:[%s4139_s3 + $0x8] sm:$0xff] %v3232_v32  ;;  %3298 = vst [vmem:[%s4139_s3 + $0x18] sm:$0xff] %v3234_v35  ;;  %v3485_v32 = vcombine.low %v135_v7, %v167_v8  ;;  %v3487_v35 = vcombine.low %v136_v11, %v168_v12  ;;  %v3422_v36 = vcombine.high %v71_v23, %v103_v24  ;;  %v265_v39 = vld [vmem:[#allocation2 + $0x6f0] sm:$0xff]  ;;  %v170_v11 = vld [vmem:[#allocation2 + $0x3f8] sm:$0xff] }
  0xf7   :  { %v3421_v45 = vcombine.low %v71_v23, %v103_v24  ;;  %v3423_v46 = vcombine.low %v72_v28, %v104_v29  ;;  %v169_v7 = vld [vmem:[#allocation2 + $0x3f0] sm:$0xff] }
  0xf8   :  { %2998 = vmatpush1.bf16.msra.mxu0 %v3481_v34  ;;  %3039 = vmatpush1.bf16.msra.mxu1 %v3483_v37  ;;  %v105_v23 = vld [vmem:[#allocation2 + $0x1f0] sm:$0xff] }
  0xf9   :  { %2999 = vmatprep.subr.bf16.mxu0 %v3418_v38  ;;  %3040 = vmatprep.subr.bf16.mxu1 %v3420_v40  ;;  %v3424_v38 = vcombine.high %v72_v28, %v104_v29  ;;  %v297_v40 = vld [vmem:[#allocation2 + $0x7f0] sm:$0xff]  ;;  %v106_v28 = vld [vmem:[#allocation2 + $0x1f8] sm:$0xff] }
  0xfc   :  { %3000 = vmatpush1.bf16.msra.mxu0 %v3417_v47  ;;  %3041 = vmatpush1.bf16.msra.mxu1 %v3419_v49  ;;  %v3892_v47 = vld [vmem:[#allocation4 + $0x8] sm:$0xff]  ;;  %v3618_v49 = vcombine.high %v265_v39, %v297_v40 }
  0xfd   :  { %3075 = vmatprep.subr.bf16.mxu0 %v3614_v51  ;;  %3116 = vmatprep.subr.bf16.mxu1 %v3616_v53  ;;  %v3620_v51 = vcombine.high %v266_v41, %v298_v44  ;;  %v201_v53 = vld [vmem:[#allocation2 + $0x4f0] sm:$0xff]  ;;  %v350_v63 = vrot.slane %v3892_v47, %v3815_v52 }
  0xff   :  { %v2035_v9 = vpop.f32.mrf.mxu0  ;;  %3647 = vmatmul.mubr.msk.bf16.vlgmr.msra.gmra.mxu0 %vm1915_vm0, %v3738_v42  ;;  %v2076_v14 = vpop.f32.mrf.mxu1  ;;  %3648 = vmatmul.mubr.msk.bf16.vlgmr.msra.gmra.mxu1 %vm1915_vm0, %v3738_v42 }
 0x100   :  { %v2036_v13 = vadd.f32 %v2035_v9, %v334_v1  ;;  %3076 = vmatpush1.bf16.msra.mxu0 %v3613_v2  ;;  %v2077_v16 = vadd.f32 %v2076_v14, %v342_v3  ;;  %3117 = vmatpush1.bf16.msra.mxu1 %v3615_v4  ;;  %v3617_v1 = vcombine.low %v265_v39, %v297_v40 }
 0x101   :  { %v2037_v17 = vpop.f32.mrf.mxu0  ;;  %3077 = vmatprep.subr.bf16.mxu0 %v3550_v5  ;;  %v2078_v22 = vpop.f32.mrf.mxu1  ;;  %3118 = vmatprep.subr.bf16.mxu1 %v3552_v43  ;;  %v358_v2 = vrot.slane %v3892_v47, %v3820_v55  ;;  %v3619_v3 = vcombine.low %v266_v41, %v298_v44  ;;  %v3554_v4 = vcombine.high %v201_v53, %v233_v57  ;;  %v137_v43 = vld [vmem:[#allocation2 + $0x2f0] sm:$0xff] }
 0x102   :  { %v3235_v20 = vmax.f32 %v2036_v13, 0.0  ;;  %v2038_v21 = vadd.f32 %v2037_v17, %v338_v6  ;;  %3099 = vmatprep.mubr.bf16.mxu0 %v3706_v0  ;;  %v3237_v25 = vmax.f32 %v2077_v16, 0.0  ;;  %v2079_v26 = vadd.f32 %v2078_v22, %v346_v10  ;;  %3140 = vmatprep.mubr.bf16.mxu1 %v3706_v0  ;;  %v138_v10 = vld [vmem:[#allocation2 + $0x2f8] sm:$0xff] }
 0x103   :  { %v2039_v27 = vpop.f32.mrf.mxu0  ;;  %v2080_v31 = vpop.f32.mrf.mxu1  ;;  %v354_v5 = vrot.slane %v3892_v47, %v3823_v58  ;;  %v3556_v6 = vcombine.high %v202_v59, %v234_v62  ;;  %v362_v9 = vrot.slane %v3892_v47, %v3826_v61  ;;  %v3553_v14 = vcombine.low %v201_v53, %v233_v57 }
 0x104   :  { %3299 = vst [vmem:[%s4139_s3 + $0x20] sm:$0xff] %v3235_v20  ;;  %v3236_v30 = vmax.f32 %v2038_v21, 0.0  ;;  %3078 = vmatpush1.bf16.msra.mxu0 %v3549_v15  ;;  %3301 = vst [vmem:[%s4139_s3 + $0x30] sm:$0xff] %v3237_v25  ;;  %v3238_v33 = vmax.f32 %v2079_v26, 0.0  ;;  %3119 = vmatpush1.bf16.msra.mxu1 %v3551_v18  ;;  %v3555_v17 = vcombine.low %v202_v59, %v234_v62  ;;  %v74_v27 = vld [vmem:[#allocation2 + $0xf8] sm:$0xff] }
 0x105   :  { %v2040_v34 = vpop.f32.mrf.mxu0  ;;  %3079 = vmatprep.subr.bf16.mxu0 %v3486_v19  ;;  %v2081_v37 = vpop.f32.mrf.mxu1  ;;  %3120 = vmatprep.subr.bf16.mxu1 %v3488_v54  ;;  %v3490_v18 = vcombine.high %v137_v43, %v169_v7  ;;  %v3492_v22 = vcombine.high %v138_v10, %v170_v11  ;;  %v73_v54 = vld [vmem:[#allocation2 + $0xf0] sm:$0xff]  ;;  %v3489_v31 = vcombine.low %v137_v43, %v169_v7 }
 0x106   :  { %3300 = vst [vmem:[%s4139_s3 + $0x28] sm:$0xff] %v3236_v30  ;;  %3302 = vst [vmem:[%s4139_s3 + $0x38] sm:$0xff] %v3238_v33  ;;  %v3491_v34 = vcombine.low %v138_v10, %v170_v11  ;;  %v3425_v37 = vcombine.low %v73_v54, %v105_v23  ;;  %v366_v39 = vrot.slane %v3892_v47, %v3855_v48 }
 0x107   :  { %v374_v40 = vrot.slane %v3892_v47, %v3858_v50  ;;  %v370_v41 = vrot.slane %v3892_v47, %v3861_v56 }
 0x108   :  { %3080 = vmatpush1.bf16.msra.mxu0 %v3485_v32  ;;  %3121 = vmatpush1.bf16.msra.mxu1 %v3487_v35  ;;  %v3426_v35 = vcombine.high %v73_v54, %v105_v23 }
 0x109   :  { %3081 = vmatprep.subr.bf16.mxu0 %v3422_v36  ;;  %3122 = vmatprep.subr.bf16.mxu1 %v3424_v38  ;;  %v3428_v36 = vcombine.high %v74_v27, %v106_v28  ;;  %v3427_v38 = vcombine.low %v74_v27, %v106_v28 }
 0x10c   :  { %3082 = vmatpush1.bf16.msra.mxu0 %v3421_v45  ;;  %3123 = vmatpush1.bf16.msra.mxu1 %v3423_v46  ;;  %v378_v45 = vrot.slane %v3892_v47, %v3864_v60 }
 0x10d   :  { %3157 = vmatprep.subr.bf16.mxu0 %v3618_v49  ;;  %3198 = vmatprep.subr.bf16.mxu1 %v3620_v51 }
 0x10f   :  { %v2117_v8 = vpop.f32.mrf.mxu0  ;;  %3649 = vmatmul.mubr.msk.bf16.vlgmr.msra.gmra.mxu0 %vm1915_vm0, %v3738_v42  ;;  %v2158_v13 = vpop.f32.mrf.mxu1  ;;  %3650 = vmatmul.mubr.msk.bf16.vlgmr.msra.gmra.mxu1 %vm1915_vm0, %v3738_v42 }
 0x110   :  { %v2118_v12 = vadd.f32 %v2117_v8, %v350_v63  ;;  %3158 = vmatpush1.bf16.msra.mxu0 %v3617_v1  ;;  %v2159_v15 = vadd.f32 %v2158_v13, %v358_v2  ;;  %3199 = vmatpush1.bf16.msra.mxu1 %v3619_v3 }
 0x111   :  { %v2119_v16 = vpop.f32.mrf.mxu0  ;;  %3159 = vmatprep.subr.bf16.mxu0 %v3554_v4  ;;  %v2160_v21 = vpop.f32.mrf.mxu1  ;;  %3200 = vmatprep.subr.bf16.mxu1 %v3556_v6  ;;  %v301_v6 = vld [vmem:[#allocation4 + $0x10] sm:$0xff] }
 0x112   :  { %v3239_v19 = vmax.f32 %v2118_v12, 0.0  ;;  %v2120_v20 = vadd.f32 %v2119_v16, %v354_v5  ;;  %3181 = vmatprep.mubr.bf16.mxu0 %v3706_v0  ;;  %v3241_v24 = vmax.f32 %v2159_v15, 0.0  ;;  %v2161_v25 = vadd.f32 %v2160_v21, %v362_v9  ;;  %3222 = vmatprep.mubr.bf16.mxu1 %v3706_v0 }
 0x113   :  { %v2121_v26 = vpop.f32.mrf.mxu0  ;;  %v2162_v30 = vpop.f32.mrf.mxu1  ;;  %v382_v43 = vrot.slane %v301_v6, %v3815_v52  ;;  %v390_v7 = vrot.slane %v301_v6, %v3820_v55  ;;  %v386_v8 = vrot.slane %v301_v6, %v3823_v58  ;;  %v394_v10 = vrot.slane %v301_v6, %v3826_v61 }
 0x114   :  { %3303 = vst [vmem:[%s4139_s3 + $0x40] sm:$0xff] %v3239_v19  ;;  %v3240_v29 = vmax.f32 %v2120_v20, 0.0  ;;  %3160 = vmatpush1.bf16.msra.mxu0 %v3553_v14  ;;  %3305 = vst [vmem:[%s4139_s3 + $0x50] sm:$0xff] %v3241_v24  ;;  %v3242_v32 = vmax.f32 %v2161_v25, 0.0  ;;  %3201 = vmatpush1.bf16.msra.mxu1 %v3555_v17  ;;  %v398_v25 = vrot.slane %v301_v6, %v3855_v48 }
 0x115   :  { %v2122_v33 = vpop.f32.mrf.mxu0  ;;  %3161 = vmatprep.subr.bf16.mxu0 %v3490_v18  ;;  %v2163_v0 = vpop.f32.mrf.mxu1  ;;  %3202 = vmatprep.subr.bf16.mxu1 %v3492_v22  ;;  %v406_v26 = vrot.slane %v301_v6, %v3858_v50  ;;  %v402_v27 = vrot.slane %v301_v6, %v3861_v56 }
 0x116   :  { %3304 = vst [vmem:[%s4139_s3 + $0x48] sm:$0xff] %v3240_v29  ;;  %3306 = vst [vmem:[%s4139_s3 + $0x58] sm:$0xff] %v3242_v32  ;;  %v410_v29 = vrot.slane %v301_v6, %v3864_v60 }
 0x118   :  { %3162 = vmatpush1.bf16.msra.mxu0 %v3489_v31  ;;  %3203 = vmatpush1.bf16.msra.mxu1 %v3491_v34 }
 0x119   :  { %3163 = vmatprep.subr.bf16.mxu0 %v3426_v35  ;;  %3204 = vmatprep.subr.bf16.mxu1 %v3428_v36 }
 0x11c   :  { %3164 = vmatpush1.bf16.msra.mxu0 %v3425_v37  ;;  %3205 = vmatpush1.bf16.msra.mxu1 %v3427_v38 }
 0x11f   :  { %v2199_v44 = vpop.f32.mrf.mxu0  ;;  %3651 = vmatmul.mubr.msk.bf16.vlgmr.msra.gmra.mxu0 %vm1915_vm0, %v3738_v42  ;;  %v2240_v49 = vpop.f32.mrf.mxu1  ;;  %3652 = vmatmul.mubr.msk.bf16.vlgmr.msra.gmra.mxu1 %vm1915_vm0, %v3738_v42 }
 0x120   :  { %v2200_v46 = vadd.f32 %v2199_v44, %v366_v39  ;;  %v2241_v51 = vadd.f32 %v2240_v49, %v374_v40 }
 0x121   :  { %v2201_v53 = vpop.f32.mrf.mxu0  ;;  %v2242_v62 = vpop.f32.mrf.mxu1 }
 0x122   :  { %v3243_v57 = vmax.f32 %v2200_v46, 0.0  ;;  %v2202_v59 = vadd.f32 %v2201_v53, %v370_v41  ;;  %v3245_v63 = vmax.f32 %v2241_v51, 0.0  ;;  %v2243_v1 = vadd.f32 %v2242_v62, %v378_v45  ;;  %v302_v46 = vld [vmem:[#allocation4 + $0x18] sm:$0xff] }
 0x123   :  { %v2203_v2 = vpop.f32.mrf.mxu0  ;;  %v2244_v4 = vpop.f32.mrf.mxu1  ;;  %v414_v49 = vrot.slane %v302_v46, %v3815_v52  ;;  %v422_v51 = vrot.slane %v302_v46, %v3820_v55  ;;  %v418_v53 = vrot.slane %v302_v46, %v3823_v58 }
 0x124   :  { %3307 = vst [vmem:[%s4139_s3 + $0x60] sm:$0xff] %v3243_v57  ;;  %v3244_v3 = vmax.f32 %v2202_v59, 0.0  ;;  %3309 = vst [vmem:[%s4139_s3 + $0x70] sm:$0xff] %v3245_v63  ;;  %v3246_v47 = vmax.f32 %v2243_v1, 0.0  ;;  %v426_v59 = vrot.slane %v302_v46, %v3826_v61 }
 0x125   :  { %v2204_v42 = vpop.f32.mrf.mxu0  ;;  %v2245_v5 = vpop.f32.mrf.mxu1 }
 0x126   :  { %3308 = vst [vmem:[%s4139_s3 + $0x68] sm:$0xff] %v3244_v3  ;;  %3310 = vst [vmem:[%s4139_s3 + $0x78] sm:$0xff] %v3246_v47 }
 0x12f   :  { %v2281_v9 = vpop.f32.mrf.mxu0  ;;  %v2322_v12 = vpop.f32.mrf.mxu1 }
 0x130   :  { %v2282_v11 = vadd.f32 %v2281_v9, %v382_v43  ;;  %v2323_v13 = vadd.f32 %v2322_v12, %v390_v7  ;;  %v438_v12 = vrot.slane %v302_v46, %v3858_v50 }
 0x131   :  { %v2283_v14 = vpop.f32.mrf.mxu0  ;;  %v2324_v17 = vpop.f32.mrf.mxu1 }
 0x132   :  { %v3247_v15 = vmax.f32 %v2282_v11, 0.0  ;;  %v2284_v16 = vadd.f32 %v2283_v14, %v386_v8  ;;  %v3249_v18 = vmax.f32 %v2323_v13, 0.0  ;;  %v2325_v19 = vadd.f32 %v2324_v17, %v394_v10 }
 0x133   :  { %v2285_v20 = vpop.f32.mrf.mxu0  ;;  %v2326_v22 = vpop.f32.mrf.mxu1  ;;  %v430_v11 = vrot.slane %v302_v46, %v3855_v48  ;;  %v434_v13 = vrot.slane %v302_v46, %v3861_v56 }
 0x134   :  { %3311 = vst [vmem:[%s4139_s3 + $0x80] sm:$0xff] %v3247_v15  ;;  %v3248_v21 = vmax.f32 %v2284_v16, 0.0  ;;  %3313 = vst [vmem:[%s4139_s3 + $0x90] sm:$0xff] %v3249_v18  ;;  %v3250_v54 = vmax.f32 %v2325_v19, 0.0  ;;  %v442_v15 = vrot.slane %v302_v46, %v3864_v60 }
 0x135   :  { %v2286_v23 = vpop.f32.mrf.mxu0  ;;  %v2327_v24 = vpop.f32.mrf.mxu1 }
 0x136   :  { %3312 = vst [vmem:[%s4139_s3 + $0x88] sm:$0xff] %v3248_v21  ;;  %3314 = vst [vmem:[%s4139_s3 + $0x98] sm:$0xff] %v3250_v54 }
 0x13f   :  { %v2363_v28 = vpop.f32.mrf.mxu0  ;;  %v2404_v31 = vpop.f32.mrf.mxu1 }
 0x140   :  { %v2364_v30 = vadd.f32 %v2363_v28, %v398_v25  ;;  %v2405_v32 = vadd.f32 %v2404_v31, %v406_v26 }
 0x141   :  { %v2365_v33 = vpop.f32.mrf.mxu0  ;;  %v2406_v0 = vpop.f32.mrf.mxu1 }
 0x142   :  { %v3251_v34 = vmax.f32 %v2364_v30, 0.0  ;;  %v2366_v35 = vadd.f32 %v2365_v33, %v402_v27  ;;  %v3253_v36 = vmax.f32 %v2405_v32, 0.0  ;;  %v2407_v37 = vadd.f32 %v2406_v0, %v410_v29  ;;  %v303_v30 = vld [vmem:[#allocation4 + $0x20] sm:$0xff] }
 0x143   :  { %v2367_v38 = vpop.f32.mrf.mxu0  ;;  %v2408_v40 = vpop.f32.mrf.mxu1  ;;  %v446_v31 = vrot.slane %v303_v30, %v3815_v52  ;;  %v454_v32 = vrot.slane %v303_v30, %v3820_v55  ;;  %v450_v33 = vrot.slane %v303_v30, %v3823_v58 }
 0x144   :  { %3315 = vst [vmem:[%s4139_s3 + $0xa0] sm:$0xff] %v3251_v34  ;;  %v3252_v39 = vmax.f32 %v2366_v35, 0.0  ;;  %3317 = vst [vmem:[%s4139_s3 + $0xb0] sm:$0xff] %v3253_v36  ;;  %v3254_v41 = vmax.f32 %v2407_v37, 0.0  ;;  %v458_v35 = vrot.slane %v303_v30, %v3826_v61 }
 0x145   :  { %v2368_v44 = vpop.f32.mrf.mxu0  ;;  %v2409_v45 = vpop.f32.mrf.mxu1 }
 0x146   :  { %3316 = vst [vmem:[%s4139_s3 + $0xa8] sm:$0xff] %v3252_v39  ;;  %3318 = vst [vmem:[%s4139_s3 + $0xb8] sm:$0xff] %v3254_v41 }
 0x14f   :  { %v2445_v57 = vpop.f32.mrf.mxu0  ;;  %v2486_v63 = vpop.f32.mrf.mxu1 }
 0x150   :  { %v2446_v62 = vadd.f32 %v2445_v57, %v414_v49  ;;  %v2487_v1 = vadd.f32 %v2486_v63, %v422_v51  ;;  %v470_v63 = vrot.slane %v303_v30, %v3858_v50 }
 0x151   :  { %v2447_v2 = vpop.f32.mrf.mxu0  ;;  %v2488_v47 = vpop.f32.mrf.mxu1 }
 0x152   :  { %v3255_v3 = vmax.f32 %v2446_v62, 0.0  ;;  %v2448_v4 = vadd.f32 %v2447_v2, %v418_v53  ;;  %v3257_v42 = vmax.f32 %v2487_v1, 0.0  ;;  %v2489_v5 = vadd.f32 %v2488_v47, %v426_v59 }
 0x153   :  { %v2449_v6 = vpop.f32.mrf.mxu0  ;;  %v2490_v7 = vpop.f32.mrf.mxu1  ;;  %v462_v62 = vrot.slane %v303_v30, %v3855_v48  ;;  %v466_v1 = vrot.slane %v303_v30, %v3861_v56 }
 0x154   :  { %3319 = vst [vmem:[%s4139_s3 + $0xc0] sm:$0xff] %v3255_v3  ;;  %v3256_v43 = vmax.f32 %v2448_v4, 0.0  ;;  %3321 = vst [vmem:[%s4139_s3 + $0xd0] sm:$0xff] %v3257_v42  ;;  %v3258_v8 = vmax.f32 %v2489_v5, 0.0  ;;  %v474_v3 = vrot.slane %v303_v30, %v3864_v60 }
 0x155   :  { %v2450_v9 = vpop.f32.mrf.mxu0  ;;  %v2491_v10 = vpop.f32.mrf.mxu1 }
 0x156   :  { %3320 = vst [vmem:[%s4139_s3 + $0xc8] sm:$0xff] %v3256_v43  ;;  %3322 = vst [vmem:[%s4139_s3 + $0xd8] sm:$0xff] %v3258_v8 }
 0x15f   :  { %v2527_v14 = vpop.f32.mrf.mxu0  ;;  %v2568_v17 = vpop.f32.mrf.mxu1 }
 0x160   :  { %v2528_v16 = vadd.f32 %v2527_v14, %v430_v11  ;;  %v2569_v18 = vadd.f32 %v2568_v17, %v438_v12 }
 0x161   :  { %v2529_v19 = vpop.f32.mrf.mxu0  ;;  %v2570_v22 = vpop.f32.mrf.mxu1 }
 0x162   :  { %v3259_v20 = vmax.f32 %v2528_v16, 0.0  ;;  %v2530_v21 = vadd.f32 %v2529_v19, %v434_v13  ;;  %v3261_v54 = vmax.f32 %v2569_v18, 0.0  ;;  %v2571_v23 = vadd.f32 %v2570_v22, %v442_v15  ;;  %v304_v16 = vld [vmem:[#allocation4 + $0x28] sm:$0xff] }
 0x163   :  { %v2531_v24 = vpop.f32.mrf.mxu0  ;;  %v2572_v26 = vpop.f32.mrf.mxu1  ;;  %v478_v17 = vrot.slane %v304_v16, %v3815_v52  ;;  %v486_v18 = vrot.slane %v304_v16, %v3820_v55  ;;  %v482_v19 = vrot.slane %v304_v16, %v3823_v58 }
 0x164   :  { %3323 = vst [vmem:[%s4139_s3 + $0xe0] sm:$0xff] %v3259_v20  ;;  %v3260_v25 = vmax.f32 %v2530_v21, 0.0  ;;  %3325 = vst [vmem:[%s4139_s3 + $0xf0] sm:$0xff] %v3261_v54  ;;  %v3262_v27 = vmax.f32 %v2571_v23, 0.0  ;;  %v490_v21 = vrot.slane %v304_v16, %v3826_v61 }
 0x165   :  { %v2532_v28 = vpop.f32.mrf.mxu0  ;;  %v2573_v29 = vpop.f32.mrf.mxu1 }
 0x166   :  { %3324 = vst [vmem:[%s4139_s3 + $0xe8] sm:$0xff] %v3260_v25  ;;  %3326 = vst [vmem:[%s4139_s3 + $0xf8] sm:$0xff] %v3262_v27 }
 0x16f   :  { %v2609_v34 = vpop.f32.mrf.mxu0  ;;  %v2650_v36 = vpop.f32.mrf.mxu1 }
 0x170   :  { %v2610_v0 = vadd.f32 %v2609_v34, %v446_v31  ;;  %v2651_v37 = vadd.f32 %v2650_v36, %v454_v32  ;;  %v502_v36 = vrot.slane %v304_v16, %v3858_v50 }
 0x171   :  { %v2611_v38 = vpop.f32.mrf.mxu0  ;;  %v2652_v41 = vpop.f32.mrf.mxu1 }
 0x172   :  { %v3263_v39 = vmax.f32 %v2610_v0, 0.0  ;;  %v2612_v40 = vadd.f32 %v2611_v38, %v450_v33  ;;  %v3265_v44 = vmax.f32 %v2651_v37, 0.0  ;;  %v2653_v45 = vadd.f32 %v2652_v41, %v458_v35 }
 0x173   :  { %v2613_v46 = vpop.f32.mrf.mxu0  ;;  %v2654_v51 = vpop.f32.mrf.mxu1  ;;  %v494_v0 = vrot.slane %v304_v16, %v3855_v48  ;;  %v498_v37 = vrot.slane %v304_v16, %v3861_v56 }
 0x174   :  { %3327 = vst [vmem:[%s4139_s3 + $0x100] sm:$0xff] %v3263_v39  ;;  %v3264_v49 = vmax.f32 %v2612_v40, 0.0  ;;  %3329 = vst [vmem:[%s4139_s3 + $0x110] sm:$0xff] %v3265_v44  ;;  %v3266_v53 = vmax.f32 %v2653_v45, 0.0  ;;  %v506_v39 = vrot.slane %v304_v16, %v3864_v60 }
 0x175   :  { %v2614_v57 = vpop.f32.mrf.mxu0  ;;  %v2655_v59 = vpop.f32.mrf.mxu1 }
 0x176   :  { %3328 = vst [vmem:[%s4139_s3 + $0x108] sm:$0xff] %v3264_v49  ;;  %3330 = vst [vmem:[%s4139_s3 + $0x118] sm:$0xff] %v3266_v53 }
 0x17f   :  { %v2691_v2 = vpop.f32.mrf.mxu0  ;;  %v2732_v47 = vpop.f32.mrf.mxu1 }
 0x180   :  { %v2692_v4 = vadd.f32 %v2691_v2, %v462_v62  ;;  %v2733_v42 = vadd.f32 %v2732_v47, %v470_v63 }
 0x181   :  { %v2693_v5 = vpop.f32.mrf.mxu0  ;;  %v2734_v7 = vpop.f32.mrf.mxu1 }
 0x182   :  { %v3267_v6 = vmax.f32 %v2692_v4, 0.0  ;;  %v2694_v43 = vadd.f32 %v2693_v5, %v466_v1  ;;  %v3269_v8 = vmax.f32 %v2733_v42, 0.0  ;;  %v2735_v9 = vadd.f32 %v2734_v7, %v474_v3  ;;  %v305_v4 = vld [vmem:[#allocation4 + $0x30] sm:$0xff] }
 0x183   :  { %v2695_v10 = vpop.f32.mrf.mxu0  ;;  %v2736_v12 = vpop.f32.mrf.mxu1  ;;  %v510_v47 = vrot.slane %v305_v4, %v3815_v52  ;;  %v518_v42 = vrot.slane %v305_v4, %v3820_v55  ;;  %v514_v5 = vrot.slane %v305_v4, %v3823_v58 }
 0x184   :  { %3331 = vst [vmem:[%s4139_s3 + $0x120] sm:$0xff] %v3267_v6  ;;  %v3268_v11 = vmax.f32 %v2694_v43, 0.0  ;;  %3333 = vst [vmem:[%s4139_s3 + $0x130] sm:$0xff] %v3269_v8  ;;  %v3270_v13 = vmax.f32 %v2735_v9, 0.0  ;;  %v522_v43 = vrot.slane %v305_v4, %v3826_v61 }
 0x185   :  { %v2696_v14 = vpop.f32.mrf.mxu0  ;;  %v2737_v15 = vpop.f32.mrf.mxu1 }
 0x186   :  { %3332 = vst [vmem:[%s4139_s3 + $0x128] sm:$0xff] %v3268_v11  ;;  %3334 = vst [vmem:[%s4139_s3 + $0x138] sm:$0xff] %v3270_v13 }
 0x18f   :  { %v2773_v20 = vpop.f32.mrf.mxu0  ;;  %v2814_v54 = vpop.f32.mrf.mxu1 }
 0x190   :  { %v2774_v22 = vadd.f32 %v2773_v20, %v478_v17  ;;  %v2815_v23 = vadd.f32 %v2814_v54, %v486_v18  ;;  %v534_v54 = vrot.slane %v305_v4, %v3858_v50 }
 0x191   :  { %v2775_v24 = vpop.f32.mrf.mxu0  ;;  %v2816_v27 = vpop.f32.mrf.mxu1 }
 0x192   :  { %v3271_v25 = vmax.f32 %v2774_v22, 0.0  ;;  %v2776_v26 = vadd.f32 %v2775_v24, %v482_v19  ;;  %v3273_v28 = vmax.f32 %v2815_v23, 0.0  ;;  %v2817_v29 = vadd.f32 %v2816_v27, %v490_v21 }
 0x193   :  { %v2777_v30 = vpop.f32.mrf.mxu0  ;;  %v2818_v32 = vpop.f32.mrf.mxu1  ;;  %v526_v22 = vrot.slane %v305_v4, %v3855_v48  ;;  %v530_v23 = vrot.slane %v305_v4, %v3861_v56 }
 0x194   :  { %3335 = vst [vmem:[%s4139_s3 + $0x140] sm:$0xff] %v3271_v25  ;;  %v3272_v31 = vmax.f32 %v2776_v26, 0.0  ;;  %3337 = vst [vmem:[%s4139_s3 + $0x150] sm:$0xff] %v3273_v28  ;;  %v3274_v33 = vmax.f32 %v2817_v29, 0.0  ;;  %v538_v25 = vrot.slane %v305_v4, %v3864_v60 }
 0x195   :  { %v2778_v34 = vpop.f32.mrf.mxu0  ;;  %v2819_v35 = vpop.f32.mrf.mxu1 }
 0x196   :  { %3336 = vst [vmem:[%s4139_s3 + $0x148] sm:$0xff] %v3272_v31  ;;  %3338 = vst [vmem:[%s4139_s3 + $0x158] sm:$0xff] %v3274_v33 }
 0x19f   :  { %v2855_v38 = vpop.f32.mrf.mxu0  ;;  %v2896_v41 = vpop.f32.mrf.mxu1 }
 0x1a0   :  { %v2856_v40 = vadd.f32 %v2855_v38, %v494_v0  ;;  %v2897_v44 = vadd.f32 %v2896_v41, %v502_v36 }
 0x1a1   :  { %v2857_v45 = vpop.f32.mrf.mxu0  ;;  %v2898_v51 = vpop.f32.mrf.mxu1 }
 0x1a2   :  { %v3275_v46 = vmax.f32 %v2856_v40, 0.0  ;;  %v2858_v49 = vadd.f32 %v2857_v45, %v498_v37  ;;  %v3277_v53 = vmax.f32 %v2897_v44, 0.0  ;;  %v2899_v57 = vadd.f32 %v2898_v51, %v506_v39  ;;  %v306_v40 = vld [vmem:[#allocation4 + $0x38] sm:$0xff] }
 0x1a3   :  { %v2859_v59 = vpop.f32.mrf.mxu0  ;;  %v2900_v63 = vpop.f32.mrf.mxu1  ;;  %v542_v41 = vrot.slane %v306_v40, %v3815_v52  ;;  %v550_v44 = vrot.slane %v306_v40, %v3820_v55  ;;  %v546_v45 = vrot.slane %v306_v40, %v3823_v58 }
 0x1a4   :  { %3339 = vst [vmem:[%s4139_s3 + $0x160] sm:$0xff] %v3275_v46  ;;  %v3276_v62 = vmax.f32 %v2858_v49, 0.0  ;;  %3341 = vst [vmem:[%s4139_s3 + $0x170] sm:$0xff] %v3277_v53  ;;  %v3278_v1 = vmax.f32 %v2899_v57, 0.0  ;;  %v554_v49 = vrot.slane %v306_v40, %v3826_v61 }
 0x1a5   :  { %v2860_v2 = vpop.f32.mrf.mxu0  ;;  %v2901_v3 = vpop.f32.mrf.mxu1 }
 0x1a6   :  { %3340 = vst [vmem:[%s4139_s3 + $0x168] sm:$0xff] %v3276_v62  ;;  %3342 = vst [vmem:[%s4139_s3 + $0x178] sm:$0xff] %v3278_v1 }
 0x1af   :  { %v2937_v6 = vpop.f32.mrf.mxu0  ;;  %v2978_v8 = vpop.f32.mrf.mxu1 }
 0x1b0   :  { %v2938_v7 = vadd.f32 %v2937_v6, %v510_v47  ;;  %v2979_v9 = vadd.f32 %v2978_v8, %v518_v42  ;;  %v558_v42 = vrot.slane %v306_v40, %v3855_v48  ;;  %v562_v6 = vrot.slane %v306_v40, %v3861_v56 }
 0x1b1   :  { %v2939_v10 = vpop.f32.mrf.mxu0  ;;  %v2980_v13 = vpop.f32.mrf.mxu1 }
 0x1b2   :  { %v3279_v11 = vmax.f32 %v2938_v7, 0.0  ;;  %v2940_v12 = vadd.f32 %v2939_v10, %v514_v5  ;;  %v3281_v14 = vmax.f32 %v2979_v9, 0.0  ;;  %v2981_v15 = vadd.f32 %v2980_v13, %v522_v43 }
 0x1b3   :  { %v2941_v16 = vpop.f32.mrf.mxu0  ;;  %v2982_v18 = vpop.f32.mrf.mxu1  ;;  %v566_v5 = vrot.slane %v306_v40, %v3858_v50  ;;  %v570_v7 = vrot.slane %v306_v40, %v3864_v60 }
 0x1b4   :  { %3343 = vst [vmem:[%s4139_s3 + $0x180] sm:$0xff] %v3279_v11  ;;  %v3280_v17 = vmax.f32 %v2940_v12, 0.0  ;;  %3345 = vst [vmem:[%s4139_s3 + $0x190] sm:$0xff] %v3281_v14  ;;  %v3282_v19 = vmax.f32 %v2981_v15, 0.0 }
 0x1b5   :  { %v2942_v20 = vpop.f32.mrf.mxu0  ;;  %v2983_v21 = vpop.f32.mrf.mxu1 }
 0x1b6   :  { %3344 = vst [vmem:[%s4139_s3 + $0x188] sm:$0xff] %v3280_v17  ;;  %3346 = vst [vmem:[%s4139_s3 + $0x198] sm:$0xff] %v3282_v19 }
 0x1bf   :  { %v3019_v24 = vpop.f32.mrf.mxu0  ;;  %v3060_v27 = vpop.f32.mrf.mxu1 }
 0x1c0   :  { %v3020_v26 = vadd.f32 %v3019_v24, %v526_v22  ;;  %v3061_v28 = vadd.f32 %v3060_v27, %v534_v54 }
 0x1c1   :  { %v3021_v29 = vpop.f32.mrf.mxu0  ;;  %v3062_v32 = vpop.f32.mrf.mxu1 }
 0x1c2   :  { %v3283_v30 = vmax.f32 %v3020_v26, 0.0  ;;  %v3022_v31 = vadd.f32 %v3021_v29, %v530_v23  ;;  %v3285_v33 = vmax.f32 %v3061_v28, 0.0  ;;  %v3063_v34 = vadd.f32 %v3062_v32, %v538_v25 }
 0x1c3   :  { %v3023_v35 = vpop.f32.mrf.mxu0  ;;  %v3064_v36 = vpop.f32.mrf.mxu1 }
 0x1c4   :  { %3347 = vst [vmem:[%s4139_s3 + $0x1a0] sm:$0xff] %v3283_v30  ;;  %v3284_v0 = vmax.f32 %v3022_v31, 0.0  ;;  %3349 = vst [vmem:[%s4139_s3 + $0x1b0] sm:$0xff] %v3285_v33  ;;  %v3286_v37 = vmax.f32 %v3063_v34, 0.0 }
 0x1c5   :  { %v3024_v38 = vpop.f32.mrf.mxu0  ;;  %v3065_v39 = vpop.f32.mrf.mxu1 }
 0x1c6   :  { %3348 = vst [vmem:[%s4139_s3 + $0x1a8] sm:$0xff] %v3284_v0  ;;  %3350 = vst [vmem:[%s4139_s3 + $0x1b8] sm:$0xff] %v3286_v37 }
 0x1cf   :  { %v3101_v46 = vpop.f32.mrf.mxu0  ;;  %v3142_v53 = vpop.f32.mrf.mxu1 }
 0x1d0   :  { %v3102_v51 = vadd.f32 %v3101_v46, %v542_v41  ;;  %v3143_v57 = vadd.f32 %v3142_v53, %v550_v44 }
 0x1d1   :  { %v3103_v59 = vpop.f32.mrf.mxu0  ;;  %v3144_v1 = vpop.f32.mrf.mxu1 }
 0x1d2   :  { %v3287_v62 = vmax.f32 %v3102_v51, 0.0  ;;  %v3104_v63 = vadd.f32 %v3103_v59, %v546_v45  ;;  %v3289_v2 = vmax.f32 %v3143_v57, 0.0  ;;  %v3145_v3 = vadd.f32 %v3144_v1, %v554_v49 }
 0x1d3   :  { %v3105_v4 = vpop.f32.mrf.mxu0  ;;  %v3146_v55 = vpop.f32.mrf.mxu1 }
 0x1d4   :  { %3351 = vst [vmem:[%s4139_s3 + $0x1c0] sm:$0xff] %v3287_v62  ;;  %v3288_v52 = vmax.f32 %v3104_v63, 0.0  ;;  %3353 = vst [vmem:[%s4139_s3 + $0x1d0] sm:$0xff] %v3289_v2  ;;  %v3290_v58 = vmax.f32 %v3145_v3, 0.0 }
 0x1d5   :  { %v3106_v61 = vpop.f32.mrf.mxu0  ;;  %v3147_v47 = vpop.f32.mrf.mxu1 }
 0x1d6   :  { %3352 = vst [vmem:[%s4139_s3 + $0x1c8] sm:$0xff] %v3288_v52  ;;  %3354 = vst [vmem:[%s4139_s3 + $0x1d8] sm:$0xff] %v3290_v58 }
 0x1df   :  { %v3183_v43 = vpop.f32.mrf.mxu0  ;;  %v3224_v9 = vpop.f32.mrf.mxu1 }
 0x1e0   :  { %v3184_v8 = vadd.f32 %v3183_v43, %v558_v42  ;;  %v3225_v10 = vadd.f32 %v3224_v9, %v566_v5 }
 0x1e1   :  { %v3185_v11 = vpop.f32.mrf.mxu0  ;;  %v3226_v14 = vpop.f32.mrf.mxu1 }
 0x1e2   :  { %v3291_v12 = vmax.f32 %v3184_v8, 0.0  ;;  %v3186_v13 = vadd.f32 %v3185_v11, %v562_v6  ;;  %v3293_v15 = vmax.f32 %v3225_v10, 0.0  ;;  %v3227_v16 = vadd.f32 %v3226_v14, %v570_v7 }
 0x1e3   :  { %v3187_v17 = vpop.f32.mrf.mxu0  ;;  %v3228_v50 = vpop.f32.mrf.mxu1 }
 0x1e4   :  { %3355 = vst [vmem:[%s4139_s3 + $0x1e0] sm:$0xff] %v3291_v12  ;;  %v3292_v48 = vmax.f32 %v3186_v13, 0.0  ;;  %3357 = vst [vmem:[%s4139_s3 + $0x1f0] sm:$0xff] %v3293_v15  ;;  %v3294_v56 = vmax.f32 %v3227_v16, 0.0 }
 0x1e5   :  { %v3188_v60 = vpop.f32.mrf.mxu0  ;;  %v3229_v18 = vpop.f32.mrf.mxu1 }
 0x1e6   :  { %3356 = vst [vmem:[%s4139_s3 + $0x1e8] sm:$0xff] %v3292_v48  ;;  %3358 = vst [vmem:[%s4139_s3 + $0x1f8] sm:$0xff] %v3294_v56 }
 0x1e7   :  { %3363 = vsyncpa [#allocation3], 1 }
 0x1e8   :  { %3364 = vsyncpa [#allocation5], 1 }

// kernel: fcnet1d_forward.4
= control target key start
LH: loop header
LB: loop body
LE: loop exit
PB: predicated region body
PF: predicated region fallthrough
CT: control target
= control target key end

     0   :  { %s17992_s0 = inlined_call_operand.vmem [shape: f32[8,8192], index: 0, kind: input, shape index: {}]   ;;  %s17993_s1 = inlined_call_operand.hbm [shape: bf16[2,8192,1536], index: 1, kind: input, shape index: {}]   ;;  %s17994_s2 = inlined_call_operand.hbm [shape: f32[1,3072], index: 2, kind: input, shape index: {}]   ;;  %s17995_s3 = inlined_call_operand.vmem [shape: f32[8,3072], index: 3, kind: output, shape index: {}]  }
   0x1   :  { %17999 = sst [smem:[#allocation12_spill]] %s17992_s0 }
   0x2   :  { %18000 = sst [smem:[#allocation13_spill]] %s17995_s3 }
   0x3   :  { %8 = vsyncpa [#allocation4], 0 }
   0x4   :  { %10 = vsyncpa [#allocation4 + $0x1], 0 }
   0x5   :  { %11 = vsyncpa [#allocation6], 0 }
   0x6   :  { %13 = vsyncpa [#allocation6 + $0x1], 0  ;;  %s15971_s12 = smov 0   ;;  %s15973_s13 = smov 0  }
   0x7   :  { %s15975_s14 = smov 0   ;;  %s15977_s15 = smov 0  }
   0x8   :  { %s15979_s16 = smov 0   ;;  %s15981_s17 = smov 0  }
   0x9   :  { %s15983_s18 = smov 0   ;;  %s15985_s19 = smov 0  }
   0xa   :  { %s15987_s20 = smov 0   ;;  %s15989_s21 = smov 0  }
   0xb   :  { %s15991_s22 = smov 0  }
   0xc LB: > { %18001 = sst [smem:[#allocation9_spill]] %s15936_s20  ;;  %s31_s23 = sadd.s32 1, %s15936_s20  ;;  %s15944_s22 = sphi %s15991_s22, %s19_s22   ;;  %s15940_s21 = sphi %s15989_s21, %s18021_s21   ;;  %s15936_s20 = sphi %s15987_s20, %s18012_s20   ;;  %s15932_s19 = sphi %s15985_s19, %s18020_s19   ;;  %s15928_s18 = sphi %s15983_s18, %s18011_s18   ;;  %s15924_s17 = sphi %s15981_s17, %s18019_s17   ;;  %s15920_s16 = sphi %s15979_s16, %s18018_s16   ;;  %s15916_s15 = sphi %s15977_s15, %s18017_s15   ;;  %s15912_s14 = sphi %s15975_s14, %s18016_s14   ;;  %s15908_s13 = sphi %s15973_s13, %s18015_s13   ;;  %s15904_s12 = sphi %s15971_s12, %s18014_s12  }
   0xd   : > { %s34_s24 = sadd.s32 1, %s15940_s21  ;;  %p32_p0 = scmp.ge.s32.totalorder %s31_s23, 4 }
   0xe   : > { %s75_s25 = sadd.s32 1, %s15924_s17  ;;  %p82_p1 = scmp.ne.s32.totalorder %s15924_s17, %s15920_s16 }
   0xf   : > { %p83_p2 = scmp.eq.s32.totalorder %s15944_s22, 0  ;;  %s18023_s23 = smov (%p32_p0, %s31_s23), 0 }
  0x10   : > { %18002 = sst [smem:[#allocation10_spill]] %s18023_s23  ;;  %s18025_s24 = smov (!%p32_p0, %s34_s24), %s15940_s21 }
  0x11   : > { %s71_s26 = ssub.s32 %s15936_s20, %s18023_s23  ;;  %p84_p3 = por %p83_p2, %p82_p1 }
  0x12   : > { %p36_p4 = scmp.ge.s32.totalorder %s18025_s24, 2  ;;  %p88_p5 = scmp.ne.s32.totalorder %s15920_s16, %s15916_s15 }
  0x13   : > { %p13398_p6 = scmp.lt.s32.totalorder %s15944_s22, 8  ;;  %s179_s27 = sand.u32 1, %s15924_s17  }
  0x14   : > { %s18027_s24 = smov (%p36_p4, %s18025_s24), 0  ;;  %s13382_s28 = smul.u32 3072, %s15936_s20 }
  0x15   : > { %18003 = sst [smem:[#allocation11_spill]] %s18027_s24  ;;  %s16048_s29 = ssub.s32 %s15940_s21, %s18027_s24 }
  0x16   : > { %s72_s30 = sor.u32 %s71_s26, %s16048_s29  ;;  %s13381_s4 = smul.u32 12288, %s179_s27 }
  0x17   : > { %p73_p7 = scmp.eq.s32.totalorder %s72_s30, 0  ;;  %s13383_s5 = smul.u32 12288, %s15940_s21 }
  0x18   : > { %p16054_p8 = pnand %p13398_p6, %p84_p3  ;;  %s183_s9 = scalar_lea.vmem [#allocation3], %s13381_s4 }
  0x19   : > { %s16059_s7 = scalar_select %p73_p7, %s15924_s17, %s75_s25  }
  0x1a   : > { %s190_s8 = sadd.s32 %s13383_s5, %s13382_s28  ;;  %s193_s10 = sshll.u32 %s183_s9, 4  ;;  %s194_s10 = int_to_ptr.vmem [resolvable:$true] %s193_s10 }
  0x1b   : > { %s11834_s11 = sshll.u32 %s190_s8, 6  ;;  %s180_s20 = scalar_lea.sflag [#allocation4], %s179_s27 }
  0x1c   : > { %s192_s26 = scalar_lea.hbm %s17993_s1, %s11834_s11  ;;  %p15796_p9 = pneg %p16054_p8 }
  0x1d   : > { %s15807_s30 = scalar_lea.vmem %s194_s10, 196608  ;;  %s15946_s3 = smov [#allocation3]  }
  0x1e   : > { %p15808_p10 = scmp.ne.s32.totalorder %s194_s10, %s15807_s30  ;;  %s15812_s0 = sshll.u32 %s15946_s3, 4  ;;  %s15813_s0 = int_to_ptr.vmem [resolvable:$false] %s15812_s0 }
  0x1f   : > { %s15814_s25 = scalar_lea.vmem %s15813_s0, 393216  ;;  %p15815_p13 = scmp.lt.s32.totalorder %s194_s10, %s15813_s0 }
  0x20   : > { %p15810_p11 = pnand %p15808_p10, %p15796_p9  ;;  %p15816_p0 = scmp.lt.s32.totalorder %s15814_s25, %s15807_s30 }
  0x22   : > { %p15811_p12 = pneg %p15810_p11  ;;  %p15817_p1 = por %p15816_p0, %p15815_p13 }
  0x24   : > { %p15818_p3 = pnand %p15817_p1, %p15811_p12 }
  0x26   : > { %15821 = shalt.err (!%p15818_p3)
}
  0x27   : > { %s15947_s28 = smov 768   ;;  %s15948_s0 = smov 48  }
  0x28   : > { %13394 = dma.hbm_to_vmem [thread:$0]  (!%p16054_p8), %s192_s26, 196608, %s194_s10, %s180_s20, %s15947_s28, %s15947_s28, %s15948_s0  }
  0x29   : > { %p11836_p4 = scmp.ge.s32.totalorder %s15944_s22, 1  ;;  %p220_p7 = scmp.lt.s32.totalorder %s15944_s22, 9 }
  0x2a   : > { %s11828_s23 = sadd.s32 4294967295, %s15944_s22   ;;  %p99_p11 = scmp.eq.s32.totalorder %s16048_s29, 0 }
  0x2b   : > { %p16070_p9 = pnand %p11836_p4, %p220_p7  ;;  %p89_p10 = scmp.eq.s32.totalorder %s11828_s23, 0 }
  0x2c   : > { %s101_s24 = sadd.s32 1, %s15912_s14  ;;  %p108_p12 = scmp.ne.s32.totalorder %s15912_s14, %s15908_s13 }
  0x2d   : > { %p16082_p13 = por %p89_p10, %p88_p5  ;;  %p114_p0 = scmp.ne.s32.totalorder %s15908_s13, %s15904_s12 }
  0x2e   : > { %s16089_s4 = scalar_select %p99_p11, %s15912_s14, %s101_s24  }
  0x2f   : > { %p110_p8 = por %p108_p12, %p83_p2  ;;  %p16093_p1 = por %p114_p0, %p89_p10 }
  0x30   : > { %s203_s5 = sand.u32 1, %s15912_s14   ;;  %s13380_s6 = smul.u32 192, %s15940_s21 }
  0x31   : > { %s13384_s8 = smul.u32 12, %s203_s5  ;;  %p16101_p3 = pnand %p13398_p6, %p110_p8 }
  0x32   : > { %s213_s12 = scalar_lea.hbm %s17994_s2, %s13380_s6  ;;  %s204_s26 = scalar_lea.sflag [#allocation6], %s203_s5 }
  0x33   : > { %s207_s10 = scalar_lea.vmem [#allocation5], %s13384_s8  ;;  %p15824_p2 = pneg %p16101_p3 }
  0x34   : > { %s215_s11 = sshll.u32 %s207_s10, 4  ;;  %s15949_s25 = smov [#allocation5]   ;;  %s216_s11 = int_to_ptr.vmem [resolvable:$true] %s215_s11 }
  0x35   : > { %s15835_s30 = scalar_lea.vmem %s216_s11, 192  ;;  %s15840_s28 = sshll.u32 %s15949_s25, 4  ;;  %s15841_s28 = int_to_ptr.vmem [resolvable:$false] %s15840_s28 }
  0x36   : > { %p15836_p5 = scmp.ne.s32.totalorder %s216_s11, %s15835_s30  ;;  %s15842_s0 = scalar_lea.vmem %s15841_s28, 384 }
  0x37   : > { %p15843_p6 = scmp.lt.s32.totalorder %s216_s11, %s15841_s28  ;;  %p15844_p10 = scmp.lt.s32.totalorder %s15842_s0, %s15835_s30 }
  0x38   : > { %p15838_p4 = pnand %p15836_p5, %p15824_p2 }
  0x39   : > { %p15845_p11 = por %p15844_p10, %p15843_p6 }
  0x3a   : > { %p15839_p7 = pneg %p15838_p4 }
  0x3c   : > { %p15846_p12 = pnand %p15845_p11, %p15839_p7 }
  0x3e   : > { %15849 = shalt.err (!%p15846_p12)
}
  0x3f   : > { %13397 = dma.hbm_to_vmem [thread:$0]  (!%p16101_p3), %s213_s12, 192, %s216_s11, %s204_s26  }
  0x40   : > { %224 = sbr.rel (%p16070_p9) target bundleno = 1851 (0x73b), region = 32  ;;  %s226_s23 = sand.u32 (!%p16070_p9), 1, %s15920_s16  }
  0x41   : > { %s13385_s24 = smul.u32 (!%p16070_p9), 12288, %s226_s23  ;;  %s227_s5 = scalar_lea.sflag (!%p16070_p9), [#allocation4], %s226_s23 }
  0x43   : > { %s16115_s6 = scalar_lea.vmem (!%p16070_p9), [#allocation3], %s13385_s24 }
  0x45   : > { %15895 = dma.done.wait (%p16082_p13), %s227_s5, 196608  }
  0x46   : > { %15897 = vsyncadd (%p16082_p13), %s227_s5, 4294770688  ;;  %s235_s8 = sand.u32 1, %s15908_s13  }
  0x47   : > { %s16122_s29 = smul.u32 12, %s235_s8  ;;  %s236_s3 = scalar_lea.sflag [#allocation6], %s235_s8 }
  0x49   : > { %s239_s15 = scalar_lea.vmem [#allocation5], %s16122_s29 }
  0x4a   : > { %15899 = dma.done.wait (%p16093_p1), %s236_s3, 192  }
  0x4b   : > { %15901 = vsyncadd (%p16093_p1), %s236_s3, 4294967104  ;;  %s11837_s9 = sshll.u32 %s15928_s18, 4  ;;  %s292_s12 = smul.u32 12, %s15932_s19 }
  0x4c   : > { %p283_p9 = scmp.lt.s32.totalorder %s11837_s9, 63  ;;  %s18009_s26 = sld [smem:[#allocation12_spill]] }
  0x4d   : > { %p295_p0 = scmp.lt.s32.totalorder %s292_s12, 23  ;;  %s18010_s23 = sld [smem:[#allocation13_spill]] }
  0x4e   : > { %s18029_s9 = smov (!%p283_p9, %s11837_s9), 63  ;;  %p11840_p13 = scmp.ne.s32.totalorder %s15928_s18, 0 }
  0x4f   : > { %s18031_s12 = smov (!%p295_p0, %s292_s12), 23  ;;  %s11838_s27 = sshll.u32 %s18029_s9, 3 }
  0x50   : > { %s11839_s25 = sshll.u32 %s18031_s12, 3  ;;  %305 = sbr.rel (%p11840_p13) target bundleno = 92 (0x5c), region = 44 }
  0x52   : > { %s16134_s30 = scalar_lea.vmem %s18009_s26, %s11838_s27 }
  0x53   : > { %s16139_s20 = scalar_lea.vmem %s18010_s23, %s11839_s25 }
  0x55   : > { %v15950_v0 = vmov 0.0  }
  0x56   : > { %306 = vst [vmem:[#allocation2 + $0x30] sm:$0xff] %v15950_v0  ;;  %307 = vst [vmem:[#allocation2] sm:$0xff] %v15950_v0 }
  0x57   : > { %308 = vst [vmem:[#allocation2 + $0x58] sm:$0xff] %v15950_v0  ;;  %309 = vst [vmem:[#allocation2 + $0x18] sm:$0xff] %v15950_v0 }
  0x58   : > { %310 = vst [vmem:[#allocation2 + $0x50] sm:$0xff] %v15950_v0  ;;  %311 = vst [vmem:[#allocation2 + $0x20] sm:$0xff] %v15950_v0 }
  0x59   : > { %312 = vst [vmem:[#allocation2 + $0x8] sm:$0xff] %v15950_v0  ;;  %313 = vst [vmem:[#allocation2 + $0x38] sm:$0xff] %v15950_v0 }
  0x5a   : > { %314 = vst [vmem:[#allocation2 + $0x28] sm:$0xff] %v15950_v0  ;;  %315 = vst [vmem:[#allocation2 + $0x48] sm:$0xff] %v15950_v0 }
  0x5b   : > { %316 = vst [vmem:[#allocation2 + $0x10] sm:$0xff] %v15950_v0  ;;  %317 = vst [vmem:[#allocation2 + $0x40] sm:$0xff] %v15950_v0 }
  0x5c PF: > { %v13490_v1 = vld [vmem:[%s16115_s6 + $0x2a4] ss:$48 sps:$4 sm:$0xff]   ;;  %v13494_v3 = vld [vmem:[%s16115_s6 + $0x2a0] ss:$48 sps:$4 sm:$0xff]   ;;  %v331_v47 = vld [vmem:[%s16134_s30 + $0x8] sm:$0xff]  ;;  %p13377_p8 = scmp.ne.s32.totalorder %s15928_s18, 3 }
  0x5d   : > { %v13492_v2 = vld [vmem:[%s16115_s6 + $0x8a4] ss:$48 sps:$4 sm:$0xff]   ;;  %9578 = vmatprep.subr.bf16.mxu0 %v13490_v1  ;;  %v13495_v4 = vld [vmem:[%s16115_s6 + $0x8a0] ss:$48 sps:$4 sm:$0xff]   ;;  %v16191_v50 = vpack.c.bf16 %v331_v47, %v331_v47  ;;  %v333_v51 = vld [vmem:[%s16134_s30 + $0x18] sm:$0xff] }
  0x5e   : > { %9619 = vmatprep.subr.bf16.mxu1 %v13492_v2  ;;  %v13496_v5 = vld [vmem:[%s16115_s6 + $0x244] ss:$48 sps:$4 sm:$0xff]   ;;  %9579 = vmatpush1.bf16.msra.mxu0 %v13494_v3  ;;  %v13500_v7 = vld [vmem:[%s16115_s6 + $0x240] ss:$48 sps:$4 sm:$0xff]   ;;  %v16195_v53 = vpack.c.bf16 %v333_v51, %v333_v51 }
  0x5f   : > { %9620 = vmatpush1.bf16.msra.mxu1 %v13495_v4  ;;  %v13498_v6 = vld [vmem:[%s16115_s6 + $0x844] ss:$48 sps:$4 sm:$0xff]   ;;  %9580 = vmatprep.subr.bf16.mxu0 %v13496_v5  ;;  %v13501_v8 = vld [vmem:[%s16115_s6 + $0x840] ss:$48 sps:$4 sm:$0xff]  }
  0x60   : > { %9621 = vmatprep.subr.bf16.mxu1 %v13498_v6  ;;  %v13502_v9 = vld [vmem:[%s16115_s6 + $0x1e4] ss:$48 sps:$4 sm:$0xff]   ;;  %v13506_v11 = vld [vmem:[%s16115_s6 + $0x1e0] ss:$48 sps:$4 sm:$0xff]   ;;  %9610 = vmatprep.mubr.bf16.mxu0 %v16191_v50 }
  0x61   : > { %v13504_v10 = vld [vmem:[%s16115_s6 + $0x7e4] ss:$48 sps:$4 sm:$0xff]   ;;  %v13507_v12 = vld [vmem:[%s16115_s6 + $0x7e0] ss:$48 sps:$4 sm:$0xff]   ;;  %9651 = vmatprep.mubr.bf16.mxu1 %v16195_v53 }
  0x62   : > { %9581 = vmatpush1.bf16.msra.mxu0 %v13500_v7  ;;  %v13508_v13 = vld [vmem:[%s16115_s6 + $0x184] ss:$48 sps:$4 sm:$0xff]   ;;  %v13512_v15 = vld [vmem:[%s16115_s6 + $0x180] ss:$48 sps:$4 sm:$0xff]  }
  0x63   : > { %9622 = vmatpush1.bf16.msra.mxu1 %v13501_v8  ;;  %9582 = vmatprep.subr.bf16.mxu0 %v13502_v9  ;;  %v13510_v14 = vld [vmem:[%s16115_s6 + $0x784] ss:$48 sps:$4 sm:$0xff]   ;;  %v13513_v16 = vld [vmem:[%s16115_s6 + $0x780] ss:$48 sps:$4 sm:$0xff]  }
  0x64   : > { %9623 = vmatprep.subr.bf16.mxu1 %v13504_v10  ;;  %v13514_v17 = vld [vmem:[%s16115_s6 + $0x124] ss:$48 sps:$4 sm:$0xff]   ;;  %v13518_v19 = vld [vmem:[%s16115_s6 + $0x120] ss:$48 sps:$4 sm:$0xff]  }
  0x65   : > { %v13516_v18 = vld [vmem:[%s16115_s6 + $0x724] ss:$48 sps:$4 sm:$0xff]   ;;  %v13519_v20 = vld [vmem:[%s16115_s6 + $0x720] ss:$48 sps:$4 sm:$0xff]  }
  0x66   : > { %9583 = vmatpush1.bf16.msra.mxu0 %v13506_v11  ;;  %v13520_v21 = vld [vmem:[%s16115_s6 + $0xc4] ss:$48 sps:$4 sm:$0xff]   ;;  %v13524_v23 = vld [vmem:[%s16115_s6 + $0xc0] ss:$48 sps:$4 sm:$0xff]  }
  0x67   : > { %9624 = vmatpush1.bf16.msra.mxu1 %v13507_v12  ;;  %9584 = vmatprep.subr.bf16.mxu0 %v13508_v13  ;;  %v13522_v22 = vld [vmem:[%s16115_s6 + $0x6c4] ss:$48 sps:$4 sm:$0xff]   ;;  %v13525_v24 = vld [vmem:[%s16115_s6 + $0x6c0] ss:$48 sps:$4 sm:$0xff]  }
  0x68   : > { %9625 = vmatprep.subr.bf16.mxu1 %v13510_v14  ;;  %v13526_v25 = vld [vmem:[%s16115_s6 + $0x64] ss:$48 sps:$4 sm:$0xff]   ;;  %v13530_v27 = vld [vmem:[%s16115_s6 + $0x60] ss:$48 sps:$4 sm:$0xff]  }
  0x69   : > { %v13528_v26 = vld [vmem:[%s16115_s6 + $0x664] ss:$48 sps:$4 sm:$0xff]   ;;  %v13531_v28 = vld [vmem:[%s16115_s6 + $0x660] ss:$48 sps:$4 sm:$0xff]  }
  0x6a   : > { %9585 = vmatpush1.bf16.msra.mxu0 %v13512_v15  ;;  %v13532_v29 = vld [vmem:[%s16115_s6 + $0x4] ss:$48 sps:$4 sm:$0xff]   ;;  %v13536_v31 = vld [vmem:[%s16115_s6] ss:$48 sps:$4 sm:$0xff]  }
  0x6b   : > { %9626 = vmatpush1.bf16.msra.mxu1 %v13513_v16  ;;  %9586 = vmatprep.subr.bf16.mxu0 %v13514_v17  ;;  %v13534_v30 = vld [vmem:[%s16115_s6 + $0x604] ss:$48 sps:$4 sm:$0xff]   ;;  %v13537_v32 = vld [vmem:[%s16115_s6 + $0x600] ss:$48 sps:$4 sm:$0xff]  }
  0x6c   : > { %9627 = vmatprep.subr.bf16.mxu1 %v13516_v18  ;;  %v13538_v33 = vld [vmem:[%s16115_s6 + $0x5a4] ss:$48 sps:$4 sm:$0xff]   ;;  %v13542_v35 = vld [vmem:[%s16115_s6 + $0x5a0] ss:$48 sps:$4 sm:$0xff]  }
  0x6d   : > { %v13540_v34 = vld [vmem:[%s16115_s6 + $0xba4] ss:$48 sps:$4 sm:$0xff]   ;;  %v13543_v36 = vld [vmem:[%s16115_s6 + $0xba0] ss:$48 sps:$4 sm:$0xff]  }
  0x6e   : > { %9587 = vmatpush1.bf16.msra.mxu0 %v13518_v19  ;;  %v13544_v37 = vld [vmem:[%s16115_s6 + $0x544] ss:$48 sps:$4 sm:$0xff]   ;;  %v13548_v39 = vld [vmem:[%s16115_s6 + $0x540] ss:$48 sps:$4 sm:$0xff]  }
  0x6f   : > { %9628 = vmatpush1.bf16.msra.mxu1 %v13519_v20  ;;  %9588 = vmatprep.subr.bf16.mxu0 %v13520_v21  ;;  %v13546_v38 = vld [vmem:[%s16115_s6 + $0xb44] ss:$48 sps:$4 sm:$0xff]   ;;  %v13549_v40 = vld [vmem:[%s16115_s6 + $0xb40] ss:$48 sps:$4 sm:$0xff]  }
  0x70   : > { %9629 = vmatprep.subr.bf16.mxu1 %v13522_v22  ;;  %v13550_v41 = vld [vmem:[%s16115_s6 + $0x4e4] ss:$48 sps:$4 sm:$0xff]   ;;  %v13554_v43 = vld [vmem:[%s16115_s6 + $0x4e0] ss:$48 sps:$4 sm:$0xff]  }
  0x71   : > { %v13552_v42 = vld [vmem:[%s16115_s6 + $0xae4] ss:$48 sps:$4 sm:$0xff]   ;;  %v13555_v44 = vld [vmem:[%s16115_s6 + $0xae0] ss:$48 sps:$4 sm:$0xff]  }
  0x72   : > { %9589 = vmatpush1.bf16.msra.mxu0 %v13524_v23  ;;  %v13556_v45 = vld [vmem:[%s16115_s6 + $0x484] ss:$48 sps:$4 sm:$0xff]   ;;  %v13560_v48 = vld [vmem:[%s16115_s6 + $0x480] ss:$48 sps:$4 sm:$0xff]  }
  0x73   : > { %9630 = vmatpush1.bf16.msra.mxu1 %v13525_v24  ;;  %9590 = vmatprep.subr.bf16.mxu0 %v13526_v25  ;;  %v13558_v46 = vld [vmem:[%s16115_s6 + $0xa84] ss:$48 sps:$4 sm:$0xff]   ;;  %v13561_v49 = vld [vmem:[%s16115_s6 + $0xa80] ss:$48 sps:$4 sm:$0xff]  }
  0x74   : > { %9631 = vmatprep.subr.bf16.mxu1 %v13528_v26  ;;  %v13562_v52 = vld [vmem:[%s16115_s6 + $0x424] ss:$48 sps:$4 sm:$0xff]   ;;  %v13566_v55 = vld [vmem:[%s16115_s6 + $0x420] ss:$48 sps:$4 sm:$0xff]  }
  0x75   : > { %v13564_v54 = vld [vmem:[%s16115_s6 + $0xa24] ss:$48 sps:$4 sm:$0xff]   ;;  %v13567_v56 = vld [vmem:[%s16115_s6 + $0xa20] ss:$48 sps:$4 sm:$0xff]  }
  0x76   : > { %9591 = vmatpush1.bf16.msra.mxu0 %v13530_v27  ;;  %v13568_v57 = vld [vmem:[%s16115_s6 + $0x3c4] ss:$48 sps:$4 sm:$0xff]   ;;  %v13572_v59 = vld [vmem:[%s16115_s6 + $0x3c0] ss:$48 sps:$4 sm:$0xff]  }
  0x77   : > { %9632 = vmatpush1.bf16.msra.mxu1 %v13531_v28  ;;  %9592 = vmatprep.subr.bf16.mxu0 %v13532_v29  ;;  %v13570_v58 = vld [vmem:[%s16115_s6 + $0x9c4] ss:$48 sps:$4 sm:$0xff]   ;;  %v13573_v60 = vld [vmem:[%s16115_s6 + $0x9c0] ss:$48 sps:$4 sm:$0xff]  }
  0x78   : > { %9633 = vmatprep.subr.bf16.mxu1 %v13534_v30  ;;  %v13574_v61 = vld [vmem:[%s16115_s6 + $0x364] ss:$48 sps:$4 sm:$0xff]   ;;  %v13578_v63 = vld [vmem:[%s16115_s6 + $0x360] ss:$48 sps:$4 sm:$0xff]  }
  0x79   : > { %v13576_v62 = vld [vmem:[%s16115_s6 + $0x964] ss:$48 sps:$4 sm:$0xff]   ;;  %v13579_v0 = vld [vmem:[%s16115_s6 + $0x960] ss:$48 sps:$4 sm:$0xff]  }
  0x7a   : > { %9593 = vmatpush1.bf16.msra.mxu0 %v13536_v31  ;;  %v13580_v1 = vld [vmem:[%s16115_s6 + $0x304] ss:$48 sps:$4 sm:$0xff]   ;;  %v13584_v3 = vld [vmem:[%s16115_s6 + $0x300] ss:$48 sps:$4 sm:$0xff]  }
  0x7b   : > { %9634 = vmatpush1.bf16.msra.mxu1 %v13537_v32  ;;  %9594 = vmatprep.subr.bf16.mxu0 %v13538_v33  ;;  %v13582_v2 = vld [vmem:[%s16115_s6 + $0x904] ss:$48 sps:$4 sm:$0xff]   ;;  %v13585_v4 = vld [vmem:[%s16115_s6 + $0x900] ss:$48 sps:$4 sm:$0xff]  }
  0x7c   : > { %9635 = vmatprep.subr.bf16.mxu1 %v13540_v34  ;;  %v330_v5 = vld [vmem:[%s16134_s30] sm:$0xff]  ;;  %v332_v6 = vld [vmem:[%s16134_s30 + $0x10] sm:$0xff] }
  0x7d   : > { %v13588_v7 = vld [vmem:[%s16115_s6 + $0xea4] ss:$48 sps:$4 sm:$0xff]   ;;  %v16218_v9 = vpack.c.bf16 %v330_v5, %v330_v5  ;;  %v16220_v10 = vpack.c.bf16 %v332_v6, %v332_v6  ;;  %v13586_v11 = vld [vmem:[%s16115_s6 + $0xea0] ss:$48 sps:$4 sm:$0xff]  }
  0x7e   : > { %9595 = vmatpush2.bf16.msra.mxu0 %v13542_v35  ;;  %v13591_v8 = vld [vmem:[%s16115_s6 + $0x14a4] ss:$48 sps:$4 sm:$0xff]   ;;  %v13589_v12 = vld [vmem:[%s16115_s6 + $0x14a0] ss:$48 sps:$4 sm:$0xff]   ;;  %v335_v35 = vld [vmem:[%s16134_s30 + $0x28] sm:$0xff] }
  0x7f   : > { %9636 = vmatpush2.bf16.msra.mxu1 %v13543_v36  ;;  %9596 = vmatprep.subr.bf16.mxu0 %v13544_v37  ;;  %v13594_v13 = vld [vmem:[%s16115_s6 + $0xe44] ss:$48 sps:$4 sm:$0xff]   ;;  %v13592_v15 = vld [vmem:[%s16115_s6 + $0xe40] ss:$48 sps:$4 sm:$0xff]  }
  0x80   : > { %9637 = vmatprep.subr.bf16.mxu1 %v13546_v38  ;;  %v13597_v14 = vld [vmem:[%s16115_s6 + $0x1444] ss:$48 sps:$4 sm:$0xff]   ;;  %v13595_v16 = vld [vmem:[%s16115_s6 + $0x1440] ss:$48 sps:$4 sm:$0xff]   ;;  %v16251_v38 = vpack.c.bf16 %v335_v35, %v335_v35 }
  0x81   : > { %v13600_v17 = vld [vmem:[%s16115_s6 + $0xde4] ss:$48 sps:$4 sm:$0xff]   ;;  %v13598_v19 = vld [vmem:[%s16115_s6 + $0xde0] ss:$48 sps:$4 sm:$0xff]  }
  0x82   : > { %9597 = vmatpush2.bf16.msra.mxu0 %v13548_v39  ;;  %v13603_v18 = vld [vmem:[%s16115_s6 + $0x13e4] ss:$48 sps:$4 sm:$0xff]   ;;  %v13601_v20 = vld [vmem:[%s16115_s6 + $0x13e0] ss:$48 sps:$4 sm:$0xff]   ;;  %v337_v39 = vld [vmem:[%s16134_s30 + $0x38] sm:$0xff] }
  0x83   : > { %9638 = vmatpush2.bf16.msra.mxu1 %v13549_v40  ;;  %9598 = vmatprep.subr.bf16.mxu0 %v13550_v41  ;;  %v13606_v21 = vld [vmem:[%s16115_s6 + $0xd84] ss:$48 sps:$4 sm:$0xff]   ;;  %v13604_v23 = vld [vmem:[%s16115_s6 + $0xd80] ss:$48 sps:$4 sm:$0xff]   ;;  %v16255_v41 = vpack.c.bf16 %v337_v39, %v337_v39 }
  0x84   : > { %9639 = vmatprep.subr.bf16.mxu1 %v13552_v42  ;;  %v13609_v22 = vld [vmem:[%s16115_s6 + $0x1384] ss:$48 sps:$4 sm:$0xff]   ;;  %v13607_v24 = vld [vmem:[%s16115_s6 + $0x1380] ss:$48 sps:$4 sm:$0xff]  }
  0x85   : > { %v13612_v25 = vld [vmem:[%s16115_s6 + $0xd24] ss:$48 sps:$4 sm:$0xff]   ;;  %v13610_v27 = vld [vmem:[%s16115_s6 + $0xd20] ss:$48 sps:$4 sm:$0xff]  }
  0x86   : > { %9599 = vmatpush2.bf16.msra.mxu0 %v13554_v43  ;;  %v13615_v26 = vld [vmem:[%s16115_s6 + $0x1324] ss:$48 sps:$4 sm:$0xff]   ;;  %v13613_v28 = vld [vmem:[%s16115_s6 + $0x1320] ss:$48 sps:$4 sm:$0xff]  }
  0x87   : > { %9640 = vmatpush2.bf16.msra.mxu1 %v13555_v44  ;;  %9600 = vmatprep.subr.bf16.mxu0 %v13556_v45  ;;  %v13618_v29 = vld [vmem:[%s16115_s6 + $0xcc4] ss:$48 sps:$4 sm:$0xff]   ;;  %v13616_v31 = vld [vmem:[%s16115_s6 + $0xcc0] ss:$48 sps:$4 sm:$0xff]  }
  0x88   : > { %9641 = vmatprep.subr.bf16.mxu1 %v13558_v46  ;;  %v13621_v30 = vld [vmem:[%s16115_s6 + $0x12c4] ss:$48 sps:$4 sm:$0xff]   ;;  %v13619_v32 = vld [vmem:[%s16115_s6 + $0x12c0] ss:$48 sps:$4 sm:$0xff]  }
  0x89   : > { %v13624_v33 = vld [vmem:[%s16115_s6 + $0xc64] ss:$48 sps:$4 sm:$0xff]   ;;  %v13622_v36 = vld [vmem:[%s16115_s6 + $0xc60] ss:$48 sps:$4 sm:$0xff]  }
  0x8a   : > { %9601 = vmatpush2.bf16.msra.mxu0 %v13560_v48  ;;  %v13627_v34 = vld [vmem:[%s16115_s6 + $0x1264] ss:$48 sps:$4 sm:$0xff]   ;;  %v13625_v37 = vld [vmem:[%s16115_s6 + $0x1260] ss:$48 sps:$4 sm:$0xff]  }
  0x8b   : > { %9642 = vmatpush2.bf16.msra.mxu1 %v13561_v49  ;;  %9602 = vmatprep.subr.bf16.mxu0 %v13562_v52  ;;  %v13630_v40 = vld [vmem:[%s16115_s6 + $0xc04] ss:$48 sps:$4 sm:$0xff]   ;;  %v13628_v43 = vld [vmem:[%s16115_s6 + $0xc00] ss:$48 sps:$4 sm:$0xff]  }
  0x8c   : > { %9643 = vmatprep.subr.bf16.mxu1 %v13564_v54  ;;  %v13633_v42 = vld [vmem:[%s16115_s6 + $0x1204] ss:$48 sps:$4 sm:$0xff]   ;;  %v13631_v44 = vld [vmem:[%s16115_s6 + $0x1200] ss:$48 sps:$4 sm:$0xff]  }
  0x8d   : > { %v13636_v45 = vld [vmem:[%s16115_s6 + $0x11a4] ss:$48 sps:$4 sm:$0xff]   ;;  %v13634_v47 = vld [vmem:[%s16115_s6 + $0x11a0] ss:$48 sps:$4 sm:$0xff]  }
  0x8e   : > { %9603 = vmatpush2.bf16.msra.mxu0 %v13566_v55  ;;  %v13639_v46 = vld [vmem:[%s16115_s6 + $0x17a4] ss:$48 sps:$4 sm:$0xff]   ;;  %v13637_v48 = vld [vmem:[%s16115_s6 + $0x17a0] ss:$48 sps:$4 sm:$0xff]  }
  0x8f   : > { %9644 = vmatpush2.bf16.msra.mxu1 %v13567_v56  ;;  %9604 = vmatprep.subr.bf16.mxu0 %v13568_v57  ;;  %v13642_v49 = vld [vmem:[%s16115_s6 + $0x1144] ss:$48 sps:$4 sm:$0xff]   ;;  %v13640_v52 = vld [vmem:[%s16115_s6 + $0x1140] ss:$48 sps:$4 sm:$0xff]  }
  0x90   : > { %9645 = vmatprep.subr.bf16.mxu1 %v13570_v58  ;;  %v13645_v51 = vld [vmem:[%s16115_s6 + $0x1744] ss:$48 sps:$4 sm:$0xff]   ;;  %v13643_v54 = vld [vmem:[%s16115_s6 + $0x1740] ss:$48 sps:$4 sm:$0xff]  }
  0x91   : > { %v13648_v55 = vld [vmem:[%s16115_s6 + $0x10e4] ss:$48 sps:$4 sm:$0xff]   ;;  %v13646_v57 = vld [vmem:[%s16115_s6 + $0x10e0] ss:$48 sps:$4 sm:$0xff]  }
  0x92   : > { %9605 = vmatpush2.bf16.msra.mxu0 %v13572_v59  ;;  %v13651_v56 = vld [vmem:[%s16115_s6 + $0x16e4] ss:$48 sps:$4 sm:$0xff]   ;;  %v13649_v58 = vld [vmem:[%s16115_s6 + $0x16e0] ss:$48 sps:$4 sm:$0xff]  }
  0x93   : > { %9646 = vmatpush2.bf16.msra.mxu1 %v13573_v60  ;;  %9606 = vmatprep.subr.bf16.mxu0 %v13574_v61  ;;  %v13654_v59 = vld [vmem:[%s16115_s6 + $0x1084] ss:$48 sps:$4 sm:$0xff]   ;;  %v13652_v61 = vld [vmem:[%s16115_s6 + $0x1080] ss:$48 sps:$4 sm:$0xff]  }
  0x94   : > { %9647 = vmatprep.subr.bf16.mxu1 %v13576_v62  ;;  %v13657_v60 = vld [vmem:[%s16115_s6 + $0x1684] ss:$48 sps:$4 sm:$0xff]   ;;  %v13655_v62 = vld [vmem:[%s16115_s6 + $0x1680] ss:$48 sps:$4 sm:$0xff]  }
  0x95   : > { %v13664_v5 = vld [vmem:[%s16115_s6 + $0xfc0] ss:$48 sps:$4 sm:$0xff]   ;;  %v13705_v39 = vld [vmem:[%s16115_s6 + $0x1f84] ss:$48 sps:$4 sm:$0xff]  }
  0x96   : > { %9607 = vmatpush2.bf16.msra.mxu0 %v13578_v63  ;;  %v13660_v63 = vld [vmem:[%s16115_s6 + $0x1024] ss:$48 sps:$4 sm:$0xff]   ;;  %v13667_v6 = vld [vmem:[%s16115_s6 + $0x15c0] ss:$48 sps:$4 sm:$0xff]  }
  0x97   : > { %9648 = vmatpush2.bf16.msra.mxu1 %v13579_v0  ;;  %9608 = vmatprep.subr.bf16.mxu0 %v13580_v1  ;;  %v13663_v0 = vld [vmem:[%s16115_s6 + $0x1624] ss:$48 sps:$4 sm:$0xff]   ;;  %v13658_v1 = vld [vmem:[%s16115_s6 + $0x1020] ss:$48 sps:$4 sm:$0xff]  }
  0x98   : > { %9649 = vmatprep.subr.bf16.mxu1 %v13582_v2  ;;  %v13661_v2 = vld [vmem:[%s16115_s6 + $0x1620] ss:$48 sps:$4 sm:$0xff]  }
  0x99   : > { %v13694_v35 = vld [vmem:[%s16115_s6 + $0x19e0] ss:$48 sps:$4 sm:$0xff]  }
  0x9a   : > { %9609 = vmatpush2.bf16.msra.mxu0 %v13584_v3  ;;  %v13666_v3 = vld [vmem:[%s16115_s6 + $0xfc4] ss:$48 sps:$4 sm:$0xff]  }
  0x9b   : > { %9650 = vmatpush2.bf16.msra.mxu1 %v13585_v4  ;;  %9660 = vmatprep.subr.bf16.mxu0 %v13588_v7  ;;  %v13669_v4 = vld [vmem:[%s16115_s6 + $0x15c4] ss:$48 sps:$4 sm:$0xff]  }
  0x9c   : > { %9701 = vmatprep.subr.bf16.mxu1 %v13591_v8  ;;  %v13672_v7 = vld [vmem:[%s16115_s6 + $0xf64] ss:$48 sps:$4 sm:$0xff]  }
  0x9d   : > { %9611 = vmatmul.mubr.bf16.vlgmr.msra.gmra.mxu0 %v16218_v9  ;;  %v13675_v8 = vld [vmem:[%s16115_s6 + $0x1564] ss:$48 sps:$4 sm:$0xff]  }
  0x9e   : > { %9652 = vmatmul.mubr.bf16.vlgmr.msra.gmra.mxu1 %v16220_v10  ;;  %9661 = vmatpush1.bf16.msra.mxu0 %v13586_v11  ;;  %v13670_v11 = vld [vmem:[%s16115_s6 + $0xf60] ss:$48 sps:$4 sm:$0xff]  }
  0x9f   : > { %9702 = vmatpush1.bf16.msra.mxu1 %v13589_v12  ;;  %9662 = vmatprep.subr.bf16.mxu0 %v13594_v13  ;;  %v13673_v12 = vld [vmem:[%s16115_s6 + $0x1560] ss:$48 sps:$4 sm:$0xff]   ;;  %v13678_v13 = vld [vmem:[%s16115_s6 + $0xf04] ss:$48 sps:$4 sm:$0xff]  }
  0xa0   : > { %9703 = vmatprep.subr.bf16.mxu1 %v13597_v14  ;;  %9692 = vmatprep.mubr.bf16.mxu0 %v16251_v38  ;;  %v13681_v14 = vld [vmem:[%s16115_s6 + $0x1504] ss:$48 sps:$4 sm:$0xff]  }
  0xa1   : > { %9733 = vmatprep.mubr.bf16.mxu1 %v16255_v41 }
  0xa2   : > { %9663 = vmatpush1.bf16.msra.mxu0 %v13592_v15  ;;  %v13676_v15 = vld [vmem:[%s16115_s6 + $0xf00] ss:$48 sps:$4 sm:$0xff]  }
  0xa3   : > { %9704 = vmatpush1.bf16.msra.mxu1 %v13595_v16  ;;  %9664 = vmatprep.subr.bf16.mxu0 %v13600_v17  ;;  %v13679_v16 = vld [vmem:[%s16115_s6 + $0x1500] ss:$48 sps:$4 sm:$0xff]  }
  0xa4   : > { %9705 = vmatprep.subr.bf16.mxu1 %v13603_v18  ;;  %v334_v17 = vld [vmem:[%s16134_s30 + $0x20] sm:$0xff]  ;;  %v336_v18 = vld [vmem:[%s16134_s30 + $0x30] sm:$0xff] }
  0xa6   : > { %9665 = vmatpush1.bf16.msra.mxu0 %v13598_v19  ;;  %v13684_v19 = vld [vmem:[%s16115_s6 + $0x1aa4] ss:$48 sps:$4 sm:$0xff]  }
  0xa7   : > { %9706 = vmatpush1.bf16.msra.mxu1 %v13601_v20  ;;  %9666 = vmatprep.subr.bf16.mxu0 %v13606_v21  ;;  %v13687_v20 = vld [vmem:[%s16115_s6 + $0x20a4] ss:$48 sps:$4 sm:$0xff]   ;;  %v16298_v21 = vpack.c.bf16 %v334_v17, %v334_v17  ;;  %v13754_v17 = vld [vmem:[%s16115_s6 + $0x1c20] ss:$48 sps:$4 sm:$0xff]  }
  0xa8   : > { %9707 = vmatprep.subr.bf16.mxu1 %v13609_v22  ;;  %v16300_v22 = vpack.c.bf16 %v336_v18, %v336_v18  ;;  %v13757_v18 = vld [vmem:[%s16115_s6 + $0x2220] ss:$48 sps:$4 sm:$0xff]  }
  0xaa   : > { %9667 = vmatpush1.bf16.msra.mxu0 %v13604_v23  ;;  %v13682_v23 = vld [vmem:[%s16115_s6 + $0x1aa0] ss:$48 sps:$4 sm:$0xff]  }
  0xab   : > { %9708 = vmatpush1.bf16.msra.mxu1 %v13607_v24  ;;  %9668 = vmatprep.subr.bf16.mxu0 %v13612_v25  ;;  %v13685_v24 = vld [vmem:[%s16115_s6 + $0x20a0] ss:$48 sps:$4 sm:$0xff]   ;;  %v13690_v25 = vld [vmem:[%s16115_s6 + $0x1a44] ss:$48 sps:$4 sm:$0xff]  }
  0xac   : > { %9709 = vmatprep.subr.bf16.mxu1 %v13615_v26  ;;  %v13693_v26 = vld [vmem:[%s16115_s6 + $0x2044] ss:$48 sps:$4 sm:$0xff]  }
  0xae   : > { %9669 = vmatpush1.bf16.msra.mxu0 %v13610_v27  ;;  %v339_v27 = vld [vmem:[%s16134_s30 + $0x48] sm:$0xff] }
  0xaf   : > { %9710 = vmatpush1.bf16.msra.mxu1 %v13613_v28  ;;  %9670 = vmatprep.subr.bf16.mxu0 %v13618_v29  ;;  %v13688_v28 = vld [vmem:[%s16115_s6 + $0x1a40] ss:$48 sps:$4 sm:$0xff]  }
  0xb0   : > { %9711 = vmatprep.subr.bf16.mxu1 %v13621_v30  ;;  %v13691_v29 = vld [vmem:[%s16115_s6 + $0x2040] ss:$48 sps:$4 sm:$0xff]   ;;  %v16311_v30 = vpack.c.bf16 %v339_v27, %v339_v27 }
  0xb1   : > { %v13766_v27 = vld [vmem:[%s16115_s6 + $0x1b60] ss:$48 sps:$4 sm:$0xff]  }
  0xb2   : > { %9671 = vmatpush1.bf16.msra.mxu0 %v13616_v31  ;;  %v341_v31 = vld [vmem:[%s16134_s30 + $0x58] sm:$0xff] }
  0xb3   : > { %9712 = vmatpush1.bf16.msra.mxu1 %v13619_v32  ;;  %9672 = vmatprep.subr.bf16.mxu0 %v13624_v33  ;;  %v13696_v32 = vld [vmem:[%s16115_s6 + $0x19e4] ss:$48 sps:$4 sm:$0xff]   ;;  %v16315_v33 = vpack.c.bf16 %v341_v31, %v341_v31 }
  0xb4   : > { %9713 = vmatprep.subr.bf16.mxu1 %v13627_v34  ;;  %v13699_v34 = vld [vmem:[%s16115_s6 + $0x1fe4] ss:$48 sps:$4 sm:$0xff]  }
  0xb5   : > { %v13777_v31 = vld [vmem:[%s16115_s6 + $0x2104] ss:$48 sps:$4 sm:$0xff]  }
  0xb6   : > { %9673 = vmatpush1.bf16.msra.mxu0 %v13622_v36  ;;  %v13697_v36 = vld [vmem:[%s16115_s6 + $0x1fe0] ss:$48 sps:$4 sm:$0xff]  }
  0xb7   : > { %9714 = vmatpush1.bf16.msra.mxu1 %v13625_v37  ;;  %9674 = vmatprep.subr.bf16.mxu0 %v13630_v40  ;;  %v13702_v37 = vld [vmem:[%s16115_s6 + $0x1984] ss:$48 sps:$4 sm:$0xff]   ;;  %v13700_v40 = vld [vmem:[%s16115_s6 + $0x1980] ss:$48 sps:$4 sm:$0xff]  }
  0xb8   : > { %9715 = vmatprep.subr.bf16.mxu1 %v13633_v42  ;;  %v13703_v42 = vld [vmem:[%s16115_s6 + $0x1f80] ss:$48 sps:$4 sm:$0xff]  }
  0xba   : > { %9675 = vmatpush1.bf16.msra.mxu0 %v13628_v43  ;;  %v13708_v43 = vld [vmem:[%s16115_s6 + $0x1924] ss:$48 sps:$4 sm:$0xff]  }
  0xbb   : > { %9716 = vmatpush1.bf16.msra.mxu1 %v13631_v44  ;;  %9676 = vmatprep.subr.bf16.mxu0 %v13636_v45  ;;  %v13711_v44 = vld [vmem:[%s16115_s6 + $0x1f24] ss:$48 sps:$4 sm:$0xff]   ;;  %v13706_v45 = vld [vmem:[%s16115_s6 + $0x1920] ss:$48 sps:$4 sm:$0xff]  }
  0xbc   : > { %9717 = vmatprep.subr.bf16.mxu1 %v13639_v46  ;;  %v13709_v46 = vld [vmem:[%s16115_s6 + $0x1f20] ss:$48 sps:$4 sm:$0xff]  }
  0xbe   : > { %9677 = vmatpush2.bf16.msra.mxu0 %v13634_v47  ;;  %v13714_v47 = vld [vmem:[%s16115_s6 + $0x18c4] ss:$48 sps:$4 sm:$0xff]  }
  0xbf   : > { %9718 = vmatpush2.bf16.msra.mxu1 %v13637_v48  ;;  %9678 = vmatprep.subr.bf16.mxu0 %v13642_v49  ;;  %v13717_v48 = vld [vmem:[%s16115_s6 + $0x1ec4] ss:$48 sps:$4 sm:$0xff]   ;;  %v13712_v49 = vld [vmem:[%s16115_s6 + $0x18c0] ss:$48 sps:$4 sm:$0xff]  }
  0xc0   : > { %9719 = vmatprep.subr.bf16.mxu1 %v13645_v51  ;;  %v13715_v51 = vld [vmem:[%s16115_s6 + $0x1ec0] ss:$48 sps:$4 sm:$0xff]  }
  0xc2   : > { %9679 = vmatpush2.bf16.msra.mxu0 %v13640_v52  ;;  %v13720_v52 = vld [vmem:[%s16115_s6 + $0x1864] ss:$48 sps:$4 sm:$0xff]  }
  0xc3   : > { %9720 = vmatpush2.bf16.msra.mxu1 %v13643_v54  ;;  %9680 = vmatprep.subr.bf16.mxu0 %v13648_v55  ;;  %v13723_v54 = vld [vmem:[%s16115_s6 + $0x1e64] ss:$48 sps:$4 sm:$0xff]   ;;  %v13718_v55 = vld [vmem:[%s16115_s6 + $0x1860] ss:$48 sps:$4 sm:$0xff]  }
  0xc4   : > { %9721 = vmatprep.subr.bf16.mxu1 %v13651_v56  ;;  %v13721_v56 = vld [vmem:[%s16115_s6 + $0x1e60] ss:$48 sps:$4 sm:$0xff]  }
  0xc6   : > { %9681 = vmatpush2.bf16.msra.mxu0 %v13646_v57  ;;  %v13726_v57 = vld [vmem:[%s16115_s6 + $0x1804] ss:$48 sps:$4 sm:$0xff]  }
  0xc7   : > { %9722 = vmatpush2.bf16.msra.mxu1 %v13649_v58  ;;  %9682 = vmatprep.subr.bf16.mxu0 %v13654_v59  ;;  %v13729_v58 = vld [vmem:[%s16115_s6 + $0x1e04] ss:$48 sps:$4 sm:$0xff]   ;;  %v13724_v59 = vld [vmem:[%s16115_s6 + $0x1800] ss:$48 sps:$4 sm:$0xff]  }
  0xc8   : > { %9723 = vmatprep.subr.bf16.mxu1 %v13657_v60  ;;  %v13727_v60 = vld [vmem:[%s16115_s6 + $0x1e00] ss:$48 sps:$4 sm:$0xff]  }
  0xca   : > { %9683 = vmatpush2.bf16.msra.mxu0 %v13652_v61  ;;  %v13732_v61 = vld [vmem:[%s16115_s6 + $0x1da4] ss:$48 sps:$4 sm:$0xff]  }
  0xcb   : > { %9724 = vmatpush2.bf16.msra.mxu1 %v13655_v62  ;;  %9684 = vmatprep.subr.bf16.mxu0 %v13660_v63  ;;  %v13735_v62 = vld [vmem:[%s16115_s6 + $0x23a4] ss:$48 sps:$4 sm:$0xff]   ;;  %v13730_v63 = vld [vmem:[%s16115_s6 + $0x1da0] ss:$48 sps:$4 sm:$0xff]  }
  0xcc   : > { %9725 = vmatprep.subr.bf16.mxu1 %v13663_v0  ;;  %v13733_v0 = vld [vmem:[%s16115_s6 + $0x23a0] ss:$48 sps:$4 sm:$0xff]  }
  0xce   : > { %9685 = vmatpush2.bf16.msra.mxu0 %v13658_v1  ;;  %v13738_v1 = vld [vmem:[%s16115_s6 + $0x1d44] ss:$48 sps:$4 sm:$0xff]  }
  0xcf   : > { %9726 = vmatpush2.bf16.msra.mxu1 %v13661_v2  ;;  %9686 = vmatprep.subr.bf16.mxu0 %v13666_v3  ;;  %v13741_v2 = vld [vmem:[%s16115_s6 + $0x2344] ss:$48 sps:$4 sm:$0xff]   ;;  %v13736_v3 = vld [vmem:[%s16115_s6 + $0x1d40] ss:$48 sps:$4 sm:$0xff]  }
  0xd0   : > { %9727 = vmatprep.subr.bf16.mxu1 %v13669_v4  ;;  %v13739_v4 = vld [vmem:[%s16115_s6 + $0x2340] ss:$48 sps:$4 sm:$0xff]  }
  0xd2   : > { %9687 = vmatpush2.bf16.msra.mxu0 %v13664_v5  ;;  %v13744_v5 = vld [vmem:[%s16115_s6 + $0x1ce4] ss:$48 sps:$4 sm:$0xff]  }
  0xd3   : > { %9728 = vmatpush2.bf16.msra.mxu1 %v13667_v6  ;;  %9688 = vmatprep.subr.bf16.mxu0 %v13672_v7  ;;  %v13747_v6 = vld [vmem:[%s16115_s6 + $0x22e4] ss:$48 sps:$4 sm:$0xff]   ;;  %v13742_v7 = vld [vmem:[%s16115_s6 + $0x1ce0] ss:$48 sps:$4 sm:$0xff]  }
  0xd4   : > { %9729 = vmatprep.subr.bf16.mxu1 %v13675_v8  ;;  %v13745_v8 = vld [vmem:[%s16115_s6 + $0x22e0] ss:$48 sps:$4 sm:$0xff]  }
  0xd6   : > { %9689 = vmatpush2.bf16.msra.mxu0 %v13670_v11  ;;  %v13750_v11 = vld [vmem:[%s16115_s6 + $0x1c84] ss:$48 sps:$4 sm:$0xff]  }
  0xd7   : > { %9730 = vmatpush2.bf16.msra.mxu1 %v13673_v12  ;;  %9690 = vmatprep.subr.bf16.mxu0 %v13678_v13  ;;  %v13753_v12 = vld [vmem:[%s16115_s6 + $0x2284] ss:$48 sps:$4 sm:$0xff]   ;;  %v13748_v13 = vld [vmem:[%s16115_s6 + $0x1c80] ss:$48 sps:$4 sm:$0xff]  }
  0xd8   : > { %9731 = vmatprep.subr.bf16.mxu1 %v13681_v14  ;;  %v13751_v14 = vld [vmem:[%s16115_s6 + $0x2280] ss:$48 sps:$4 sm:$0xff]  }
  0xda   : > { %9691 = vmatpush2.bf16.msra.mxu0 %v13676_v15  ;;  %v13756_v15 = vld [vmem:[%s16115_s6 + $0x1c24] ss:$48 sps:$4 sm:$0xff]  }
  0xdb   : > { %9732 = vmatpush2.bf16.msra.mxu1 %v13679_v16  ;;  %9742 = vmatprep.subr.bf16.mxu0 %v13684_v19  ;;  %v13759_v16 = vld [vmem:[%s16115_s6 + $0x2224] ss:$48 sps:$4 sm:$0xff]  }
  0xdc   : > { %9783 = vmatprep.subr.bf16.mxu1 %v13687_v20  ;;  %v13762_v19 = vld [vmem:[%s16115_s6 + $0x1bc4] ss:$48 sps:$4 sm:$0xff]  }
  0xdd   : > { %9693 = vmatmul.mubr.bf16.vlgmr.msra.gmra.mxu0 %v16298_v21  ;;  %v13765_v20 = vld [vmem:[%s16115_s6 + $0x21c4] ss:$48 sps:$4 sm:$0xff]  }
  0xde   : > { %9734 = vmatmul.mubr.bf16.vlgmr.msra.gmra.mxu1 %v16300_v22  ;;  %9743 = vmatpush1.bf16.msra.mxu0 %v13682_v23  ;;  %v13760_v23 = vld [vmem:[%s16115_s6 + $0x1bc0] ss:$48 sps:$4 sm:$0xff]  }
  0xdf   : > { %9784 = vmatpush1.bf16.msra.mxu1 %v13685_v24  ;;  %9744 = vmatprep.subr.bf16.mxu0 %v13690_v25  ;;  %v13763_v24 = vld [vmem:[%s16115_s6 + $0x21c0] ss:$48 sps:$4 sm:$0xff]   ;;  %v13768_v25 = vld [vmem:[%s16115_s6 + $0x1b64] ss:$48 sps:$4 sm:$0xff]  }
  0xe0   : > { %9785 = vmatprep.subr.bf16.mxu1 %v13693_v26  ;;  %9774 = vmatprep.mubr.bf16.mxu0 %v16311_v30  ;;  %v13771_v26 = vld [vmem:[%s16115_s6 + $0x2164] ss:$48 sps:$4 sm:$0xff]  }
  0xe1   : > { %9815 = vmatprep.mubr.bf16.mxu1 %v16315_v33 }
  0xe2   : > { %9745 = vmatpush1.bf16.msra.mxu0 %v13688_v28  ;;  %v13769_v28 = vld [vmem:[%s16115_s6 + $0x2160] ss:$48 sps:$4 sm:$0xff]  }
  0xe3   : > { %9786 = vmatpush1.bf16.msra.mxu1 %v13691_v29  ;;  %9746 = vmatprep.subr.bf16.mxu0 %v13696_v32  ;;  %v13774_v29 = vld [vmem:[%s16115_s6 + $0x1b04] ss:$48 sps:$4 sm:$0xff]   ;;  %v13772_v32 = vld [vmem:[%s16115_s6 + $0x1b00] ss:$48 sps:$4 sm:$0xff]  }
  0xe4   : > { %9787 = vmatprep.subr.bf16.mxu1 %v13699_v34  ;;  %v13775_v34 = vld [vmem:[%s16115_s6 + $0x2100] ss:$48 sps:$4 sm:$0xff]  }
  0xe6   : > { %9747 = vmatpush1.bf16.msra.mxu0 %v13694_v35  ;;  %v338_v35 = vld [vmem:[%s16134_s30 + $0x40] sm:$0xff] }
  0xe7   : > { %9788 = vmatpush1.bf16.msra.mxu1 %v13697_v36  ;;  %9748 = vmatprep.subr.bf16.mxu0 %v13702_v37  ;;  %v340_v36 = vld [vmem:[%s16134_s30 + $0x50] sm:$0xff] }
  0xe8   : > { %9789 = vmatprep.subr.bf16.mxu1 %v13705_v39  ;;  %v13780_v37 = vld [vmem:[%s16115_s6 + $0x26a4] ss:$48 sps:$4 sm:$0xff]  }
  0xe9   : > { %v13783_v39 = vld [vmem:[%s16115_s6 + $0x2ca4] ss:$48 sps:$4 sm:$0xff]  }
  0xea   : > { %9749 = vmatpush1.bf16.msra.mxu0 %v13700_v40  ;;  %v13778_v40 = vld [vmem:[%s16115_s6 + $0x26a0] ss:$48 sps:$4 sm:$0xff]  }
  0xeb   : > { %9790 = vmatpush1.bf16.msra.mxu1 %v13703_v42  ;;  %9750 = vmatprep.subr.bf16.mxu0 %v13708_v43  ;;  %v13781_v42 = vld [vmem:[%s16115_s6 + $0x2ca0] ss:$48 sps:$4 sm:$0xff]   ;;  %v16380_v43 = vpack.c.bf16 %v338_v35, %v338_v35 }
  0xec   : > { %9791 = vmatprep.subr.bf16.mxu1 %v13711_v44  ;;  %v16382_v44 = vpack.c.bf16 %v340_v36, %v340_v36  ;;  %v13844_v35 = vld [vmem:[%s16115_s6 + $0x2880] ss:$48 sps:$4 sm:$0xff]  }
  0xed   : > { %v13847_v36 = vld [vmem:[%s16115_s6 + $0x2e80] ss:$48 sps:$4 sm:$0xff]  }
  0xee   : > { %9751 = vmatpush1.bf16.msra.mxu0 %v13706_v45  ;;  %v343_v45 = vld [vmem:[%s16134_s30 + $0x68] sm:$0xff] }
  0xef   : > { %9792 = vmatpush1.bf16.msra.mxu1 %v13709_v46  ;;  %9752 = vmatprep.subr.bf16.mxu0 %v13714_v47  ;;  %v345_v46 = vld [vmem:[%s16134_s30 + $0x78] sm:$0xff]  ;;  %v13786_v47 = vld [vmem:[%s16115_s6 + $0x2644] ss:$48 sps:$4 sm:$0xff]  }
  0xf0   : > { %9793 = vmatprep.subr.bf16.mxu1 %v13717_v48  ;;  %v13789_v48 = vld [vmem:[%s16115_s6 + $0x2c44] ss:$48 sps:$4 sm:$0xff]  }
  0xf2   : > { %9753 = vmatpush1.bf16.msra.mxu0 %v13712_v49  ;;  %v16388_v49 = vpack.c.bf16 %v343_v45, %v343_v45  ;;  %v13858_v45 = vld [vmem:[%s16115_s6 + $0x27c4] ss:$48 sps:$4 sm:$0xff]  }
  0xf3   : > { %9794 = vmatpush1.bf16.msra.mxu1 %v13715_v51  ;;  %9754 = vmatprep.subr.bf16.mxu0 %v13720_v52  ;;  %v16390_v51 = vpack.c.bf16 %v345_v46, %v345_v46  ;;  %v13784_v52 = vld [vmem:[%s16115_s6 + $0x2640] ss:$48 sps:$4 sm:$0xff]   ;;  %v13861_v46 = vld [vmem:[%s16115_s6 + $0x2dc4] ss:$48 sps:$4 sm:$0xff]  }
  0xf4   : > { %9795 = vmatprep.subr.bf16.mxu1 %v13723_v54  ;;  %v13787_v54 = vld [vmem:[%s16115_s6 + $0x2c40] ss:$48 sps:$4 sm:$0xff]  }
  0xf6   : > { %9755 = vmatpush1.bf16.msra.mxu0 %v13718_v55  ;;  %v13792_v55 = vld [vmem:[%s16115_s6 + $0x25e4] ss:$48 sps:$4 sm:$0xff]  }
  0xf7   : > { %9796 = vmatpush1.bf16.msra.mxu1 %v13721_v56  ;;  %9756 = vmatprep.subr.bf16.mxu0 %v13726_v57  ;;  %v13795_v56 = vld [vmem:[%s16115_s6 + $0x2be4] ss:$48 sps:$4 sm:$0xff]   ;;  %v13790_v57 = vld [vmem:[%s16115_s6 + $0x25e0] ss:$48 sps:$4 sm:$0xff]  }
  0xf8   : > { %9797 = vmatprep.subr.bf16.mxu1 %v13729_v58  ;;  %v13793_v58 = vld [vmem:[%s16115_s6 + $0x2be0] ss:$48 sps:$4 sm:$0xff]  }
  0xfa   : > { %9757 = vmatpush1.bf16.msra.mxu0 %v13724_v59  ;;  %v13798_v59 = vld [vmem:[%s16115_s6 + $0x2584] ss:$48 sps:$4 sm:$0xff]  }
  0xfb   : > { %9798 = vmatpush1.bf16.msra.mxu1 %v13727_v60  ;;  %9758 = vmatprep.subr.bf16.mxu0 %v13732_v61  ;;  %v13801_v60 = vld [vmem:[%s16115_s6 + $0x2b84] ss:$48 sps:$4 sm:$0xff]   ;;  %v13796_v61 = vld [vmem:[%s16115_s6 + $0x2580] ss:$48 sps:$4 sm:$0xff]  }
  0xfc   : > { %9799 = vmatprep.subr.bf16.mxu1 %v13735_v62  ;;  %v13799_v62 = vld [vmem:[%s16115_s6 + $0x2b80] ss:$48 sps:$4 sm:$0xff]  }
  0xfe   : > { %9759 = vmatpush2.bf16.msra.mxu0 %v13730_v63  ;;  %v13804_v63 = vld [vmem:[%s16115_s6 + $0x2524] ss:$48 sps:$4 sm:$0xff]  }
  0xff   : > { %9800 = vmatpush2.bf16.msra.mxu1 %v13733_v0  ;;  %9760 = vmatprep.subr.bf16.mxu0 %v13738_v1  ;;  %v13807_v0 = vld [vmem:[%s16115_s6 + $0x2b24] ss:$48 sps:$4 sm:$0xff]   ;;  %v13802_v1 = vld [vmem:[%s16115_s6 + $0x2520] ss:$48 sps:$4 sm:$0xff]  }
 0x100   : > { %9801 = vmatprep.subr.bf16.mxu1 %v13741_v2  ;;  %v13805_v2 = vld [vmem:[%s16115_s6 + $0x2b20] ss:$48 sps:$4 sm:$0xff]  }
 0x102   : > { %9761 = vmatpush2.bf16.msra.mxu0 %v13736_v3  ;;  %v13810_v3 = vld [vmem:[%s16115_s6 + $0x24c4] ss:$48 sps:$4 sm:$0xff]  }
 0x103   : > { %9802 = vmatpush2.bf16.msra.mxu1 %v13739_v4  ;;  %9762 = vmatprep.subr.bf16.mxu0 %v13744_v5  ;;  %v13813_v4 = vld [vmem:[%s16115_s6 + $0x2ac4] ss:$48 sps:$4 sm:$0xff]   ;;  %v13808_v5 = vld [vmem:[%s16115_s6 + $0x24c0] ss:$48 sps:$4 sm:$0xff]  }
 0x104   : > { %9803 = vmatprep.subr.bf16.mxu1 %v13747_v6  ;;  %v13811_v6 = vld [vmem:[%s16115_s6 + $0x2ac0] ss:$48 sps:$4 sm:$0xff]  }
 0x106   : > { %9763 = vmatpush2.bf16.msra.mxu0 %v13742_v7  ;;  %v13816_v7 = vld [vmem:[%s16115_s6 + $0x2464] ss:$48 sps:$4 sm:$0xff]  }
 0x107   : > { %9804 = vmatpush2.bf16.msra.mxu1 %v13745_v8  ;;  %9764 = vmatprep.subr.bf16.mxu0 %v13750_v11  ;;  %v13819_v8 = vld [vmem:[%s16115_s6 + $0x2a64] ss:$48 sps:$4 sm:$0xff]   ;;  %v13814_v11 = vld [vmem:[%s16115_s6 + $0x2460] ss:$48 sps:$4 sm:$0xff]  }
 0x108   : > { %9805 = vmatprep.subr.bf16.mxu1 %v13753_v12  ;;  %v13817_v12 = vld [vmem:[%s16115_s6 + $0x2a60] ss:$48 sps:$4 sm:$0xff]  }
 0x10a   : > { %9765 = vmatpush2.bf16.msra.mxu0 %v13748_v13  ;;  %v13822_v13 = vld [vmem:[%s16115_s6 + $0x2404] ss:$48 sps:$4 sm:$0xff]  }
 0x10b   : > { %9806 = vmatpush2.bf16.msra.mxu1 %v13751_v14  ;;  %9766 = vmatprep.subr.bf16.mxu0 %v13756_v15  ;;  %v13825_v14 = vld [vmem:[%s16115_s6 + $0x2a04] ss:$48 sps:$4 sm:$0xff]   ;;  %v13820_v15 = vld [vmem:[%s16115_s6 + $0x2400] ss:$48 sps:$4 sm:$0xff]  }
 0x10c   : > { %9807 = vmatprep.subr.bf16.mxu1 %v13759_v16  ;;  %v13823_v16 = vld [vmem:[%s16115_s6 + $0x2a00] ss:$48 sps:$4 sm:$0xff]  }
 0x10e   : > { %9767 = vmatpush2.bf16.msra.mxu0 %v13754_v17  ;;  %v13828_v17 = vld [vmem:[%s16115_s6 + $0x29a4] ss:$48 sps:$4 sm:$0xff]  }
 0x10f   : > { %9808 = vmatpush2.bf16.msra.mxu1 %v13757_v18  ;;  %9768 = vmatprep.subr.bf16.mxu0 %v13762_v19  ;;  %v13831_v18 = vld [vmem:[%s16115_s6 + $0x2fa4] ss:$48 sps:$4 sm:$0xff]   ;;  %v13826_v19 = vld [vmem:[%s16115_s6 + $0x29a0] ss:$48 sps:$4 sm:$0xff]  }
 0x110   : > { %9809 = vmatprep.subr.bf16.mxu1 %v13765_v20  ;;  %v13829_v20 = vld [vmem:[%s16115_s6 + $0x2fa0] ss:$48 sps:$4 sm:$0xff]  }
 0x112   : > { %9769 = vmatpush2.bf16.msra.mxu0 %v13760_v23  ;;  %v13834_v23 = vld [vmem:[%s16115_s6 + $0x2944] ss:$48 sps:$4 sm:$0xff]  }
 0x113   : > { %9810 = vmatpush2.bf16.msra.mxu1 %v13763_v24  ;;  %9770 = vmatprep.subr.bf16.mxu0 %v13768_v25  ;;  %v13837_v24 = vld [vmem:[%s16115_s6 + $0x2f44] ss:$48 sps:$4 sm:$0xff]   ;;  %v13832_v25 = vld [vmem:[%s16115_s6 + $0x2940] ss:$48 sps:$4 sm:$0xff]  }
 0x114   : > { %9811 = vmatprep.subr.bf16.mxu1 %v13771_v26  ;;  %v13835_v26 = vld [vmem:[%s16115_s6 + $0x2f40] ss:$48 sps:$4 sm:$0xff]  }
 0x116   : > { %9771 = vmatpush2.bf16.msra.mxu0 %v13766_v27  ;;  %v13840_v27 = vld [vmem:[%s16115_s6 + $0x28e4] ss:$48 sps:$4 sm:$0xff]  }
 0x117   : > { %9812 = vmatpush2.bf16.msra.mxu1 %v13769_v28  ;;  %9772 = vmatprep.subr.bf16.mxu0 %v13774_v29  ;;  %v13843_v28 = vld [vmem:[%s16115_s6 + $0x2ee4] ss:$48 sps:$4 sm:$0xff]   ;;  %v13838_v29 = vld [vmem:[%s16115_s6 + $0x28e0] ss:$48 sps:$4 sm:$0xff]  }
 0x118   : > { %9813 = vmatprep.subr.bf16.mxu1 %v13777_v31  ;;  %v13841_v31 = vld [vmem:[%s16115_s6 + $0x2ee0] ss:$48 sps:$4 sm:$0xff]  }
 0x11a   : > { %9773 = vmatpush2.bf16.msra.mxu0 %v13772_v32  ;;  %v13846_v32 = vld [vmem:[%s16115_s6 + $0x2884] ss:$48 sps:$4 sm:$0xff]  }
 0x11b   : > { %9814 = vmatpush2.bf16.msra.mxu1 %v13775_v34  ;;  %9824 = vmatprep.subr.bf16.mxu0 %v13780_v37  ;;  %v13849_v34 = vld [vmem:[%s16115_s6 + $0x2e84] ss:$48 sps:$4 sm:$0xff]  }
 0x11c   : > { %9865 = vmatprep.subr.bf16.mxu1 %v13783_v39  ;;  %v13852_v37 = vld [vmem:[%s16115_s6 + $0x2824] ss:$48 sps:$4 sm:$0xff]  }
 0x11d   : > { %9775 = vmatmul.mubr.bf16.vlgmr.msra.gmra.mxu0 %v16380_v43  ;;  %v13855_v39 = vld [vmem:[%s16115_s6 + $0x2e24] ss:$48 sps:$4 sm:$0xff]  }
 0x11e   : > { %9816 = vmatmul.mubr.bf16.vlgmr.msra.gmra.mxu1 %v16382_v44  ;;  %9825 = vmatpush1.bf16.msra.mxu0 %v13778_v40  ;;  %v13850_v40 = vld [vmem:[%s16115_s6 + $0x2820] ss:$48 sps:$4 sm:$0xff]  }
 0x11f   : > { %9866 = vmatpush1.bf16.msra.mxu1 %v13781_v42  ;;  %9826 = vmatprep.subr.bf16.mxu0 %v13786_v47  ;;  %v13853_v42 = vld [vmem:[%s16115_s6 + $0x2e20] ss:$48 sps:$4 sm:$0xff]  }
 0x120   : > { %9867 = vmatprep.subr.bf16.mxu1 %v13789_v48  ;;  %9856 = vmatprep.mubr.bf16.mxu0 %v16388_v49  ;;  %v13856_v47 = vld [vmem:[%s16115_s6 + $0x27c0] ss:$48 sps:$4 sm:$0xff]  }
 0x121   : > { %9897 = vmatprep.mubr.bf16.mxu1 %v16390_v51  ;;  %v13859_v48 = vld [vmem:[%s16115_s6 + $0x2dc0] ss:$48 sps:$4 sm:$0xff]  }
 0x122   : > { %9827 = vmatpush1.bf16.msra.mxu0 %v13784_v52  ;;  %v13864_v52 = vld [vmem:[%s16115_s6 + $0x2764] ss:$48 sps:$4 sm:$0xff]  }
 0x123   : > { %9868 = vmatpush1.bf16.msra.mxu1 %v13787_v54  ;;  %9828 = vmatprep.subr.bf16.mxu0 %v13792_v55  ;;  %v13867_v54 = vld [vmem:[%s16115_s6 + $0x2d64] ss:$48 sps:$4 sm:$0xff]   ;;  %v13862_v55 = vld [vmem:[%s16115_s6 + $0x2760] ss:$48 sps:$4 sm:$0xff]  }
 0x124   : > { %9869 = vmatprep.subr.bf16.mxu1 %v13795_v56  ;;  %v13865_v56 = vld [vmem:[%s16115_s6 + $0x2d60] ss:$48 sps:$4 sm:$0xff]  }
 0x126   : > { %9829 = vmatpush1.bf16.msra.mxu0 %v13790_v57  ;;  %v13870_v57 = vld [vmem:[%s16115_s6 + $0x2704] ss:$48 sps:$4 sm:$0xff]  }
 0x127   : > { %9870 = vmatpush1.bf16.msra.mxu1 %v13793_v58  ;;  %9830 = vmatprep.subr.bf16.mxu0 %v13798_v59  ;;  %v13873_v58 = vld [vmem:[%s16115_s6 + $0x2d04] ss:$48 sps:$4 sm:$0xff]   ;;  %v13868_v59 = vld [vmem:[%s16115_s6 + $0x2700] ss:$48 sps:$4 sm:$0xff]  }
 0x128   : > { %9871 = vmatprep.subr.bf16.mxu1 %v13801_v60  ;;  %v13871_v60 = vld [vmem:[%s16115_s6 + $0x2d00] ss:$48 sps:$4 sm:$0xff]  }
 0x12a   : > { %9831 = vmatpush1.bf16.msra.mxu0 %v13796_v61  ;;  %v342_v61 = vld [vmem:[%s16134_s30 + $0x60] sm:$0xff] }
 0x12b   : > { %9872 = vmatpush1.bf16.msra.mxu1 %v13799_v62  ;;  %9832 = vmatprep.subr.bf16.mxu0 %v13804_v63  ;;  %v344_v62 = vld [vmem:[%s16134_s30 + $0x70] sm:$0xff]  ;;  %v13876_v63 = vld [vmem:[%s16115_s6 + $0x2ac] ss:$48 sps:$4 sm:$0xff]  }
 0x12c   : > { %9873 = vmatprep.subr.bf16.mxu1 %v13807_v0  ;;  %v13879_v0 = vld [vmem:[%s16115_s6 + $0x8ac] ss:$48 sps:$4 sm:$0xff]  }
 0x12e   : > { %9833 = vmatpush1.bf16.msra.mxu0 %v13802_v1  ;;  %v16458_v1 = vpack.c.bf16 %v342_v61, %v342_v61  ;;  %v13930_v61 = vld [vmem:[%s16115_s6 + $0x54c] ss:$48 sps:$4 sm:$0xff]  }
 0x12f   : > { %9874 = vmatpush1.bf16.msra.mxu1 %v13805_v2  ;;  %9834 = vmatprep.subr.bf16.mxu0 %v13810_v3  ;;  %v16460_v2 = vpack.c.bf16 %v344_v62, %v344_v62  ;;  %v13874_v3 = vld [vmem:[%s16115_s6 + $0x2a8] ss:$48 sps:$4 sm:$0xff]   ;;  %v13933_v62 = vld [vmem:[%s16115_s6 + $0xb4c] ss:$48 sps:$4 sm:$0xff]  }
 0x130   : > { %9875 = vmatprep.subr.bf16.mxu1 %v13813_v4  ;;  %v13877_v4 = vld [vmem:[%s16115_s6 + $0x8a8] ss:$48 sps:$4 sm:$0xff]  }
 0x132   : > { %9835 = vmatpush1.bf16.msra.mxu0 %v13808_v5  ;;  %v13882_v5 = vld [vmem:[%s16115_s6 + $0x24c] ss:$48 sps:$4 sm:$0xff]  }
 0x133   : > { %9876 = vmatpush1.bf16.msra.mxu1 %v13811_v6  ;;  %9836 = vmatprep.subr.bf16.mxu0 %v13816_v7  ;;  %v13885_v6 = vld [vmem:[%s16115_s6 + $0x84c] ss:$48 sps:$4 sm:$0xff]  }
 0x134   : > { %9877 = vmatprep.subr.bf16.mxu1 %v13819_v8 }
 0x136   : > { %9837 = vmatpush1.bf16.msra.mxu0 %v13814_v11  ;;  %v13880_v11 = vld [vmem:[%s16115_s6 + $0x248] ss:$48 sps:$4 sm:$0xff]  }
 0x137   : > { %9878 = vmatpush1.bf16.msra.mxu1 %v13817_v12  ;;  %9838 = vmatprep.subr.bf16.mxu0 %v13822_v13  ;;  %v13883_v12 = vld [vmem:[%s16115_s6 + $0x848] ss:$48 sps:$4 sm:$0xff]  }
 0x138   : > { %9879 = vmatprep.subr.bf16.mxu1 %v13825_v14  ;;  %v13888_v14 = vld [vmem:[%s16115_s6 + $0x1ec] ss:$48 sps:$4 sm:$0xff]  }
 0x13a   : > { %9839 = vmatpush1.bf16.msra.mxu0 %v13820_v15 }
 0x13b   : > { %9880 = vmatpush1.bf16.msra.mxu1 %v13823_v16  ;;  %9840 = vmatprep.subr.bf16.mxu0 %v13828_v17  ;;  %v13891_v17 = vld [vmem:[%s16115_s6 + $0x7ec] ss:$48 sps:$4 sm:$0xff]  }
 0x13c   : > { %9881 = vmatprep.subr.bf16.mxu1 %v13831_v18 }
 0x13e   : > { %9841 = vmatpush2.bf16.msra.mxu0 %v13826_v19 }
 0x13f   : > { %9882 = vmatpush2.bf16.msra.mxu1 %v13829_v20  ;;  %9842 = vmatprep.subr.bf16.mxu0 %v13834_v23  ;;  %v13886_v23 = vld [vmem:[%s16115_s6 + $0x1e8] ss:$48 sps:$4 sm:$0xff]  }
 0x140   : > { %9883 = vmatprep.subr.bf16.mxu1 %v13837_v24  ;;  %v13889_v24 = vld [vmem:[%s16115_s6 + $0x7e8] ss:$48 sps:$4 sm:$0xff]  }
 0x142   : > { %9843 = vmatpush2.bf16.msra.mxu0 %v13832_v25  ;;  %v13894_v25 = vld [vmem:[%s16115_s6 + $0x18c] ss:$48 sps:$4 sm:$0xff]  }
 0x143   : > { %9884 = vmatpush2.bf16.msra.mxu1 %v13835_v26  ;;  %9844 = vmatprep.subr.bf16.mxu0 %v13840_v27 }
 0x144   : > { %9885 = vmatprep.subr.bf16.mxu1 %v13843_v28  ;;  %v13897_v28 = vld [vmem:[%s16115_s6 + $0x78c] ss:$48 sps:$4 sm:$0xff]  }
 0x146   : > { %9845 = vmatpush2.bf16.msra.mxu0 %v13838_v29  ;;  %v13892_v29 = vld [vmem:[%s16115_s6 + $0x188] ss:$48 sps:$4 sm:$0xff]  }
 0x147   : > { %9886 = vmatpush2.bf16.msra.mxu1 %v13841_v31  ;;  %9846 = vmatprep.subr.bf16.mxu0 %v13846_v32  ;;  %v13895_v31 = vld [vmem:[%s16115_s6 + $0x788] ss:$48 sps:$4 sm:$0xff]   ;;  %v13900_v32 = vld [vmem:[%s16115_s6 + $0x12c] ss:$48 sps:$4 sm:$0xff]  }
 0x148   : > { %9887 = vmatprep.subr.bf16.mxu1 %v13849_v34  ;;  %v13903_v34 = vld [vmem:[%s16115_s6 + $0x72c] ss:$48 sps:$4 sm:$0xff]  }
 0x14a   : > { %9847 = vmatpush2.bf16.msra.mxu0 %v13844_v35  ;;  %v13898_v35 = vld [vmem:[%s16115_s6 + $0x128] ss:$48 sps:$4 sm:$0xff]  }
 0x14b   : > { %9888 = vmatpush2.bf16.msra.mxu1 %v13847_v36  ;;  %9848 = vmatprep.subr.bf16.mxu0 %v13852_v37  ;;  %v13901_v36 = vld [vmem:[%s16115_s6 + $0x728] ss:$48 sps:$4 sm:$0xff]   ;;  %v13906_v37 = vld [vmem:[%s16115_s6 + $0xcc] ss:$48 sps:$4 sm:$0xff]  }
 0x14c   : > { %9889 = vmatprep.subr.bf16.mxu1 %v13855_v39  ;;  %v13909_v39 = vld [vmem:[%s16115_s6 + $0x6cc] ss:$48 sps:$4 sm:$0xff]  }
 0x14e   : > { %9849 = vmatpush2.bf16.msra.mxu0 %v13850_v40  ;;  %v13904_v40 = vld [vmem:[%s16115_s6 + $0xc8] ss:$48 sps:$4 sm:$0xff]  }
 0x14f   : > { %9890 = vmatpush2.bf16.msra.mxu1 %v13853_v42  ;;  %9850 = vmatprep.subr.bf16.mxu0 %v13858_v45  ;;  %v13907_v42 = vld [vmem:[%s16115_s6 + $0x6c8] ss:$48 sps:$4 sm:$0xff]   ;;  %v13912_v45 = vld [vmem:[%s16115_s6 + $0x6c] ss:$48 sps:$4 sm:$0xff]  }
 0x150   : > { %9891 = vmatprep.subr.bf16.mxu1 %v13861_v46  ;;  %v13915_v46 = vld [vmem:[%s16115_s6 + $0x66c] ss:$48 sps:$4 sm:$0xff]  }
 0x152   : > { %9851 = vmatpush2.bf16.msra.mxu0 %v13856_v47  ;;  %v13910_v47 = vld [vmem:[%s16115_s6 + $0x68] ss:$48 sps:$4 sm:$0xff]  }
 0x153   : > { %9892 = vmatpush2.bf16.msra.mxu1 %v13859_v48  ;;  %9852 = vmatprep.subr.bf16.mxu0 %v13864_v52  ;;  %v13913_v48 = vld [vmem:[%s16115_s6 + $0x668] ss:$48 sps:$4 sm:$0xff]   ;;  %v13918_v52 = vld [vmem:[%s16115_s6 + $0xc] ss:$48 sps:$4 sm:$0xff]  }
 0x154   : > { %9893 = vmatprep.subr.bf16.mxu1 %v13867_v54  ;;  %v13921_v54 = vld [vmem:[%s16115_s6 + $0x60c] ss:$48 sps:$4 sm:$0xff]  }
 0x156   : > { %9853 = vmatpush2.bf16.msra.mxu0 %v13862_v55  ;;  %v13916_v55 = vld [vmem:[%s16115_s6 + $0x8] ss:$48 sps:$4 sm:$0xff]  }
 0x157   : > { %9894 = vmatpush2.bf16.msra.mxu1 %v13865_v56  ;;  %9854 = vmatprep.subr.bf16.mxu0 %v13870_v57  ;;  %v13919_v56 = vld [vmem:[%s16115_s6 + $0x608] ss:$48 sps:$4 sm:$0xff]   ;;  %v13924_v57 = vld [vmem:[%s16115_s6 + $0x5ac] ss:$48 sps:$4 sm:$0xff]  }
 0x158   : > { %9895 = vmatprep.subr.bf16.mxu1 %v13873_v58  ;;  %v13927_v58 = vld [vmem:[%s16115_s6 + $0xbac] ss:$48 sps:$4 sm:$0xff]  }
 0x15a   : > { %9855 = vmatpush2.bf16.msra.mxu0 %v13868_v59  ;;  %v13922_v59 = vld [vmem:[%s16115_s6 + $0x5a8] ss:$48 sps:$4 sm:$0xff]  }
 0x15b   : > { %9896 = vmatpush2.bf16.msra.mxu1 %v13871_v60  ;;  %9906 = vmatprep.subr.bf16.mxu0 %v13876_v63  ;;  %v13925_v60 = vld [vmem:[%s16115_s6 + $0xba8] ss:$48 sps:$4 sm:$0xff]  }
 0x15c   : > { %9947 = vmatprep.subr.bf16.mxu1 %v13879_v0  ;;  %v13928_v63 = vld [vmem:[%s16115_s6 + $0x548] ss:$48 sps:$4 sm:$0xff]  }
 0x15d   : > { %v9612_v7 = vpop.f32.mrf.mxu0  ;;  %9857 = vmatmul.mubr.bf16.vlgmr.msra.gmra.mxu0 %v16458_v1  ;;  %v13931_v0 = vld [vmem:[%s16115_s6 + $0xb48] ss:$48 sps:$4 sm:$0xff]  }
 0x15e   : > { %v9653_v8 = vpop.f32.mrf.mxu1  ;;  %9898 = vmatmul.mubr.bf16.vlgmr.msra.gmra.mxu1 %v16460_v2  ;;  %9907 = vmatpush1.bf16.msra.mxu0 %v13874_v3  ;;  %v13936_v3 = vld [vmem:[%s16115_s6 + $0x4ec] ss:$48 sps:$4 sm:$0xff]  }
 0x15f   : > { %v16470_v13 = vadd.f32 %v9653_v8, %v9612_v7  ;;  %9948 = vmatpush1.bf16.msra.mxu1 %v13877_v4  ;;  %v9614_v15 = vpop.f32.mrf.mxu0  ;;  %9908 = vmatprep.subr.bf16.mxu0 %v13882_v5  ;;  %v13939_v4 = vld [vmem:[%s16115_s6 + $0xaec] ss:$48 sps:$4 sm:$0xff]   ;;  %v13934_v5 = vld [vmem:[%s16115_s6 + $0x4e8] ss:$48 sps:$4 sm:$0xff]  }
 0x160   : > { %v9655_v16 = vpop.f32.mrf.mxu1  ;;  %9949 = vmatprep.subr.bf16.mxu1 %v13885_v6  ;;  %9938 = vmatprep.mubr.bf16.mxu0 %v16191_v50  ;;  %v13937_v6 = vld [vmem:[%s16115_s6 + $0xae8] ss:$48 sps:$4 sm:$0xff]   ;;  %v13942_v7 = vld [vmem:[%s16115_s6 + $0x48c] ss:$48 sps:$4 sm:$0xff]  }
 0x161   : > { %v16474_v18 = vadd.f32 %v9655_v16, %v9614_v15  ;;  %9979 = vmatprep.mubr.bf16.mxu1 %v16195_v53  ;;  %v9616_v19 = vpop.f32.mrf.mxu0  ;;  %v13945_v8 = vld [vmem:[%s16115_s6 + $0xa8c] ss:$48 sps:$4 sm:$0xff]   ;;  %v13946_v16 = vld [vmem:[%s16115_s6 + $0x428] ss:$48 sps:$4 sm:$0xff]  }
 0x162   : > { %v9657_v20 = vpop.f32.mrf.mxu1  ;;  %9909 = vmatpush1.bf16.msra.mxu0 %v13880_v11  ;;  %v13940_v11 = vld [vmem:[%s16115_s6 + $0x488] ss:$48 sps:$4 sm:$0xff]   ;;  %v13951_v15 = vld [vmem:[%s16115_s6 + $0xa2c] ss:$48 sps:$4 sm:$0xff]  }
 0x163   : > { %9950 = vmatpush1.bf16.msra.mxu1 %v13883_v12  ;;  %v9617_v26 = vpop.f32.mrf.mxu0  ;;  %9910 = vmatprep.subr.bf16.mxu0 %v13888_v14  ;;  %v13943_v12 = vld [vmem:[%s16115_s6 + $0xa88] ss:$48 sps:$4 sm:$0xff]   ;;  %v13948_v14 = vld [vmem:[%s16115_s6 + $0x42c] ss:$48 sps:$4 sm:$0xff]  }
 0x164   : > { %v9658_v27 = vpop.f32.mrf.mxu1  ;;  %9951 = vmatprep.subr.bf16.mxu1 %v13891_v17  ;;  %v13949_v17 = vld [vmem:[%s16115_s6 + $0xa28] ss:$48 sps:$4 sm:$0xff]   ;;  %v13954_v19 = vld [vmem:[%s16115_s6 + $0x3cc] ss:$48 sps:$4 sm:$0xff]  }
 0x165   : > { %v13957_v20 = vld [vmem:[%s16115_s6 + $0x9cc] ss:$48 sps:$4 sm:$0xff]   ;;  %v13958_v27 = vld [vmem:[%s16115_s6 + $0x368] ss:$48 sps:$4 sm:$0xff]  }
 0x166   : > { %9911 = vmatpush1.bf16.msra.mxu0 %v13886_v23  ;;  %v13952_v23 = vld [vmem:[%s16115_s6 + $0x3c8] ss:$48 sps:$4 sm:$0xff]   ;;  %v13963_v26 = vld [vmem:[%s16115_s6 + $0x96c] ss:$48 sps:$4 sm:$0xff]  }
 0x167   : > { %9952 = vmatpush1.bf16.msra.mxu1 %v13889_v24  ;;  %9912 = vmatprep.subr.bf16.mxu0 %v13894_v25  ;;  %v13955_v24 = vld [vmem:[%s16115_s6 + $0x9c8] ss:$48 sps:$4 sm:$0xff]   ;;  %v13960_v25 = vld [vmem:[%s16115_s6 + $0x36c] ss:$48 sps:$4 sm:$0xff]  }
 0x168   : > { %9953 = vmatprep.subr.bf16.mxu1 %v13897_v28  ;;  %v13961_v28 = vld [vmem:[%s16115_s6 + $0x968] ss:$48 sps:$4 sm:$0xff]  }
 0x16a   : > { %9913 = vmatpush1.bf16.msra.mxu0 %v13892_v29  ;;  %v13966_v29 = vld [vmem:[%s16115_s6 + $0x30c] ss:$48 sps:$4 sm:$0xff]  }
 0x16b   : > { %9954 = vmatpush1.bf16.msra.mxu1 %v13895_v31  ;;  %9914 = vmatprep.subr.bf16.mxu0 %v13900_v32  ;;  %v13969_v31 = vld [vmem:[%s16115_s6 + $0x90c] ss:$48 sps:$4 sm:$0xff]   ;;  %v13964_v32 = vld [vmem:[%s16115_s6 + $0x308] ss:$48 sps:$4 sm:$0xff]  }
 0x16c   : > { %9955 = vmatprep.subr.bf16.mxu1 %v13903_v34  ;;  %v13967_v34 = vld [vmem:[%s16115_s6 + $0x908] ss:$48 sps:$4 sm:$0xff]  }
 0x16e   : > { %9915 = vmatpush1.bf16.msra.mxu0 %v13898_v35  ;;  %v13972_v35 = vld [vmem:[%s16115_s6 + $0xeac] ss:$48 sps:$4 sm:$0xff]  }
 0x16f   : > { %9956 = vmatpush1.bf16.msra.mxu1 %v13901_v36  ;;  %9916 = vmatprep.subr.bf16.mxu0 %v13906_v37  ;;  %v13975_v36 = vld [vmem:[%s16115_s6 + $0x14ac] ss:$48 sps:$4 sm:$0xff]   ;;  %v13970_v37 = vld [vmem:[%s16115_s6 + $0xea8] ss:$48 sps:$4 sm:$0xff]  }
 0x170   : > { %9957 = vmatprep.subr.bf16.mxu1 %v13909_v39  ;;  %v13973_v39 = vld [vmem:[%s16115_s6 + $0x14a8] ss:$48 sps:$4 sm:$0xff]  }
 0x172   : > { %9917 = vmatpush1.bf16.msra.mxu0 %v13904_v40  ;;  %v13978_v40 = vld [vmem:[%s16115_s6 + $0xe4c] ss:$48 sps:$4 sm:$0xff]  }
 0x173   : > { %9958 = vmatpush1.bf16.msra.mxu1 %v13907_v42  ;;  %9918 = vmatprep.subr.bf16.mxu0 %v13912_v45  ;;  %v13981_v42 = vld [vmem:[%s16115_s6 + $0x144c] ss:$48 sps:$4 sm:$0xff]   ;;  %v13976_v45 = vld [vmem:[%s16115_s6 + $0xe48] ss:$48 sps:$4 sm:$0xff]  }
 0x174   : > { %9959 = vmatprep.subr.bf16.mxu1 %v13915_v46 }
 0x176   : > { %9919 = vmatpush1.bf16.msra.mxu0 %v13910_v47 }
 0x177   : > { %9960 = vmatpush1.bf16.msra.mxu1 %v13913_v48  ;;  %9920 = vmatprep.subr.bf16.mxu0 %v13918_v52  ;;  %v13979_v52 = vld [vmem:[%s16115_s6 + $0x1448] ss:$48 sps:$4 sm:$0xff]  }
 0x178   : > { %9961 = vmatprep.subr.bf16.mxu1 %v13921_v54 }
 0x17a   : > { %9921 = vmatpush1.bf16.msra.mxu0 %v13916_v55 }
 0x17b   : > { %9962 = vmatpush1.bf16.msra.mxu1 %v13919_v56  ;;  %9922 = vmatprep.subr.bf16.mxu0 %v13924_v57  ;;  %v13984_v56 = vld [vmem:[%s16115_s6 + $0xdec] ss:$48 sps:$4 sm:$0xff]  }
 0x17c   : > { %9963 = vmatprep.subr.bf16.mxu1 %v13927_v58  ;;  %v13987_v57 = vld [vmem:[%s16115_s6 + $0x13ec] ss:$48 sps:$4 sm:$0xff]  }
 0x17e   : > { %9923 = vmatpush2.bf16.msra.mxu0 %v13922_v59 }
 0x17f   : > { %9964 = vmatpush2.bf16.msra.mxu1 %v13925_v60  ;;  %9924 = vmatprep.subr.bf16.mxu0 %v13930_v61  ;;  %v13982_v60 = vld [vmem:[%s16115_s6 + $0xde8] ss:$48 sps:$4 sm:$0xff]  }
 0x180   : > { %9965 = vmatprep.subr.bf16.mxu1 %v13933_v62  ;;  %v13985_v61 = vld [vmem:[%s16115_s6 + $0x13e8] ss:$48 sps:$4 sm:$0xff]  }
 0x182   : > { %9925 = vmatpush2.bf16.msra.mxu0 %v13928_v63 }
 0x183   : > { %9966 = vmatpush2.bf16.msra.mxu1 %v13931_v0  ;;  %9926 = vmatprep.subr.bf16.mxu0 %v13936_v3 }
 0x184   : > { %9967 = vmatprep.subr.bf16.mxu1 %v13939_v4  ;;  %v13993_v4 = vld [vmem:[%s16115_s6 + $0x138c] ss:$48 sps:$4 sm:$0xff]  }
 0x186   : > { %9927 = vmatpush2.bf16.msra.mxu0 %v13934_v5  ;;  %v13988_v5 = vld [vmem:[%s16115_s6 + $0xd88] ss:$48 sps:$4 sm:$0xff]  }
 0x187   : > { %9968 = vmatpush2.bf16.msra.mxu1 %v13937_v6  ;;  %9928 = vmatprep.subr.bf16.mxu0 %v13942_v7  ;;  %v13991_v6 = vld [vmem:[%s16115_s6 + $0x1388] ss:$48 sps:$4 sm:$0xff]   ;;  %v13996_v7 = vld [vmem:[%s16115_s6 + $0xd2c] ss:$48 sps:$4 sm:$0xff]  }
 0x188   : > { %9969 = vmatprep.subr.bf16.mxu1 %v13945_v8  ;;  %v13999_v8 = vld [vmem:[%s16115_s6 + $0x132c] ss:$48 sps:$4 sm:$0xff]  }
 0x18a   : > { %9929 = vmatpush2.bf16.msra.mxu0 %v13940_v11  ;;  %v13994_v11 = vld [vmem:[%s16115_s6 + $0xd28] ss:$48 sps:$4 sm:$0xff]  }
 0x18b   : > { %9970 = vmatpush2.bf16.msra.mxu1 %v13943_v12  ;;  %9930 = vmatprep.subr.bf16.mxu0 %v13948_v14  ;;  %v13997_v12 = vld [vmem:[%s16115_s6 + $0x1328] ss:$48 sps:$4 sm:$0xff]   ;;  %v14002_v14 = vld [vmem:[%s16115_s6 + $0xccc] ss:$48 sps:$4 sm:$0xff]  }
 0x18c   : > { %9971 = vmatprep.subr.bf16.mxu1 %v13951_v15  ;;  %v14005_v15 = vld [vmem:[%s16115_s6 + $0x12cc] ss:$48 sps:$4 sm:$0xff]  }
 0x18e   : > { %9931 = vmatpush2.bf16.msra.mxu0 %v13946_v16  ;;  %v14000_v16 = vld [vmem:[%s16115_s6 + $0xcc8] ss:$48 sps:$4 sm:$0xff]  }
 0x18f   : > { %9972 = vmatpush2.bf16.msra.mxu1 %v13949_v17  ;;  %9932 = vmatprep.subr.bf16.mxu0 %v13954_v19  ;;  %v14003_v17 = vld [vmem:[%s16115_s6 + $0x12c8] ss:$48 sps:$4 sm:$0xff]   ;;  %v14008_v19 = vld [vmem:[%s16115_s6 + $0xc6c] ss:$48 sps:$4 sm:$0xff]  }
 0x190   : > { %9973 = vmatprep.subr.bf16.mxu1 %v13957_v20  ;;  %v14011_v20 = vld [vmem:[%s16115_s6 + $0x126c] ss:$48 sps:$4 sm:$0xff]  }
 0x192   : > { %9933 = vmatpush2.bf16.msra.mxu0 %v13952_v23  ;;  %v14006_v23 = vld [vmem:[%s16115_s6 + $0xc68] ss:$48 sps:$4 sm:$0xff]  }
 0x193   : > { %9974 = vmatpush2.bf16.msra.mxu1 %v13955_v24  ;;  %9934 = vmatprep.subr.bf16.mxu0 %v13960_v25  ;;  %v14009_v24 = vld [vmem:[%s16115_s6 + $0x1268] ss:$48 sps:$4 sm:$0xff]   ;;  %v14014_v25 = vld [vmem:[%s16115_s6 + $0xc0c] ss:$48 sps:$4 sm:$0xff]  }
 0x194   : > { %9975 = vmatprep.subr.bf16.mxu1 %v13963_v26  ;;  %v14017_v26 = vld [vmem:[%s16115_s6 + $0x120c] ss:$48 sps:$4 sm:$0xff]  }
 0x196   : > { %9935 = vmatpush2.bf16.msra.mxu0 %v13958_v27  ;;  %v14012_v27 = vld [vmem:[%s16115_s6 + $0xc08] ss:$48 sps:$4 sm:$0xff]  }
 0x197   : > { %9976 = vmatpush2.bf16.msra.mxu1 %v13961_v28  ;;  %9936 = vmatprep.subr.bf16.mxu0 %v13966_v29  ;;  %v14015_v28 = vld [vmem:[%s16115_s6 + $0x1208] ss:$48 sps:$4 sm:$0xff]   ;;  %v14020_v29 = vld [vmem:[%s16115_s6 + $0x11ac] ss:$48 sps:$4 sm:$0xff]  }
 0x198   : > { %9977 = vmatprep.subr.bf16.mxu1 %v13969_v31  ;;  %v14023_v31 = vld [vmem:[%s16115_s6 + $0x17ac] ss:$48 sps:$4 sm:$0xff]  }
 0x19a   : > { %9937 = vmatpush2.bf16.msra.mxu0 %v13964_v32  ;;  %v14018_v32 = vld [vmem:[%s16115_s6 + $0x11a8] ss:$48 sps:$4 sm:$0xff]  }
 0x19b   : > { %9978 = vmatpush2.bf16.msra.mxu1 %v13967_v34  ;;  %9988 = vmatprep.subr.bf16.mxu0 %v13972_v35  ;;  %v14021_v34 = vld [vmem:[%s16115_s6 + $0x17a8] ss:$48 sps:$4 sm:$0xff]   ;;  %v14026_v35 = vld [vmem:[%s16115_s6 + $0x114c] ss:$48 sps:$4 sm:$0xff]  }
 0x19c   : > { %10029 = vmatprep.subr.bf16.mxu1 %v13975_v36  ;;  %v14029_v36 = vld [vmem:[%s16115_s6 + $0x174c] ss:$48 sps:$4 sm:$0xff]  }
 0x19d   : > { %v9694_v46 = vpop.f32.mrf.mxu0  ;;  %9939 = vmatmul.mubr.bf16.vlgmr.msra.gmra.mxu0 %v16218_v9 }
 0x19e   : > { %v9735_v47 = vpop.f32.mrf.mxu1  ;;  %9980 = vmatmul.mubr.bf16.vlgmr.msra.gmra.mxu1 %v16220_v10  ;;  %v9695_v48 = vadd.f32 %v9694_v46, %v16470_v13  ;;  %9989 = vmatpush1.bf16.msra.mxu0 %v13970_v37  ;;  %v14024_v37 = vld [vmem:[%s16115_s6 + $0x1148] ss:$48 sps:$4 sm:$0xff]  }
 0x19f   : > { %10030 = vmatpush1.bf16.msra.mxu1 %v13973_v39  ;;  %v9696_v54 = vpop.f32.mrf.mxu0  ;;  %9990 = vmatprep.subr.bf16.mxu0 %v13978_v40  ;;  %v14027_v39 = vld [vmem:[%s16115_s6 + $0x1748] ss:$48 sps:$4 sm:$0xff]   ;;  %v14032_v40 = vld [vmem:[%s16115_s6 + $0x10ec] ss:$48 sps:$4 sm:$0xff]  }
 0x1a0   : > { %v9737_v55 = vpop.f32.mrf.mxu1  ;;  %10031 = vmatprep.subr.bf16.mxu1 %v13981_v42  ;;  %v16545_v58 = vadd.f32 %v9735_v47, %v9695_v48  ;;  %v9697_v59 = vadd.f32 %v9696_v54, %v16474_v18  ;;  %10020 = vmatprep.mubr.bf16.mxu0 %v16251_v38  ;;  %v13990_v18 = vld [vmem:[%s16115_s6 + $0xd8c] ss:$48 sps:$4 sm:$0xff]   ;;  %v14033_v46 = vld [vmem:[%s16115_s6 + $0x16e8] ss:$48 sps:$4 sm:$0xff]  }
 0x1a1   : > { %10061 = vmatprep.mubr.bf16.mxu1 %v16255_v41  ;;  %v9698_v13 = vpop.f32.mrf.mxu0  ;;  %v14035_v42 = vld [vmem:[%s16115_s6 + $0x16ec] ss:$48 sps:$4 sm:$0xff]   ;;  %v14039_v54 = vld [vmem:[%s16115_s6 + $0x1688] ss:$48 sps:$4 sm:$0xff]  }
 0x1a2   : > { %v9739_v62 = vpop.f32.mrf.mxu1  ;;  %v16552_v63 = vadd.f32 %v9737_v55, %v9697_v59  ;;  %9991 = vmatpush1.bf16.msra.mxu0 %v13976_v45  ;;  %v14030_v45 = vld [vmem:[%s16115_s6 + $0x10e8] ss:$48 sps:$4 sm:$0xff]   ;;  %v14038_v47 = vld [vmem:[%s16115_s6 + $0x108c] ss:$48 sps:$4 sm:$0xff]  }
 0x1a3   : > { %10032 = vmatpush1.bf16.msra.mxu1 %v13979_v52  ;;  %v9699_v0 = vpop.f32.mrf.mxu0  ;;  %9992 = vmatprep.subr.bf16.mxu0 %v13984_v56  ;;  %v14041_v48 = vld [vmem:[%s16115_s6 + $0x168c] ss:$48 sps:$4 sm:$0xff]   ;;  %v14036_v52 = vld [vmem:[%s16115_s6 + $0x1088] ss:$48 sps:$4 sm:$0xff]  }
 0x1a4   : > { %v9740_v3 = vpop.f32.mrf.mxu1  ;;  %10033 = vmatprep.subr.bf16.mxu1 %v13987_v57  ;;  %v14044_v55 = vld [vmem:[%s16115_s6 + $0x102c] ss:$48 sps:$4 sm:$0xff]   ;;  %v14042_v57 = vld [vmem:[%s16115_s6 + $0x1028] ss:$48 sps:$4 sm:$0xff]  }
 0x1a5   : > { %v14047_v56 = vld [vmem:[%s16115_s6 + $0x162c] ss:$48 sps:$4 sm:$0xff]   ;;  %v14045_v59 = vld [vmem:[%s16115_s6 + $0x1628] ss:$48 sps:$4 sm:$0xff]  }
 0x1a6   : > { %9993 = vmatpush1.bf16.msra.mxu0 %v13982_v60  ;;  %v14050_v60 = vld [vmem:[%s16115_s6 + $0xfcc] ss:$48 sps:$4 sm:$0xff]   ;;  %v14048_v13 = vld [vmem:[%s16115_s6 + $0xfc8] ss:$48 sps:$4 sm:$0xff]  }
 0x1a7   : > { %10034 = vmatpush1.bf16.msra.mxu1 %v13985_v61  ;;  %9994 = vmatprep.subr.bf16.mxu0 %v13990_v18  ;;  %v14053_v61 = vld [vmem:[%s16115_s6 + $0x15cc] ss:$48 sps:$4 sm:$0xff]   ;;  %v14051_v62 = vld [vmem:[%s16115_s6 + $0x15c8] ss:$48 sps:$4 sm:$0xff]  }
 0x1a8   : > { %10035 = vmatprep.subr.bf16.mxu1 %v13993_v4  ;;  %v14056_v0 = vld [vmem:[%s16115_s6 + $0xf6c] ss:$48 sps:$4 sm:$0xff]   ;;  %v14054_v18 = vld [vmem:[%s16115_s6 + $0xf68] ss:$48 sps:$4 sm:$0xff]  }
 0x1a9   : > { %v14059_v3 = vld [vmem:[%s16115_s6 + $0x156c] ss:$48 sps:$4 sm:$0xff]   ;;  %v14057_v4 = vld [vmem:[%s16115_s6 + $0x1568] ss:$48 sps:$4 sm:$0xff]  }
 0x1aa   : > { %9995 = vmatpush1.bf16.msra.mxu0 %v13988_v5  ;;  %v14062_v5 = vld [vmem:[%s16115_s6 + $0xf0c] ss:$48 sps:$4 sm:$0xff]  }
 0x1ab   : > { %10036 = vmatpush1.bf16.msra.mxu1 %v13991_v6  ;;  %9996 = vmatprep.subr.bf16.mxu0 %v13996_v7  ;;  %v14065_v6 = vld [vmem:[%s16115_s6 + $0x150c] ss:$48 sps:$4 sm:$0xff]   ;;  %v14060_v7 = vld [vmem:[%s16115_s6 + $0xf08] ss:$48 sps:$4 sm:$0xff]  }
 0x1ac   : > { %10037 = vmatprep.subr.bf16.mxu1 %v13999_v8  ;;  %v14063_v8 = vld [vmem:[%s16115_s6 + $0x1508] ss:$48 sps:$4 sm:$0xff]  }
 0x1ae   : > { %9997 = vmatpush1.bf16.msra.mxu0 %v13994_v11  ;;  %v14068_v11 = vld [vmem:[%s16115_s6 + $0x1aac] ss:$48 sps:$4 sm:$0xff]  }
 0x1af   : > { %10038 = vmatpush1.bf16.msra.mxu1 %v13997_v12  ;;  %9998 = vmatprep.subr.bf16.mxu0 %v14002_v14  ;;  %v14071_v12 = vld [vmem:[%s16115_s6 + $0x20ac] ss:$48 sps:$4 sm:$0xff]   ;;  %v14066_v14 = vld [vmem:[%s16115_s6 + $0x1aa8] ss:$48 sps:$4 sm:$0xff]  }
 0x1b0   : > { %10039 = vmatprep.subr.bf16.mxu1 %v14005_v15  ;;  %v14069_v15 = vld [vmem:[%s16115_s6 + $0x20a8] ss:$48 sps:$4 sm:$0xff]  }
 0x1b2   : > { %9999 = vmatpush1.bf16.msra.mxu0 %v14000_v16  ;;  %v14074_v16 = vld [vmem:[%s16115_s6 + $0x1a4c] ss:$48 sps:$4 sm:$0xff]  }
 0x1b3   : > { %10040 = vmatpush1.bf16.msra.mxu1 %v14003_v17  ;;  %10000 = vmatprep.subr.bf16.mxu0 %v14008_v19  ;;  %v14077_v17 = vld [vmem:[%s16115_s6 + $0x204c] ss:$48 sps:$4 sm:$0xff]   ;;  %v14072_v19 = vld [vmem:[%s16115_s6 + $0x1a48] ss:$48 sps:$4 sm:$0xff]  }
 0x1b4   : > { %10041 = vmatprep.subr.bf16.mxu1 %v14011_v20  ;;  %v14075_v20 = vld [vmem:[%s16115_s6 + $0x2048] ss:$48 sps:$4 sm:$0xff]  }
 0x1b6   : > { %10001 = vmatpush1.bf16.msra.mxu0 %v14006_v23 }
 0x1b7   : > { %10042 = vmatpush1.bf16.msra.mxu1 %v14009_v24  ;;  %10002 = vmatprep.subr.bf16.mxu0 %v14014_v25 }
 0x1b8   : > { %10043 = vmatprep.subr.bf16.mxu1 %v14017_v26 }
 0x1ba   : > { %10003 = vmatpush1.bf16.msra.mxu0 %v14012_v27  ;;  %v14080_v27 = vld [vmem:[%s16115_s6 + $0x19ec] ss:$48 sps:$4 sm:$0xff]  }
 0x1bb   : > { %10044 = vmatpush1.bf16.msra.mxu1 %v14015_v28  ;;  %10004 = vmatprep.subr.bf16.mxu0 %v14020_v29  ;;  %v14083_v28 = vld [vmem:[%s16115_s6 + $0x1fec] ss:$48 sps:$4 sm:$0xff]   ;;  %v14078_v29 = vld [vmem:[%s16115_s6 + $0x19e8] ss:$48 sps:$4 sm:$0xff]  }
 0x1bc   : > { %10045 = vmatprep.subr.bf16.mxu1 %v14023_v31  ;;  %v14081_v31 = vld [vmem:[%s16115_s6 + $0x1fe8] ss:$48 sps:$4 sm:$0xff]  }
 0x1be   : > { %10005 = vmatpush2.bf16.msra.mxu0 %v14018_v32 }
 0x1bf   : > { %10046 = vmatpush2.bf16.msra.mxu1 %v14021_v34  ;;  %10006 = vmatprep.subr.bf16.mxu0 %v14026_v35 }
 0x1c0   : > { %10047 = vmatprep.subr.bf16.mxu1 %v14029_v36 }
 0x1c2   : > { %10007 = vmatpush2.bf16.msra.mxu0 %v14024_v37  ;;  %v14086_v37 = vld [vmem:[%s16115_s6 + $0x198c] ss:$48 sps:$4 sm:$0xff]  }
 0x1c3   : > { %10048 = vmatpush2.bf16.msra.mxu1 %v14027_v39  ;;  %10008 = vmatprep.subr.bf16.mxu0 %v14032_v40  ;;  %v14089_v39 = vld [vmem:[%s16115_s6 + $0x1f8c] ss:$48 sps:$4 sm:$0xff]   ;;  %v14084_v40 = vld [vmem:[%s16115_s6 + $0x1988] ss:$48 sps:$4 sm:$0xff]  }
 0x1c4   : > { %10049 = vmatprep.subr.bf16.mxu1 %v14035_v42  ;;  %v14087_v42 = vld [vmem:[%s16115_s6 + $0x1f88] ss:$48 sps:$4 sm:$0xff]  }
 0x1c6   : > { %10009 = vmatpush2.bf16.msra.mxu0 %v14030_v45  ;;  %v14092_v45 = vld [vmem:[%s16115_s6 + $0x192c] ss:$48 sps:$4 sm:$0xff]  }
 0x1c7   : > { %10050 = vmatpush2.bf16.msra.mxu1 %v14033_v46  ;;  %10010 = vmatprep.subr.bf16.mxu0 %v14038_v47  ;;  %v14095_v46 = vld [vmem:[%s16115_s6 + $0x1f2c] ss:$48 sps:$4 sm:$0xff]   ;;  %v14090_v47 = vld [vmem:[%s16115_s6 + $0x1928] ss:$48 sps:$4 sm:$0xff]  }
 0x1c8   : > { %10051 = vmatprep.subr.bf16.mxu1 %v14041_v48  ;;  %v14093_v48 = vld [vmem:[%s16115_s6 + $0x1f28] ss:$48 sps:$4 sm:$0xff]  }
 0x1ca   : > { %10011 = vmatpush2.bf16.msra.mxu0 %v14036_v52  ;;  %v14098_v52 = vld [vmem:[%s16115_s6 + $0x18cc] ss:$48 sps:$4 sm:$0xff]  }
 0x1cb   : > { %10052 = vmatpush2.bf16.msra.mxu1 %v14039_v54  ;;  %10012 = vmatprep.subr.bf16.mxu0 %v14044_v55  ;;  %v14101_v54 = vld [vmem:[%s16115_s6 + $0x1ecc] ss:$48 sps:$4 sm:$0xff]   ;;  %v14096_v55 = vld [vmem:[%s16115_s6 + $0x18c8] ss:$48 sps:$4 sm:$0xff]  }
 0x1cc   : > { %10053 = vmatprep.subr.bf16.mxu1 %v14047_v56  ;;  %v14099_v56 = vld [vmem:[%s16115_s6 + $0x1ec8] ss:$48 sps:$4 sm:$0xff]  }
 0x1ce   : > { %10013 = vmatpush2.bf16.msra.mxu0 %v14042_v57  ;;  %v14104_v57 = vld [vmem:[%s16115_s6 + $0x186c] ss:$48 sps:$4 sm:$0xff]  }
 0x1cf   : > { %10054 = vmatpush2.bf16.msra.mxu1 %v14045_v59  ;;  %10014 = vmatprep.subr.bf16.mxu0 %v14050_v60  ;;  %v14107_v59 = vld [vmem:[%s16115_s6 + $0x1e6c] ss:$48 sps:$4 sm:$0xff]   ;;  %v14102_v60 = vld [vmem:[%s16115_s6 + $0x1868] ss:$48 sps:$4 sm:$0xff]  }
 0x1d0   : > { %10055 = vmatprep.subr.bf16.mxu1 %v14053_v61  ;;  %v14105_v61 = vld [vmem:[%s16115_s6 + $0x1e68] ss:$48 sps:$4 sm:$0xff]  }
 0x1d2   : > { %10015 = vmatpush2.bf16.msra.mxu0 %v14048_v13  ;;  %v14110_v13 = vld [vmem:[%s16115_s6 + $0x180c] ss:$48 sps:$4 sm:$0xff]  }
 0x1d3   : > { %10056 = vmatpush2.bf16.msra.mxu1 %v14051_v62  ;;  %10016 = vmatprep.subr.bf16.mxu0 %v14056_v0  ;;  %v14113_v62 = vld [vmem:[%s16115_s6 + $0x1e0c] ss:$48 sps:$4 sm:$0xff]   ;;  %v14108_v0 = vld [vmem:[%s16115_s6 + $0x1808] ss:$48 sps:$4 sm:$0xff]  }
 0x1d4   : > { %10057 = vmatprep.subr.bf16.mxu1 %v14059_v3  ;;  %v14111_v3 = vld [vmem:[%s16115_s6 + $0x1e08] ss:$48 sps:$4 sm:$0xff]  }
 0x1d6   : > { %10017 = vmatpush2.bf16.msra.mxu0 %v14054_v18  ;;  %v14116_v18 = vld [vmem:[%s16115_s6 + $0x1dac] ss:$48 sps:$4 sm:$0xff]  }
 0x1d7   : > { %10058 = vmatpush2.bf16.msra.mxu1 %v14057_v4  ;;  %10018 = vmatprep.subr.bf16.mxu0 %v14062_v5  ;;  %v14119_v4 = vld [vmem:[%s16115_s6 + $0x23ac] ss:$48 sps:$4 sm:$0xff]   ;;  %v14114_v5 = vld [vmem:[%s16115_s6 + $0x1da8] ss:$48 sps:$4 sm:$0xff]  }
 0x1d8   : > { %10059 = vmatprep.subr.bf16.mxu1 %v14065_v6  ;;  %v14117_v6 = vld [vmem:[%s16115_s6 + $0x23a8] ss:$48 sps:$4 sm:$0xff]  }
 0x1da   : > { %10019 = vmatpush2.bf16.msra.mxu0 %v14060_v7  ;;  %v14122_v7 = vld [vmem:[%s16115_s6 + $0x1d4c] ss:$48 sps:$4 sm:$0xff]  }
 0x1db   : > { %10060 = vmatpush2.bf16.msra.mxu1 %v14063_v8  ;;  %10070 = vmatprep.subr.bf16.mxu0 %v14068_v11  ;;  %v14125_v8 = vld [vmem:[%s16115_s6 + $0x234c] ss:$48 sps:$4 sm:$0xff]   ;;  %v14120_v11 = vld [vmem:[%s16115_s6 + $0x1d48] ss:$48 sps:$4 sm:$0xff]  }
 0x1dc   : > { %10111 = vmatprep.subr.bf16.mxu1 %v14071_v12  ;;  %v14123_v12 = vld [vmem:[%s16115_s6 + $0x2348] ss:$48 sps:$4 sm:$0xff]  }
 0x1dd   : > { %v16614_v23 = vpop.f32.mrf.mxu0  ;;  %10021 = vmatmul.mubr.bf16.vlgmr.msra.gmra.mxu0 %v16298_v21 }
 0x1de   : > { %v16616_v24 = vpop.f32.mrf.mxu1  ;;  %10062 = vmatmul.mubr.bf16.vlgmr.msra.gmra.mxu1 %v16300_v22  ;;  %10071 = vmatpush1.bf16.msra.mxu0 %v14066_v14  ;;  %v14128_v14 = vld [vmem:[%s16115_s6 + $0x1cec] ss:$48 sps:$4 sm:$0xff]  }
 0x1df   : > { %10112 = vmatpush1.bf16.msra.mxu1 %v14069_v15  ;;  %v16620_v25 = vpop.f32.mrf.mxu0  ;;  %10072 = vmatprep.subr.bf16.mxu0 %v14074_v16  ;;  %v14131_v15 = vld [vmem:[%s16115_s6 + $0x22ec] ss:$48 sps:$4 sm:$0xff]   ;;  %v14126_v16 = vld [vmem:[%s16115_s6 + $0x1ce8] ss:$48 sps:$4 sm:$0xff]  }
 0x1e0   : > { %v16622_v26 = vpop.f32.mrf.mxu1  ;;  %10113 = vmatprep.subr.bf16.mxu1 %v14077_v17  ;;  %10102 = vmatprep.mubr.bf16.mxu0 %v16311_v30  ;;  %v14129_v17 = vld [vmem:[%s16115_s6 + $0x22e8] ss:$48 sps:$4 sm:$0xff]  }
 0x1e1   : > { %10143 = vmatprep.mubr.bf16.mxu1 %v16315_v33  ;;  %v9780_v32 = vpop.f32.mrf.mxu0 }
 0x1e2   : > { %v9821_v34 = vpop.f32.mrf.mxu1  ;;  %10073 = vmatpush1.bf16.msra.mxu0 %v14072_v19  ;;  %v14134_v19 = vld [vmem:[%s16115_s6 + $0x1c8c] ss:$48 sps:$4 sm:$0xff]   ;;  %v14138_v32 = vld [vmem:[%s16115_s6 + $0x1c28] ss:$48 sps:$4 sm:$0xff]  }
 0x1e3   : > { %10114 = vmatpush1.bf16.msra.mxu1 %v14075_v20  ;;  %v9781_v35 = vpop.f32.mrf.mxu0  ;;  %10074 = vmatprep.subr.bf16.mxu0 %v14080_v27  ;;  %v14137_v20 = vld [vmem:[%s16115_s6 + $0x228c] ss:$48 sps:$4 sm:$0xff]   ;;  %v14132_v27 = vld [vmem:[%s16115_s6 + $0x1c88] ss:$48 sps:$4 sm:$0xff]  }
 0x1e4   : > { %v9822_v36 = vpop.f32.mrf.mxu1  ;;  %10115 = vmatprep.subr.bf16.mxu1 %v14083_v28  ;;  %v14135_v28 = vld [vmem:[%s16115_s6 + $0x2288] ss:$48 sps:$4 sm:$0xff]   ;;  %v14146_v35 = vld [vmem:[%s16115_s6 + $0x1bcc] ss:$48 sps:$4 sm:$0xff]  }
 0x1e5   : > { %v14141_v34 = vld [vmem:[%s16115_s6 + $0x2228] ss:$48 sps:$4 sm:$0xff]   ;;  %v14149_v36 = vld [vmem:[%s16115_s6 + $0x21cc] ss:$48 sps:$4 sm:$0xff]  }
 0x1e6   : > { %10075 = vmatpush1.bf16.msra.mxu0 %v14078_v29  ;;  %v14140_v29 = vld [vmem:[%s16115_s6 + $0x1c2c] ss:$48 sps:$4 sm:$0xff]  }
 0x1e7   : > { %10116 = vmatpush1.bf16.msra.mxu1 %v14081_v31  ;;  %10076 = vmatprep.subr.bf16.mxu0 %v14086_v37  ;;  %v14143_v31 = vld [vmem:[%s16115_s6 + $0x222c] ss:$48 sps:$4 sm:$0xff]   ;;  %v14144_v37 = vld [vmem:[%s16115_s6 + $0x1bc8] ss:$48 sps:$4 sm:$0xff]  }
 0x1e8   : > { %10117 = vmatprep.subr.bf16.mxu1 %v14089_v39  ;;  %v14147_v39 = vld [vmem:[%s16115_s6 + $0x21c8] ss:$48 sps:$4 sm:$0xff]  }
 0x1ea   : > { %10077 = vmatpush1.bf16.msra.mxu0 %v14084_v40  ;;  %v14152_v40 = vld [vmem:[%s16115_s6 + $0x1b6c] ss:$48 sps:$4 sm:$0xff]  }
 0x1eb   : > { %10118 = vmatpush1.bf16.msra.mxu1 %v14087_v42  ;;  %10078 = vmatprep.subr.bf16.mxu0 %v14092_v45  ;;  %v14155_v42 = vld [vmem:[%s16115_s6 + $0x216c] ss:$48 sps:$4 sm:$0xff]   ;;  %v14150_v45 = vld [vmem:[%s16115_s6 + $0x1b68] ss:$48 sps:$4 sm:$0xff]  }
 0x1ec   : > { %10119 = vmatprep.subr.bf16.mxu1 %v14095_v46  ;;  %v14153_v46 = vld [vmem:[%s16115_s6 + $0x2168] ss:$48 sps:$4 sm:$0xff]  }
 0x1ee   : > { %10079 = vmatpush1.bf16.msra.mxu0 %v14090_v47  ;;  %v14158_v47 = vld [vmem:[%s16115_s6 + $0x1b0c] ss:$48 sps:$4 sm:$0xff]  }
 0x1ef   : > { %10120 = vmatpush1.bf16.msra.mxu1 %v14093_v48  ;;  %10080 = vmatprep.subr.bf16.mxu0 %v14098_v52  ;;  %v14161_v48 = vld [vmem:[%s16115_s6 + $0x210c] ss:$48 sps:$4 sm:$0xff]   ;;  %v14156_v52 = vld [vmem:[%s16115_s6 + $0x1b08] ss:$48 sps:$4 sm:$0xff]  }
 0x1f0   : > { %10121 = vmatprep.subr.bf16.mxu1 %v14101_v54  ;;  %v14159_v54 = vld [vmem:[%s16115_s6 + $0x2108] ss:$48 sps:$4 sm:$0xff]  }
 0x1f2   : > { %10081 = vmatpush1.bf16.msra.mxu0 %v14096_v55  ;;  %v14164_v55 = vld [vmem:[%s16115_s6 + $0x26ac] ss:$48 sps:$4 sm:$0xff]  }
 0x1f3   : > { %10122 = vmatpush1.bf16.msra.mxu1 %v14099_v56  ;;  %10082 = vmatprep.subr.bf16.mxu0 %v14104_v57  ;;  %v14167_v56 = vld [vmem:[%s16115_s6 + $0x2cac] ss:$48 sps:$4 sm:$0xff]   ;;  %v9777_v57 = vadd.f32 %v16614_v23, %v16545_v58 }
 0x1f4   : > { %10123 = vmatprep.subr.bf16.mxu1 %v14107_v59  ;;  %v14162_v59 = vld [vmem:[%s16115_s6 + $0x26a8] ss:$48 sps:$4 sm:$0xff]  }
 0x1f6   : > { %10083 = vmatpush1.bf16.msra.mxu0 %v14102_v60  ;;  %v14165_v60 = vld [vmem:[%s16115_s6 + $0x2ca8] ss:$48 sps:$4 sm:$0xff]  }
 0x1f7   : > { %10124 = vmatpush1.bf16.msra.mxu1 %v14105_v61  ;;  %10084 = vmatprep.subr.bf16.mxu0 %v14110_v13  ;;  %v9779_v61 = vadd.f32 %v16620_v25, %v16552_v63  ;;  %v14170_v13 = vld [vmem:[%s16115_s6 + $0x264c] ss:$48 sps:$4 sm:$0xff]  }
 0x1f8   : > { %10125 = vmatprep.subr.bf16.mxu1 %v14113_v62  ;;  %v14173_v62 = vld [vmem:[%s16115_s6 + $0x2c4c] ss:$48 sps:$4 sm:$0xff]  }
 0x1f9   : > { %v9820_v63 = vadd.f32 %v16622_v26, %v9779_v61  ;;  %v14215_v61 = vld [vmem:[%s16115_s6 + $0x2fac] ss:$48 sps:$4 sm:$0xff]  }
 0x1fa   : > { %10085 = vmatpush1.bf16.msra.mxu0 %v14108_v0  ;;  %v9818_v0 = vadd.f32 %v16616_v24, %v9777_v57  ;;  %v319_v24 = vld [vmem:[#allocation2] sm:$0xff]  ;;  %v14204_v57 = vld [vmem:[%s16115_s6 + $0x2408] ss:$48 sps:$4 sm:$0xff]  }
 0x1fb   : > { %10126 = vmatpush1.bf16.msra.mxu1 %v14111_v3  ;;  %10086 = vmatprep.subr.bf16.mxu0 %v14116_v18  ;;  %v14168_v3 = vld [vmem:[%s16115_s6 + $0x2648] ss:$48 sps:$4 sm:$0xff]  }
 0x1fc   : > { %10127 = vmatprep.subr.bf16.mxu1 %v14119_v4  ;;  %v14171_v18 = vld [vmem:[%s16115_s6 + $0x2c48] ss:$48 sps:$4 sm:$0xff]  }
 0x1fe   : > { %10087 = vmatpush2.bf16.msra.mxu0 %v14114_v5  ;;  %v318_v5 = vld [vmem:[#allocation2 + $0x30] sm:$0xff] }
 0x1ff   : > { %10128 = vmatpush2.bf16.msra.mxu1 %v14117_v6  ;;  %10088 = vmatprep.subr.bf16.mxu0 %v14122_v7  ;;  %v14176_v7 = vld [vmem:[%s16115_s6 + $0x25ec] ss:$48 sps:$4 sm:$0xff]  }
 0x200   : > { %10129 = vmatprep.subr.bf16.mxu1 %v14125_v8  ;;  %v14179_v8 = vld [vmem:[%s16115_s6 + $0x2bec] ss:$48 sps:$4 sm:$0xff]  }
 0x202   : > { %10089 = vmatpush2.bf16.msra.mxu0 %v14120_v11 }
 0x203   : > { %10130 = vmatpush2.bf16.msra.mxu1 %v14123_v12  ;;  %10090 = vmatprep.subr.bf16.mxu0 %v14128_v14  ;;  %v14174_v14 = vld [vmem:[%s16115_s6 + $0x25e8] ss:$48 sps:$4 sm:$0xff]  }
 0x204   : > { %10131 = vmatprep.subr.bf16.mxu1 %v14131_v15  ;;  %v14177_v15 = vld [vmem:[%s16115_s6 + $0x2be8] ss:$48 sps:$4 sm:$0xff]  }
 0x206   : > { %10091 = vmatpush2.bf16.msra.mxu0 %v14126_v16 }
 0x207   : > { %10132 = vmatpush2.bf16.msra.mxu1 %v14129_v17  ;;  %10092 = vmatprep.subr.bf16.mxu0 %v14134_v19 }
 0x208   : > { %10133 = vmatprep.subr.bf16.mxu1 %v14137_v20 }
 0x20a   : > { %10093 = vmatpush2.bf16.msra.mxu0 %v14132_v27 }
 0x20b   : > { %10134 = vmatpush2.bf16.msra.mxu1 %v14135_v28  ;;  %10094 = vmatprep.subr.bf16.mxu0 %v14140_v29  ;;  %v14182_v28 = vld [vmem:[%s16115_s6 + $0x258c] ss:$48 sps:$4 sm:$0xff]  }
 0x20c   : > { %10135 = vmatprep.subr.bf16.mxu1 %v14143_v31  ;;  %v14185_v29 = vld [vmem:[%s16115_s6 + $0x2b8c] ss:$48 sps:$4 sm:$0xff]  }
 0x20e   : > { %10095 = vmatpush2.bf16.msra.mxu0 %v14138_v32  ;;  %v14180_v32 = vld [vmem:[%s16115_s6 + $0x2588] ss:$48 sps:$4 sm:$0xff]  }
 0x20f   : > { %10136 = vmatpush2.bf16.msra.mxu1 %v14141_v34  ;;  %10096 = vmatprep.subr.bf16.mxu0 %v14146_v35  ;;  %v14183_v34 = vld [vmem:[%s16115_s6 + $0x2b88] ss:$48 sps:$4 sm:$0xff]   ;;  %v14188_v35 = vld [vmem:[%s16115_s6 + $0x252c] ss:$48 sps:$4 sm:$0xff]  }
 0x210   : > { %10137 = vmatprep.subr.bf16.mxu1 %v14149_v36  ;;  %v14191_v36 = vld [vmem:[%s16115_s6 + $0x2b2c] ss:$48 sps:$4 sm:$0xff]  }
 0x212   : > { %10097 = vmatpush2.bf16.msra.mxu0 %v14144_v37  ;;  %v14186_v37 = vld [vmem:[%s16115_s6 + $0x2528] ss:$48 sps:$4 sm:$0xff]  }
 0x213   : > { %10138 = vmatpush2.bf16.msra.mxu1 %v14147_v39  ;;  %10098 = vmatprep.subr.bf16.mxu0 %v14152_v40  ;;  %v14189_v39 = vld [vmem:[%s16115_s6 + $0x2b28] ss:$48 sps:$4 sm:$0xff]   ;;  %v14194_v40 = vld [vmem:[%s16115_s6 + $0x24cc] ss:$48 sps:$4 sm:$0xff]  }
 0x214   : > { %10139 = vmatprep.subr.bf16.mxu1 %v14155_v42  ;;  %v14197_v42 = vld [vmem:[%s16115_s6 + $0x2acc] ss:$48 sps:$4 sm:$0xff]  }
 0x216   : > { %10099 = vmatpush2.bf16.msra.mxu0 %v14150_v45  ;;  %v14192_v45 = vld [vmem:[%s16115_s6 + $0x24c8] ss:$48 sps:$4 sm:$0xff]  }
 0x217   : > { %10140 = vmatpush2.bf16.msra.mxu1 %v14153_v46  ;;  %10100 = vmatprep.subr.bf16.mxu0 %v14158_v47  ;;  %v14195_v46 = vld [vmem:[%s16115_s6 + $0x2ac8] ss:$48 sps:$4 sm:$0xff]   ;;  %v14200_v47 = vld [vmem:[%s16115_s6 + $0x246c] ss:$48 sps:$4 sm:$0xff]  }
 0x218   : > { %10141 = vmatprep.subr.bf16.mxu1 %v14161_v48  ;;  %v14203_v48 = vld [vmem:[%s16115_s6 + $0x2a6c] ss:$48 sps:$4 sm:$0xff]  }
 0x21a   : > { %10101 = vmatpush2.bf16.msra.mxu0 %v14156_v52  ;;  %v14198_v52 = vld [vmem:[%s16115_s6 + $0x2468] ss:$48 sps:$4 sm:$0xff]  }
 0x21b   : > { %10142 = vmatpush2.bf16.msra.mxu1 %v14159_v54  ;;  %10152 = vmatprep.subr.bf16.mxu0 %v14164_v55  ;;  %v14201_v54 = vld [vmem:[%s16115_s6 + $0x2a68] ss:$48 sps:$4 sm:$0xff]   ;;  %v14206_v55 = vld [vmem:[%s16115_s6 + $0x240c] ss:$48 sps:$4 sm:$0xff]  }
 0x21c   : > { %10193 = vmatprep.subr.bf16.mxu1 %v14167_v56  ;;  %v14209_v56 = vld [vmem:[%s16115_s6 + $0x2a0c] ss:$48 sps:$4 sm:$0xff]  }
 0x21d   : > { %v9858_v4 = vpop.f32.mrf.mxu0  ;;  %10103 = vmatmul.mubr.bf16.vlgmr.msra.gmra.mxu0 %v16380_v43 }
 0x21e   : > { %v9899_v58 = vpop.f32.mrf.mxu1  ;;  %10144 = vmatmul.mubr.bf16.vlgmr.msra.gmra.mxu1 %v16382_v44  ;;  %v9859_v23 = vadd.f32 %v9858_v4, %v9818_v0  ;;  %10153 = vmatpush1.bf16.msra.mxu0 %v14162_v59  ;;  %v14207_v59 = vld [vmem:[%s16115_s6 + $0x2a08] ss:$48 sps:$4 sm:$0xff]   ;;  %v14218_v0 = vld [vmem:[%s16115_s6 + $0x294c] ss:$48 sps:$4 sm:$0xff]  }
 0x21f   : > { %10194 = vmatpush1.bf16.msra.mxu1 %v14165_v60  ;;  %v9860_v25 = vpop.f32.mrf.mxu0  ;;  %10154 = vmatprep.subr.bf16.mxu0 %v14170_v13  ;;  %v14212_v60 = vld [vmem:[%s16115_s6 + $0x29ac] ss:$48 sps:$4 sm:$0xff]   ;;  %v14210_v13 = vld [vmem:[%s16115_s6 + $0x29a8] ss:$48 sps:$4 sm:$0xff]  }
 0x220   : > { %v9901_v6 = vpop.f32.mrf.mxu1  ;;  %10195 = vmatprep.subr.bf16.mxu1 %v14173_v62  ;;  %v9900_v11 = vadd.f32 %v9899_v58, %v9859_v23  ;;  %v9861_v12 = vadd.f32 %v9860_v25, %v9820_v63  ;;  %10184 = vmatprep.mubr.bf16.mxu0 %v16388_v49  ;;  %v14213_v62 = vld [vmem:[%s16115_s6 + $0x2fa8] ss:$48 sps:$4 sm:$0xff]   ;;  %v14227_v58 = vld [vmem:[%s16115_s6 + $0x2eec] ss:$48 sps:$4 sm:$0xff]  }
 0x221   : > { %10225 = vmatprep.mubr.bf16.mxu1 %v16390_v51  ;;  %v9862_v26 = vpop.f32.mrf.mxu0  ;;  %v14219_v4 = vld [vmem:[%s16115_s6 + $0x2f48] ss:$48 sps:$4 sm:$0xff]   ;;  %v14230_v25 = vld [vmem:[%s16115_s6 + $0x288c] ss:$48 sps:$4 sm:$0xff]  }
 0x222   : > { %v9903_v16 = vpop.f32.mrf.mxu1  ;;  %v11546_v17 = vadd.f32 %v9900_v11, %v318_v5  ;;  %v9902_v19 = vadd.f32 %v9901_v6, %v9861_v12  ;;  %10155 = vmatpush1.bf16.msra.mxu0 %v14168_v3  ;;  %v14221_v3 = vld [vmem:[%s16115_s6 + $0x2f4c] ss:$48 sps:$4 sm:$0xff]   ;;  %v14222_v63 = vld [vmem:[%s16115_s6 + $0x28e8] ss:$48 sps:$4 sm:$0xff]  }
 0x223   : > { %10196 = vmatpush1.bf16.msra.mxu1 %v14171_v18  ;;  %v9863_v20 = vpop.f32.mrf.mxu0  ;;  %10156 = vmatprep.subr.bf16.mxu0 %v14176_v7  ;;  %v14216_v18 = vld [vmem:[%s16115_s6 + $0x2948] ss:$48 sps:$4 sm:$0xff]   ;;  %v14224_v5 = vld [vmem:[%s16115_s6 + $0x28ec] ss:$48 sps:$4 sm:$0xff]  }
 0x224   : > { %v9904_v27 = vpop.f32.mrf.mxu1  ;;  %10197 = vmatprep.subr.bf16.mxu1 %v14179_v8  ;;  %11558 = vst [vmem:[#allocation2 + $0x30] sm:$0xff] %v11546_v17  ;;  %v11547_v31 = vadd.f32 %v9902_v19, %v319_v24  ;;  %v14225_v23 = vld [vmem:[%s16115_s6 + $0x2ee8] ss:$48 sps:$4 sm:$0xff]   ;;  %v14233_v24 = vld [vmem:[%s16115_s6 + $0x2e8c] ss:$48 sps:$4 sm:$0xff]  }
 0x225   : > { %v14228_v6 = vld [vmem:[%s16115_s6 + $0x2888] ss:$48 sps:$4 sm:$0xff]   ;;  %v14236_v8 = vld [vmem:[%s16115_s6 + $0x282c] ss:$48 sps:$4 sm:$0xff]  }
 0x226   : > { %11559 = vst [vmem:[#allocation2] sm:$0xff] %v11547_v31  ;;  %10157 = vmatpush1.bf16.msra.mxu0 %v14174_v14  ;;  %v14231_v7 = vld [vmem:[%s16115_s6 + $0x2e88] ss:$48 sps:$4 sm:$0xff]   ;;  %v14239_v11 = vld [vmem:[%s16115_s6 + $0x2e2c] ss:$48 sps:$4 sm:$0xff]  }
 0x227   : > { %10198 = vmatpush1.bf16.msra.mxu1 %v14177_v15  ;;  %10158 = vmatprep.subr.bf16.mxu0 %v14182_v28  ;;  %v14234_v12 = vld [vmem:[%s16115_s6 + $0x2828] ss:$48 sps:$4 sm:$0xff]   ;;  %v14242_v15 = vld [vmem:[%s16115_s6 + $0x27cc] ss:$48 sps:$4 sm:$0xff]  }
 0x228   : > { %10199 = vmatprep.subr.bf16.mxu1 %v14185_v29  ;;  %v14237_v14 = vld [vmem:[%s16115_s6 + $0x2e28] ss:$48 sps:$4 sm:$0xff]   ;;  %v14245_v26 = vld [vmem:[%s16115_s6 + $0x2dcc] ss:$48 sps:$4 sm:$0xff]  }
 0x229   : > { %v14240_v16 = vld [vmem:[%s16115_s6 + $0x27c8] ss:$48 sps:$4 sm:$0xff]   ;;  %v14248_v19 = vld [vmem:[%s16115_s6 + $0x276c] ss:$48 sps:$4 sm:$0xff]  }
 0x22a   : > { %10159 = vmatpush1.bf16.msra.mxu0 %v14180_v32  ;;  %v14243_v17 = vld [vmem:[%s16115_s6 + $0x2dc8] ss:$48 sps:$4 sm:$0xff]   ;;  %v14251_v20 = vld [vmem:[%s16115_s6 + $0x2d6c] ss:$48 sps:$4 sm:$0xff]  }
 0x22b   : > { %10200 = vmatpush1.bf16.msra.mxu1 %v14183_v34  ;;  %10160 = vmatprep.subr.bf16.mxu0 %v14188_v35  ;;  %v14246_v27 = vld [vmem:[%s16115_s6 + $0x2768] ss:$48 sps:$4 sm:$0xff]   ;;  %v14254_v29 = vld [vmem:[%s16115_s6 + $0x270c] ss:$48 sps:$4 sm:$0xff]   ;;  %v14260_v35 = vld [vmem:[%s16115_s6 + $0x2b4] ss:$48 sps:$4 sm:$0xff]  }
 0x22c   : > { %10201 = vmatprep.subr.bf16.mxu1 %v14191_v36  ;;  %v14249_v28 = vld [vmem:[%s16115_s6 + $0x2d68] ss:$48 sps:$4 sm:$0xff]   ;;  %v14257_v31 = vld [vmem:[%s16115_s6 + $0x2d0c] ss:$48 sps:$4 sm:$0xff]   ;;  %v14263_v36 = vld [vmem:[%s16115_s6 + $0x8b4] ss:$48 sps:$4 sm:$0xff]  }
 0x22d   : > { %v14252_v32 = vld [vmem:[%s16115_s6 + $0x2708] ss:$48 sps:$4 sm:$0xff]  }
 0x22e   : > { %10161 = vmatpush1.bf16.msra.mxu0 %v14186_v37  ;;  %v14255_v34 = vld [vmem:[%s16115_s6 + $0x2d08] ss:$48 sps:$4 sm:$0xff]   ;;  %v14258_v37 = vld [vmem:[%s16115_s6 + $0x2b0] ss:$48 sps:$4 sm:$0xff]  }
 0x22f   : > { %10202 = vmatpush1.bf16.msra.mxu1 %v14189_v39  ;;  %10162 = vmatprep.subr.bf16.mxu0 %v14194_v40  ;;  %v14261_v39 = vld [vmem:[%s16115_s6 + $0x8b0] ss:$48 sps:$4 sm:$0xff]   ;;  %v14266_v40 = vld [vmem:[%s16115_s6 + $0x254] ss:$48 sps:$4 sm:$0xff]  }
 0x230   : > { %10203 = vmatprep.subr.bf16.mxu1 %v14197_v42  ;;  %v14269_v42 = vld [vmem:[%s16115_s6 + $0x854] ss:$48 sps:$4 sm:$0xff]  }
 0x232   : > { %10163 = vmatpush1.bf16.msra.mxu0 %v14192_v45  ;;  %v14264_v45 = vld [vmem:[%s16115_s6 + $0x250] ss:$48 sps:$4 sm:$0xff]  }
 0x233   : > { %10204 = vmatpush1.bf16.msra.mxu1 %v14195_v46  ;;  %10164 = vmatprep.subr.bf16.mxu0 %v14200_v47  ;;  %v14267_v46 = vld [vmem:[%s16115_s6 + $0x850] ss:$48 sps:$4 sm:$0xff]  }
 0x234   : > { %10205 = vmatprep.subr.bf16.mxu1 %v14203_v48 }
 0x236   : > { %10165 = vmatpush1.bf16.msra.mxu0 %v14198_v52 }
 0x237   : > { %10206 = vmatpush1.bf16.msra.mxu1 %v14201_v54  ;;  %10166 = vmatprep.subr.bf16.mxu0 %v14206_v55 }
 0x238   : > { %10207 = vmatprep.subr.bf16.mxu1 %v14209_v56  ;;  %v14272_v56 = vld [vmem:[%s16115_s6 + $0x1f4] ss:$48 sps:$4 sm:$0xff]  }
 0x23a   : > { %10167 = vmatpush1.bf16.msra.mxu0 %v14204_v57  ;;  %v14275_v57 = vld [vmem:[%s16115_s6 + $0x7f4] ss:$48 sps:$4 sm:$0xff]  }
 0x23b   : > { %10208 = vmatpush1.bf16.msra.mxu1 %v14207_v59  ;;  %10168 = vmatprep.subr.bf16.mxu0 %v14212_v60  ;;  %v14270_v60 = vld [vmem:[%s16115_s6 + $0x1f0] ss:$48 sps:$4 sm:$0xff]  }
 0x23c   : > { %10209 = vmatprep.subr.bf16.mxu1 %v14215_v61  ;;  %v14273_v61 = vld [vmem:[%s16115_s6 + $0x7f0] ss:$48 sps:$4 sm:$0xff]  }
 0x23e   : > { %10169 = vmatpush2.bf16.msra.mxu0 %v14210_v13 }
 0x23f   : > { %10210 = vmatpush2.bf16.msra.mxu1 %v14213_v62  ;;  %10170 = vmatprep.subr.bf16.mxu0 %v14218_v0 }
 0x240   : > { %10211 = vmatprep.subr.bf16.mxu1 %v14221_v3 }
 0x242   : > { %10171 = vmatpush2.bf16.msra.mxu0 %v14216_v18  ;;  %v14278_v18 = vld [vmem:[%s16115_s6 + $0x194] ss:$48 sps:$4 sm:$0xff]  }
 0x243   : > { %10212 = vmatpush2.bf16.msra.mxu1 %v14219_v4  ;;  %10172 = vmatprep.subr.bf16.mxu0 %v14224_v5  ;;  %v14281_v4 = vld [vmem:[%s16115_s6 + $0x794] ss:$48 sps:$4 sm:$0xff]   ;;  %v14276_v5 = vld [vmem:[%s16115_s6 + $0x190] ss:$48 sps:$4 sm:$0xff]  }
 0x244   : > { %10213 = vmatprep.subr.bf16.mxu1 %v14227_v58  ;;  %v14279_v58 = vld [vmem:[%s16115_s6 + $0x790] ss:$48 sps:$4 sm:$0xff]  }
 0x246   : > { %10173 = vmatpush2.bf16.msra.mxu0 %v14222_v63  ;;  %v14284_v63 = vld [vmem:[%s16115_s6 + $0x134] ss:$48 sps:$4 sm:$0xff]  }
 0x247   : > { %10214 = vmatpush2.bf16.msra.mxu1 %v14225_v23  ;;  %10174 = vmatprep.subr.bf16.mxu0 %v14230_v25  ;;  %v14287_v23 = vld [vmem:[%s16115_s6 + $0x734] ss:$48 sps:$4 sm:$0xff]   ;;  %v14282_v25 = vld [vmem:[%s16115_s6 + $0x130] ss:$48 sps:$4 sm:$0xff]  }
 0x248   : > { %10215 = vmatprep.subr.bf16.mxu1 %v14233_v24  ;;  %v14285_v24 = vld [vmem:[%s16115_s6 + $0x730] ss:$48 sps:$4 sm:$0xff]  }
 0x24a   : > { %10175 = vmatpush2.bf16.msra.mxu0 %v14228_v6  ;;  %v14290_v6 = vld [vmem:[%s16115_s6 + $0xd4] ss:$48 sps:$4 sm:$0xff]  }
 0x24b   : > { %10216 = vmatpush2.bf16.msra.mxu1 %v14231_v7  ;;  %10176 = vmatprep.subr.bf16.mxu0 %v14236_v8  ;;  %v14293_v7 = vld [vmem:[%s16115_s6 + $0x6d4] ss:$48 sps:$4 sm:$0xff]   ;;  %v14288_v8 = vld [vmem:[%s16115_s6 + $0xd0] ss:$48 sps:$4 sm:$0xff]  }
 0x24c   : > { %10217 = vmatprep.subr.bf16.mxu1 %v14239_v11  ;;  %v14291_v11 = vld [vmem:[%s16115_s6 + $0x6d0] ss:$48 sps:$4 sm:$0xff]  }
 0x24e   : > { %10177 = vmatpush2.bf16.msra.mxu0 %v14234_v12  ;;  %v14296_v12 = vld [vmem:[%s16115_s6 + $0x74] ss:$48 sps:$4 sm:$0xff]  }
 0x24f   : > { %10218 = vmatpush2.bf16.msra.mxu1 %v14237_v14  ;;  %10178 = vmatprep.subr.bf16.mxu0 %v14242_v15  ;;  %v14299_v14 = vld [vmem:[%s16115_s6 + $0x674] ss:$48 sps:$4 sm:$0xff]   ;;  %v14294_v15 = vld [vmem:[%s16115_s6 + $0x70] ss:$48 sps:$4 sm:$0xff]  }
 0x250   : > { %10219 = vmatprep.subr.bf16.mxu1 %v14245_v26  ;;  %v14297_v26 = vld [vmem:[%s16115_s6 + $0x670] ss:$48 sps:$4 sm:$0xff]  }
 0x252   : > { %10179 = vmatpush2.bf16.msra.mxu0 %v14240_v16  ;;  %v14302_v16 = vld [vmem:[%s16115_s6 + $0x14] ss:$48 sps:$4 sm:$0xff]  }
 0x253   : > { %10220 = vmatpush2.bf16.msra.mxu1 %v14243_v17  ;;  %10180 = vmatprep.subr.bf16.mxu0 %v14248_v19  ;;  %v14305_v17 = vld [vmem:[%s16115_s6 + $0x614] ss:$48 sps:$4 sm:$0xff]   ;;  %v14300_v19 = vld [vmem:[%s16115_s6 + $0x10] ss:$48 sps:$4 sm:$0xff]  }
 0x254   : > { %10221 = vmatprep.subr.bf16.mxu1 %v14251_v20  ;;  %v14303_v20 = vld [vmem:[%s16115_s6 + $0x610] ss:$48 sps:$4 sm:$0xff]  }
 0x256   : > { %10181 = vmatpush2.bf16.msra.mxu0 %v14246_v27  ;;  %v14308_v27 = vld [vmem:[%s16115_s6 + $0x5b4] ss:$48 sps:$4 sm:$0xff]  }
 0x257   : > { %10222 = vmatpush2.bf16.msra.mxu1 %v14249_v28  ;;  %10182 = vmatprep.subr.bf16.mxu0 %v14254_v29  ;;  %v14311_v28 = vld [vmem:[%s16115_s6 + $0xbb4] ss:$48 sps:$4 sm:$0xff]   ;;  %v14306_v29 = vld [vmem:[%s16115_s6 + $0x5b0] ss:$48 sps:$4 sm:$0xff]  }
 0x258   : > { %10223 = vmatprep.subr.bf16.mxu1 %v14257_v31  ;;  %v14309_v31 = vld [vmem:[%s16115_s6 + $0xbb0] ss:$48 sps:$4 sm:$0xff]  }
 0x25a   : > { %10183 = vmatpush2.bf16.msra.mxu0 %v14252_v32  ;;  %v14314_v32 = vld [vmem:[%s16115_s6 + $0x554] ss:$48 sps:$4 sm:$0xff]  }
 0x25b   : > { %10224 = vmatpush2.bf16.msra.mxu1 %v14255_v34  ;;  %10234 = vmatprep.subr.bf16.mxu0 %v14260_v35  ;;  %v14317_v34 = vld [vmem:[%s16115_s6 + $0xb54] ss:$48 sps:$4 sm:$0xff]   ;;  %v14312_v35 = vld [vmem:[%s16115_s6 + $0x550] ss:$48 sps:$4 sm:$0xff]  }
 0x25c   : > { %10275 = vmatprep.subr.bf16.mxu1 %v14263_v36  ;;  %v14315_v36 = vld [vmem:[%s16115_s6 + $0xb50] ss:$48 sps:$4 sm:$0xff]  }
 0x25d   : > { %v9940_v47 = vpop.f32.mrf.mxu0  ;;  %10185 = vmatmul.mubr.bf16.vlgmr.msra.gmra.mxu0 %v16458_v1 }
 0x25e   : > { %v9981_v48 = vpop.f32.mrf.mxu1  ;;  %10226 = vmatmul.mubr.bf16.vlgmr.msra.gmra.mxu1 %v16460_v2  ;;  %10235 = vmatpush1.bf16.msra.mxu0 %v14258_v37  ;;  %v14320_v37 = vld [vmem:[%s16115_s6 + $0x4f4] ss:$48 sps:$4 sm:$0xff]  }
 0x25f   : > { %v16766_v52 = vadd.f32 %v9981_v48, %v9940_v47  ;;  %10276 = vmatpush1.bf16.msra.mxu1 %v14261_v39  ;;  %v9942_v54 = vpop.f32.mrf.mxu0  ;;  %10236 = vmatprep.subr.bf16.mxu0 %v14266_v40  ;;  %v14323_v39 = vld [vmem:[%s16115_s6 + $0xaf4] ss:$48 sps:$4 sm:$0xff]   ;;  %v14318_v40 = vld [vmem:[%s16115_s6 + $0x4f0] ss:$48 sps:$4 sm:$0xff]  }
 0x260   : > { %v9983_v55 = vpop.f32.mrf.mxu1  ;;  %10277 = vmatprep.subr.bf16.mxu1 %v14269_v42  ;;  %10266 = vmatprep.mubr.bf16.mxu0 %v16191_v50  ;;  %v14321_v42 = vld [vmem:[%s16115_s6 + $0xaf0] ss:$48 sps:$4 sm:$0xff]  }
 0x261   : > { %v16770_v59 = vadd.f32 %v9983_v55, %v9942_v54  ;;  %10307 = vmatprep.mubr.bf16.mxu1 %v16195_v53  ;;  %v9944_v13 = vpop.f32.mrf.mxu0  ;;  %v14324_v47 = vld [vmem:[%s16115_s6 + $0x490] ss:$48 sps:$4 sm:$0xff]   ;;  %v14332_v54 = vld [vmem:[%s16115_s6 + $0x434] ss:$48 sps:$4 sm:$0xff]  }
 0x262   : > { %v9985_v62 = vpop.f32.mrf.mxu1  ;;  %10237 = vmatpush1.bf16.msra.mxu0 %v14264_v45  ;;  %v14326_v45 = vld [vmem:[%s16115_s6 + $0x494] ss:$48 sps:$4 sm:$0xff]   ;;  %v14327_v48 = vld [vmem:[%s16115_s6 + $0xa90] ss:$48 sps:$4 sm:$0xff]  }
 0x263   : > { %10278 = vmatpush1.bf16.msra.mxu1 %v14267_v46  ;;  %v9945_v0 = vpop.f32.mrf.mxu0  ;;  %10238 = vmatprep.subr.bf16.mxu0 %v14272_v56  ;;  %v14329_v46 = vld [vmem:[%s16115_s6 + $0xa94] ss:$48 sps:$4 sm:$0xff]   ;;  %v14330_v56 = vld [vmem:[%s16115_s6 + $0x430] ss:$48 sps:$4 sm:$0xff]  }
 0x264   : > { %v9986_v3 = vpop.f32.mrf.mxu1  ;;  %10279 = vmatprep.subr.bf16.mxu1 %v14275_v57  ;;  %v14335_v55 = vld [vmem:[%s16115_s6 + $0xa34] ss:$48 sps:$4 sm:$0xff]   ;;  %v14333_v57 = vld [vmem:[%s16115_s6 + $0xa30] ss:$48 sps:$4 sm:$0xff]  }
 0x265   : > { %v14336_v13 = vld [vmem:[%s16115_s6 + $0x3d0] ss:$48 sps:$4 sm:$0xff]   ;;  %v14344_v0 = vld [vmem:[%s16115_s6 + $0x374] ss:$48 sps:$4 sm:$0xff]  }
 0x266   : > { %10239 = vmatpush1.bf16.msra.mxu0 %v14270_v60  ;;  %v14338_v60 = vld [vmem:[%s16115_s6 + $0x3d4] ss:$48 sps:$4 sm:$0xff]   ;;  %v14339_v62 = vld [vmem:[%s16115_s6 + $0x9d0] ss:$48 sps:$4 sm:$0xff]  }
 0x267   : > { %10280 = vmatpush1.bf16.msra.mxu1 %v14273_v61  ;;  %10240 = vmatprep.subr.bf16.mxu0 %v14278_v18  ;;  %v14341_v61 = vld [vmem:[%s16115_s6 + $0x9d4] ss:$48 sps:$4 sm:$0xff]   ;;  %v14342_v18 = vld [vmem:[%s16115_s6 + $0x370] ss:$48 sps:$4 sm:$0xff]  }
 0x268   : > { %10281 = vmatprep.subr.bf16.mxu1 %v14281_v4  ;;  %v14347_v3 = vld [vmem:[%s16115_s6 + $0x974] ss:$48 sps:$4 sm:$0xff]   ;;  %v14345_v4 = vld [vmem:[%s16115_s6 + $0x970] ss:$48 sps:$4 sm:$0xff]  }
 0x26a   : > { %10241 = vmatpush1.bf16.msra.mxu0 %v14276_v5  ;;  %v14350_v5 = vld [vmem:[%s16115_s6 + $0x314] ss:$48 sps:$4 sm:$0xff]  }
 0x26b   : > { %10282 = vmatpush1.bf16.msra.mxu1 %v14279_v58  ;;  %10242 = vmatprep.subr.bf16.mxu0 %v14284_v63  ;;  %v14353_v58 = vld [vmem:[%s16115_s6 + $0x914] ss:$48 sps:$4 sm:$0xff]   ;;  %v14348_v63 = vld [vmem:[%s16115_s6 + $0x310] ss:$48 sps:$4 sm:$0xff]  }
 0x26c   : > { %10283 = vmatprep.subr.bf16.mxu1 %v14287_v23  ;;  %v14351_v23 = vld [vmem:[%s16115_s6 + $0x910] ss:$48 sps:$4 sm:$0xff]  }
 0x26e   : > { %10243 = vmatpush1.bf16.msra.mxu0 %v14282_v25  ;;  %v14356_v25 = vld [vmem:[%s16115_s6 + $0xeb4] ss:$48 sps:$4 sm:$0xff]  }
 0x26f   : > { %10284 = vmatpush1.bf16.msra.mxu1 %v14285_v24  ;;  %10244 = vmatprep.subr.bf16.mxu0 %v14290_v6  ;;  %v14359_v24 = vld [vmem:[%s16115_s6 + $0x14b4] ss:$48 sps:$4 sm:$0xff]   ;;  %v14354_v6 = vld [vmem:[%s16115_s6 + $0xeb0] ss:$48 sps:$4 sm:$0xff]  }
 0x270   : > { %10285 = vmatprep.subr.bf16.mxu1 %v14293_v7  ;;  %v14357_v7 = vld [vmem:[%s16115_s6 + $0x14b0] ss:$48 sps:$4 sm:$0xff]  }
 0x272   : > { %10245 = vmatpush1.bf16.msra.mxu0 %v14288_v8  ;;  %v14362_v8 = vld [vmem:[%s16115_s6 + $0xe54] ss:$48 sps:$4 sm:$0xff]  }
 0x273   : > { %10286 = vmatpush1.bf16.msra.mxu1 %v14291_v11  ;;  %10246 = vmatprep.subr.bf16.mxu0 %v14296_v12  ;;  %v14365_v11 = vld [vmem:[%s16115_s6 + $0x1454] ss:$48 sps:$4 sm:$0xff]   ;;  %v14360_v12 = vld [vmem:[%s16115_s6 + $0xe50] ss:$48 sps:$4 sm:$0xff]  }
 0x274   : > { %10287 = vmatprep.subr.bf16.mxu1 %v14299_v14 }
 0x276   : > { %10247 = vmatpush1.bf16.msra.mxu0 %v14294_v15 }
 0x277   : > { %10288 = vmatpush1.bf16.msra.mxu1 %v14297_v26  ;;  %10248 = vmatprep.subr.bf16.mxu0 %v14302_v16  ;;  %v14363_v16 = vld [vmem:[%s16115_s6 + $0x1450] ss:$48 sps:$4 sm:$0xff]  }
 0x278   : > { %10289 = vmatprep.subr.bf16.mxu1 %v14305_v17 }
 0x27a   : > { %10249 = vmatpush1.bf16.msra.mxu0 %v14300_v19 }
 0x27b   : > { %10290 = vmatpush1.bf16.msra.mxu1 %v14303_v20  ;;  %10250 = vmatprep.subr.bf16.mxu0 %v14308_v27  ;;  %v14368_v20 = vld [vmem:[%s16115_s6 + $0xdf4] ss:$48 sps:$4 sm:$0xff]  }
 0x27c   : > { %10291 = vmatprep.subr.bf16.mxu1 %v14311_v28  ;;  %v14371_v27 = vld [vmem:[%s16115_s6 + $0x13f4] ss:$48 sps:$4 sm:$0xff]  }
 0x27e   : > { %10251 = vmatpush2.bf16.msra.mxu0 %v14306_v29 }
 0x27f   : > { %10292 = vmatpush2.bf16.msra.mxu1 %v14309_v31  ;;  %10252 = vmatprep.subr.bf16.mxu0 %v14314_v32  ;;  %v14366_v31 = vld [vmem:[%s16115_s6 + $0xdf0] ss:$48 sps:$4 sm:$0xff]  }
 0x280   : > { %10293 = vmatprep.subr.bf16.mxu1 %v14317_v34  ;;  %v14369_v32 = vld [vmem:[%s16115_s6 + $0x13f0] ss:$48 sps:$4 sm:$0xff]  }
 0x282   : > { %10253 = vmatpush2.bf16.msra.mxu0 %v14312_v35 }
 0x283   : > { %10294 = vmatpush2.bf16.msra.mxu1 %v14315_v36  ;;  %10254 = vmatprep.subr.bf16.mxu0 %v14320_v37 }
 0x284   : > { %10295 = vmatprep.subr.bf16.mxu1 %v14323_v39  ;;  %v14377_v39 = vld [vmem:[%s16115_s6 + $0x1394] ss:$48 sps:$4 sm:$0xff]  }
 0x286   : > { %10255 = vmatpush2.bf16.msra.mxu0 %v14318_v40  ;;  %v14372_v40 = vld [vmem:[%s16115_s6 + $0xd90] ss:$48 sps:$4 sm:$0xff]  }
 0x287   : > { %10296 = vmatpush2.bf16.msra.mxu1 %v14321_v42  ;;  %10256 = vmatprep.subr.bf16.mxu0 %v14326_v45  ;;  %v14375_v42 = vld [vmem:[%s16115_s6 + $0x1390] ss:$48 sps:$4 sm:$0xff]   ;;  %v14380_v45 = vld [vmem:[%s16115_s6 + $0xd34] ss:$48 sps:$4 sm:$0xff]  }
 0x288   : > { %10297 = vmatprep.subr.bf16.mxu1 %v14329_v46  ;;  %v14383_v46 = vld [vmem:[%s16115_s6 + $0x1334] ss:$48 sps:$4 sm:$0xff]  }
 0x28a   : > { %10257 = vmatpush2.bf16.msra.mxu0 %v14324_v47  ;;  %v14378_v47 = vld [vmem:[%s16115_s6 + $0xd30] ss:$48 sps:$4 sm:$0xff]  }
 0x28b   : > { %10298 = vmatpush2.bf16.msra.mxu1 %v14327_v48  ;;  %10258 = vmatprep.subr.bf16.mxu0 %v14332_v54  ;;  %v14381_v48 = vld [vmem:[%s16115_s6 + $0x1330] ss:$48 sps:$4 sm:$0xff]   ;;  %v14386_v54 = vld [vmem:[%s16115_s6 + $0xcd4] ss:$48 sps:$4 sm:$0xff]  }
 0x28c   : > { %10299 = vmatprep.subr.bf16.mxu1 %v14335_v55  ;;  %v14389_v55 = vld [vmem:[%s16115_s6 + $0x12d4] ss:$48 sps:$4 sm:$0xff]  }
 0x28e   : > { %10259 = vmatpush2.bf16.msra.mxu0 %v14330_v56  ;;  %v14384_v56 = vld [vmem:[%s16115_s6 + $0xcd0] ss:$48 sps:$4 sm:$0xff]  }
 0x28f   : > { %10300 = vmatpush2.bf16.msra.mxu1 %v14333_v57  ;;  %10260 = vmatprep.subr.bf16.mxu0 %v14338_v60  ;;  %v14387_v57 = vld [vmem:[%s16115_s6 + $0x12d0] ss:$48 sps:$4 sm:$0xff]   ;;  %v14392_v60 = vld [vmem:[%s16115_s6 + $0xc74] ss:$48 sps:$4 sm:$0xff]  }
 0x290   : > { %10301 = vmatprep.subr.bf16.mxu1 %v14341_v61  ;;  %v14395_v61 = vld [vmem:[%s16115_s6 + $0x1274] ss:$48 sps:$4 sm:$0xff]  }
 0x292   : > { %10261 = vmatpush2.bf16.msra.mxu0 %v14336_v13  ;;  %v14390_v13 = vld [vmem:[%s16115_s6 + $0xc70] ss:$48 sps:$4 sm:$0xff]  }
 0x293   : > { %10302 = vmatpush2.bf16.msra.mxu1 %v14339_v62  ;;  %10262 = vmatprep.subr.bf16.mxu0 %v14344_v0  ;;  %v14393_v62 = vld [vmem:[%s16115_s6 + $0x1270] ss:$48 sps:$4 sm:$0xff]   ;;  %v14398_v0 = vld [vmem:[%s16115_s6 + $0xc14] ss:$48 sps:$4 sm:$0xff]  }
 0x294   : > { %10303 = vmatprep.subr.bf16.mxu1 %v14347_v3  ;;  %v14401_v3 = vld [vmem:[%s16115_s6 + $0x1214] ss:$48 sps:$4 sm:$0xff]  }
 0x296   : > { %10263 = vmatpush2.bf16.msra.mxu0 %v14342_v18  ;;  %v14396_v18 = vld [vmem:[%s16115_s6 + $0xc10] ss:$48 sps:$4 sm:$0xff]  }
 0x297   : > { %10304 = vmatpush2.bf16.msra.mxu1 %v14345_v4  ;;  %10264 = vmatprep.subr.bf16.mxu0 %v14350_v5  ;;  %v14399_v4 = vld [vmem:[%s16115_s6 + $0x1210] ss:$48 sps:$4 sm:$0xff]   ;;  %v14404_v5 = vld [vmem:[%s16115_s6 + $0x11b4] ss:$48 sps:$4 sm:$0xff]  }
 0x298   : > { %10305 = vmatprep.subr.bf16.mxu1 %v14353_v58  ;;  %v14407_v58 = vld [vmem:[%s16115_s6 + $0x17b4] ss:$48 sps:$4 sm:$0xff]  }
 0x29a   : > { %10265 = vmatpush2.bf16.msra.mxu0 %v14348_v63  ;;  %v14402_v63 = vld [vmem:[%s16115_s6 + $0x11b0] ss:$48 sps:$4 sm:$0xff]  }
 0x29b   : > { %10306 = vmatpush2.bf16.msra.mxu1 %v14351_v23  ;;  %10316 = vmatprep.subr.bf16.mxu0 %v14356_v25  ;;  %v14405_v23 = vld [vmem:[%s16115_s6 + $0x17b0] ss:$48 sps:$4 sm:$0xff]   ;;  %v14410_v25 = vld [vmem:[%s16115_s6 + $0x1154] ss:$48 sps:$4 sm:$0xff]  }
 0x29c   : > { %10357 = vmatprep.subr.bf16.mxu1 %v14359_v24  ;;  %v14413_v24 = vld [vmem:[%s16115_s6 + $0x1754] ss:$48 sps:$4 sm:$0xff]  }
 0x29d   : > { %v10022_v14 = vpop.f32.mrf.mxu0  ;;  %10267 = vmatmul.mubr.bf16.vlgmr.msra.gmra.mxu0 %v16218_v9 }
 0x29e   : > { %v10063_v15 = vpop.f32.mrf.mxu1  ;;  %10308 = vmatmul.mubr.bf16.vlgmr.msra.gmra.mxu1 %v16220_v10  ;;  %v10023_v26 = vadd.f32 %v10022_v14, %v16766_v52  ;;  %10317 = vmatpush1.bf16.msra.mxu0 %v14354_v6  ;;  %v14408_v6 = vld [vmem:[%s16115_s6 + $0x1150] ss:$48 sps:$4 sm:$0xff]  }
 0x29f   : > { %10358 = vmatpush1.bf16.msra.mxu1 %v14357_v7  ;;  %v10024_v17 = vpop.f32.mrf.mxu0  ;;  %10318 = vmatprep.subr.bf16.mxu0 %v14362_v8  ;;  %v14411_v7 = vld [vmem:[%s16115_s6 + $0x1750] ss:$48 sps:$4 sm:$0xff]   ;;  %v14416_v8 = vld [vmem:[%s16115_s6 + $0x10f4] ss:$48 sps:$4 sm:$0xff]  }
 0x2a0   : > { %v10065_v19 = vpop.f32.mrf.mxu1  ;;  %10359 = vmatprep.subr.bf16.mxu1 %v14365_v11  ;;  %v16841_v28 = vadd.f32 %v10063_v15, %v10023_v26  ;;  %v10025_v29 = vadd.f32 %v10024_v17, %v16770_v59  ;;  %10348 = vmatprep.mubr.bf16.mxu0 %v16251_v38  ;;  %v14374_v59 = vld [vmem:[%s16115_s6 + $0xd94] ss:$48 sps:$4 sm:$0xff]   ;;  %v14417_v14 = vld [vmem:[%s16115_s6 + $0x16f0] ss:$48 sps:$4 sm:$0xff]  }
 0x2a1   : > { %10389 = vmatprep.mubr.bf16.mxu1 %v16255_v41  ;;  %v10026_v52 = vpop.f32.mrf.mxu0  ;;  %v14419_v11 = vld [vmem:[%s16115_s6 + $0x16f4] ss:$48 sps:$4 sm:$0xff]   ;;  %v14423_v17 = vld [vmem:[%s16115_s6 + $0x1690] ss:$48 sps:$4 sm:$0xff]  }
 0x2a2   : > { %v10067_v34 = vpop.f32.mrf.mxu1  ;;  %v16848_v35 = vadd.f32 %v10065_v19, %v10025_v29  ;;  %10319 = vmatpush1.bf16.msra.mxu0 %v14360_v12  ;;  %v14414_v12 = vld [vmem:[%s16115_s6 + $0x10f0] ss:$48 sps:$4 sm:$0xff]   ;;  %v14422_v15 = vld [vmem:[%s16115_s6 + $0x1094] ss:$48 sps:$4 sm:$0xff]  }
 0x2a3   : > { %10360 = vmatpush1.bf16.msra.mxu1 %v14363_v16  ;;  %v10027_v36 = vpop.f32.mrf.mxu0  ;;  %10320 = vmatprep.subr.bf16.mxu0 %v14368_v20  ;;  %v14425_v26 = vld [vmem:[%s16115_s6 + $0x1694] ss:$48 sps:$4 sm:$0xff]   ;;  %v14420_v16 = vld [vmem:[%s16115_s6 + $0x1090] ss:$48 sps:$4 sm:$0xff]  }
 0x2a4   : > { %v10068_v37 = vpop.f32.mrf.mxu1  ;;  %10361 = vmatprep.subr.bf16.mxu1 %v14371_v27  ;;  %v14428_v19 = vld [vmem:[%s16115_s6 + $0x1034] ss:$48 sps:$4 sm:$0xff]   ;;  %v14426_v27 = vld [vmem:[%s16115_s6 + $0x1030] ss:$48 sps:$4 sm:$0xff]  }
 0x2a5   : > { %v14431_v20 = vld [vmem:[%s16115_s6 + $0x1634] ss:$48 sps:$4 sm:$0xff]   ;;  %v14429_v29 = vld [vmem:[%s16115_s6 + $0x1630] ss:$48 sps:$4 sm:$0xff]  }
 0x2a6   : > { %10321 = vmatpush1.bf16.msra.mxu0 %v14366_v31  ;;  %v14434_v31 = vld [vmem:[%s16115_s6 + $0xfd4] ss:$48 sps:$4 sm:$0xff]   ;;  %v14432_v52 = vld [vmem:[%s16115_s6 + $0xfd0] ss:$48 sps:$4 sm:$0xff]  }
 0x2a7   : > { %10362 = vmatpush1.bf16.msra.mxu1 %v14369_v32  ;;  %10322 = vmatprep.subr.bf16.mxu0 %v14374_v59  ;;  %v14437_v32 = vld [vmem:[%s16115_s6 + $0x15d4] ss:$48 sps:$4 sm:$0xff]   ;;  %v14435_v34 = vld [vmem:[%s16115_s6 + $0x15d0] ss:$48 sps:$4 sm:$0xff]  }
 0x2a8   : > { %10363 = vmatprep.subr.bf16.mxu1 %v14377_v39  ;;  %v14440_v36 = vld [vmem:[%s16115_s6 + $0xf74] ss:$48 sps:$4 sm:$0xff]   ;;  %v14438_v59 = vld [vmem:[%s16115_s6 + $0xf70] ss:$48 sps:$4 sm:$0xff]  }
 0x2a9   : > { %v14443_v37 = vld [vmem:[%s16115_s6 + $0x1574] ss:$48 sps:$4 sm:$0xff]   ;;  %v14441_v39 = vld [vmem:[%s16115_s6 + $0x1570] ss:$48 sps:$4 sm:$0xff]  }
 0x2aa   : > { %10323 = vmatpush1.bf16.msra.mxu0 %v14372_v40  ;;  %v14446_v40 = vld [vmem:[%s16115_s6 + $0xf14] ss:$48 sps:$4 sm:$0xff]  }
 0x2ab   : > { %10364 = vmatpush1.bf16.msra.mxu1 %v14375_v42  ;;  %10324 = vmatprep.subr.bf16.mxu0 %v14380_v45  ;;  %v14449_v42 = vld [vmem:[%s16115_s6 + $0x1514] ss:$48 sps:$4 sm:$0xff]   ;;  %v14444_v45 = vld [vmem:[%s16115_s6 + $0xf10] ss:$48 sps:$4 sm:$0xff]  }
 0x2ac   : > { %10365 = vmatprep.subr.bf16.mxu1 %v14383_v46  ;;  %v14447_v46 = vld [vmem:[%s16115_s6 + $0x1510] ss:$48 sps:$4 sm:$0xff]  }
 0x2ae   : > { %10325 = vmatpush1.bf16.msra.mxu0 %v14378_v47  ;;  %v14452_v47 = vld [vmem:[%s16115_s6 + $0x1ab4] ss:$48 sps:$4 sm:$0xff]  }
 0x2af   : > { %10366 = vmatpush1.bf16.msra.mxu1 %v14381_v48  ;;  %10326 = vmatprep.subr.bf16.mxu0 %v14386_v54  ;;  %v14455_v48 = vld [vmem:[%s16115_s6 + $0x20b4] ss:$48 sps:$4 sm:$0xff]   ;;  %v14450_v54 = vld [vmem:[%s16115_s6 + $0x1ab0] ss:$48 sps:$4 sm:$0xff]  }
 0x2b0   : > { %10367 = vmatprep.subr.bf16.mxu1 %v14389_v55  ;;  %v14453_v55 = vld [vmem:[%s16115_s6 + $0x20b0] ss:$48 sps:$4 sm:$0xff]  }
 0x2b2   : > { %10327 = vmatpush1.bf16.msra.mxu0 %v14384_v56  ;;  %v14458_v56 = vld [vmem:[%s16115_s6 + $0x1a54] ss:$48 sps:$4 sm:$0xff]  }
 0x2b3   : > { %10368 = vmatpush1.bf16.msra.mxu1 %v14387_v57  ;;  %10328 = vmatprep.subr.bf16.mxu0 %v14392_v60  ;;  %v14461_v57 = vld [vmem:[%s16115_s6 + $0x2054] ss:$48 sps:$4 sm:$0xff]   ;;  %v14456_v60 = vld [vmem:[%s16115_s6 + $0x1a50] ss:$48 sps:$4 sm:$0xff]  }
 0x2b4   : > { %10369 = vmatprep.subr.bf16.mxu1 %v14395_v61  ;;  %v14459_v61 = vld [vmem:[%s16115_s6 + $0x2050] ss:$48 sps:$4 sm:$0xff]  }
 0x2b6   : > { %10329 = vmatpush1.bf16.msra.mxu0 %v14390_v13 }
 0x2b7   : > { %10370 = vmatpush1.bf16.msra.mxu1 %v14393_v62  ;;  %10330 = vmatprep.subr.bf16.mxu0 %v14398_v0 }
 0x2b8   : > { %10371 = vmatprep.subr.bf16.mxu1 %v14401_v3 }
 0x2ba   : > { %10331 = vmatpush1.bf16.msra.mxu0 %v14396_v18  ;;  %v14464_v18 = vld [vmem:[%s16115_s6 + $0x19f4] ss:$48 sps:$4 sm:$0xff]  }
 0x2bb   : > { %10372 = vmatpush1.bf16.msra.mxu1 %v14399_v4  ;;  %10332 = vmatprep.subr.bf16.mxu0 %v14404_v5  ;;  %v14467_v4 = vld [vmem:[%s16115_s6 + $0x1ff4] ss:$48 sps:$4 sm:$0xff]   ;;  %v14462_v5 = vld [vmem:[%s16115_s6 + $0x19f0] ss:$48 sps:$4 sm:$0xff]  }
 0x2bc   : > { %10373 = vmatprep.subr.bf16.mxu1 %v14407_v58  ;;  %v14465_v58 = vld [vmem:[%s16115_s6 + $0x1ff0] ss:$48 sps:$4 sm:$0xff]  }
 0x2be   : > { %10333 = vmatpush2.bf16.msra.mxu0 %v14402_v63 }
 0x2bf   : > { %10374 = vmatpush2.bf16.msra.mxu1 %v14405_v23  ;;  %10334 = vmatprep.subr.bf16.mxu0 %v14410_v25 }
 0x2c0   : > { %10375 = vmatprep.subr.bf16.mxu1 %v14413_v24 }
 0x2c2   : > { %10335 = vmatpush2.bf16.msra.mxu0 %v14408_v6  ;;  %v14470_v6 = vld [vmem:[%s16115_s6 + $0x1994] ss:$48 sps:$4 sm:$0xff]  }
 0x2c3   : > { %10376 = vmatpush2.bf16.msra.mxu1 %v14411_v7  ;;  %10336 = vmatprep.subr.bf16.mxu0 %v14416_v8  ;;  %v14473_v7 = vld [vmem:[%s16115_s6 + $0x1f94] ss:$48 sps:$4 sm:$0xff]   ;;  %v14468_v8 = vld [vmem:[%s16115_s6 + $0x1990] ss:$48 sps:$4 sm:$0xff]  }
 0x2c4   : > { %10377 = vmatprep.subr.bf16.mxu1 %v14419_v11  ;;  %v14471_v11 = vld [vmem:[%s16115_s6 + $0x1f90] ss:$48 sps:$4 sm:$0xff]  }
 0x2c6   : > { %10337 = vmatpush2.bf16.msra.mxu0 %v14414_v12  ;;  %v14476_v12 = vld [vmem:[%s16115_s6 + $0x1934] ss:$48 sps:$4 sm:$0xff]  }
 0x2c7   : > { %10378 = vmatpush2.bf16.msra.mxu1 %v14417_v14  ;;  %10338 = vmatprep.subr.bf16.mxu0 %v14422_v15  ;;  %v14479_v14 = vld [vmem:[%s16115_s6 + $0x1f34] ss:$48 sps:$4 sm:$0xff]   ;;  %v14474_v15 = vld [vmem:[%s16115_s6 + $0x1930] ss:$48 sps:$4 sm:$0xff]  }
 0x2c8   : > { %10379 = vmatprep.subr.bf16.mxu1 %v14425_v26  ;;  %v14477_v26 = vld [vmem:[%s16115_s6 + $0x1f30] ss:$48 sps:$4 sm:$0xff]  }
 0x2ca   : > { %10339 = vmatpush2.bf16.msra.mxu0 %v14420_v16  ;;  %v14482_v16 = vld [vmem:[%s16115_s6 + $0x18d4] ss:$48 sps:$4 sm:$0xff]  }
 0x2cb   : > { %10380 = vmatpush2.bf16.msra.mxu1 %v14423_v17  ;;  %10340 = vmatprep.subr.bf16.mxu0 %v14428_v19  ;;  %v14485_v17 = vld [vmem:[%s16115_s6 + $0x1ed4] ss:$48 sps:$4 sm:$0xff]   ;;  %v14480_v19 = vld [vmem:[%s16115_s6 + $0x18d0] ss:$48 sps:$4 sm:$0xff]  }
 0x2cc   : > { %10381 = vmatprep.subr.bf16.mxu1 %v14431_v20  ;;  %v14483_v20 = vld [vmem:[%s16115_s6 + $0x1ed0] ss:$48 sps:$4 sm:$0xff]  }
 0x2ce   : > { %10341 = vmatpush2.bf16.msra.mxu0 %v14426_v27  ;;  %v14488_v27 = vld [vmem:[%s16115_s6 + $0x1874] ss:$48 sps:$4 sm:$0xff]  }
 0x2cf   : > { %10382 = vmatpush2.bf16.msra.mxu1 %v14429_v29  ;;  %10342 = vmatprep.subr.bf16.mxu0 %v14434_v31  ;;  %v14491_v29 = vld [vmem:[%s16115_s6 + $0x1e74] ss:$48 sps:$4 sm:$0xff]   ;;  %v14486_v31 = vld [vmem:[%s16115_s6 + $0x1870] ss:$48 sps:$4 sm:$0xff]  }
 0x2d0   : > { %10383 = vmatprep.subr.bf16.mxu1 %v14437_v32  ;;  %v14489_v32 = vld [vmem:[%s16115_s6 + $0x1e70] ss:$48 sps:$4 sm:$0xff]  }
 0x2d2   : > { %10343 = vmatpush2.bf16.msra.mxu0 %v14432_v52  ;;  %v14494_v52 = vld [vmem:[%s16115_s6 + $0x1814] ss:$48 sps:$4 sm:$0xff]  }
 0x2d3   : > { %10384 = vmatpush2.bf16.msra.mxu1 %v14435_v34  ;;  %10344 = vmatprep.subr.bf16.mxu0 %v14440_v36  ;;  %v14497_v34 = vld [vmem:[%s16115_s6 + $0x1e14] ss:$48 sps:$4 sm:$0xff]   ;;  %v14492_v36 = vld [vmem:[%s16115_s6 + $0x1810] ss:$48 sps:$4 sm:$0xff]  }
 0x2d4   : > { %10385 = vmatprep.subr.bf16.mxu1 %v14443_v37  ;;  %v14495_v37 = vld [vmem:[%s16115_s6 + $0x1e10] ss:$48 sps:$4 sm:$0xff]  }
 0x2d6   : > { %10345 = vmatpush2.bf16.msra.mxu0 %v14438_v59  ;;  %v14500_v59 = vld [vmem:[%s16115_s6 + $0x1db4] ss:$48 sps:$4 sm:$0xff]  }
 0x2d7   : > { %10386 = vmatpush2.bf16.msra.mxu1 %v14441_v39  ;;  %10346 = vmatprep.subr.bf16.mxu0 %v14446_v40  ;;  %v14503_v39 = vld [vmem:[%s16115_s6 + $0x23b4] ss:$48 sps:$4 sm:$0xff]   ;;  %v14498_v40 = vld [vmem:[%s16115_s6 + $0x1db0] ss:$48 sps:$4 sm:$0xff]  }
 0x2d8   : > { %10387 = vmatprep.subr.bf16.mxu1 %v14449_v42  ;;  %v14501_v42 = vld [vmem:[%s16115_s6 + $0x23b0] ss:$48 sps:$4 sm:$0xff]  }
 0x2da   : > { %10347 = vmatpush2.bf16.msra.mxu0 %v14444_v45  ;;  %v14506_v45 = vld [vmem:[%s16115_s6 + $0x1d54] ss:$48 sps:$4 sm:$0xff]  }
 0x2db   : > { %10388 = vmatpush2.bf16.msra.mxu1 %v14447_v46  ;;  %10398 = vmatprep.subr.bf16.mxu0 %v14452_v47  ;;  %v14509_v46 = vld [vmem:[%s16115_s6 + $0x2354] ss:$48 sps:$4 sm:$0xff]   ;;  %v14504_v47 = vld [vmem:[%s16115_s6 + $0x1d50] ss:$48 sps:$4 sm:$0xff]  }
 0x2dc   : > { %10439 = vmatprep.subr.bf16.mxu1 %v14455_v48  ;;  %v14507_v48 = vld [vmem:[%s16115_s6 + $0x2350] ss:$48 sps:$4 sm:$0xff]  }
 0x2dd   : > { %v16910_v13 = vpop.f32.mrf.mxu0  ;;  %10349 = vmatmul.mubr.bf16.vlgmr.msra.gmra.mxu0 %v16298_v21 }
 0x2de   : > { %v16912_v62 = vpop.f32.mrf.mxu1  ;;  %10390 = vmatmul.mubr.bf16.vlgmr.msra.gmra.mxu1 %v16300_v22  ;;  %10399 = vmatpush1.bf16.msra.mxu0 %v14450_v54  ;;  %v14512_v54 = vld [vmem:[%s16115_s6 + $0x1cf4] ss:$48 sps:$4 sm:$0xff]  }
 0x2df   : > { %10440 = vmatpush1.bf16.msra.mxu1 %v14453_v55  ;;  %v16916_v0 = vpop.f32.mrf.mxu0  ;;  %10400 = vmatprep.subr.bf16.mxu0 %v14458_v56  ;;  %v14515_v55 = vld [vmem:[%s16115_s6 + $0x22f4] ss:$48 sps:$4 sm:$0xff]   ;;  %v14510_v56 = vld [vmem:[%s16115_s6 + $0x1cf0] ss:$48 sps:$4 sm:$0xff]  }
 0x2e0   : > { %v16918_v3 = vpop.f32.mrf.mxu1  ;;  %10441 = vmatprep.subr.bf16.mxu1 %v14461_v57  ;;  %10430 = vmatprep.mubr.bf16.mxu0 %v16311_v30  ;;  %v14513_v57 = vld [vmem:[%s16115_s6 + $0x22f0] ss:$48 sps:$4 sm:$0xff]  }
 0x2e1   : > { %10471 = vmatprep.mubr.bf16.mxu1 %v16315_v33  ;;  %v10108_v63 = vpop.f32.mrf.mxu0 }
 0x2e2   : > { %v10149_v23 = vpop.f32.mrf.mxu1  ;;  %10401 = vmatpush1.bf16.msra.mxu0 %v14456_v60  ;;  %v14518_v60 = vld [vmem:[%s16115_s6 + $0x1c94] ss:$48 sps:$4 sm:$0xff]   ;;  %v14522_v63 = vld [vmem:[%s16115_s6 + $0x1c30] ss:$48 sps:$4 sm:$0xff]  }
 0x2e3   : > { %10442 = vmatpush1.bf16.msra.mxu1 %v14459_v61  ;;  %v10109_v25 = vpop.f32.mrf.mxu0  ;;  %10402 = vmatprep.subr.bf16.mxu0 %v14464_v18  ;;  %v14521_v61 = vld [vmem:[%s16115_s6 + $0x2294] ss:$48 sps:$4 sm:$0xff]   ;;  %v14516_v18 = vld [vmem:[%s16115_s6 + $0x1c90] ss:$48 sps:$4 sm:$0xff]  }
 0x2e4   : > { %v10150_v24 = vpop.f32.mrf.mxu1  ;;  %10443 = vmatprep.subr.bf16.mxu1 %v14467_v4  ;;  %v14519_v4 = vld [vmem:[%s16115_s6 + $0x2290] ss:$48 sps:$4 sm:$0xff]   ;;  %v14530_v25 = vld [vmem:[%s16115_s6 + $0x1bd4] ss:$48 sps:$4 sm:$0xff]  }
 0x2e5   : > { %v14525_v23 = vld [vmem:[%s16115_s6 + $0x2230] ss:$48 sps:$4 sm:$0xff]   ;;  %v14533_v24 = vld [vmem:[%s16115_s6 + $0x21d4] ss:$48 sps:$4 sm:$0xff]  }
 0x2e6   : > { %10403 = vmatpush1.bf16.msra.mxu0 %v14462_v5  ;;  %v14524_v5 = vld [vmem:[%s16115_s6 + $0x1c34] ss:$48 sps:$4 sm:$0xff]  }
 0x2e7   : > { %10444 = vmatpush1.bf16.msra.mxu1 %v14465_v58  ;;  %10404 = vmatprep.subr.bf16.mxu0 %v14470_v6  ;;  %v14527_v58 = vld [vmem:[%s16115_s6 + $0x2234] ss:$48 sps:$4 sm:$0xff]   ;;  %v14528_v6 = vld [vmem:[%s16115_s6 + $0x1bd0] ss:$48 sps:$4 sm:$0xff]  }
 0x2e8   : > { %10445 = vmatprep.subr.bf16.mxu1 %v14473_v7  ;;  %v14531_v7 = vld [vmem:[%s16115_s6 + $0x21d0] ss:$48 sps:$4 sm:$0xff]  }
 0x2ea   : > { %10405 = vmatpush1.bf16.msra.mxu0 %v14468_v8  ;;  %v14536_v8 = vld [vmem:[%s16115_s6 + $0x1b74] ss:$48 sps:$4 sm:$0xff]  }
 0x2eb   : > { %10446 = vmatpush1.bf16.msra.mxu1 %v14471_v11  ;;  %10406 = vmatprep.subr.bf16.mxu0 %v14476_v12  ;;  %v14539_v11 = vld [vmem:[%s16115_s6 + $0x2174] ss:$48 sps:$4 sm:$0xff]   ;;  %v14534_v12 = vld [vmem:[%s16115_s6 + $0x1b70] ss:$48 sps:$4 sm:$0xff]  }
 0x2ec   : > { %10447 = vmatprep.subr.bf16.mxu1 %v14479_v14  ;;  %v14537_v14 = vld [vmem:[%s16115_s6 + $0x2170] ss:$48 sps:$4 sm:$0xff]  }
 0x2ee   : > { %10407 = vmatpush1.bf16.msra.mxu0 %v14474_v15  ;;  %v14542_v15 = vld [vmem:[%s16115_s6 + $0x1b14] ss:$48 sps:$4 sm:$0xff]  }
 0x2ef   : > { %10448 = vmatpush1.bf16.msra.mxu1 %v14477_v26  ;;  %10408 = vmatprep.subr.bf16.mxu0 %v14482_v16  ;;  %v14545_v26 = vld [vmem:[%s16115_s6 + $0x2114] ss:$48 sps:$4 sm:$0xff]   ;;  %v14540_v16 = vld [vmem:[%s16115_s6 + $0x1b10] ss:$48 sps:$4 sm:$0xff]  }
 0x2f0   : > { %10449 = vmatprep.subr.bf16.mxu1 %v14485_v17  ;;  %v14543_v17 = vld [vmem:[%s16115_s6 + $0x2110] ss:$48 sps:$4 sm:$0xff]  }
 0x2f2   : > { %10409 = vmatpush1.bf16.msra.mxu0 %v14480_v19  ;;  %v14548_v19 = vld [vmem:[%s16115_s6 + $0x26b4] ss:$48 sps:$4 sm:$0xff]  }
 0x2f3   : > { %10450 = vmatpush1.bf16.msra.mxu1 %v14483_v20  ;;  %10410 = vmatprep.subr.bf16.mxu0 %v14488_v27  ;;  %v14551_v20 = vld [vmem:[%s16115_s6 + $0x2cb4] ss:$48 sps:$4 sm:$0xff]   ;;  %v10105_v27 = vadd.f32 %v16910_v13, %v16841_v28 }
 0x2f4   : > { %10451 = vmatprep.subr.bf16.mxu1 %v14491_v29  ;;  %v14546_v29 = vld [vmem:[%s16115_s6 + $0x26b0] ss:$48 sps:$4 sm:$0xff]  }
 0x2f6   : > { %10411 = vmatpush1.bf16.msra.mxu0 %v14486_v31  ;;  %v14549_v31 = vld [vmem:[%s16115_s6 + $0x2cb0] ss:$48 sps:$4 sm:$0xff]  }
 0x2f7   : > { %10452 = vmatpush1.bf16.msra.mxu1 %v14489_v32  ;;  %10412 = vmatprep.subr.bf16.mxu0 %v14494_v52  ;;  %v10107_v32 = vadd.f32 %v16916_v0, %v16848_v35  ;;  %v14554_v52 = vld [vmem:[%s16115_s6 + $0x2654] ss:$48 sps:$4 sm:$0xff]  }
 0x2f8   : > { %10453 = vmatprep.subr.bf16.mxu1 %v14497_v34  ;;  %v14557_v34 = vld [vmem:[%s16115_s6 + $0x2c54] ss:$48 sps:$4 sm:$0xff]  }
 0x2f9   : > { %v10148_v35 = vadd.f32 %v16918_v3, %v10107_v32  ;;  %v14599_v32 = vld [vmem:[%s16115_s6 + $0x2fb4] ss:$48 sps:$4 sm:$0xff]  }
 0x2fa   : > { %10413 = vmatpush1.bf16.msra.mxu0 %v14492_v36  ;;  %v10146_v36 = vadd.f32 %v16912_v62, %v10105_v27  ;;  %v321_v62 = vld [vmem:[#allocation2 + $0x18] sm:$0xff]  ;;  %v14588_v27 = vld [vmem:[%s16115_s6 + $0x2410] ss:$48 sps:$4 sm:$0xff]  }
 0x2fb   : > { %10454 = vmatpush1.bf16.msra.mxu1 %v14495_v37  ;;  %10414 = vmatprep.subr.bf16.mxu0 %v14500_v59  ;;  %v14552_v37 = vld [vmem:[%s16115_s6 + $0x2650] ss:$48 sps:$4 sm:$0xff]  }
 0x2fc   : > { %10455 = vmatprep.subr.bf16.mxu1 %v14503_v39  ;;  %v14555_v59 = vld [vmem:[%s16115_s6 + $0x2c50] ss:$48 sps:$4 sm:$0xff]  }
 0x2fe   : > { %10415 = vmatpush2.bf16.msra.mxu0 %v14498_v40  ;;  %v320_v40 = vld [vmem:[#allocation2 + $0x58] sm:$0xff] }
 0x2ff   : > { %10456 = vmatpush2.bf16.msra.mxu1 %v14501_v42  ;;  %10416 = vmatprep.subr.bf16.mxu0 %v14506_v45  ;;  %v14560_v45 = vld [vmem:[%s16115_s6 + $0x25f4] ss:$48 sps:$4 sm:$0xff]  }
 0x300   : > { %10457 = vmatprep.subr.bf16.mxu1 %v14509_v46  ;;  %v14563_v46 = vld [vmem:[%s16115_s6 + $0x2bf4] ss:$48 sps:$4 sm:$0xff]  }
 0x302   : > { %10417 = vmatpush2.bf16.msra.mxu0 %v14504_v47 }
 0x303   : > { %10458 = vmatpush2.bf16.msra.mxu1 %v14507_v48  ;;  %10418 = vmatprep.subr.bf16.mxu0 %v14512_v54  ;;  %v14558_v54 = vld [vmem:[%s16115_s6 + $0x25f0] ss:$48 sps:$4 sm:$0xff]  }
 0x304   : > { %10459 = vmatprep.subr.bf16.mxu1 %v14515_v55  ;;  %v14561_v55 = vld [vmem:[%s16115_s6 + $0x2bf0] ss:$48 sps:$4 sm:$0xff]  }
 0x306   : > { %10419 = vmatpush2.bf16.msra.mxu0 %v14510_v56 }
 0x307   : > { %10460 = vmatpush2.bf16.msra.mxu1 %v14513_v57  ;;  %10420 = vmatprep.subr.bf16.mxu0 %v14518_v60 }
 0x308   : > { %10461 = vmatprep.subr.bf16.mxu1 %v14521_v61 }
 0x30a   : > { %10421 = vmatpush2.bf16.msra.mxu0 %v14516_v18 }
 0x30b   : > { %10462 = vmatpush2.bf16.msra.mxu1 %v14519_v4  ;;  %10422 = vmatprep.subr.bf16.mxu0 %v14524_v5  ;;  %v14566_v4 = vld [vmem:[%s16115_s6 + $0x2594] ss:$48 sps:$4 sm:$0xff]  }
 0x30c   : > { %10463 = vmatprep.subr.bf16.mxu1 %v14527_v58  ;;  %v14569_v5 = vld [vmem:[%s16115_s6 + $0x2b94] ss:$48 sps:$4 sm:$0xff]  }
 0x30e   : > { %10423 = vmatpush2.bf16.msra.mxu0 %v14522_v63  ;;  %v14564_v63 = vld [vmem:[%s16115_s6 + $0x2590] ss:$48 sps:$4 sm:$0xff]  }
 0x30f   : > { %10464 = vmatpush2.bf16.msra.mxu1 %v14525_v23  ;;  %10424 = vmatprep.subr.bf16.mxu0 %v14530_v25  ;;  %v14567_v23 = vld [vmem:[%s16115_s6 + $0x2b90] ss:$48 sps:$4 sm:$0xff]   ;;  %v14572_v25 = vld [vmem:[%s16115_s6 + $0x2534] ss:$48 sps:$4 sm:$0xff]  }
 0x310   : > { %10465 = vmatprep.subr.bf16.mxu1 %v14533_v24  ;;  %v14575_v24 = vld [vmem:[%s16115_s6 + $0x2b34] ss:$48 sps:$4 sm:$0xff]  }
 0x312   : > { %10425 = vmatpush2.bf16.msra.mxu0 %v14528_v6  ;;  %v14570_v6 = vld [vmem:[%s16115_s6 + $0x2530] ss:$48 sps:$4 sm:$0xff]  }
 0x313   : > { %10466 = vmatpush2.bf16.msra.mxu1 %v14531_v7  ;;  %10426 = vmatprep.subr.bf16.mxu0 %v14536_v8  ;;  %v14573_v7 = vld [vmem:[%s16115_s6 + $0x2b30] ss:$48 sps:$4 sm:$0xff]   ;;  %v14578_v8 = vld [vmem:[%s16115_s6 + $0x24d4] ss:$48 sps:$4 sm:$0xff]  }
 0x314   : > { %10467 = vmatprep.subr.bf16.mxu1 %v14539_v11  ;;  %v14581_v11 = vld [vmem:[%s16115_s6 + $0x2ad4] ss:$48 sps:$4 sm:$0xff]  }
 0x316   : > { %10427 = vmatpush2.bf16.msra.mxu0 %v14534_v12  ;;  %v14576_v12 = vld [vmem:[%s16115_s6 + $0x24d0] ss:$48 sps:$4 sm:$0xff]  }
 0x317   : > { %10468 = vmatpush2.bf16.msra.mxu1 %v14537_v14  ;;  %10428 = vmatprep.subr.bf16.mxu0 %v14542_v15  ;;  %v14579_v14 = vld [vmem:[%s16115_s6 + $0x2ad0] ss:$48 sps:$4 sm:$0xff]   ;;  %v14584_v15 = vld [vmem:[%s16115_s6 + $0x2474] ss:$48 sps:$4 sm:$0xff]  }
 0x318   : > { %10469 = vmatprep.subr.bf16.mxu1 %v14545_v26  ;;  %v14587_v26 = vld [vmem:[%s16115_s6 + $0x2a74] ss:$48 sps:$4 sm:$0xff]  }
 0x31a   : > { %10429 = vmatpush2.bf16.msra.mxu0 %v14540_v16  ;;  %v14582_v16 = vld [vmem:[%s16115_s6 + $0x2470] ss:$48 sps:$4 sm:$0xff]  }
 0x31b   : > { %10470 = vmatpush2.bf16.msra.mxu1 %v14543_v17  ;;  %10480 = vmatprep.subr.bf16.mxu0 %v14548_v19  ;;  %v14585_v17 = vld [vmem:[%s16115_s6 + $0x2a70] ss:$48 sps:$4 sm:$0xff]   ;;  %v14590_v19 = vld [vmem:[%s16115_s6 + $0x2414] ss:$48 sps:$4 sm:$0xff]  }
 0x31c   : > { %10521 = vmatprep.subr.bf16.mxu1 %v14551_v20  ;;  %v14593_v20 = vld [vmem:[%s16115_s6 + $0x2a14] ss:$48 sps:$4 sm:$0xff]  }
 0x31d   : > { %v10186_v39 = vpop.f32.mrf.mxu0  ;;  %10431 = vmatmul.mubr.bf16.vlgmr.msra.gmra.mxu0 %v16380_v43 }
 0x31e   : > { %v10227_v28 = vpop.f32.mrf.mxu1  ;;  %10472 = vmatmul.mubr.bf16.vlgmr.msra.gmra.mxu1 %v16382_v44  ;;  %v10187_v13 = vadd.f32 %v10186_v39, %v10146_v36  ;;  %10481 = vmatpush1.bf16.msra.mxu0 %v14546_v29  ;;  %v14591_v29 = vld [vmem:[%s16115_s6 + $0x2a10] ss:$48 sps:$4 sm:$0xff]   ;;  %v14602_v36 = vld [vmem:[%s16115_s6 + $0x2954] ss:$48 sps:$4 sm:$0xff]  }
 0x31f   : > { %10522 = vmatpush1.bf16.msra.mxu1 %v14549_v31  ;;  %v10188_v0 = vpop.f32.mrf.mxu0  ;;  %10482 = vmatprep.subr.bf16.mxu0 %v14554_v52  ;;  %v14596_v31 = vld [vmem:[%s16115_s6 + $0x29b4] ss:$48 sps:$4 sm:$0xff]   ;;  %v14594_v52 = vld [vmem:[%s16115_s6 + $0x29b0] ss:$48 sps:$4 sm:$0xff]  }
 0x320   : > { %v10229_v42 = vpop.f32.mrf.mxu1  ;;  %10523 = vmatprep.subr.bf16.mxu1 %v14557_v34  ;;  %v10228_v47 = vadd.f32 %v10227_v28, %v10187_v13  ;;  %v10189_v48 = vadd.f32 %v10188_v0, %v10148_v35  ;;  %10512 = vmatprep.mubr.bf16.mxu0 %v16388_v49  ;;  %v14597_v34 = vld [vmem:[%s16115_s6 + $0x2fb0] ss:$48 sps:$4 sm:$0xff]   ;;  %v14611_v28 = vld [vmem:[%s16115_s6 + $0x2ef4] ss:$48 sps:$4 sm:$0xff]  }
 0x321   : > { %10553 = vmatprep.mubr.bf16.mxu1 %v16390_v51  ;;  %v10190_v3 = vpop.f32.mrf.mxu0  ;;  %v14603_v39 = vld [vmem:[%s16115_s6 + $0x2f50] ss:$48 sps:$4 sm:$0xff]   ;;  %v14614_v0 = vld [vmem:[%s16115_s6 + $0x2894] ss:$48 sps:$4 sm:$0xff]  }
 0x322   : > { %v10231_v56 = vpop.f32.mrf.mxu1  ;;  %v11548_v57 = vadd.f32 %v10228_v47, %v320_v40  ;;  %v10230_v60 = vadd.f32 %v10229_v42, %v10189_v48  ;;  %10483 = vmatpush1.bf16.msra.mxu0 %v14552_v37  ;;  %v14605_v37 = vld [vmem:[%s16115_s6 + $0x2f54] ss:$48 sps:$4 sm:$0xff]   ;;  %v14606_v35 = vld [vmem:[%s16115_s6 + $0x28f0] ss:$48 sps:$4 sm:$0xff]  }
 0x323   : > { %10524 = vmatpush1.bf16.msra.mxu1 %v14555_v59  ;;  %v10191_v61 = vpop.f32.mrf.mxu0  ;;  %10484 = vmatprep.subr.bf16.mxu0 %v14560_v45  ;;  %v14600_v59 = vld [vmem:[%s16115_s6 + $0x2950] ss:$48 sps:$4 sm:$0xff]   ;;  %v14608_v40 = vld [vmem:[%s16115_s6 + $0x28f4] ss:$48 sps:$4 sm:$0xff]  }
 0x324   : > { %v10232_v18 = vpop.f32.mrf.mxu1  ;;  %10525 = vmatprep.subr.bf16.mxu1 %v14563_v46  ;;  %11560 = vst [vmem:[#allocation2 + $0x58] sm:$0xff] %v11548_v57  ;;  %v11549_v58 = vadd.f32 %v10230_v60, %v321_v62  ;;  %v14609_v13 = vld [vmem:[%s16115_s6 + $0x2ef0] ss:$48 sps:$4 sm:$0xff]   ;;  %v14617_v62 = vld [vmem:[%s16115_s6 + $0x2e94] ss:$48 sps:$4 sm:$0xff]  }
 0x325   : > { %v14612_v42 = vld [vmem:[%s16115_s6 + $0x2890] ss:$48 sps:$4 sm:$0xff]   ;;  %v14620_v46 = vld [vmem:[%s16115_s6 + $0x2834] ss:$48 sps:$4 sm:$0xff]  }
 0x326   : > { %11561 = vst [vmem:[#allocation2 + $0x18] sm:$0xff] %v11549_v58  ;;  %10485 = vmatpush1.bf16.msra.mxu0 %v14558_v54  ;;  %v14615_v45 = vld [vmem:[%s16115_s6 + $0x2e90] ss:$48 sps:$4 sm:$0xff]   ;;  %v14623_v47 = vld [vmem:[%s16115_s6 + $0x2e34] ss:$48 sps:$4 sm:$0xff]  }
 0x327   : > { %10526 = vmatpush1.bf16.msra.mxu1 %v14561_v55  ;;  %10486 = vmatprep.subr.bf16.mxu0 %v14566_v4  ;;  %v14618_v48 = vld [vmem:[%s16115_s6 + $0x2830] ss:$48 sps:$4 sm:$0xff]   ;;  %v14626_v55 = vld [vmem:[%s16115_s6 + $0x27d4] ss:$48 sps:$4 sm:$0xff]  }
 0x328   : > { %10527 = vmatprep.subr.bf16.mxu1 %v14569_v5  ;;  %v14621_v54 = vld [vmem:[%s16115_s6 + $0x2e30] ss:$48 sps:$4 sm:$0xff]   ;;  %v14629_v3 = vld [vmem:[%s16115_s6 + $0x2dd4] ss:$48 sps:$4 sm:$0xff]  }
 0x329   : > { %v14624_v56 = vld [vmem:[%s16115_s6 + $0x27d0] ss:$48 sps:$4 sm:$0xff]   ;;  %v14632_v60 = vld [vmem:[%s16115_s6 + $0x2774] ss:$48 sps:$4 sm:$0xff]  }
 0x32a   : > { %10487 = vmatpush1.bf16.msra.mxu0 %v14564_v63  ;;  %v14627_v57 = vld [vmem:[%s16115_s6 + $0x2dd0] ss:$48 sps:$4 sm:$0xff]   ;;  %v14635_v61 = vld [vmem:[%s16115_s6 + $0x2d74] ss:$48 sps:$4 sm:$0xff]  }
 0x32b   : > { %10528 = vmatpush1.bf16.msra.mxu1 %v14567_v23  ;;  %10488 = vmatprep.subr.bf16.mxu0 %v14572_v25  ;;  %v14630_v18 = vld [vmem:[%s16115_s6 + $0x2770] ss:$48 sps:$4 sm:$0xff]   ;;  %v14638_v5 = vld [vmem:[%s16115_s6 + $0x2714] ss:$48 sps:$4 sm:$0xff]   ;;  %v14644_v25 = vld [vmem:[%s16115_s6 + $0x2bc] ss:$48 sps:$4 sm:$0xff]  }
 0x32c   : > { %10529 = vmatprep.subr.bf16.mxu1 %v14575_v24  ;;  %v14633_v4 = vld [vmem:[%s16115_s6 + $0x2d70] ss:$48 sps:$4 sm:$0xff]   ;;  %v14641_v58 = vld [vmem:[%s16115_s6 + $0x2d14] ss:$48 sps:$4 sm:$0xff]   ;;  %v14647_v24 = vld [vmem:[%s16115_s6 + $0x8bc] ss:$48 sps:$4 sm:$0xff]  }
 0x32d   : > { %v14636_v63 = vld [vmem:[%s16115_s6 + $0x2710] ss:$48 sps:$4 sm:$0xff]  }
 0x32e   : > { %10489 = vmatpush1.bf16.msra.mxu0 %v14570_v6  ;;  %v14639_v23 = vld [vmem:[%s16115_s6 + $0x2d10] ss:$48 sps:$4 sm:$0xff]   ;;  %v14642_v6 = vld [vmem:[%s16115_s6 + $0x2b8] ss:$48 sps:$4 sm:$0xff]  }
 0x32f   : > { %10530 = vmatpush1.bf16.msra.mxu1 %v14573_v7  ;;  %10490 = vmatprep.subr.bf16.mxu0 %v14578_v8  ;;  %v14645_v7 = vld [vmem:[%s16115_s6 + $0x8b8] ss:$48 sps:$4 sm:$0xff]   ;;  %v14650_v8 = vld [vmem:[%s16115_s6 + $0x25c] ss:$48 sps:$4 sm:$0xff]  }
 0x330   : > { %10531 = vmatprep.subr.bf16.mxu1 %v14581_v11  ;;  %v14653_v11 = vld [vmem:[%s16115_s6 + $0x85c] ss:$48 sps:$4 sm:$0xff]  }
 0x332   : > { %10491 = vmatpush1.bf16.msra.mxu0 %v14576_v12  ;;  %v14648_v12 = vld [vmem:[%s16115_s6 + $0x258] ss:$48 sps:$4 sm:$0xff]  }
 0x333   : > { %10532 = vmatpush1.bf16.msra.mxu1 %v14579_v14  ;;  %10492 = vmatprep.subr.bf16.mxu0 %v14584_v15  ;;  %v14651_v14 = vld [vmem:[%s16115_s6 + $0x858] ss:$48 sps:$4 sm:$0xff]  }
 0x334   : > { %10533 = vmatprep.subr.bf16.mxu1 %v14587_v26 }
 0x336   : > { %10493 = vmatpush1.bf16.msra.mxu0 %v14582_v16 }
 0x337   : > { %10534 = vmatpush1.bf16.msra.mxu1 %v14585_v17  ;;  %10494 = vmatprep.subr.bf16.mxu0 %v14590_v19 }
 0x338   : > { %10535 = vmatprep.subr.bf16.mxu1 %v14593_v20  ;;  %v14656_v20 = vld [vmem:[%s16115_s6 + $0x1fc] ss:$48 sps:$4 sm:$0xff]  }
 0x33a   : > { %10495 = vmatpush1.bf16.msra.mxu0 %v14588_v27  ;;  %v14659_v27 = vld [vmem:[%s16115_s6 + $0x7fc] ss:$48 sps:$4 sm:$0xff]  }
 0x33b   : > { %10536 = vmatpush1.bf16.msra.mxu1 %v14591_v29  ;;  %10496 = vmatprep.subr.bf16.mxu0 %v14596_v31  ;;  %v14654_v31 = vld [vmem:[%s16115_s6 + $0x1f8] ss:$48 sps:$4 sm:$0xff]  }
 0x33c   : > { %10537 = vmatprep.subr.bf16.mxu1 %v14599_v32  ;;  %v14657_v32 = vld [vmem:[%s16115_s6 + $0x7f8] ss:$48 sps:$4 sm:$0xff]  }
 0x33e   : > { %10497 = vmatpush2.bf16.msra.mxu0 %v14594_v52 }
 0x33f   : > { %10538 = vmatpush2.bf16.msra.mxu1 %v14597_v34  ;;  %10498 = vmatprep.subr.bf16.mxu0 %v14602_v36 }
 0x340   : > { %10539 = vmatprep.subr.bf16.mxu1 %v14605_v37 }
 0x342   : > { %10499 = vmatpush2.bf16.msra.mxu0 %v14600_v59  ;;  %v14662_v59 = vld [vmem:[%s16115_s6 + $0x19c] ss:$48 sps:$4 sm:$0xff]  }
 0x343   : > { %10540 = vmatpush2.bf16.msra.mxu1 %v14603_v39  ;;  %10500 = vmatprep.subr.bf16.mxu0 %v14608_v40  ;;  %v14665_v39 = vld [vmem:[%s16115_s6 + $0x79c] ss:$48 sps:$4 sm:$0xff]   ;;  %v14660_v40 = vld [vmem:[%s16115_s6 + $0x198] ss:$48 sps:$4 sm:$0xff]  }
 0x344   : > { %10541 = vmatprep.subr.bf16.mxu1 %v14611_v28  ;;  %v14663_v28 = vld [vmem:[%s16115_s6 + $0x798] ss:$48 sps:$4 sm:$0xff]  }
 0x346   : > { %10501 = vmatpush2.bf16.msra.mxu0 %v14606_v35  ;;  %v14668_v35 = vld [vmem:[%s16115_s6 + $0x13c] ss:$48 sps:$4 sm:$0xff]  }
 0x347   : > { %10542 = vmatpush2.bf16.msra.mxu1 %v14609_v13  ;;  %10502 = vmatprep.subr.bf16.mxu0 %v14614_v0  ;;  %v14671_v13 = vld [vmem:[%s16115_s6 + $0x73c] ss:$48 sps:$4 sm:$0xff]   ;;  %v14666_v0 = vld [vmem:[%s16115_s6 + $0x138] ss:$48 sps:$4 sm:$0xff]  }
 0x348   : > { %10543 = vmatprep.subr.bf16.mxu1 %v14617_v62  ;;  %v14669_v62 = vld [vmem:[%s16115_s6 + $0x738] ss:$48 sps:$4 sm:$0xff]  }
 0x34a   : > { %10503 = vmatpush2.bf16.msra.mxu0 %v14612_v42  ;;  %v14674_v42 = vld [vmem:[%s16115_s6 + $0xdc] ss:$48 sps:$4 sm:$0xff]  }
 0x34b   : > { %10544 = vmatpush2.bf16.msra.mxu1 %v14615_v45  ;;  %10504 = vmatprep.subr.bf16.mxu0 %v14620_v46  ;;  %v14677_v45 = vld [vmem:[%s16115_s6 + $0x6dc] ss:$48 sps:$4 sm:$0xff]   ;;  %v14672_v46 = vld [vmem:[%s16115_s6 + $0xd8] ss:$48 sps:$4 sm:$0xff]  }
 0x34c   : > { %10545 = vmatprep.subr.bf16.mxu1 %v14623_v47  ;;  %v14675_v47 = vld [vmem:[%s16115_s6 + $0x6d8] ss:$48 sps:$4 sm:$0xff]  }
 0x34e   : > { %10505 = vmatpush2.bf16.msra.mxu0 %v14618_v48  ;;  %v14680_v48 = vld [vmem:[%s16115_s6 + $0x7c] ss:$48 sps:$4 sm:$0xff]  }
 0x34f   : > { %10546 = vmatpush2.bf16.msra.mxu1 %v14621_v54  ;;  %10506 = vmatprep.subr.bf16.mxu0 %v14626_v55  ;;  %v14683_v54 = vld [vmem:[%s16115_s6 + $0x67c] ss:$48 sps:$4 sm:$0xff]   ;;  %v14678_v55 = vld [vmem:[%s16115_s6 + $0x78] ss:$48 sps:$4 sm:$0xff]  }
 0x350   : > { %10547 = vmatprep.subr.bf16.mxu1 %v14629_v3  ;;  %v14681_v3 = vld [vmem:[%s16115_s6 + $0x678] ss:$48 sps:$4 sm:$0xff]  }
 0x352   : > { %10507 = vmatpush2.bf16.msra.mxu0 %v14624_v56  ;;  %v14686_v56 = vld [vmem:[%s16115_s6 + $0x1c] ss:$48 sps:$4 sm:$0xff]  }
 0x353   : > { %10548 = vmatpush2.bf16.msra.mxu1 %v14627_v57  ;;  %10508 = vmatprep.subr.bf16.mxu0 %v14632_v60  ;;  %v14689_v57 = vld [vmem:[%s16115_s6 + $0x61c] ss:$48 sps:$4 sm:$0xff]   ;;  %v14684_v60 = vld [vmem:[%s16115_s6 + $0x18] ss:$48 sps:$4 sm:$0xff]  }
 0x354   : > { %10549 = vmatprep.subr.bf16.mxu1 %v14635_v61  ;;  %v14687_v61 = vld [vmem:[%s16115_s6 + $0x618] ss:$48 sps:$4 sm:$0xff]  }
 0x356   : > { %10509 = vmatpush2.bf16.msra.mxu0 %v14630_v18  ;;  %v14692_v18 = vld [vmem:[%s16115_s6 + $0x5bc] ss:$48 sps:$4 sm:$0xff]  }
 0x357   : > { %10550 = vmatpush2.bf16.msra.mxu1 %v14633_v4  ;;  %10510 = vmatprep.subr.bf16.mxu0 %v14638_v5  ;;  %v14695_v4 = vld [vmem:[%s16115_s6 + $0xbbc] ss:$48 sps:$4 sm:$0xff]   ;;  %v14690_v5 = vld [vmem:[%s16115_s6 + $0x5b8] ss:$48 sps:$4 sm:$0xff]  }
 0x358   : > { %10551 = vmatprep.subr.bf16.mxu1 %v14641_v58  ;;  %v14693_v58 = vld [vmem:[%s16115_s6 + $0xbb8] ss:$48 sps:$4 sm:$0xff]  }
 0x35a   : > { %10511 = vmatpush2.bf16.msra.mxu0 %v14636_v63  ;;  %v14698_v63 = vld [vmem:[%s16115_s6 + $0x55c] ss:$48 sps:$4 sm:$0xff]  }
 0x35b   : > { %10552 = vmatpush2.bf16.msra.mxu1 %v14639_v23  ;;  %10562 = vmatprep.subr.bf16.mxu0 %v14644_v25  ;;  %v14701_v23 = vld [vmem:[%s16115_s6 + $0xb5c] ss:$48 sps:$4 sm:$0xff]   ;;  %v14696_v25 = vld [vmem:[%s16115_s6 + $0x558] ss:$48 sps:$4 sm:$0xff]  }
 0x35c   : > { %10603 = vmatprep.subr.bf16.mxu1 %v14647_v24  ;;  %v14699_v24 = vld [vmem:[%s16115_s6 + $0xb58] ss:$48 sps:$4 sm:$0xff]  }
 0x35d   : > { %v10268_v15 = vpop.f32.mrf.mxu0  ;;  %10513 = vmatmul.mubr.bf16.vlgmr.msra.gmra.mxu0 %v16458_v1 }
 0x35e   : > { %v10309_v26 = vpop.f32.mrf.mxu1  ;;  %10554 = vmatmul.mubr.bf16.vlgmr.msra.gmra.mxu1 %v16460_v2  ;;  %10563 = vmatpush1.bf16.msra.mxu0 %v14642_v6  ;;  %v14704_v6 = vld [vmem:[%s16115_s6 + $0x4fc] ss:$48 sps:$4 sm:$0xff]  }
 0x35f   : > { %v17062_v16 = vadd.f32 %v10309_v26, %v10268_v15  ;;  %10604 = vmatpush1.bf16.msra.mxu1 %v14645_v7  ;;  %v10270_v17 = vpop.f32.mrf.mxu0  ;;  %10564 = vmatprep.subr.bf16.mxu0 %v14650_v8  ;;  %v14707_v7 = vld [vmem:[%s16115_s6 + $0xafc] ss:$48 sps:$4 sm:$0xff]   ;;  %v14702_v8 = vld [vmem:[%s16115_s6 + $0x4f8] ss:$48 sps:$4 sm:$0xff]  }
 0x360   : > { %v10311_v19 = vpop.f32.mrf.mxu1  ;;  %10605 = vmatprep.subr.bf16.mxu1 %v14653_v11  ;;  %10594 = vmatprep.mubr.bf16.mxu0 %v16191_v50  ;;  %v14705_v11 = vld [vmem:[%s16115_s6 + $0xaf8] ss:$48 sps:$4 sm:$0xff]  }
 0x361   : > { %v17066_v29 = vadd.f32 %v10311_v19, %v10270_v17  ;;  %10635 = vmatprep.mubr.bf16.mxu1 %v16195_v53  ;;  %v10272_v52 = vpop.f32.mrf.mxu0  ;;  %v14708_v15 = vld [vmem:[%s16115_s6 + $0x498] ss:$48 sps:$4 sm:$0xff]   ;;  %v14716_v17 = vld [vmem:[%s16115_s6 + $0x43c] ss:$48 sps:$4 sm:$0xff]  }
 0x362   : > { %v10313_v34 = vpop.f32.mrf.mxu1  ;;  %10565 = vmatpush1.bf16.msra.mxu0 %v14648_v12  ;;  %v14710_v12 = vld [vmem:[%s16115_s6 + $0x49c] ss:$48 sps:$4 sm:$0xff]   ;;  %v14711_v26 = vld [vmem:[%s16115_s6 + $0xa98] ss:$48 sps:$4 sm:$0xff]  }
 0x363   : > { %10606 = vmatpush1.bf16.msra.mxu1 %v14651_v14  ;;  %v10273_v36 = vpop.f32.mrf.mxu0  ;;  %10566 = vmatprep.subr.bf16.mxu0 %v14656_v20  ;;  %v14713_v14 = vld [vmem:[%s16115_s6 + $0xa9c] ss:$48 sps:$4 sm:$0xff]   ;;  %v14714_v20 = vld [vmem:[%s16115_s6 + $0x438] ss:$48 sps:$4 sm:$0xff]  }
 0x364   : > { %v10314_v37 = vpop.f32.mrf.mxu1  ;;  %10607 = vmatprep.subr.bf16.mxu1 %v14659_v27  ;;  %v14719_v19 = vld [vmem:[%s16115_s6 + $0xa3c] ss:$48 sps:$4 sm:$0xff]   ;;  %v14717_v27 = vld [vmem:[%s16115_s6 + $0xa38] ss:$48 sps:$4 sm:$0xff]  }
 0x365   : > { %v14720_v52 = vld [vmem:[%s16115_s6 + $0x3d8] ss:$48 sps:$4 sm:$0xff]   ;;  %v14728_v36 = vld [vmem:[%s16115_s6 + $0x37c] ss:$48 sps:$4 sm:$0xff]  }
 0x366   : > { %10567 = vmatpush1.bf16.msra.mxu0 %v14654_v31  ;;  %v14722_v31 = vld [vmem:[%s16115_s6 + $0x3dc] ss:$48 sps:$4 sm:$0xff]   ;;  %v14723_v34 = vld [vmem:[%s16115_s6 + $0x9d8] ss:$48 sps:$4 sm:$0xff]  }
 0x367   : > { %10608 = vmatpush1.bf16.msra.mxu1 %v14657_v32  ;;  %10568 = vmatprep.subr.bf16.mxu0 %v14662_v59  ;;  %v14725_v32 = vld [vmem:[%s16115_s6 + $0x9dc] ss:$48 sps:$4 sm:$0xff]   ;;  %v14726_v59 = vld [vmem:[%s16115_s6 + $0x378] ss:$48 sps:$4 sm:$0xff]  }
 0x368   : > { %10609 = vmatprep.subr.bf16.mxu1 %v14665_v39  ;;  %v14731_v37 = vld [vmem:[%s16115_s6 + $0x97c] ss:$48 sps:$4 sm:$0xff]   ;;  %v14729_v39 = vld [vmem:[%s16115_s6 + $0x978] ss:$48 sps:$4 sm:$0xff]  }
 0x36a   : > { %10569 = vmatpush1.bf16.msra.mxu0 %v14660_v40  ;;  %v14734_v40 = vld [vmem:[%s16115_s6 + $0x31c] ss:$48 sps:$4 sm:$0xff]  }
 0x36b   : > { %10610 = vmatpush1.bf16.msra.mxu1 %v14663_v28  ;;  %10570 = vmatprep.subr.bf16.mxu0 %v14668_v35  ;;  %v14737_v28 = vld [vmem:[%s16115_s6 + $0x91c] ss:$48 sps:$4 sm:$0xff]   ;;  %v14732_v35 = vld [vmem:[%s16115_s6 + $0x318] ss:$48 sps:$4 sm:$0xff]  }
 0x36c   : > { %10611 = vmatprep.subr.bf16.mxu1 %v14671_v13  ;;  %v14735_v13 = vld [vmem:[%s16115_s6 + $0x918] ss:$48 sps:$4 sm:$0xff]  }
 0x36e   : > { %10571 = vmatpush1.bf16.msra.mxu0 %v14666_v0  ;;  %v14740_v0 = vld [vmem:[%s16115_s6 + $0xebc] ss:$48 sps:$4 sm:$0xff]  }
 0x36f   : > { %10612 = vmatpush1.bf16.msra.mxu1 %v14669_v62  ;;  %10572 = vmatprep.subr.bf16.mxu0 %v14674_v42  ;;  %v14743_v62 = vld [vmem:[%s16115_s6 + $0x14bc] ss:$48 sps:$4 sm:$0xff]   ;;  %v14738_v42 = vld [vmem:[%s16115_s6 + $0xeb8] ss:$48 sps:$4 sm:$0xff]  }
 0x370   : > { %10613 = vmatprep.subr.bf16.mxu1 %v14677_v45  ;;  %v14741_v45 = vld [vmem:[%s16115_s6 + $0x14b8] ss:$48 sps:$4 sm:$0xff]  }
 0x372   : > { %10573 = vmatpush1.bf16.msra.mxu0 %v14672_v46  ;;  %v14746_v46 = vld [vmem:[%s16115_s6 + $0xe5c] ss:$48 sps:$4 sm:$0xff]  }
 0x373   : > { %10614 = vmatpush1.bf16.msra.mxu1 %v14675_v47  ;;  %10574 = vmatprep.subr.bf16.mxu0 %v14680_v48  ;;  %v14749_v47 = vld [vmem:[%s16115_s6 + $0x145c] ss:$48 sps:$4 sm:$0xff]   ;;  %v14744_v48 = vld [vmem:[%s16115_s6 + $0xe58] ss:$48 sps:$4 sm:$0xff]  }
 0x374   : > { %10615 = vmatprep.subr.bf16.mxu1 %v14683_v54 }
 0x376   : > { %10575 = vmatpush1.bf16.msra.mxu0 %v14678_v55 }
 0x377   : > { %10616 = vmatpush1.bf16.msra.mxu1 %v14681_v3  ;;  %10576 = vmatprep.subr.bf16.mxu0 %v14686_v56  ;;  %v14747_v56 = vld [vmem:[%s16115_s6 + $0x1458] ss:$48 sps:$4 sm:$0xff]  }
 0x378   : > { %10617 = vmatprep.subr.bf16.mxu1 %v14689_v57 }
 0x37a   : > { %10577 = vmatpush1.bf16.msra.mxu0 %v14684_v60 }
 0x37b   : > { %10618 = vmatpush1.bf16.msra.mxu1 %v14687_v61  ;;  %10578 = vmatprep.subr.bf16.mxu0 %v14692_v18  ;;  %v14752_v61 = vld [vmem:[%s16115_s6 + $0xdfc] ss:$48 sps:$4 sm:$0xff]  }
 0x37c   : > { %10619 = vmatprep.subr.bf16.mxu1 %v14695_v4  ;;  %v14755_v18 = vld [vmem:[%s16115_s6 + $0x13fc] ss:$48 sps:$4 sm:$0xff]  }
 0x37e   : > { %10579 = vmatpush2.bf16.msra.mxu0 %v14690_v5 }
 0x37f   : > { %10620 = vmatpush2.bf16.msra.mxu1 %v14693_v58  ;;  %10580 = vmatprep.subr.bf16.mxu0 %v14698_v63  ;;  %v14750_v58 = vld [vmem:[%s16115_s6 + $0xdf8] ss:$48 sps:$4 sm:$0xff]  }
 0x380   : > { %10621 = vmatprep.subr.bf16.mxu1 %v14701_v23  ;;  %v14753_v63 = vld [vmem:[%s16115_s6 + $0x13f8] ss:$48 sps:$4 sm:$0xff]  }
 0x382   : > { %10581 = vmatpush2.bf16.msra.mxu0 %v14696_v25 }
 0x383   : > { %10622 = vmatpush2.bf16.msra.mxu1 %v14699_v24  ;;  %10582 = vmatprep.subr.bf16.mxu0 %v14704_v6 }
 0x384   : > { %10623 = vmatprep.subr.bf16.mxu1 %v14707_v7  ;;  %v14761_v7 = vld [vmem:[%s16115_s6 + $0x139c] ss:$48 sps:$4 sm:$0xff]  }
 0x386   : > { %10583 = vmatpush2.bf16.msra.mxu0 %v14702_v8  ;;  %v14756_v8 = vld [vmem:[%s16115_s6 + $0xd98] ss:$48 sps:$4 sm:$0xff]  }
 0x387   : > { %10624 = vmatpush2.bf16.msra.mxu1 %v14705_v11  ;;  %10584 = vmatprep.subr.bf16.mxu0 %v14710_v12  ;;  %v14759_v11 = vld [vmem:[%s16115_s6 + $0x1398] ss:$48 sps:$4 sm:$0xff]   ;;  %v14764_v12 = vld [vmem:[%s16115_s6 + $0xd3c] ss:$48 sps:$4 sm:$0xff]  }
 0x388   : > { %10625 = vmatprep.subr.bf16.mxu1 %v14713_v14  ;;  %v14767_v14 = vld [vmem:[%s16115_s6 + $0x133c] ss:$48 sps:$4 sm:$0xff]  }
 0x38a   : > { %10585 = vmatpush2.bf16.msra.mxu0 %v14708_v15  ;;  %v14762_v15 = vld [vmem:[%s16115_s6 + $0xd38] ss:$48 sps:$4 sm:$0xff]  }
 0x38b   : > { %10626 = vmatpush2.bf16.msra.mxu1 %v14711_v26  ;;  %10586 = vmatprep.subr.bf16.mxu0 %v14716_v17  ;;  %v14765_v26 = vld [vmem:[%s16115_s6 + $0x1338] ss:$48 sps:$4 sm:$0xff]   ;;  %v14770_v17 = vld [vmem:[%s16115_s6 + $0xcdc] ss:$48 sps:$4 sm:$0xff]  }
 0x38c   : > { %10627 = vmatprep.subr.bf16.mxu1 %v14719_v19  ;;  %v14773_v19 = vld [vmem:[%s16115_s6 + $0x12dc] ss:$48 sps:$4 sm:$0xff]  }
 0x38e   : > { %10587 = vmatpush2.bf16.msra.mxu0 %v14714_v20  ;;  %v14768_v20 = vld [vmem:[%s16115_s6 + $0xcd8] ss:$48 sps:$4 sm:$0xff]  }
 0x38f   : > { %10628 = vmatpush2.bf16.msra.mxu1 %v14717_v27  ;;  %10588 = vmatprep.subr.bf16.mxu0 %v14722_v31  ;;  %v14771_v27 = vld [vmem:[%s16115_s6 + $0x12d8] ss:$48 sps:$4 sm:$0xff]   ;;  %v14776_v31 = vld [vmem:[%s16115_s6 + $0xc7c] ss:$48 sps:$4 sm:$0xff]  }
 0x390   : > { %10629 = vmatprep.subr.bf16.mxu1 %v14725_v32  ;;  %v14779_v32 = vld [vmem:[%s16115_s6 + $0x127c] ss:$48 sps:$4 sm:$0xff]  }
 0x392   : > { %10589 = vmatpush2.bf16.msra.mxu0 %v14720_v52  ;;  %v14774_v52 = vld [vmem:[%s16115_s6 + $0xc78] ss:$48 sps:$4 sm:$0xff]  }
 0x393   : > { %10630 = vmatpush2.bf16.msra.mxu1 %v14723_v34  ;;  %10590 = vmatprep.subr.bf16.mxu0 %v14728_v36  ;;  %v14777_v34 = vld [vmem:[%s16115_s6 + $0x1278] ss:$48 sps:$4 sm:$0xff]   ;;  %v14782_v36 = vld [vmem:[%s16115_s6 + $0xc1c] ss:$48 sps:$4 sm:$0xff]  }
 0x394   : > { %10631 = vmatprep.subr.bf16.mxu1 %v14731_v37  ;;  %v14785_v37 = vld [vmem:[%s16115_s6 + $0x121c] ss:$48 sps:$4 sm:$0xff]  }
 0x396   : > { %10591 = vmatpush2.bf16.msra.mxu0 %v14726_v59  ;;  %v14780_v59 = vld [vmem:[%s16115_s6 + $0xc18] ss:$48 sps:$4 sm:$0xff]  }
 0x397   : > { %10632 = vmatpush2.bf16.msra.mxu1 %v14729_v39  ;;  %10592 = vmatprep.subr.bf16.mxu0 %v14734_v40  ;;  %v14783_v39 = vld [vmem:[%s16115_s6 + $0x1218] ss:$48 sps:$4 sm:$0xff]   ;;  %v14788_v40 = vld [vmem:[%s16115_s6 + $0x11bc] ss:$48 sps:$4 sm:$0xff]  }
 0x398   : > { %10633 = vmatprep.subr.bf16.mxu1 %v14737_v28  ;;  %v14791_v28 = vld [vmem:[%s16115_s6 + $0x17bc] ss:$48 sps:$4 sm:$0xff]  }
 0x39a   : > { %10593 = vmatpush2.bf16.msra.mxu0 %v14732_v35  ;;  %v14786_v35 = vld [vmem:[%s16115_s6 + $0x11b8] ss:$48 sps:$4 sm:$0xff]  }
 0x39b   : > { %10634 = vmatpush2.bf16.msra.mxu1 %v14735_v13  ;;  %10644 = vmatprep.subr.bf16.mxu0 %v14740_v0  ;;  %v14789_v13 = vld [vmem:[%s16115_s6 + $0x17b8] ss:$48 sps:$4 sm:$0xff]   ;;  %v14794_v0 = vld [vmem:[%s16115_s6 + $0x115c] ss:$48 sps:$4 sm:$0xff]  }
 0x39c   : > { %10685 = vmatprep.subr.bf16.mxu1 %v14743_v62  ;;  %v14797_v62 = vld [vmem:[%s16115_s6 + $0x175c] ss:$48 sps:$4 sm:$0xff]  }
 0x39d   : > { %v10350_v54 = vpop.f32.mrf.mxu0  ;;  %10595 = vmatmul.mubr.bf16.vlgmr.msra.gmra.mxu0 %v16218_v9 }
 0x39e   : > { %v10391_v55 = vpop.f32.mrf.mxu1  ;;  %10636 = vmatmul.mubr.bf16.vlgmr.msra.gmra.mxu1 %v16220_v10  ;;  %v10351_v3 = vadd.f32 %v10350_v54, %v17062_v16  ;;  %10645 = vmatpush1.bf16.msra.mxu0 %v14738_v42  ;;  %v14792_v42 = vld [vmem:[%s16115_s6 + $0x1158] ss:$48 sps:$4 sm:$0xff]  }
 0x39f   : > { %10686 = vmatpush1.bf16.msra.mxu1 %v14741_v45  ;;  %v10352_v57 = vpop.f32.mrf.mxu0  ;;  %10646 = vmatprep.subr.bf16.mxu0 %v14746_v46  ;;  %v14795_v45 = vld [vmem:[%s16115_s6 + $0x1758] ss:$48 sps:$4 sm:$0xff]   ;;  %v14800_v46 = vld [vmem:[%s16115_s6 + $0x10fc] ss:$48 sps:$4 sm:$0xff]  }
 0x3a0   : > { %v10393_v60 = vpop.f32.mrf.mxu1  ;;  %10687 = vmatprep.subr.bf16.mxu1 %v14749_v47  ;;  %v17137_v4 = vadd.f32 %v10391_v55, %v10351_v3  ;;  %v10353_v5 = vadd.f32 %v10352_v57, %v17066_v29  ;;  %10676 = vmatprep.mubr.bf16.mxu0 %v16251_v38  ;;  %v14758_v29 = vld [vmem:[%s16115_s6 + $0xd9c] ss:$48 sps:$4 sm:$0xff]   ;;  %v14801_v54 = vld [vmem:[%s16115_s6 + $0x16f8] ss:$48 sps:$4 sm:$0xff]  }
 0x3a1   : > { %10717 = vmatprep.mubr.bf16.mxu1 %v16255_v41  ;;  %v10354_v16 = vpop.f32.mrf.mxu0  ;;  %v14803_v47 = vld [vmem:[%s16115_s6 + $0x16fc] ss:$48 sps:$4 sm:$0xff]   ;;  %v14807_v57 = vld [vmem:[%s16115_s6 + $0x1698] ss:$48 sps:$4 sm:$0xff]  }
 0x3a2   : > { %v10395_v23 = vpop.f32.mrf.mxu1  ;;  %v17144_v25 = vadd.f32 %v10393_v60, %v10353_v5  ;;  %10647 = vmatpush1.bf16.msra.mxu0 %v14744_v48  ;;  %v14798_v48 = vld [vmem:[%s16115_s6 + $0x10f8] ss:$48 sps:$4 sm:$0xff]   ;;  %v14806_v55 = vld [vmem:[%s16115_s6 + $0x109c] ss:$48 sps:$4 sm:$0xff]  }
 0x3a3   : > { %10688 = vmatpush1.bf16.msra.mxu1 %v14747_v56  ;;  %v10355_v24 = vpop.f32.mrf.mxu0  ;;  %10648 = vmatprep.subr.bf16.mxu0 %v14752_v61  ;;  %v14809_v3 = vld [vmem:[%s16115_s6 + $0x169c] ss:$48 sps:$4 sm:$0xff]   ;;  %v14804_v56 = vld [vmem:[%s16115_s6 + $0x1098] ss:$48 sps:$4 sm:$0xff]  }
 0x3a4   : > { %v10396_v6 = vpop.f32.mrf.mxu1  ;;  %10689 = vmatprep.subr.bf16.mxu1 %v14755_v18  ;;  %v14812_v60 = vld [vmem:[%s16115_s6 + $0x103c] ss:$48 sps:$4 sm:$0xff]   ;;  %v14810_v18 = vld [vmem:[%s16115_s6 + $0x1038] ss:$48 sps:$4 sm:$0xff]  }
 0x3a5   : > { %v14815_v61 = vld [vmem:[%s16115_s6 + $0x163c] ss:$48 sps:$4 sm:$0xff]   ;;  %v14813_v5 = vld [vmem:[%s16115_s6 + $0x1638] ss:$48 sps:$4 sm:$0xff]  }
 0x3a6   : > { %10649 = vmatpush1.bf16.msra.mxu0 %v14750_v58  ;;  %v14818_v58 = vld [vmem:[%s16115_s6 + $0xfdc] ss:$48 sps:$4 sm:$0xff]   ;;  %v14816_v16 = vld [vmem:[%s16115_s6 + $0xfd8] ss:$48 sps:$4 sm:$0xff]  }
 0x3a7   : > { %10690 = vmatpush1.bf16.msra.mxu1 %v14753_v63  ;;  %10650 = vmatprep.subr.bf16.mxu0 %v14758_v29  ;;  %v14821_v63 = vld [vmem:[%s16115_s6 + $0x15dc] ss:$48 sps:$4 sm:$0xff]   ;;  %v14819_v23 = vld [vmem:[%s16115_s6 + $0x15d8] ss:$48 sps:$4 sm:$0xff]  }
 0x3a8   : > { %10691 = vmatprep.subr.bf16.mxu1 %v14761_v7  ;;  %v14824_v24 = vld [vmem:[%s16115_s6 + $0xf7c] ss:$48 sps:$4 sm:$0xff]   ;;  %v14822_v29 = vld [vmem:[%s16115_s6 + $0xf78] ss:$48 sps:$4 sm:$0xff]  }
 0x3a9   : > { %v14827_v6 = vld [vmem:[%s16115_s6 + $0x157c] ss:$48 sps:$4 sm:$0xff]   ;;  %v14825_v7 = vld [vmem:[%s16115_s6 + $0x1578] ss:$48 sps:$4 sm:$0xff]  }
 0x3aa   : > { %10651 = vmatpush1.bf16.msra.mxu0 %v14756_v8  ;;  %v14830_v8 = vld [vmem:[%s16115_s6 + $0xf1c] ss:$48 sps:$4 sm:$0xff]  }
 0x3ab   : > { %10692 = vmatpush1.bf16.msra.mxu1 %v14759_v11  ;;  %10652 = vmatprep.subr.bf16.mxu0 %v14764_v12  ;;  %v14833_v11 = vld [vmem:[%s16115_s6 + $0x151c] ss:$48 sps:$4 sm:$0xff]   ;;  %v14828_v12 = vld [vmem:[%s16115_s6 + $0xf18] ss:$48 sps:$4 sm:$0xff]  }
 0x3ac   : > { %10693 = vmatprep.subr.bf16.mxu1 %v14767_v14  ;;  %v14831_v14 = vld [vmem:[%s16115_s6 + $0x1518] ss:$48 sps:$4 sm:$0xff]  }
 0x3ae   : > { %10653 = vmatpush1.bf16.msra.mxu0 %v14762_v15  ;;  %v14836_v15 = vld [vmem:[%s16115_s6 + $0x1abc] ss:$48 sps:$4 sm:$0xff]  }
 0x3af   : > { %10694 = vmatpush1.bf16.msra.mxu1 %v14765_v26  ;;  %10654 = vmatprep.subr.bf16.mxu0 %v14770_v17  ;;  %v14839_v26 = vld [vmem:[%s16115_s6 + $0x20bc] ss:$48 sps:$4 sm:$0xff]   ;;  %v14834_v17 = vld [vmem:[%s16115_s6 + $0x1ab8] ss:$48 sps:$4 sm:$0xff]  }
 0x3b0   : > { %10695 = vmatprep.subr.bf16.mxu1 %v14773_v19  ;;  %v14837_v19 = vld [vmem:[%s16115_s6 + $0x20b8] ss:$48 sps:$4 sm:$0xff]  }
 0x3b2   : > { %10655 = vmatpush1.bf16.msra.mxu0 %v14768_v20  ;;  %v14842_v20 = vld [vmem:[%s16115_s6 + $0x1a5c] ss:$48 sps:$4 sm:$0xff]  }
 0x3b3   : > { %10696 = vmatpush1.bf16.msra.mxu1 %v14771_v27  ;;  %10656 = vmatprep.subr.bf16.mxu0 %v14776_v31  ;;  %v14845_v27 = vld [vmem:[%s16115_s6 + $0x205c] ss:$48 sps:$4 sm:$0xff]  }
 0x3b4   : > { %10697 = vmatprep.subr.bf16.mxu1 %v14779_v32 }
 0x3b6   : > { %10657 = vmatpush1.bf16.msra.mxu0 %v14774_v52  ;;  %v14840_v52 = vld [vmem:[%s16115_s6 + $0x1a58] ss:$48 sps:$4 sm:$0xff]  }
 0x3b7   : > { %10698 = vmatpush1.bf16.msra.mxu1 %v14777_v34  ;;  %10658 = vmatprep.subr.bf16.mxu0 %v14782_v36  ;;  %v14843_v34 = vld [vmem:[%s16115_s6 + $0x2058] ss:$48 sps:$4 sm:$0xff]  }
 0x3b8   : > { %10699 = vmatprep.subr.bf16.mxu1 %v14785_v37 }
 0x3ba   : > { %10659 = vmatpush1.bf16.msra.mxu0 %v14780_v59  ;;  %v14848_v59 = vld [vmem:[%s16115_s6 + $0x19fc] ss:$48 sps:$4 sm:$0xff]  }
 0x3bb   : > { %10700 = vmatpush1.bf16.msra.mxu1 %v14783_v39  ;;  %10660 = vmatprep.subr.bf16.mxu0 %v14788_v40  ;;  %v14851_v39 = vld [vmem:[%s16115_s6 + $0x1ffc] ss:$48 sps:$4 sm:$0xff]  }
 0x3bc   : > { %10701 = vmatprep.subr.bf16.mxu1 %v14791_v28 }
 0x3be   : > { %10661 = vmatpush2.bf16.msra.mxu0 %v14786_v35  ;;  %v14846_v35 = vld [vmem:[%s16115_s6 + $0x19f8] ss:$48 sps:$4 sm:$0xff]  }
 0x3bf   : > { %10702 = vmatpush2.bf16.msra.mxu1 %v14789_v13  ;;  %10662 = vmatprep.subr.bf16.mxu0 %v14794_v0  ;;  %v14849_v13 = vld [vmem:[%s16115_s6 + $0x1ff8] ss:$48 sps:$4 sm:$0xff]  }
 0x3c0   : > { %10703 = vmatprep.subr.bf16.mxu1 %v14797_v62 }
 0x3c2   : > { %10663 = vmatpush2.bf16.msra.mxu0 %v14792_v42  ;;  %v14854_v42 = vld [vmem:[%s16115_s6 + $0x199c] ss:$48 sps:$4 sm:$0xff]  }
 0x3c3   : > { %10704 = vmatpush2.bf16.msra.mxu1 %v14795_v45  ;;  %10664 = vmatprep.subr.bf16.mxu0 %v14800_v46  ;;  %v14857_v45 = vld [vmem:[%s16115_s6 + $0x1f9c] ss:$48 sps:$4 sm:$0xff]   ;;  %v14852_v46 = vld [vmem:[%s16115_s6 + $0x1998] ss:$48 sps:$4 sm:$0xff]  }
 0x3c4   : > { %10705 = vmatprep.subr.bf16.mxu1 %v14803_v47  ;;  %v14855_v47 = vld [vmem:[%s16115_s6 + $0x1f98] ss:$48 sps:$4 sm:$0xff]  }
 0x3c6   : > { %10665 = vmatpush2.bf16.msra.mxu0 %v14798_v48  ;;  %v14860_v48 = vld [vmem:[%s16115_s6 + $0x193c] ss:$48 sps:$4 sm:$0xff]  }
 0x3c7   : > { %10706 = vmatpush2.bf16.msra.mxu1 %v14801_v54  ;;  %10666 = vmatprep.subr.bf16.mxu0 %v14806_v55  ;;  %v14863_v54 = vld [vmem:[%s16115_s6 + $0x1f3c] ss:$48 sps:$4 sm:$0xff]   ;;  %v14858_v55 = vld [vmem:[%s16115_s6 + $0x1938] ss:$48 sps:$4 sm:$0xff]  }
 0x3c8   : > { %10707 = vmatprep.subr.bf16.mxu1 %v14809_v3  ;;  %v14861_v3 = vld [vmem:[%s16115_s6 + $0x1f38] ss:$48 sps:$4 sm:$0xff]  }
 0x3ca   : > { %10667 = vmatpush2.bf16.msra.mxu0 %v14804_v56  ;;  %v14866_v56 = vld [vmem:[%s16115_s6 + $0x18dc] ss:$48 sps:$4 sm:$0xff]  }
 0x3cb   : > { %10708 = vmatpush2.bf16.msra.mxu1 %v14807_v57  ;;  %10668 = vmatprep.subr.bf16.mxu0 %v14812_v60  ;;  %v14869_v57 = vld [vmem:[%s16115_s6 + $0x1edc] ss:$48 sps:$4 sm:$0xff]   ;;  %v14864_v60 = vld [vmem:[%s16115_s6 + $0x18d8] ss:$48 sps:$4 sm:$0xff]  }
 0x3cc   : > { %10709 = vmatprep.subr.bf16.mxu1 %v14815_v61  ;;  %v14867_v61 = vld [vmem:[%s16115_s6 + $0x1ed8] ss:$48 sps:$4 sm:$0xff]  }
 0x3ce   : > { %10669 = vmatpush2.bf16.msra.mxu0 %v14810_v18  ;;  %v14872_v18 = vld [vmem:[%s16115_s6 + $0x187c] ss:$48 sps:$4 sm:$0xff]  }
 0x3cf   : > { %10710 = vmatpush2.bf16.msra.mxu1 %v14813_v5  ;;  %10670 = vmatprep.subr.bf16.mxu0 %v14818_v58  ;;  %v14875_v5 = vld [vmem:[%s16115_s6 + $0x1e7c] ss:$48 sps:$4 sm:$0xff]   ;;  %v14870_v58 = vld [vmem:[%s16115_s6 + $0x1878] ss:$48 sps:$4 sm:$0xff]  }
 0x3d0   : > { %10711 = vmatprep.subr.bf16.mxu1 %v14821_v63  ;;  %v14873_v63 = vld [vmem:[%s16115_s6 + $0x1e78] ss:$48 sps:$4 sm:$0xff]  }
 0x3d2   : > { %10671 = vmatpush2.bf16.msra.mxu0 %v14816_v16  ;;  %v14878_v16 = vld [vmem:[%s16115_s6 + $0x181c] ss:$48 sps:$4 sm:$0xff]  }
 0x3d3   : > { %10712 = vmatpush2.bf16.msra.mxu1 %v14819_v23  ;;  %10672 = vmatprep.subr.bf16.mxu0 %v14824_v24  ;;  %v14881_v23 = vld [vmem:[%s16115_s6 + $0x1e1c] ss:$48 sps:$4 sm:$0xff]   ;;  %v14876_v24 = vld [vmem:[%s16115_s6 + $0x1818] ss:$48 sps:$4 sm:$0xff]  }
 0x3d4   : > { %10713 = vmatprep.subr.bf16.mxu1 %v14827_v6  ;;  %v14879_v6 = vld [vmem:[%s16115_s6 + $0x1e18] ss:$48 sps:$4 sm:$0xff]  }
 0x3d6   : > { %10673 = vmatpush2.bf16.msra.mxu0 %v14822_v29  ;;  %v14884_v29 = vld [vmem:[%s16115_s6 + $0x1dbc] ss:$48 sps:$4 sm:$0xff]  }
 0x3d7   : > { %10714 = vmatpush2.bf16.msra.mxu1 %v14825_v7  ;;  %10674 = vmatprep.subr.bf16.mxu0 %v14830_v8  ;;  %v14887_v7 = vld [vmem:[%s16115_s6 + $0x23bc] ss:$48 sps:$4 sm:$0xff]   ;;  %v14882_v8 = vld [vmem:[%s16115_s6 + $0x1db8] ss:$48 sps:$4 sm:$0xff]  }
 0x3d8   : > { %10715 = vmatprep.subr.bf16.mxu1 %v14833_v11  ;;  %v14885_v11 = vld [vmem:[%s16115_s6 + $0x23b8] ss:$48 sps:$4 sm:$0xff]  }
 0x3da   : > { %10675 = vmatpush2.bf16.msra.mxu0 %v14828_v12  ;;  %v14890_v12 = vld [vmem:[%s16115_s6 + $0x1d5c] ss:$48 sps:$4 sm:$0xff]  }
 0x3db   : > { %10716 = vmatpush2.bf16.msra.mxu1 %v14831_v14  ;;  %10726 = vmatprep.subr.bf16.mxu0 %v14836_v15  ;;  %v14893_v14 = vld [vmem:[%s16115_s6 + $0x235c] ss:$48 sps:$4 sm:$0xff]   ;;  %v14888_v15 = vld [vmem:[%s16115_s6 + $0x1d58] ss:$48 sps:$4 sm:$0xff]  }
 0x3dc   : > { %10767 = vmatprep.subr.bf16.mxu1 %v14839_v26  ;;  %v14891_v26 = vld [vmem:[%s16115_s6 + $0x2358] ss:$48 sps:$4 sm:$0xff]  }
 0x3dd   : > { %v17204_v31 = vpop.f32.mrf.mxu0  ;;  %10677 = vmatmul.mubr.bf16.vlgmr.msra.gmra.mxu0 %v16298_v21 }
 0x3de   : > { %v17206_v32 = vpop.f32.mrf.mxu1  ;;  %10718 = vmatmul.mubr.bf16.vlgmr.msra.gmra.mxu1 %v16300_v22  ;;  %10727 = vmatpush1.bf16.msra.mxu0 %v14834_v17  ;;  %v14896_v17 = vld [vmem:[%s16115_s6 + $0x1cfc] ss:$48 sps:$4 sm:$0xff]  }
 0x3df   : > { %10768 = vmatpush1.bf16.msra.mxu1 %v14837_v19  ;;  %v17212_v36 = vpop.f32.mrf.mxu0  ;;  %10728 = vmatprep.subr.bf16.mxu0 %v14842_v20  ;;  %v14899_v19 = vld [vmem:[%s16115_s6 + $0x22fc] ss:$48 sps:$4 sm:$0xff]   ;;  %v14894_v20 = vld [vmem:[%s16115_s6 + $0x1cf8] ss:$48 sps:$4 sm:$0xff]  }
 0x3e0   : > { %v17214_v37 = vpop.f32.mrf.mxu1  ;;  %10769 = vmatprep.subr.bf16.mxu1 %v14845_v27  ;;  %10758 = vmatprep.mubr.bf16.mxu0 %v16311_v30  ;;  %v14897_v27 = vld [vmem:[%s16115_s6 + $0x22f8] ss:$48 sps:$4 sm:$0xff]  }
 0x3e1   : > { %10799 = vmatprep.mubr.bf16.mxu1 %v16315_v33  ;;  %v10436_v40 = vpop.f32.mrf.mxu0 }
 0x3e2   : > { %v10477_v28 = vpop.f32.mrf.mxu1  ;;  %10729 = vmatpush1.bf16.msra.mxu0 %v14840_v52  ;;  %v14902_v52 = vld [vmem:[%s16115_s6 + $0x1c9c] ss:$48 sps:$4 sm:$0xff]  }
 0x3e3   : > { %10770 = vmatpush1.bf16.msra.mxu1 %v14843_v34  ;;  %v10437_v0 = vpop.f32.mrf.mxu0  ;;  %10730 = vmatprep.subr.bf16.mxu0 %v14848_v59  ;;  %v14905_v34 = vld [vmem:[%s16115_s6 + $0x229c] ss:$48 sps:$4 sm:$0xff]   ;;  %v14900_v59 = vld [vmem:[%s16115_s6 + $0x1c98] ss:$48 sps:$4 sm:$0xff]  }
 0x3e4   : > { %v10478_v62 = vpop.f32.mrf.mxu1  ;;  %10771 = vmatprep.subr.bf16.mxu1 %v14851_v39  ;;  %v14903_v39 = vld [vmem:[%s16115_s6 + $0x2298] ss:$48 sps:$4 sm:$0xff]   ;;  %v14908_v40 = vld [vmem:[%s16115_s6 + $0x1c3c] ss:$48 sps:$4 sm:$0xff]  }
 0x3e5   : > { %v14911_v28 = vld [vmem:[%s16115_s6 + $0x223c] ss:$48 sps:$4 sm:$0xff]  }
 0x3e6   : > { %10731 = vmatpush1.bf16.msra.mxu0 %v14846_v35  ;;  %v14906_v35 = vld [vmem:[%s16115_s6 + $0x1c38] ss:$48 sps:$4 sm:$0xff]   ;;  %v14914_v0 = vld [vmem:[%s16115_s6 + $0x1bdc] ss:$48 sps:$4 sm:$0xff]  }
 0x3e7   : > { %10772 = vmatpush1.bf16.msra.mxu1 %v14849_v13  ;;  %10732 = vmatprep.subr.bf16.mxu0 %v14854_v42  ;;  %v14909_v13 = vld [vmem:[%s16115_s6 + $0x2238] ss:$48 sps:$4 sm:$0xff]   ;;  %v14917_v62 = vld [vmem:[%s16115_s6 + $0x21dc] ss:$48 sps:$4 sm:$0xff]  }
 0x3e8   : > { %10773 = vmatprep.subr.bf16.mxu1 %v14857_v45  ;;  %v14912_v42 = vld [vmem:[%s16115_s6 + $0x1bd8] ss:$48 sps:$4 sm:$0xff]  }
 0x3e9   : > { %v14915_v45 = vld [vmem:[%s16115_s6 + $0x21d8] ss:$48 sps:$4 sm:$0xff]  }
 0x3ea   : > { %10733 = vmatpush1.bf16.msra.mxu0 %v14852_v46  ;;  %v14920_v46 = vld [vmem:[%s16115_s6 + $0x1b7c] ss:$48 sps:$4 sm:$0xff]  }
 0x3eb   : > { %10774 = vmatpush1.bf16.msra.mxu1 %v14855_v47  ;;  %10734 = vmatprep.subr.bf16.mxu0 %v14860_v48  ;;  %v14923_v47 = vld [vmem:[%s16115_s6 + $0x217c] ss:$48 sps:$4 sm:$0xff]   ;;  %v14918_v48 = vld [vmem:[%s16115_s6 + $0x1b78] ss:$48 sps:$4 sm:$0xff]  }
 0x3ec   : > { %10775 = vmatprep.subr.bf16.mxu1 %v14863_v54  ;;  %v14921_v54 = vld [vmem:[%s16115_s6 + $0x2178] ss:$48 sps:$4 sm:$0xff]  }
 0x3ee   : > { %10735 = vmatpush1.bf16.msra.mxu0 %v14858_v55  ;;  %v14926_v55 = vld [vmem:[%s16115_s6 + $0x1b1c] ss:$48 sps:$4 sm:$0xff]  }
 0x3ef   : > { %10776 = vmatpush1.bf16.msra.mxu1 %v14861_v3  ;;  %10736 = vmatprep.subr.bf16.mxu0 %v14866_v56  ;;  %v14929_v3 = vld [vmem:[%s16115_s6 + $0x211c] ss:$48 sps:$4 sm:$0xff]   ;;  %v14924_v56 = vld [vmem:[%s16115_s6 + $0x1b18] ss:$48 sps:$4 sm:$0xff]  }
 0x3f0   : > { %10777 = vmatprep.subr.bf16.mxu1 %v14869_v57  ;;  %v14927_v57 = vld [vmem:[%s16115_s6 + $0x2118] ss:$48 sps:$4 sm:$0xff]  }
 0x3f2   : > { %10737 = vmatpush1.bf16.msra.mxu0 %v14864_v60  ;;  %v14932_v60 = vld [vmem:[%s16115_s6 + $0x26bc] ss:$48 sps:$4 sm:$0xff]  }
 0x3f3   : > { %10778 = vmatpush1.bf16.msra.mxu1 %v14867_v61  ;;  %10738 = vmatprep.subr.bf16.mxu0 %v14872_v18  ;;  %v14935_v61 = vld [vmem:[%s16115_s6 + $0x2cbc] ss:$48 sps:$4 sm:$0xff]   ;;  %v10433_v18 = vadd.f32 %v17204_v31, %v17137_v4  ;;  %v14936_v31 = vld [vmem:[%s16115_s6 + $0x2658] ss:$48 sps:$4 sm:$0xff]  }
 0x3f4   : > { %10779 = vmatprep.subr.bf16.mxu1 %v14875_v5  ;;  %v10435_v5 = vadd.f32 %v17212_v36, %v17144_v25  ;;  %v14939_v36 = vld [vmem:[%s16115_s6 + $0x2c58] ss:$48 sps:$4 sm:$0xff]  }
 0x3f6   : > { %10739 = vmatpush1.bf16.msra.mxu0 %v14870_v58  ;;  %v14930_v58 = vld [vmem:[%s16115_s6 + $0x26b8] ss:$48 sps:$4 sm:$0xff]   ;;  %v10476_v4 = vadd.f32 %v17214_v37, %v10435_v5  ;;  %v323_v37 = vld [vmem:[#allocation2 + $0x20] sm:$0xff] }
 0x3f7   : > { %10780 = vmatpush1.bf16.msra.mxu1 %v14873_v63  ;;  %10740 = vmatprep.subr.bf16.mxu0 %v14878_v16  ;;  %v14933_v63 = vld [vmem:[%s16115_s6 + $0x2cb8] ss:$48 sps:$4 sm:$0xff]   ;;  %v14938_v16 = vld [vmem:[%s16115_s6 + $0x265c] ss:$48 sps:$4 sm:$0xff]  }
 0x3f8   : > { %10781 = vmatprep.subr.bf16.mxu1 %v14881_v23  ;;  %v14941_v23 = vld [vmem:[%s16115_s6 + $0x2c5c] ss:$48 sps:$4 sm:$0xff]   ;;  %v14975_v5 = vld [vmem:[%s16115_s6 + $0x2a18] ss:$48 sps:$4 sm:$0xff]  }
 0x3fa   : > { %10741 = vmatpush1.bf16.msra.mxu0 %v14876_v24  ;;  %v10474_v24 = vadd.f32 %v17206_v32, %v10433_v18  ;;  %v14944_v32 = vld [vmem:[%s16115_s6 + $0x25fc] ss:$48 sps:$4 sm:$0xff]   ;;  %v14972_v18 = vld [vmem:[%s16115_s6 + $0x2418] ss:$48 sps:$4 sm:$0xff]  }
 0x3fb   : > { %10782 = vmatpush1.bf16.msra.mxu1 %v14879_v6  ;;  %10742 = vmatprep.subr.bf16.mxu0 %v14884_v29 }
 0x3fc   : > { %10783 = vmatprep.subr.bf16.mxu1 %v14887_v7  ;;  %v322_v7 = vld [vmem:[#allocation2 + $0x50] sm:$0xff] }
 0x3fe   : > { %10743 = vmatpush2.bf16.msra.mxu0 %v14882_v8 }
 0x3ff   : > { %10784 = vmatpush2.bf16.msra.mxu1 %v14885_v11  ;;  %10744 = vmatprep.subr.bf16.mxu0 %v14890_v12  ;;  %v14947_v12 = vld [vmem:[%s16115_s6 + $0x2bfc] ss:$48 sps:$4 sm:$0xff]  }
 0x400   : > { %10785 = vmatprep.subr.bf16.mxu1 %v14893_v14 }
 0x402   : > { %10745 = vmatpush2.bf16.msra.mxu0 %v14888_v15 }
 0x403   : > { %10786 = vmatpush2.bf16.msra.mxu1 %v14891_v26  ;;  %10746 = vmatprep.subr.bf16.mxu0 %v14896_v17 }
 0x404   : > { %10787 = vmatprep.subr.bf16.mxu1 %v14899_v19 }
 0x406   : > { %10747 = vmatpush2.bf16.msra.mxu0 %v14894_v20 }
 0x407   : > { %10788 = vmatpush2.bf16.msra.mxu1 %v14897_v27  ;;  %10748 = vmatprep.subr.bf16.mxu0 %v14902_v52  ;;  %v14942_v27 = vld [vmem:[%s16115_s6 + $0x25f8] ss:$48 sps:$4 sm:$0xff]  }
 0x408   : > { %10789 = vmatprep.subr.bf16.mxu1 %v14905_v34  ;;  %v14945_v52 = vld [vmem:[%s16115_s6 + $0x2bf8] ss:$48 sps:$4 sm:$0xff]  }
 0x40a   : > { %10749 = vmatpush2.bf16.msra.mxu0 %v14900_v59 }
 0x40b   : > { %10790 = vmatpush2.bf16.msra.mxu1 %v14903_v39  ;;  %10750 = vmatprep.subr.bf16.mxu0 %v14908_v40  ;;  %v14950_v39 = vld [vmem:[%s16115_s6 + $0x259c] ss:$48 sps:$4 sm:$0xff]  }
 0x40c   : > { %10791 = vmatprep.subr.bf16.mxu1 %v14911_v28  ;;  %v14953_v40 = vld [vmem:[%s16115_s6 + $0x2b9c] ss:$48 sps:$4 sm:$0xff]  }
 0x40e   : > { %10751 = vmatpush2.bf16.msra.mxu0 %v14906_v35  ;;  %v14948_v35 = vld [vmem:[%s16115_s6 + $0x2598] ss:$48 sps:$4 sm:$0xff]  }
 0x40f   : > { %10792 = vmatpush2.bf16.msra.mxu1 %v14909_v13  ;;  %10752 = vmatprep.subr.bf16.mxu0 %v14914_v0  ;;  %v14951_v13 = vld [vmem:[%s16115_s6 + $0x2b98] ss:$48 sps:$4 sm:$0xff]   ;;  %v14956_v0 = vld [vmem:[%s16115_s6 + $0x253c] ss:$48 sps:$4 sm:$0xff]  }
 0x410   : > { %10793 = vmatprep.subr.bf16.mxu1 %v14917_v62  ;;  %v14959_v62 = vld [vmem:[%s16115_s6 + $0x2b3c] ss:$48 sps:$4 sm:$0xff]  }
 0x412   : > { %10753 = vmatpush2.bf16.msra.mxu0 %v14912_v42  ;;  %v14954_v42 = vld [vmem:[%s16115_s6 + $0x2538] ss:$48 sps:$4 sm:$0xff]  }
 0x413   : > { %10794 = vmatpush2.bf16.msra.mxu1 %v14915_v45  ;;  %10754 = vmatprep.subr.bf16.mxu0 %v14920_v46  ;;  %v14957_v45 = vld [vmem:[%s16115_s6 + $0x2b38] ss:$48 sps:$4 sm:$0xff]   ;;  %v14962_v46 = vld [vmem:[%s16115_s6 + $0x24dc] ss:$48 sps:$4 sm:$0xff]  }
 0x414   : > { %10795 = vmatprep.subr.bf16.mxu1 %v14923_v47  ;;  %v14965_v47 = vld [vmem:[%s16115_s6 + $0x2adc] ss:$48 sps:$4 sm:$0xff]  }
 0x416   : > { %10755 = vmatpush2.bf16.msra.mxu0 %v14918_v48  ;;  %v14960_v48 = vld [vmem:[%s16115_s6 + $0x24d8] ss:$48 sps:$4 sm:$0xff]  }
 0x417   : > { %10796 = vmatpush2.bf16.msra.mxu1 %v14921_v54  ;;  %10756 = vmatprep.subr.bf16.mxu0 %v14926_v55  ;;  %v14963_v54 = vld [vmem:[%s16115_s6 + $0x2ad8] ss:$48 sps:$4 sm:$0xff]   ;;  %v14968_v55 = vld [vmem:[%s16115_s6 + $0x247c] ss:$48 sps:$4 sm:$0xff]  }
 0x418   : > { %10797 = vmatprep.subr.bf16.mxu1 %v14929_v3  ;;  %v14971_v3 = vld [vmem:[%s16115_s6 + $0x2a7c] ss:$48 sps:$4 sm:$0xff]  }
 0x41a   : > { %10757 = vmatpush2.bf16.msra.mxu0 %v14924_v56  ;;  %v14966_v56 = vld [vmem:[%s16115_s6 + $0x2478] ss:$48 sps:$4 sm:$0xff]  }
 0x41b   : > { %10798 = vmatpush2.bf16.msra.mxu1 %v14927_v57  ;;  %10808 = vmatprep.subr.bf16.mxu0 %v14932_v60  ;;  %v14969_v57 = vld [vmem:[%s16115_s6 + $0x2a78] ss:$48 sps:$4 sm:$0xff]   ;;  %v14974_v60 = vld [vmem:[%s16115_s6 + $0x241c] ss:$48 sps:$4 sm:$0xff]  }
 0x41c   : > { %10849 = vmatprep.subr.bf16.mxu1 %v14935_v61  ;;  %v14977_v61 = vld [vmem:[%s16115_s6 + $0x2a1c] ss:$48 sps:$4 sm:$0xff]  }
 0x41d   : > { %v10514_v6 = vpop.f32.mrf.mxu0  ;;  %10759 = vmatmul.mubr.bf16.vlgmr.msra.gmra.mxu0 %v16380_v43 }
 0x41e   : > { %v10555_v29 = vpop.f32.mrf.mxu1  ;;  %10800 = vmatmul.mubr.bf16.vlgmr.msra.gmra.mxu1 %v16382_v44  ;;  %v10515_v25 = vadd.f32 %v10514_v6, %v10474_v24  ;;  %10809 = vmatpush1.bf16.msra.mxu0 %v14930_v58  ;;  %v14980_v58 = vld [vmem:[%s16115_s6 + $0x29bc] ss:$48 sps:$4 sm:$0xff]  }
 0x41f   : > { %10850 = vmatpush1.bf16.msra.mxu1 %v14933_v63  ;;  %v10516_v8 = vpop.f32.mrf.mxu0  ;;  %10810 = vmatprep.subr.bf16.mxu0 %v14938_v16  ;;  %v14983_v63 = vld [vmem:[%s16115_s6 + $0x2fbc] ss:$48 sps:$4 sm:$0xff]   ;;  %v14978_v16 = vld [vmem:[%s16115_s6 + $0x29b8] ss:$48 sps:$4 sm:$0xff]  }
 0x420   : > { %v10557_v11 = vpop.f32.mrf.mxu1  ;;  %10851 = vmatprep.subr.bf16.mxu1 %v14941_v23  ;;  %v10556_v14 = vadd.f32 %v10555_v29, %v10515_v25  ;;  %v10517_v15 = vadd.f32 %v10516_v8, %v10476_v4  ;;  %10840 = vmatprep.mubr.bf16.mxu0 %v16388_v49  ;;  %v14981_v23 = vld [vmem:[%s16115_s6 + $0x2fb8] ss:$48 sps:$4 sm:$0xff]   ;;  %v14986_v24 = vld [vmem:[%s16115_s6 + $0x295c] ss:$48 sps:$4 sm:$0xff]  }
 0x421   : > { %10881 = vmatprep.mubr.bf16.mxu1 %v16390_v51  ;;  %v10518_v26 = vpop.f32.mrf.mxu0  ;;  %v14989_v6 = vld [vmem:[%s16115_s6 + $0x2f5c] ss:$48 sps:$4 sm:$0xff]   ;;  %v14984_v29 = vld [vmem:[%s16115_s6 + $0x2958] ss:$48 sps:$4 sm:$0xff]  }
 0x422   : > { %v10559_v17 = vpop.f32.mrf.mxu1  ;;  %v11550_v19 = vadd.f32 %v10556_v14, %v322_v7  ;;  %v10558_v20 = vadd.f32 %v10557_v11, %v10517_v15  ;;  %10811 = vmatpush1.bf16.msra.mxu0 %v14936_v31  ;;  %v14987_v4 = vld [vmem:[%s16115_s6 + $0x2f58] ss:$48 sps:$4 sm:$0xff]   ;;  %v14992_v25 = vld [vmem:[%s16115_s6 + $0x28fc] ss:$48 sps:$4 sm:$0xff]  }
 0x423   : > { %10852 = vmatpush1.bf16.msra.mxu1 %v14939_v36  ;;  %v10519_v34 = vpop.f32.mrf.mxu0  ;;  %10812 = vmatprep.subr.bf16.mxu0 %v14944_v32  ;;  %v14995_v31 = vld [vmem:[%s16115_s6 + $0x2efc] ss:$48 sps:$4 sm:$0xff]   ;;  %v14990_v36 = vld [vmem:[%s16115_s6 + $0x28f8] ss:$48 sps:$4 sm:$0xff]  }
 0x424   : > { %v10560_v59 = vpop.f32.mrf.mxu1  ;;  %10853 = vmatprep.subr.bf16.mxu1 %v14947_v12  ;;  %11562 = vst [vmem:[#allocation2 + $0x50] sm:$0xff] %v11550_v19  ;;  %v11551_v28 = vadd.f32 %v10558_v20, %v323_v37  ;;  %v14993_v7 = vld [vmem:[%s16115_s6 + $0x2ef8] ss:$48 sps:$4 sm:$0xff]   ;;  %v14998_v8 = vld [vmem:[%s16115_s6 + $0x289c] ss:$48 sps:$4 sm:$0xff]  }
 0x425   : > { %v15001_v11 = vld [vmem:[%s16115_s6 + $0x2e9c] ss:$48 sps:$4 sm:$0xff]   ;;  %v14996_v32 = vld [vmem:[%s16115_s6 + $0x2898] ss:$48 sps:$4 sm:$0xff]  }
 0x426   : > { %11563 = vst [vmem:[#allocation2 + $0x20] sm:$0xff] %v11551_v28  ;;  %10813 = vmatpush1.bf16.msra.mxu0 %v14942_v27  ;;  %v14999_v12 = vld [vmem:[%s16115_s6 + $0x2e98] ss:$48 sps:$4 sm:$0xff]   ;;  %v15004_v14 = vld [vmem:[%s16115_s6 + $0x283c] ss:$48 sps:$4 sm:$0xff]  }
 0x427   : > { %10854 = vmatpush1.bf16.msra.mxu1 %v14945_v52  ;;  %10814 = vmatprep.subr.bf16.mxu0 %v14950_v39  ;;  %v15007_v15 = vld [vmem:[%s16115_s6 + $0x2e3c] ss:$48 sps:$4 sm:$0xff]   ;;  %v15002_v37 = vld [vmem:[%s16115_s6 + $0x2838] ss:$48 sps:$4 sm:$0xff]  }
 0x428   : > { %10855 = vmatprep.subr.bf16.mxu1 %v14953_v40  ;;  %v15005_v26 = vld [vmem:[%s16115_s6 + $0x2e38] ss:$48 sps:$4 sm:$0xff]   ;;  %v15010_v17 = vld [vmem:[%s16115_s6 + $0x27dc] ss:$48 sps:$4 sm:$0xff]  }
 0x429   : > { %v15013_v19 = vld [vmem:[%s16115_s6 + $0x2ddc] ss:$48 sps:$4 sm:$0xff]   ;;  %v15008_v20 = vld [vmem:[%s16115_s6 + $0x27d8] ss:$48 sps:$4 sm:$0xff]  }
 0x42a   : > { %10815 = vmatpush1.bf16.msra.mxu0 %v14948_v35  ;;  %v15011_v27 = vld [vmem:[%s16115_s6 + $0x2dd8] ss:$48 sps:$4 sm:$0xff]   ;;  %v15016_v52 = vld [vmem:[%s16115_s6 + $0x277c] ss:$48 sps:$4 sm:$0xff]  }
 0x42b   : > { %10856 = vmatpush1.bf16.msra.mxu1 %v14951_v13  ;;  %10816 = vmatprep.subr.bf16.mxu0 %v14956_v0  ;;  %v15019_v34 = vld [vmem:[%s16115_s6 + $0x2d7c] ss:$48 sps:$4 sm:$0xff]   ;;  %v15014_v59 = vld [vmem:[%s16115_s6 + $0x2778] ss:$48 sps:$4 sm:$0xff]   ;;  %v15028_v0 = vld [vmem:[%s16115_s6 + $0x2c4] ss:$48 sps:$4 sm:$0xff]  }
 0x42c   : > { %10857 = vmatprep.subr.bf16.mxu1 %v14959_v62  ;;  %v15017_v39 = vld [vmem:[%s16115_s6 + $0x2d78] ss:$48 sps:$4 sm:$0xff]   ;;  %v15022_v40 = vld [vmem:[%s16115_s6 + $0x271c] ss:$48 sps:$4 sm:$0xff]   ;;  %v15031_v62 = vld [vmem:[%s16115_s6 + $0x8c4] ss:$48 sps:$4 sm:$0xff]  }
 0x42d   : > { %v15025_v28 = vld [vmem:[%s16115_s6 + $0x2d1c] ss:$48 sps:$4 sm:$0xff]   ;;  %v15020_v35 = vld [vmem:[%s16115_s6 + $0x2718] ss:$48 sps:$4 sm:$0xff]  }
 0x42e   : > { %10817 = vmatpush1.bf16.msra.mxu0 %v14954_v42  ;;  %v15023_v13 = vld [vmem:[%s16115_s6 + $0x2d18] ss:$48 sps:$4 sm:$0xff]   ;;  %v15026_v42 = vld [vmem:[%s16115_s6 + $0x2c0] ss:$48 sps:$4 sm:$0xff]  }
 0x42f   : > { %10858 = vmatpush1.bf16.msra.mxu1 %v14957_v45  ;;  %10818 = vmatprep.subr.bf16.mxu0 %v14962_v46  ;;  %v15029_v45 = vld [vmem:[%s16115_s6 + $0x8c0] ss:$48 sps:$4 sm:$0xff]   ;;  %v15034_v46 = vld [vmem:[%s16115_s6 + $0x264] ss:$48 sps:$4 sm:$0xff]  }
 0x430   : > { %10859 = vmatprep.subr.bf16.mxu1 %v14965_v47  ;;  %v15037_v47 = vld [vmem:[%s16115_s6 + $0x864] ss:$48 sps:$4 sm:$0xff]  }
 0x432   : > { %10819 = vmatpush1.bf16.msra.mxu0 %v14960_v48 }
 0x433   : > { %10860 = vmatpush1.bf16.msra.mxu1 %v14963_v54  ;;  %10820 = vmatprep.subr.bf16.mxu0 %v14968_v55 }
 0x434   : > { %10861 = vmatprep.subr.bf16.mxu1 %v14971_v3  ;;  %v15032_v3 = vld [vmem:[%s16115_s6 + $0x260] ss:$48 sps:$4 sm:$0xff]  }
 0x436   : > { %10821 = vmatpush1.bf16.msra.mxu0 %v14966_v56  ;;  %v15035_v56 = vld [vmem:[%s16115_s6 + $0x860] ss:$48 sps:$4 sm:$0xff]  }
 0x437   : > { %10862 = vmatpush1.bf16.msra.mxu1 %v14969_v57  ;;  %10822 = vmatprep.subr.bf16.mxu0 %v14974_v60 }
 0x438   : > { %10863 = vmatprep.subr.bf16.mxu1 %v14977_v61  ;;  %v15040_v61 = vld [vmem:[%s16115_s6 + $0x204] ss:$48 sps:$4 sm:$0xff]  }
 0x43a   : > { %10823 = vmatpush1.bf16.msra.mxu0 %v14972_v18  ;;  %v15043_v18 = vld [vmem:[%s16115_s6 + $0x804] ss:$48 sps:$4 sm:$0xff]  }
 0x43b   : > { %10864 = vmatpush1.bf16.msra.mxu1 %v14975_v5  ;;  %10824 = vmatprep.subr.bf16.mxu0 %v14980_v58 }
 0x43c   : > { %10865 = vmatprep.subr.bf16.mxu1 %v14983_v63 }
 0x43e   : > { %10825 = vmatpush2.bf16.msra.mxu0 %v14978_v16  ;;  %v15038_v16 = vld [vmem:[%s16115_s6 + $0x200] ss:$48 sps:$4 sm:$0xff]  }
 0x43f   : > { %10866 = vmatpush2.bf16.msra.mxu1 %v14981_v23  ;;  %10826 = vmatprep.subr.bf16.mxu0 %v14986_v24  ;;  %v15041_v23 = vld [vmem:[%s16115_s6 + $0x800] ss:$48 sps:$4 sm:$0xff]  }
 0x440   : > { %10867 = vmatprep.subr.bf16.mxu1 %v14989_v6 }
 0x442   : > { %10827 = vmatpush2.bf16.msra.mxu0 %v14984_v29  ;;  %v15046_v29 = vld [vmem:[%s16115_s6 + $0x1a4] ss:$48 sps:$4 sm:$0xff]  }
 0x443   : > { %10868 = vmatpush2.bf16.msra.mxu1 %v14987_v4  ;;  %10828 = vmatprep.subr.bf16.mxu0 %v14992_v25  ;;  %v15049_v4 = vld [vmem:[%s16115_s6 + $0x7a4] ss:$48 sps:$4 sm:$0xff]   ;;  %v15044_v25 = vld [vmem:[%s16115_s6 + $0x1a0] ss:$48 sps:$4 sm:$0xff]  }
 0x444   : > { %10869 = vmatprep.subr.bf16.mxu1 %v14995_v31  ;;  %v15047_v31 = vld [vmem:[%s16115_s6 + $0x7a0] ss:$48 sps:$4 sm:$0xff]  }
 0x446   : > { %10829 = vmatpush2.bf16.msra.mxu0 %v14990_v36  ;;  %v15052_v36 = vld [vmem:[%s16115_s6 + $0x144] ss:$48 sps:$4 sm:$0xff]  }
 0x447   : > { %10870 = vmatpush2.bf16.msra.mxu1 %v14993_v7  ;;  %10830 = vmatprep.subr.bf16.mxu0 %v14998_v8  ;;  %v15055_v7 = vld [vmem:[%s16115_s6 + $0x744] ss:$48 sps:$4 sm:$0xff]   ;;  %v15050_v8 = vld [vmem:[%s16115_s6 + $0x140] ss:$48 sps:$4 sm:$0xff]  }
 0x448   : > { %10871 = vmatprep.subr.bf16.mxu1 %v15001_v11  ;;  %v15053_v11 = vld [vmem:[%s16115_s6 + $0x740] ss:$48 sps:$4 sm:$0xff]  }
 0x44a   : > { %10831 = vmatpush2.bf16.msra.mxu0 %v14996_v32  ;;  %v15058_v32 = vld [vmem:[%s16115_s6 + $0xe4] ss:$48 sps:$4 sm:$0xff]  }
 0x44b   : > { %10872 = vmatpush2.bf16.msra.mxu1 %v14999_v12  ;;  %10832 = vmatprep.subr.bf16.mxu0 %v15004_v14  ;;  %v15061_v12 = vld [vmem:[%s16115_s6 + $0x6e4] ss:$48 sps:$4 sm:$0xff]   ;;  %v15056_v14 = vld [vmem:[%s16115_s6 + $0xe0] ss:$48 sps:$4 sm:$0xff]  }
 0x44c   : > { %10873 = vmatprep.subr.bf16.mxu1 %v15007_v15  ;;  %v15059_v15 = vld [vmem:[%s16115_s6 + $0x6e0] ss:$48 sps:$4 sm:$0xff]  }
 0x44e   : > { %10833 = vmatpush2.bf16.msra.mxu0 %v15002_v37  ;;  %v15064_v37 = vld [vmem:[%s16115_s6 + $0x84] ss:$48 sps:$4 sm:$0xff]  }
 0x44f   : > { %10874 = vmatpush2.bf16.msra.mxu1 %v15005_v26  ;;  %10834 = vmatprep.subr.bf16.mxu0 %v15010_v17  ;;  %v15067_v26 = vld [vmem:[%s16115_s6 + $0x684] ss:$48 sps:$4 sm:$0xff]   ;;  %v15062_v17 = vld [vmem:[%s16115_s6 + $0x80] ss:$48 sps:$4 sm:$0xff]  }
 0x450   : > { %10875 = vmatprep.subr.bf16.mxu1 %v15013_v19  ;;  %v15065_v19 = vld [vmem:[%s16115_s6 + $0x680] ss:$48 sps:$4 sm:$0xff]  }
 0x452   : > { %10835 = vmatpush2.bf16.msra.mxu0 %v15008_v20  ;;  %v15070_v20 = vld [vmem:[%s16115_s6 + $0x24] ss:$48 sps:$4 sm:$0xff]  }
 0x453   : > { %10876 = vmatpush2.bf16.msra.mxu1 %v15011_v27  ;;  %10836 = vmatprep.subr.bf16.mxu0 %v15016_v52  ;;  %v15073_v27 = vld [vmem:[%s16115_s6 + $0x624] ss:$48 sps:$4 sm:$0xff]   ;;  %v15068_v52 = vld [vmem:[%s16115_s6 + $0x20] ss:$48 sps:$4 sm:$0xff]  }
 0x454   : > { %10877 = vmatprep.subr.bf16.mxu1 %v15019_v34  ;;  %v15071_v34 = vld [vmem:[%s16115_s6 + $0x620] ss:$48 sps:$4 sm:$0xff]  }
 0x456   : > { %10837 = vmatpush2.bf16.msra.mxu0 %v15014_v59  ;;  %v15076_v59 = vld [vmem:[%s16115_s6 + $0x5c4] ss:$48 sps:$4 sm:$0xff]  }
 0x457   : > { %10878 = vmatpush2.bf16.msra.mxu1 %v15017_v39  ;;  %10838 = vmatprep.subr.bf16.mxu0 %v15022_v40  ;;  %v15079_v39 = vld [vmem:[%s16115_s6 + $0xbc4] ss:$48 sps:$4 sm:$0xff]   ;;  %v15074_v40 = vld [vmem:[%s16115_s6 + $0x5c0] ss:$48 sps:$4 sm:$0xff]  }
 0x458   : > { %10879 = vmatprep.subr.bf16.mxu1 %v15025_v28  ;;  %v15077_v28 = vld [vmem:[%s16115_s6 + $0xbc0] ss:$48 sps:$4 sm:$0xff]  }
 0x45a   : > { %10839 = vmatpush2.bf16.msra.mxu0 %v15020_v35  ;;  %v15082_v35 = vld [vmem:[%s16115_s6 + $0x564] ss:$48 sps:$4 sm:$0xff]  }
 0x45b   : > { %10880 = vmatpush2.bf16.msra.mxu1 %v15023_v13  ;;  %10890 = vmatprep.subr.bf16.mxu0 %v15028_v0  ;;  %v15085_v13 = vld [vmem:[%s16115_s6 + $0xb64] ss:$48 sps:$4 sm:$0xff]   ;;  %v15080_v0 = vld [vmem:[%s16115_s6 + $0x560] ss:$48 sps:$4 sm:$0xff]  }
 0x45c   : > { %10931 = vmatprep.subr.bf16.mxu1 %v15031_v62  ;;  %v15083_v62 = vld [vmem:[%s16115_s6 + $0xb60] ss:$48 sps:$4 sm:$0xff]  }
 0x45d   : > { %v10596_v48 = vpop.f32.mrf.mxu0  ;;  %10841 = vmatmul.mubr.bf16.vlgmr.msra.gmra.mxu0 %v16458_v1 }
 0x45e   : > { %v10637_v54 = vpop.f32.mrf.mxu1  ;;  %10882 = vmatmul.mubr.bf16.vlgmr.msra.gmra.mxu1 %v16460_v2  ;;  %10891 = vmatpush1.bf16.msra.mxu0 %v15026_v42  ;;  %v15088_v42 = vld [vmem:[%s16115_s6 + $0x504] ss:$48 sps:$4 sm:$0xff]  }
 0x45f   : > { %v17356_v55 = vadd.f32 %v10637_v54, %v10596_v48  ;;  %10932 = vmatpush1.bf16.msra.mxu1 %v15029_v45  ;;  %v10598_v57 = vpop.f32.mrf.mxu0  ;;  %10892 = vmatprep.subr.bf16.mxu0 %v15034_v46  ;;  %v15091_v45 = vld [vmem:[%s16115_s6 + $0xb04] ss:$48 sps:$4 sm:$0xff]   ;;  %v15086_v46 = vld [vmem:[%s16115_s6 + $0x500] ss:$48 sps:$4 sm:$0xff]  }
 0x460   : > { %v10639_v60 = vpop.f32.mrf.mxu1  ;;  %10933 = vmatprep.subr.bf16.mxu1 %v15037_v47  ;;  %10922 = vmatprep.mubr.bf16.mxu0 %v16191_v50  ;;  %v15089_v47 = vld [vmem:[%s16115_s6 + $0xb00] ss:$48 sps:$4 sm:$0xff]   ;;  %v15094_v48 = vld [vmem:[%s16115_s6 + $0x4a4] ss:$48 sps:$4 sm:$0xff]  }
 0x461   : > { %v17362_v5 = vadd.f32 %v10639_v60, %v10598_v57  ;;  %10963 = vmatprep.mubr.bf16.mxu1 %v16195_v53  ;;  %v10600_v58 = vpop.f32.mrf.mxu0  ;;  %v15097_v54 = vld [vmem:[%s16115_s6 + $0xaa4] ss:$48 sps:$4 sm:$0xff]  }
 0x462   : > { %v10641_v63 = vpop.f32.mrf.mxu1  ;;  %10893 = vmatpush1.bf16.msra.mxu0 %v15032_v3  ;;  %v15092_v3 = vld [vmem:[%s16115_s6 + $0x4a0] ss:$48 sps:$4 sm:$0xff]   ;;  %v15100_v57 = vld [vmem:[%s16115_s6 + $0x444] ss:$48 sps:$4 sm:$0xff]  }
 0x463   : > { %10934 = vmatpush1.bf16.msra.mxu1 %v15035_v56  ;;  %v10601_v24 = vpop.f32.mrf.mxu0  ;;  %10894 = vmatprep.subr.bf16.mxu0 %v15040_v61  ;;  %v15095_v56 = vld [vmem:[%s16115_s6 + $0xaa0] ss:$48 sps:$4 sm:$0xff]   ;;  %v15103_v60 = vld [vmem:[%s16115_s6 + $0xa44] ss:$48 sps:$4 sm:$0xff]  }
 0x464   : > { %v10642_v6 = vpop.f32.mrf.mxu1  ;;  %10935 = vmatprep.subr.bf16.mxu1 %v15043_v18  ;;  %v15098_v61 = vld [vmem:[%s16115_s6 + $0x440] ss:$48 sps:$4 sm:$0xff]   ;;  %v15106_v58 = vld [vmem:[%s16115_s6 + $0x3e4] ss:$48 sps:$4 sm:$0xff]  }
 0x465   : > { %v15101_v18 = vld [vmem:[%s16115_s6 + $0xa40] ss:$48 sps:$4 sm:$0xff]   ;;  %v15109_v63 = vld [vmem:[%s16115_s6 + $0x9e4] ss:$48 sps:$4 sm:$0xff]  }
 0x466   : > { %10895 = vmatpush1.bf16.msra.mxu0 %v15038_v16  ;;  %v15104_v16 = vld [vmem:[%s16115_s6 + $0x3e0] ss:$48 sps:$4 sm:$0xff]   ;;  %v15112_v24 = vld [vmem:[%s16115_s6 + $0x384] ss:$48 sps:$4 sm:$0xff]  }
 0x467   : > { %10936 = vmatpush1.bf16.msra.mxu1 %v15041_v23  ;;  %10896 = vmatprep.subr.bf16.mxu0 %v15046_v29  ;;  %v15107_v23 = vld [vmem:[%s16115_s6 + $0x9e0] ss:$48 sps:$4 sm:$0xff]   ;;  %v15115_v6 = vld [vmem:[%s16115_s6 + $0x984] ss:$48 sps:$4 sm:$0xff]  }
 0x468   : > { %10937 = vmatprep.subr.bf16.mxu1 %v15049_v4  ;;  %v15110_v29 = vld [vmem:[%s16115_s6 + $0x380] ss:$48 sps:$4 sm:$0xff]  }
 0x469   : > { %v15113_v4 = vld [vmem:[%s16115_s6 + $0x980] ss:$48 sps:$4 sm:$0xff]  }
 0x46a   : > { %10897 = vmatpush1.bf16.msra.mxu0 %v15044_v25  ;;  %v15118_v25 = vld [vmem:[%s16115_s6 + $0x324] ss:$48 sps:$4 sm:$0xff]  }
 0x46b   : > { %10938 = vmatpush1.bf16.msra.mxu1 %v15047_v31  ;;  %10898 = vmatprep.subr.bf16.mxu0 %v15052_v36  ;;  %v15121_v31 = vld [vmem:[%s16115_s6 + $0x924] ss:$48 sps:$4 sm:$0xff]   ;;  %v15116_v36 = vld [vmem:[%s16115_s6 + $0x320] ss:$48 sps:$4 sm:$0xff]  }
 0x46c   : > { %10939 = vmatprep.subr.bf16.mxu1 %v15055_v7  ;;  %v15119_v7 = vld [vmem:[%s16115_s6 + $0x920] ss:$48 sps:$4 sm:$0xff]  }
 0x46e   : > { %10899 = vmatpush1.bf16.msra.mxu0 %v15050_v8  ;;  %v15124_v8 = vld [vmem:[%s16115_s6 + $0xec4] ss:$48 sps:$4 sm:$0xff]  }
 0x46f   : > { %10940 = vmatpush1.bf16.msra.mxu1 %v15053_v11  ;;  %10900 = vmatprep.subr.bf16.mxu0 %v15058_v32  ;;  %v15127_v11 = vld [vmem:[%s16115_s6 + $0x14c4] ss:$48 sps:$4 sm:$0xff]   ;;  %v15122_v32 = vld [vmem:[%s16115_s6 + $0xec0] ss:$48 sps:$4 sm:$0xff]  }
 0x470   : > { %10941 = vmatprep.subr.bf16.mxu1 %v15061_v12  ;;  %v15125_v12 = vld [vmem:[%s16115_s6 + $0x14c0] ss:$48 sps:$4 sm:$0xff]  }
 0x472   : > { %10901 = vmatpush1.bf16.msra.mxu0 %v15056_v14  ;;  %v15130_v14 = vld [vmem:[%s16115_s6 + $0xe64] ss:$48 sps:$4 sm:$0xff]  }
 0x473   : > { %10942 = vmatpush1.bf16.msra.mxu1 %v15059_v15  ;;  %10902 = vmatprep.subr.bf16.mxu0 %v15064_v37  ;;  %v15133_v15 = vld [vmem:[%s16115_s6 + $0x1464] ss:$48 sps:$4 sm:$0xff]  }
 0x474   : > { %10943 = vmatprep.subr.bf16.mxu1 %v15067_v26 }
 0x476   : > { %10903 = vmatpush1.bf16.msra.mxu0 %v15062_v17 }
 0x477   : > { %10944 = vmatpush1.bf16.msra.mxu1 %v15065_v19  ;;  %10904 = vmatprep.subr.bf16.mxu0 %v15070_v20  ;;  %v15128_v19 = vld [vmem:[%s16115_s6 + $0xe60] ss:$48 sps:$4 sm:$0xff]  }
 0x478   : > { %10945 = vmatprep.subr.bf16.mxu1 %v15073_v27  ;;  %v15131_v20 = vld [vmem:[%s16115_s6 + $0x1460] ss:$48 sps:$4 sm:$0xff]  }
 0x47a   : > { %10905 = vmatpush1.bf16.msra.mxu0 %v15068_v52 }
 0x47b   : > { %10946 = vmatpush1.bf16.msra.mxu1 %v15071_v34  ;;  %10906 = vmatprep.subr.bf16.mxu0 %v15076_v59  ;;  %v15136_v34 = vld [vmem:[%s16115_s6 + $0xe04] ss:$48 sps:$4 sm:$0xff]  }
 0x47c   : > { %10947 = vmatprep.subr.bf16.mxu1 %v15079_v39  ;;  %v15139_v59 = vld [vmem:[%s16115_s6 + $0x1404] ss:$48 sps:$4 sm:$0xff]  }
 0x47e   : > { %10907 = vmatpush2.bf16.msra.mxu0 %v15074_v40 }
 0x47f   : > { %10948 = vmatpush2.bf16.msra.mxu1 %v15077_v28  ;;  %10908 = vmatprep.subr.bf16.mxu0 %v15082_v35 }
 0x480   : > { %10949 = vmatprep.subr.bf16.mxu1 %v15085_v13  ;;  %v15134_v13 = vld [vmem:[%s16115_s6 + $0xe00] ss:$48 sps:$4 sm:$0xff]  }
 0x482   : > { %10909 = vmatpush2.bf16.msra.mxu0 %v15080_v0  ;;  %v15137_v0 = vld [vmem:[%s16115_s6 + $0x1400] ss:$48 sps:$4 sm:$0xff]  }
 0x483   : > { %10950 = vmatpush2.bf16.msra.mxu1 %v15083_v62  ;;  %10910 = vmatprep.subr.bf16.mxu0 %v15088_v42 }
 0x484   : > { %10951 = vmatprep.subr.bf16.mxu1 %v15091_v45  ;;  %v15145_v45 = vld [vmem:[%s16115_s6 + $0x13a4] ss:$48 sps:$4 sm:$0xff]  }
 0x486   : > { %10911 = vmatpush2.bf16.msra.mxu0 %v15086_v46  ;;  %v15140_v46 = vld [vmem:[%s16115_s6 + $0xda0] ss:$48 sps:$4 sm:$0xff]  }
 0x487   : > { %10952 = vmatpush2.bf16.msra.mxu1 %v15089_v47  ;;  %10912 = vmatprep.subr.bf16.mxu0 %v15094_v48  ;;  %v15143_v47 = vld [vmem:[%s16115_s6 + $0x13a0] ss:$48 sps:$4 sm:$0xff]   ;;  %v15148_v48 = vld [vmem:[%s16115_s6 + $0xd44] ss:$48 sps:$4 sm:$0xff]  }
 0x488   : > { %10953 = vmatprep.subr.bf16.mxu1 %v15097_v54  ;;  %v15151_v54 = vld [vmem:[%s16115_s6 + $0x1344] ss:$48 sps:$4 sm:$0xff]  }
 0x48a   : > { %10913 = vmatpush2.bf16.msra.mxu0 %v15092_v3  ;;  %v15146_v3 = vld [vmem:[%s16115_s6 + $0xd40] ss:$48 sps:$4 sm:$0xff]  }
 0x48b   : > { %10954 = vmatpush2.bf16.msra.mxu1 %v15095_v56  ;;  %10914 = vmatprep.subr.bf16.mxu0 %v15100_v57  ;;  %v15149_v56 = vld [vmem:[%s16115_s6 + $0x1340] ss:$48 sps:$4 sm:$0xff]   ;;  %v15154_v57 = vld [vmem:[%s16115_s6 + $0xce4] ss:$48 sps:$4 sm:$0xff]  }
 0x48c   : > { %10955 = vmatprep.subr.bf16.mxu1 %v15103_v60  ;;  %v15157_v60 = vld [vmem:[%s16115_s6 + $0x12e4] ss:$48 sps:$4 sm:$0xff]  }
 0x48e   : > { %10915 = vmatpush2.bf16.msra.mxu0 %v15098_v61  ;;  %v15152_v61 = vld [vmem:[%s16115_s6 + $0xce0] ss:$48 sps:$4 sm:$0xff]  }
 0x48f   : > { %10956 = vmatpush2.bf16.msra.mxu1 %v15101_v18  ;;  %10916 = vmatprep.subr.bf16.mxu0 %v15106_v58  ;;  %v15155_v18 = vld [vmem:[%s16115_s6 + $0x12e0] ss:$48 sps:$4 sm:$0xff]   ;;  %v15160_v58 = vld [vmem:[%s16115_s6 + $0xc84] ss:$48 sps:$4 sm:$0xff]  }
 0x490   : > { %10957 = vmatprep.subr.bf16.mxu1 %v15109_v63  ;;  %v15163_v63 = vld [vmem:[%s16115_s6 + $0x1284] ss:$48 sps:$4 sm:$0xff]  }
 0x492   : > { %10917 = vmatpush2.bf16.msra.mxu0 %v15104_v16  ;;  %v15158_v16 = vld [vmem:[%s16115_s6 + $0xc80] ss:$48 sps:$4 sm:$0xff]  }
 0x493   : > { %10958 = vmatpush2.bf16.msra.mxu1 %v15107_v23  ;;  %10918 = vmatprep.subr.bf16.mxu0 %v15112_v24  ;;  %v15161_v23 = vld [vmem:[%s16115_s6 + $0x1280] ss:$48 sps:$4 sm:$0xff]   ;;  %v15166_v24 = vld [vmem:[%s16115_s6 + $0xc24] ss:$48 sps:$4 sm:$0xff]  }
 0x494   : > { %10959 = vmatprep.subr.bf16.mxu1 %v15115_v6  ;;  %v15169_v6 = vld [vmem:[%s16115_s6 + $0x1224] ss:$48 sps:$4 sm:$0xff]  }
 0x496   : > { %10919 = vmatpush2.bf16.msra.mxu0 %v15110_v29  ;;  %v15164_v29 = vld [vmem:[%s16115_s6 + $0xc20] ss:$48 sps:$4 sm:$0xff]  }
 0x497   : > { %10960 = vmatpush2.bf16.msra.mxu1 %v15113_v4  ;;  %10920 = vmatprep.subr.bf16.mxu0 %v15118_v25  ;;  %v15167_v4 = vld [vmem:[%s16115_s6 + $0x1220] ss:$48 sps:$4 sm:$0xff]   ;;  %v15172_v25 = vld [vmem:[%s16115_s6 + $0x11c4] ss:$48 sps:$4 sm:$0xff]  }
 0x498   : > { %10961 = vmatprep.subr.bf16.mxu1 %v15121_v31  ;;  %v15175_v31 = vld [vmem:[%s16115_s6 + $0x17c4] ss:$48 sps:$4 sm:$0xff]  }
 0x49a   : > { %10921 = vmatpush2.bf16.msra.mxu0 %v15116_v36  ;;  %v15170_v36 = vld [vmem:[%s16115_s6 + $0x11c0] ss:$48 sps:$4 sm:$0xff]  }
 0x49b   : > { %10962 = vmatpush2.bf16.msra.mxu1 %v15119_v7  ;;  %10972 = vmatprep.subr.bf16.mxu0 %v15124_v8  ;;  %v15173_v7 = vld [vmem:[%s16115_s6 + $0x17c0] ss:$48 sps:$4 sm:$0xff]   ;;  %v15178_v8 = vld [vmem:[%s16115_s6 + $0x1164] ss:$48 sps:$4 sm:$0xff]  }
 0x49c   : > { %11013 = vmatprep.subr.bf16.mxu1 %v15127_v11  ;;  %v15181_v11 = vld [vmem:[%s16115_s6 + $0x1764] ss:$48 sps:$4 sm:$0xff]  }
 0x49d   : > { %v10678_v37 = vpop.f32.mrf.mxu0  ;;  %10923 = vmatmul.mubr.bf16.vlgmr.msra.gmra.mxu0 %v16218_v9 }
 0x49e   : > { %v10719_v26 = vpop.f32.mrf.mxu1  ;;  %10964 = vmatmul.mubr.bf16.vlgmr.msra.gmra.mxu1 %v16220_v10  ;;  %v10679_v17 = vadd.f32 %v10678_v37, %v17356_v55  ;;  %10973 = vmatpush1.bf16.msra.mxu0 %v15122_v32  ;;  %v15176_v32 = vld [vmem:[%s16115_s6 + $0x1160] ss:$48 sps:$4 sm:$0xff]  }
 0x49f   : > { %11014 = vmatpush1.bf16.msra.mxu1 %v15125_v12  ;;  %v10680_v27 = vpop.f32.mrf.mxu0  ;;  %10974 = vmatprep.subr.bf16.mxu0 %v15130_v14  ;;  %v15179_v12 = vld [vmem:[%s16115_s6 + $0x1760] ss:$48 sps:$4 sm:$0xff]   ;;  %v15184_v14 = vld [vmem:[%s16115_s6 + $0x1104] ss:$48 sps:$4 sm:$0xff]  }
 0x4a0   : > { %v10721_v52 = vpop.f32.mrf.mxu1  ;;  %11015 = vmatprep.subr.bf16.mxu1 %v15133_v15  ;;  %v17433_v39 = vadd.f32 %v10719_v26, %v10679_v17  ;;  %v10681_v40 = vadd.f32 %v10680_v27, %v17362_v5  ;;  %11004 = vmatprep.mubr.bf16.mxu0 %v16251_v38  ;;  %v15142_v5 = vld [vmem:[%s16115_s6 + $0xda4] ss:$48 sps:$4 sm:$0xff]   ;;  %v15182_v37 = vld [vmem:[%s16115_s6 + $0x1100] ss:$48 sps:$4 sm:$0xff]  }
 0x4a1   : > { %11045 = vmatprep.mubr.bf16.mxu1 %v16255_v41  ;;  %v10682_v55 = vpop.f32.mrf.mxu0  ;;  %v15187_v15 = vld [vmem:[%s16115_s6 + $0x1704] ss:$48 sps:$4 sm:$0xff]   ;;  %v15185_v26 = vld [vmem:[%s16115_s6 + $0x1700] ss:$48 sps:$4 sm:$0xff]  }
 0x4a2   : > { %v10723_v28 = vpop.f32.mrf.mxu1  ;;  %v17438_v35 = vadd.f32 %v10721_v52, %v10681_v40  ;;  %10975 = vmatpush1.bf16.msra.mxu0 %v15128_v19  ;;  %v15190_v17 = vld [vmem:[%s16115_s6 + $0x10a4] ss:$48 sps:$4 sm:$0xff]   ;;  %v15191_v27 = vld [vmem:[%s16115_s6 + $0x16a0] ss:$48 sps:$4 sm:$0xff]  }
 0x4a3   : > { %11016 = vmatpush1.bf16.msra.mxu1 %v15131_v20  ;;  %v10683_v62 = vpop.f32.mrf.mxu0  ;;  %10976 = vmatprep.subr.bf16.mxu0 %v15136_v34  ;;  %v15193_v19 = vld [vmem:[%s16115_s6 + $0x16a4] ss:$48 sps:$4 sm:$0xff]   ;;  %v15188_v20 = vld [vmem:[%s16115_s6 + $0x10a0] ss:$48 sps:$4 sm:$0xff]  }
 0x4a4   : > { %v10724_v42 = vpop.f32.mrf.mxu1  ;;  %11017 = vmatprep.subr.bf16.mxu1 %v15139_v59  ;;  %v15196_v52 = vld [vmem:[%s16115_s6 + $0x1044] ss:$48 sps:$4 sm:$0xff]   ;;  %v15194_v59 = vld [vmem:[%s16115_s6 + $0x1040] ss:$48 sps:$4 sm:$0xff]  }
 0x4a5   : > { %v15199_v34 = vld [vmem:[%s16115_s6 + $0x1644] ss:$48 sps:$4 sm:$0xff]   ;;  %v15197_v40 = vld [vmem:[%s16115_s6 + $0x1640] ss:$48 sps:$4 sm:$0xff]  }
 0x4a6   : > { %10977 = vmatpush1.bf16.msra.mxu0 %v15134_v13  ;;  %v15202_v55 = vld [vmem:[%s16115_s6 + $0xfe4] ss:$48 sps:$4 sm:$0xff]   ;;  %v15200_v13 = vld [vmem:[%s16115_s6 + $0xfe0] ss:$48 sps:$4 sm:$0xff]  }
 0x4a7   : > { %11018 = vmatpush1.bf16.msra.mxu1 %v15137_v0  ;;  %10978 = vmatprep.subr.bf16.mxu0 %v15142_v5  ;;  %v15205_v28 = vld [vmem:[%s16115_s6 + $0x15e4] ss:$48 sps:$4 sm:$0xff]   ;;  %v15203_v0 = vld [vmem:[%s16115_s6 + $0x15e0] ss:$48 sps:$4 sm:$0xff]  }
 0x4a8   : > { %11019 = vmatprep.subr.bf16.mxu1 %v15145_v45  ;;  %v15208_v62 = vld [vmem:[%s16115_s6 + $0xf84] ss:$48 sps:$4 sm:$0xff]   ;;  %v15206_v5 = vld [vmem:[%s16115_s6 + $0xf80] ss:$48 sps:$4 sm:$0xff]  }
 0x4a9   : > { %v15211_v42 = vld [vmem:[%s16115_s6 + $0x1584] ss:$48 sps:$4 sm:$0xff]   ;;  %v15209_v45 = vld [vmem:[%s16115_s6 + $0x1580] ss:$48 sps:$4 sm:$0xff]  }
 0x4aa   : > { %10979 = vmatpush1.bf16.msra.mxu0 %v15140_v46  ;;  %v15214_v46 = vld [vmem:[%s16115_s6 + $0xf24] ss:$48 sps:$4 sm:$0xff]  }
 0x4ab   : > { %11020 = vmatpush1.bf16.msra.mxu1 %v15143_v47  ;;  %10980 = vmatprep.subr.bf16.mxu0 %v15148_v48  ;;  %v15217_v47 = vld [vmem:[%s16115_s6 + $0x1524] ss:$48 sps:$4 sm:$0xff]   ;;  %v15212_v48 = vld [vmem:[%s16115_s6 + $0xf20] ss:$48 sps:$4 sm:$0xff]  }
 0x4ac   : > { %11021 = vmatprep.subr.bf16.mxu1 %v15151_v54  ;;  %v15215_v54 = vld [vmem:[%s16115_s6 + $0x1520] ss:$48 sps:$4 sm:$0xff]  }
 0x4ae   : > { %10981 = vmatpush1.bf16.msra.mxu0 %v15146_v3  ;;  %v15220_v3 = vld [vmem:[%s16115_s6 + $0x1ac4] ss:$48 sps:$4 sm:$0xff]  }
 0x4af   : > { %11022 = vmatpush1.bf16.msra.mxu1 %v15149_v56  ;;  %10982 = vmatprep.subr.bf16.mxu0 %v15154_v57  ;;  %v15223_v56 = vld [vmem:[%s16115_s6 + $0x20c4] ss:$48 sps:$4 sm:$0xff]   ;;  %v15218_v57 = vld [vmem:[%s16115_s6 + $0x1ac0] ss:$48 sps:$4 sm:$0xff]  }
 0x4b0   : > { %11023 = vmatprep.subr.bf16.mxu1 %v15157_v60  ;;  %v15221_v60 = vld [vmem:[%s16115_s6 + $0x20c0] ss:$48 sps:$4 sm:$0xff]  }
 0x4b2   : > { %10983 = vmatpush1.bf16.msra.mxu0 %v15152_v61  ;;  %v15226_v61 = vld [vmem:[%s16115_s6 + $0x1a64] ss:$48 sps:$4 sm:$0xff]  }
 0x4b3   : > { %11024 = vmatpush1.bf16.msra.mxu1 %v15155_v18  ;;  %10984 = vmatprep.subr.bf16.mxu0 %v15160_v58  ;;  %v15229_v18 = vld [vmem:[%s16115_s6 + $0x2064] ss:$48 sps:$4 sm:$0xff]  }
 0x4b4   : > { %11025 = vmatprep.subr.bf16.mxu1 %v15163_v63 }
 0x4b6   : > { %10985 = vmatpush1.bf16.msra.mxu0 %v15158_v16  ;;  %v15224_v16 = vld [vmem:[%s16115_s6 + $0x1a60] ss:$48 sps:$4 sm:$0xff]  }
 0x4b7   : > { %11026 = vmatpush1.bf16.msra.mxu1 %v15161_v23  ;;  %10986 = vmatprep.subr.bf16.mxu0 %v15166_v24  ;;  %v15227_v23 = vld [vmem:[%s16115_s6 + $0x2060] ss:$48 sps:$4 sm:$0xff]  }
 0x4b8   : > { %11027 = vmatprep.subr.bf16.mxu1 %v15169_v6 }
 0x4ba   : > { %10987 = vmatpush1.bf16.msra.mxu0 %v15164_v29  ;;  %v15232_v29 = vld [vmem:[%s16115_s6 + $0x1a04] ss:$48 sps:$4 sm:$0xff]  }
 0x4bb   : > { %11028 = vmatpush1.bf16.msra.mxu1 %v15167_v4  ;;  %10988 = vmatprep.subr.bf16.mxu0 %v15172_v25  ;;  %v15235_v4 = vld [vmem:[%s16115_s6 + $0x2004] ss:$48 sps:$4 sm:$0xff]  }
 0x4bc   : > { %11029 = vmatprep.subr.bf16.mxu1 %v15175_v31 }
 0x4be   : > { %10989 = vmatpush2.bf16.msra.mxu0 %v15170_v36  ;;  %v15230_v36 = vld [vmem:[%s16115_s6 + $0x1a00] ss:$48 sps:$4 sm:$0xff]  }
 0x4bf   : > { %11030 = vmatpush2.bf16.msra.mxu1 %v15173_v7  ;;  %10990 = vmatprep.subr.bf16.mxu0 %v15178_v8  ;;  %v15233_v7 = vld [vmem:[%s16115_s6 + $0x2000] ss:$48 sps:$4 sm:$0xff]  }
 0x4c0   : > { %11031 = vmatprep.subr.bf16.mxu1 %v15181_v11 }
 0x4c2   : > { %10991 = vmatpush2.bf16.msra.mxu0 %v15176_v32  ;;  %v15238_v32 = vld [vmem:[%s16115_s6 + $0x19a4] ss:$48 sps:$4 sm:$0xff]  }
 0x4c3   : > { %11032 = vmatpush2.bf16.msra.mxu1 %v15179_v12  ;;  %10992 = vmatprep.subr.bf16.mxu0 %v15184_v14  ;;  %v15241_v12 = vld [vmem:[%s16115_s6 + $0x1fa4] ss:$48 sps:$4 sm:$0xff]   ;;  %v15236_v14 = vld [vmem:[%s16115_s6 + $0x19a0] ss:$48 sps:$4 sm:$0xff]  }
 0x4c4   : > { %11033 = vmatprep.subr.bf16.mxu1 %v15187_v15  ;;  %v15239_v15 = vld [vmem:[%s16115_s6 + $0x1fa0] ss:$48 sps:$4 sm:$0xff]  }
 0x4c6   : > { %10993 = vmatpush2.bf16.msra.mxu0 %v15182_v37  ;;  %v15244_v37 = vld [vmem:[%s16115_s6 + $0x1944] ss:$48 sps:$4 sm:$0xff]  }
 0x4c7   : > { %11034 = vmatpush2.bf16.msra.mxu1 %v15185_v26  ;;  %10994 = vmatprep.subr.bf16.mxu0 %v15190_v17  ;;  %v15247_v26 = vld [vmem:[%s16115_s6 + $0x1f44] ss:$48 sps:$4 sm:$0xff]   ;;  %v15242_v17 = vld [vmem:[%s16115_s6 + $0x1940] ss:$48 sps:$4 sm:$0xff]  }
 0x4c8   : > { %11035 = vmatprep.subr.bf16.mxu1 %v15193_v19  ;;  %v15245_v19 = vld [vmem:[%s16115_s6 + $0x1f40] ss:$48 sps:$4 sm:$0xff]  }
 0x4ca   : > { %10995 = vmatpush2.bf16.msra.mxu0 %v15188_v20  ;;  %v15250_v20 = vld [vmem:[%s16115_s6 + $0x18e4] ss:$48 sps:$4 sm:$0xff]  }
 0x4cb   : > { %11036 = vmatpush2.bf16.msra.mxu1 %v15191_v27  ;;  %10996 = vmatprep.subr.bf16.mxu0 %v15196_v52  ;;  %v15253_v27 = vld [vmem:[%s16115_s6 + $0x1ee4] ss:$48 sps:$4 sm:$0xff]   ;;  %v15248_v52 = vld [vmem:[%s16115_s6 + $0x18e0] ss:$48 sps:$4 sm:$0xff]  }
 0x4cc   : > { %11037 = vmatprep.subr.bf16.mxu1 %v15199_v34  ;;  %v15251_v34 = vld [vmem:[%s16115_s6 + $0x1ee0] ss:$48 sps:$4 sm:$0xff]  }
 0x4ce   : > { %10997 = vmatpush2.bf16.msra.mxu0 %v15194_v59  ;;  %v15256_v59 = vld [vmem:[%s16115_s6 + $0x1884] ss:$48 sps:$4 sm:$0xff]  }
 0x4cf   : > { %11038 = vmatpush2.bf16.msra.mxu1 %v15197_v40  ;;  %10998 = vmatprep.subr.bf16.mxu0 %v15202_v55  ;;  %v15259_v40 = vld [vmem:[%s16115_s6 + $0x1e84] ss:$48 sps:$4 sm:$0xff]   ;;  %v15254_v55 = vld [vmem:[%s16115_s6 + $0x1880] ss:$48 sps:$4 sm:$0xff]  }
 0x4d0   : > { %11039 = vmatprep.subr.bf16.mxu1 %v15205_v28  ;;  %v15257_v28 = vld [vmem:[%s16115_s6 + $0x1e80] ss:$48 sps:$4 sm:$0xff]  }
 0x4d2   : > { %10999 = vmatpush2.bf16.msra.mxu0 %v15200_v13  ;;  %v15262_v13 = vld [vmem:[%s16115_s6 + $0x1824] ss:$48 sps:$4 sm:$0xff]  }
 0x4d3   : > { %11040 = vmatpush2.bf16.msra.mxu1 %v15203_v0  ;;  %11000 = vmatprep.subr.bf16.mxu0 %v15208_v62  ;;  %v15265_v0 = vld [vmem:[%s16115_s6 + $0x1e24] ss:$48 sps:$4 sm:$0xff]   ;;  %v15260_v62 = vld [vmem:[%s16115_s6 + $0x1820] ss:$48 sps:$4 sm:$0xff]  }
 0x4d4   : > { %11041 = vmatprep.subr.bf16.mxu1 %v15211_v42  ;;  %v15263_v42 = vld [vmem:[%s16115_s6 + $0x1e20] ss:$48 sps:$4 sm:$0xff]  }
 0x4d6   : > { %11001 = vmatpush2.bf16.msra.mxu0 %v15206_v5  ;;  %v15268_v5 = vld [vmem:[%s16115_s6 + $0x1dc4] ss:$48 sps:$4 sm:$0xff]  }
 0x4d7   : > { %11042 = vmatpush2.bf16.msra.mxu1 %v15209_v45  ;;  %11002 = vmatprep.subr.bf16.mxu0 %v15214_v46  ;;  %v15271_v45 = vld [vmem:[%s16115_s6 + $0x23c4] ss:$48 sps:$4 sm:$0xff]   ;;  %v15266_v46 = vld [vmem:[%s16115_s6 + $0x1dc0] ss:$48 sps:$4 sm:$0xff]  }
 0x4d8   : > { %11043 = vmatprep.subr.bf16.mxu1 %v15217_v47  ;;  %v15269_v47 = vld [vmem:[%s16115_s6 + $0x23c0] ss:$48 sps:$4 sm:$0xff]  }
 0x4da   : > { %11003 = vmatpush2.bf16.msra.mxu0 %v15212_v48  ;;  %v15274_v48 = vld [vmem:[%s16115_s6 + $0x1d64] ss:$48 sps:$4 sm:$0xff]  }
 0x4db   : > { %11044 = vmatpush2.bf16.msra.mxu1 %v15215_v54  ;;  %11054 = vmatprep.subr.bf16.mxu0 %v15220_v3  ;;  %v15277_v54 = vld [vmem:[%s16115_s6 + $0x2364] ss:$48 sps:$4 sm:$0xff]   ;;  %v15272_v3 = vld [vmem:[%s16115_s6 + $0x1d60] ss:$48 sps:$4 sm:$0xff]  }
 0x4dc   : > { %11095 = vmatprep.subr.bf16.mxu1 %v15223_v56  ;;  %v15275_v56 = vld [vmem:[%s16115_s6 + $0x2360] ss:$48 sps:$4 sm:$0xff]  }
 0x4dd   : > { %v17500_v58 = vpop.f32.mrf.mxu0  ;;  %11005 = vmatmul.mubr.bf16.vlgmr.msra.gmra.mxu0 %v16298_v21 }
 0x4de   : > { %v17502_v63 = vpop.f32.mrf.mxu1  ;;  %11046 = vmatmul.mubr.bf16.vlgmr.msra.gmra.mxu1 %v16300_v22  ;;  %11055 = vmatpush1.bf16.msra.mxu0 %v15218_v57  ;;  %v15280_v57 = vld [vmem:[%s16115_s6 + $0x1d04] ss:$48 sps:$4 sm:$0xff]  }
 0x4df   : > { %11096 = vmatpush1.bf16.msra.mxu1 %v15221_v60  ;;  %v17508_v24 = vpop.f32.mrf.mxu0  ;;  %11056 = vmatprep.subr.bf16.mxu0 %v15226_v61  ;;  %v15283_v60 = vld [vmem:[%s16115_s6 + $0x2304] ss:$48 sps:$4 sm:$0xff]   ;;  %v15278_v61 = vld [vmem:[%s16115_s6 + $0x1d00] ss:$48 sps:$4 sm:$0xff]  }
 0x4e0   : > { %v17510_v6 = vpop.f32.mrf.mxu1  ;;  %11097 = vmatprep.subr.bf16.mxu1 %v15229_v18  ;;  %11086 = vmatprep.mubr.bf16.mxu0 %v16311_v30  ;;  %v15281_v18 = vld [vmem:[%s16115_s6 + $0x2300] ss:$48 sps:$4 sm:$0xff]  }
 0x4e1   : > { %11127 = vmatprep.mubr.bf16.mxu1 %v16315_v33  ;;  %v10764_v25 = vpop.f32.mrf.mxu0 }
 0x4e2   : > { %v10805_v31 = vpop.f32.mrf.mxu1  ;;  %11057 = vmatpush1.bf16.msra.mxu0 %v15224_v16  ;;  %v15286_v16 = vld [vmem:[%s16115_s6 + $0x1ca4] ss:$48 sps:$4 sm:$0xff]  }
 0x4e3   : > { %11098 = vmatpush1.bf16.msra.mxu1 %v15227_v23  ;;  %v10765_v8 = vpop.f32.mrf.mxu0  ;;  %11058 = vmatprep.subr.bf16.mxu0 %v15232_v29  ;;  %v15289_v23 = vld [vmem:[%s16115_s6 + $0x22a4] ss:$48 sps:$4 sm:$0xff]   ;;  %v15284_v29 = vld [vmem:[%s16115_s6 + $0x1ca0] ss:$48 sps:$4 sm:$0xff]  }
 0x4e4   : > { %v10806_v11 = vpop.f32.mrf.mxu1  ;;  %11099 = vmatprep.subr.bf16.mxu1 %v15235_v4  ;;  %v15287_v4 = vld [vmem:[%s16115_s6 + $0x22a0] ss:$48 sps:$4 sm:$0xff]   ;;  %v15292_v25 = vld [vmem:[%s16115_s6 + $0x1c44] ss:$48 sps:$4 sm:$0xff]  }
 0x4e5   : > { %v15295_v31 = vld [vmem:[%s16115_s6 + $0x2244] ss:$48 sps:$4 sm:$0xff]  }
 0x4e6   : > { %11059 = vmatpush1.bf16.msra.mxu0 %v15230_v36  ;;  %v15290_v36 = vld [vmem:[%s16115_s6 + $0x1c40] ss:$48 sps:$4 sm:$0xff]   ;;  %v15298_v8 = vld [vmem:[%s16115_s6 + $0x1be4] ss:$48 sps:$4 sm:$0xff]  }
 0x4e7   : > { %11100 = vmatpush1.bf16.msra.mxu1 %v15233_v7  ;;  %11060 = vmatprep.subr.bf16.mxu0 %v15238_v32  ;;  %v15293_v7 = vld [vmem:[%s16115_s6 + $0x2240] ss:$48 sps:$4 sm:$0xff]   ;;  %v15301_v11 = vld [vmem:[%s16115_s6 + $0x21e4] ss:$48 sps:$4 sm:$0xff]  }
 0x4e8   : > { %11101 = vmatprep.subr.bf16.mxu1 %v15241_v12  ;;  %v15296_v32 = vld [vmem:[%s16115_s6 + $0x1be0] ss:$48 sps:$4 sm:$0xff]  }
 0x4e9   : > { %v15299_v12 = vld [vmem:[%s16115_s6 + $0x21e0] ss:$48 sps:$4 sm:$0xff]  }
 0x4ea   : > { %11061 = vmatpush1.bf16.msra.mxu0 %v15236_v14  ;;  %v15304_v14 = vld [vmem:[%s16115_s6 + $0x1b84] ss:$48 sps:$4 sm:$0xff]  }
 0x4eb   : > { %11102 = vmatpush1.bf16.msra.mxu1 %v15239_v15  ;;  %11062 = vmatprep.subr.bf16.mxu0 %v15244_v37  ;;  %v15307_v15 = vld [vmem:[%s16115_s6 + $0x2184] ss:$48 sps:$4 sm:$0xff]   ;;  %v15302_v37 = vld [vmem:[%s16115_s6 + $0x1b80] ss:$48 sps:$4 sm:$0xff]  }
 0x4ec   : > { %11103 = vmatprep.subr.bf16.mxu1 %v15247_v26  ;;  %v15305_v26 = vld [vmem:[%s16115_s6 + $0x2180] ss:$48 sps:$4 sm:$0xff]  }
 0x4ee   : > { %11063 = vmatpush1.bf16.msra.mxu0 %v15242_v17  ;;  %v15310_v17 = vld [vmem:[%s16115_s6 + $0x1b24] ss:$48 sps:$4 sm:$0xff]  }
 0x4ef   : > { %11104 = vmatpush1.bf16.msra.mxu1 %v15245_v19  ;;  %11064 = vmatprep.subr.bf16.mxu0 %v15250_v20  ;;  %v15313_v19 = vld [vmem:[%s16115_s6 + $0x2124] ss:$48 sps:$4 sm:$0xff]   ;;  %v15308_v20 = vld [vmem:[%s16115_s6 + $0x1b20] ss:$48 sps:$4 sm:$0xff]  }
 0x4f0   : > { %11105 = vmatprep.subr.bf16.mxu1 %v15253_v27  ;;  %v15311_v27 = vld [vmem:[%s16115_s6 + $0x2120] ss:$48 sps:$4 sm:$0xff]  }
 0x4f2   : > { %11065 = vmatpush1.bf16.msra.mxu0 %v15248_v52  ;;  %v15316_v52 = vld [vmem:[%s16115_s6 + $0x26c4] ss:$48 sps:$4 sm:$0xff]  }
 0x4f3   : > { %11106 = vmatpush1.bf16.msra.mxu1 %v15251_v34  ;;  %11066 = vmatprep.subr.bf16.mxu0 %v15256_v59  ;;  %v15319_v34 = vld [vmem:[%s16115_s6 + $0x2cc4] ss:$48 sps:$4 sm:$0xff]   ;;  %v10761_v59 = vadd.f32 %v17500_v58, %v17433_v39  ;;  %v15320_v58 = vld [vmem:[%s16115_s6 + $0x2660] ss:$48 sps:$4 sm:$0xff]  }
 0x4f4   : > { %11107 = vmatprep.subr.bf16.mxu1 %v15259_v40  ;;  %v10763_v40 = vadd.f32 %v17508_v24, %v17438_v35  ;;  %v15323_v24 = vld [vmem:[%s16115_s6 + $0x2c60] ss:$48 sps:$4 sm:$0xff]  }
 0x4f6   : > { %11067 = vmatpush1.bf16.msra.mxu0 %v15254_v55  ;;  %v15314_v55 = vld [vmem:[%s16115_s6 + $0x26c0] ss:$48 sps:$4 sm:$0xff]   ;;  %v10804_v39 = vadd.f32 %v17510_v6, %v10763_v40  ;;  %v325_v6 = vld [vmem:[#allocation2 + $0x38] sm:$0xff] }
 0x4f7   : > { %11108 = vmatpush1.bf16.msra.mxu1 %v15257_v28  ;;  %11068 = vmatprep.subr.bf16.mxu0 %v15262_v13  ;;  %v15317_v28 = vld [vmem:[%s16115_s6 + $0x2cc0] ss:$48 sps:$4 sm:$0xff]   ;;  %v15322_v13 = vld [vmem:[%s16115_s6 + $0x2664] ss:$48 sps:$4 sm:$0xff]  }
 0x4f8   : > { %11109 = vmatprep.subr.bf16.mxu1 %v15265_v0  ;;  %v15325_v0 = vld [vmem:[%s16115_s6 + $0x2c64] ss:$48 sps:$4 sm:$0xff]   ;;  %v15359_v40 = vld [vmem:[%s16115_s6 + $0x2a20] ss:$48 sps:$4 sm:$0xff]  }
 0x4fa   : > { %11069 = vmatpush1.bf16.msra.mxu0 %v15260_v62  ;;  %v10802_v62 = vadd.f32 %v17502_v63, %v10761_v59  ;;  %v15328_v63 = vld [vmem:[%s16115_s6 + $0x2604] ss:$48 sps:$4 sm:$0xff]   ;;  %v15356_v59 = vld [vmem:[%s16115_s6 + $0x2420] ss:$48 sps:$4 sm:$0xff]  }
 0x4fb   : > { %11110 = vmatpush1.bf16.msra.mxu1 %v15263_v42  ;;  %11070 = vmatprep.subr.bf16.mxu0 %v15268_v5 }
 0x4fc   : > { %11111 = vmatprep.subr.bf16.mxu1 %v15271_v45  ;;  %v324_v45 = vld [vmem:[#allocation2 + $0x8] sm:$0xff] }
 0x4fe   : > { %11071 = vmatpush2.bf16.msra.mxu0 %v15266_v46 }
 0x4ff   : > { %11112 = vmatpush2.bf16.msra.mxu1 %v15269_v47  ;;  %11072 = vmatprep.subr.bf16.mxu0 %v15274_v48  ;;  %v15331_v48 = vld [vmem:[%s16115_s6 + $0x2c04] ss:$48 sps:$4 sm:$0xff]  }
 0x500   : > { %11113 = vmatprep.subr.bf16.mxu1 %v15277_v54 }
 0x502   : > { %11073 = vmatpush2.bf16.msra.mxu0 %v15272_v3 }
 0x503   : > { %11114 = vmatpush2.bf16.msra.mxu1 %v15275_v56  ;;  %11074 = vmatprep.subr.bf16.mxu0 %v15280_v57 }
 0x504   : > { %11115 = vmatprep.subr.bf16.mxu1 %v15283_v60 }
 0x506   : > { %11075 = vmatpush2.bf16.msra.mxu0 %v15278_v61 }
 0x507   : > { %11116 = vmatpush2.bf16.msra.mxu1 %v15281_v18  ;;  %11076 = vmatprep.subr.bf16.mxu0 %v15286_v16  ;;  %v15326_v18 = vld [vmem:[%s16115_s6 + $0x2600] ss:$48 sps:$4 sm:$0xff]  }
 0x508   : > { %11117 = vmatprep.subr.bf16.mxu1 %v15289_v23  ;;  %v15329_v16 = vld [vmem:[%s16115_s6 + $0x2c00] ss:$48 sps:$4 sm:$0xff]  }
 0x50a   : > { %11077 = vmatpush2.bf16.msra.mxu0 %v15284_v29 }
 0x50b   : > { %11118 = vmatpush2.bf16.msra.mxu1 %v15287_v4  ;;  %11078 = vmatprep.subr.bf16.mxu0 %v15292_v25  ;;  %v15334_v4 = vld [vmem:[%s16115_s6 + $0x25a4] ss:$48 sps:$4 sm:$0xff]  }
 0x50c   : > { %11119 = vmatprep.subr.bf16.mxu1 %v15295_v31  ;;  %v15337_v25 = vld [vmem:[%s16115_s6 + $0x2ba4] ss:$48 sps:$4 sm:$0xff]  }
 0x50e   : > { %11079 = vmatpush2.bf16.msra.mxu0 %v15290_v36  ;;  %v15332_v36 = vld [vmem:[%s16115_s6 + $0x25a0] ss:$48 sps:$4 sm:$0xff]  }
 0x50f   : > { %11120 = vmatpush2.bf16.msra.mxu1 %v15293_v7  ;;  %11080 = vmatprep.subr.bf16.mxu0 %v15298_v8  ;;  %v15335_v7 = vld [vmem:[%s16115_s6 + $0x2ba0] ss:$48 sps:$4 sm:$0xff]   ;;  %v15340_v8 = vld [vmem:[%s16115_s6 + $0x2544] ss:$48 sps:$4 sm:$0xff]  }
 0x510   : > { %11121 = vmatprep.subr.bf16.mxu1 %v15301_v11  ;;  %v15343_v11 = vld [vmem:[%s16115_s6 + $0x2b44] ss:$48 sps:$4 sm:$0xff]  }
 0x512   : > { %11081 = vmatpush2.bf16.msra.mxu0 %v15296_v32  ;;  %v15338_v32 = vld [vmem:[%s16115_s6 + $0x2540] ss:$48 sps:$4 sm:$0xff]  }
 0x513   : > { %11122 = vmatpush2.bf16.msra.mxu1 %v15299_v12  ;;  %11082 = vmatprep.subr.bf16.mxu0 %v15304_v14  ;;  %v15341_v12 = vld [vmem:[%s16115_s6 + $0x2b40] ss:$48 sps:$4 sm:$0xff]   ;;  %v15346_v14 = vld [vmem:[%s16115_s6 + $0x24e4] ss:$48 sps:$4 sm:$0xff]  }
 0x514   : > { %11123 = vmatprep.subr.bf16.mxu1 %v15307_v15  ;;  %v15349_v15 = vld [vmem:[%s16115_s6 + $0x2ae4] ss:$48 sps:$4 sm:$0xff]  }
 0x516   : > { %11083 = vmatpush2.bf16.msra.mxu0 %v15302_v37  ;;  %v15344_v37 = vld [vmem:[%s16115_s6 + $0x24e0] ss:$48 sps:$4 sm:$0xff]  }
 0x517   : > { %11124 = vmatpush2.bf16.msra.mxu1 %v15305_v26  ;;  %11084 = vmatprep.subr.bf16.mxu0 %v15310_v17  ;;  %v15347_v26 = vld [vmem:[%s16115_s6 + $0x2ae0] ss:$48 sps:$4 sm:$0xff]   ;;  %v15352_v17 = vld [vmem:[%s16115_s6 + $0x2484] ss:$48 sps:$4 sm:$0xff]  }
 0x518   : > { %11125 = vmatprep.subr.bf16.mxu1 %v15313_v19  ;;  %v15355_v19 = vld [vmem:[%s16115_s6 + $0x2a84] ss:$48 sps:$4 sm:$0xff]  }
 0x51a   : > { %11085 = vmatpush2.bf16.msra.mxu0 %v15308_v20  ;;  %v15350_v20 = vld [vmem:[%s16115_s6 + $0x2480] ss:$48 sps:$4 sm:$0xff]  }
 0x51b   : > { %11126 = vmatpush2.bf16.msra.mxu1 %v15311_v27  ;;  %11136 = vmatprep.subr.bf16.mxu0 %v15316_v52  ;;  %v15353_v27 = vld [vmem:[%s16115_s6 + $0x2a80] ss:$48 sps:$4 sm:$0xff]   ;;  %v15358_v52 = vld [vmem:[%s16115_s6 + $0x2424] ss:$48 sps:$4 sm:$0xff]  }
 0x51c   : > { %11177 = vmatprep.subr.bf16.mxu1 %v15319_v34  ;;  %v15361_v34 = vld [vmem:[%s16115_s6 + $0x2a24] ss:$48 sps:$4 sm:$0xff]  }
 0x51d   : > { %v10842_v42 = vpop.f32.mrf.mxu0  ;;  %11087 = vmatmul.mubr.bf16.vlgmr.msra.gmra.mxu0 %v16380_v43 }
 0x51e   : > { %v10883_v5 = vpop.f32.mrf.mxu1  ;;  %11128 = vmatmul.mubr.bf16.vlgmr.msra.gmra.mxu1 %v16382_v44  ;;  %v10843_v35 = vadd.f32 %v10842_v42, %v10802_v62  ;;  %11137 = vmatpush1.bf16.msra.mxu0 %v15314_v55  ;;  %v15364_v55 = vld [vmem:[%s16115_s6 + $0x29c4] ss:$48 sps:$4 sm:$0xff]  }
 0x51f   : > { %11178 = vmatpush1.bf16.msra.mxu1 %v15317_v28  ;;  %v10844_v46 = vpop.f32.mrf.mxu0  ;;  %11138 = vmatprep.subr.bf16.mxu0 %v15322_v13  ;;  %v15367_v28 = vld [vmem:[%s16115_s6 + $0x2fc4] ss:$48 sps:$4 sm:$0xff]   ;;  %v15362_v13 = vld [vmem:[%s16115_s6 + $0x29c0] ss:$48 sps:$4 sm:$0xff]  }
 0x520   : > { %v10885_v47 = vpop.f32.mrf.mxu1  ;;  %11179 = vmatprep.subr.bf16.mxu1 %v15325_v0  ;;  %v10884_v54 = vadd.f32 %v10883_v5, %v10843_v35  ;;  %v10845_v3 = vadd.f32 %v10844_v46, %v10804_v39  ;;  %11168 = vmatprep.mubr.bf16.mxu0 %v16388_v49  ;;  %v15365_v0 = vld [vmem:[%s16115_s6 + $0x2fc0] ss:$48 sps:$4 sm:$0xff]   ;;  %v15370_v62 = vld [vmem:[%s16115_s6 + $0x2964] ss:$48 sps:$4 sm:$0xff]  }
 0x521   : > { %11209 = vmatprep.mubr.bf16.mxu1 %v16390_v51  ;;  %v10846_v56 = vpop.f32.mrf.mxu0  ;;  %v15373_v42 = vld [vmem:[%s16115_s6 + $0x2f64] ss:$48 sps:$4 sm:$0xff]   ;;  %v15368_v5 = vld [vmem:[%s16115_s6 + $0x2960] ss:$48 sps:$4 sm:$0xff]  }
 0x522   : > { %v10887_v57 = vpop.f32.mrf.mxu1  ;;  %v11552_v60 = vadd.f32 %v10884_v54, %v324_v45  ;;  %v10886_v61 = vadd.f32 %v10885_v47, %v10845_v3  ;;  %11139 = vmatpush1.bf16.msra.mxu0 %v15320_v58  ;;  %v15371_v39 = vld [vmem:[%s16115_s6 + $0x2f60] ss:$48 sps:$4 sm:$0xff]   ;;  %v15376_v35 = vld [vmem:[%s16115_s6 + $0x2904] ss:$48 sps:$4 sm:$0xff]  }
 0x523   : > { %11180 = vmatpush1.bf16.msra.mxu1 %v15323_v24  ;;  %v10847_v23 = vpop.f32.mrf.mxu0  ;;  %11140 = vmatprep.subr.bf16.mxu0 %v15328_v63  ;;  %v15379_v58 = vld [vmem:[%s16115_s6 + $0x2f04] ss:$48 sps:$4 sm:$0xff]   ;;  %v15374_v24 = vld [vmem:[%s16115_s6 + $0x2900] ss:$48 sps:$4 sm:$0xff]  }
 0x524   : > { %v10888_v29 = vpop.f32.mrf.mxu1  ;;  %11181 = vmatprep.subr.bf16.mxu1 %v15331_v48  ;;  %11564 = vst [vmem:[#allocation2 + $0x8] sm:$0xff] %v11552_v60  ;;  %v11553_v31 = vadd.f32 %v10886_v61, %v325_v6  ;;  %v15377_v45 = vld [vmem:[%s16115_s6 + $0x2f00] ss:$48 sps:$4 sm:$0xff]   ;;  %v15382_v46 = vld [vmem:[%s16115_s6 + $0x28a4] ss:$48 sps:$4 sm:$0xff]  }
 0x525   : > { %v15385_v47 = vld [vmem:[%s16115_s6 + $0x2ea4] ss:$48 sps:$4 sm:$0xff]   ;;  %v15380_v63 = vld [vmem:[%s16115_s6 + $0x28a0] ss:$48 sps:$4 sm:$0xff]  }
 0x526   : > { %11565 = vst [vmem:[#allocation2 + $0x38] sm:$0xff] %v11553_v31  ;;  %11141 = vmatpush1.bf16.msra.mxu0 %v15326_v18  ;;  %v15383_v48 = vld [vmem:[%s16115_s6 + $0x2ea0] ss:$48 sps:$4 sm:$0xff]   ;;  %v15388_v54 = vld [vmem:[%s16115_s6 + $0x2844] ss:$48 sps:$4 sm:$0xff]  }
 0x527   : > { %11182 = vmatpush1.bf16.msra.mxu1 %v15329_v16  ;;  %11142 = vmatprep.subr.bf16.mxu0 %v15334_v4  ;;  %v15391_v3 = vld [vmem:[%s16115_s6 + $0x2e44] ss:$48 sps:$4 sm:$0xff]   ;;  %v15386_v6 = vld [vmem:[%s16115_s6 + $0x2840] ss:$48 sps:$4 sm:$0xff]  }
 0x528   : > { %11183 = vmatprep.subr.bf16.mxu1 %v15337_v25  ;;  %v15389_v56 = vld [vmem:[%s16115_s6 + $0x2e40] ss:$48 sps:$4 sm:$0xff]   ;;  %v15394_v57 = vld [vmem:[%s16115_s6 + $0x27e4] ss:$48 sps:$4 sm:$0xff]  }
 0x529   : > { %v15397_v60 = vld [vmem:[%s16115_s6 + $0x2de4] ss:$48 sps:$4 sm:$0xff]   ;;  %v15392_v61 = vld [vmem:[%s16115_s6 + $0x27e0] ss:$48 sps:$4 sm:$0xff]  }
 0x52a   : > { %11143 = vmatpush1.bf16.msra.mxu0 %v15332_v36  ;;  %v15395_v18 = vld [vmem:[%s16115_s6 + $0x2de0] ss:$48 sps:$4 sm:$0xff]   ;;  %v15400_v16 = vld [vmem:[%s16115_s6 + $0x2784] ss:$48 sps:$4 sm:$0xff]  }
 0x52b   : > { %11184 = vmatpush1.bf16.msra.mxu1 %v15335_v7  ;;  %11144 = vmatprep.subr.bf16.mxu0 %v15340_v8  ;;  %v15403_v23 = vld [vmem:[%s16115_s6 + $0x2d84] ss:$48 sps:$4 sm:$0xff]   ;;  %v15398_v29 = vld [vmem:[%s16115_s6 + $0x2780] ss:$48 sps:$4 sm:$0xff]   ;;  %v15412_v8 = vld [vmem:[%s16115_s6 + $0x2cc] ss:$48 sps:$4 sm:$0xff]  }
 0x52c   : > { %11185 = vmatprep.subr.bf16.mxu1 %v15343_v11  ;;  %v15401_v4 = vld [vmem:[%s16115_s6 + $0x2d80] ss:$48 sps:$4 sm:$0xff]   ;;  %v15406_v25 = vld [vmem:[%s16115_s6 + $0x2724] ss:$48 sps:$4 sm:$0xff]   ;;  %v15415_v11 = vld [vmem:[%s16115_s6 + $0x8cc] ss:$48 sps:$4 sm:$0xff]  }
 0x52d   : > { %v15409_v31 = vld [vmem:[%s16115_s6 + $0x2d24] ss:$48 sps:$4 sm:$0xff]   ;;  %v15404_v36 = vld [vmem:[%s16115_s6 + $0x2720] ss:$48 sps:$4 sm:$0xff]  }
 0x52e   : > { %11145 = vmatpush1.bf16.msra.mxu0 %v15338_v32  ;;  %v15407_v7 = vld [vmem:[%s16115_s6 + $0x2d20] ss:$48 sps:$4 sm:$0xff]   ;;  %v15410_v32 = vld [vmem:[%s16115_s6 + $0x2c8] ss:$48 sps:$4 sm:$0xff]  }
 0x52f   : > { %11186 = vmatpush1.bf16.msra.mxu1 %v15341_v12  ;;  %11146 = vmatprep.subr.bf16.mxu0 %v15346_v14  ;;  %v15413_v12 = vld [vmem:[%s16115_s6 + $0x8c8] ss:$48 sps:$4 sm:$0xff]   ;;  %v15418_v14 = vld [vmem:[%s16115_s6 + $0x26c] ss:$48 sps:$4 sm:$0xff]  }
 0x530   : > { %11187 = vmatprep.subr.bf16.mxu1 %v15349_v15  ;;  %v15421_v15 = vld [vmem:[%s16115_s6 + $0x86c] ss:$48 sps:$4 sm:$0xff]  }
 0x532   : > { %11147 = vmatpush1.bf16.msra.mxu0 %v15344_v37 }
 0x533   : > { %11188 = vmatpush1.bf16.msra.mxu1 %v15347_v26  ;;  %11148 = vmatprep.subr.bf16.mxu0 %v15352_v17 }
 0x534   : > { %11189 = vmatprep.subr.bf16.mxu1 %v15355_v19  ;;  %v15416_v19 = vld [vmem:[%s16115_s6 + $0x268] ss:$48 sps:$4 sm:$0xff]  }
 0x536   : > { %11149 = vmatpush1.bf16.msra.mxu0 %v15350_v20  ;;  %v15419_v20 = vld [vmem:[%s16115_s6 + $0x868] ss:$48 sps:$4 sm:$0xff]  }
 0x537   : > { %11190 = vmatpush1.bf16.msra.mxu1 %v15353_v27  ;;  %11150 = vmatprep.subr.bf16.mxu0 %v15358_v52 }
 0x538   : > { %11191 = vmatprep.subr.bf16.mxu1 %v15361_v34  ;;  %v15424_v34 = vld [vmem:[%s16115_s6 + $0x20c] ss:$48 sps:$4 sm:$0xff]  }
 0x53a   : > { %11151 = vmatpush1.bf16.msra.mxu0 %v15356_v59  ;;  %v15427_v59 = vld [vmem:[%s16115_s6 + $0x80c] ss:$48 sps:$4 sm:$0xff]  }
 0x53b   : > { %11192 = vmatpush1.bf16.msra.mxu1 %v15359_v40  ;;  %11152 = vmatprep.subr.bf16.mxu0 %v15364_v55 }
 0x53c   : > { %11193 = vmatprep.subr.bf16.mxu1 %v15367_v28 }
 0x53e   : > { %11153 = vmatpush2.bf16.msra.mxu0 %v15362_v13  ;;  %v15422_v13 = vld [vmem:[%s16115_s6 + $0x208] ss:$48 sps:$4 sm:$0xff]  }
 0x53f   : > { %11194 = vmatpush2.bf16.msra.mxu1 %v15365_v0  ;;  %11154 = vmatprep.subr.bf16.mxu0 %v15370_v62  ;;  %v15425_v0 = vld [vmem:[%s16115_s6 + $0x808] ss:$48 sps:$4 sm:$0xff]  }
 0x540   : > { %11195 = vmatprep.subr.bf16.mxu1 %v15373_v42 }
 0x542   : > { %11155 = vmatpush2.bf16.msra.mxu0 %v15368_v5  ;;  %v15430_v5 = vld [vmem:[%s16115_s6 + $0x1ac] ss:$48 sps:$4 sm:$0xff]  }
 0x543   : > { %11196 = vmatpush2.bf16.msra.mxu1 %v15371_v39  ;;  %11156 = vmatprep.subr.bf16.mxu0 %v15376_v35  ;;  %v15431_v39 = vld [vmem:[%s16115_s6 + $0x7a8] ss:$48 sps:$4 sm:$0xff]   ;;  %v15436_v35 = vld [vmem:[%s16115_s6 + $0x14c] ss:$48 sps:$4 sm:$0xff]  }
 0x544   : > { %11197 = vmatprep.subr.bf16.mxu1 %v15379_v58  ;;  %v15439_v58 = vld [vmem:[%s16115_s6 + $0x74c] ss:$48 sps:$4 sm:$0xff]  }
 0x546   : > { %11157 = vmatpush2.bf16.msra.mxu0 %v15374_v24  ;;  %v15434_v24 = vld [vmem:[%s16115_s6 + $0x148] ss:$48 sps:$4 sm:$0xff]  }
 0x547   : > { %11198 = vmatpush2.bf16.msra.mxu1 %v15377_v45  ;;  %11158 = vmatprep.subr.bf16.mxu0 %v15382_v46  ;;  %v15437_v45 = vld [vmem:[%s16115_s6 + $0x748] ss:$48 sps:$4 sm:$0xff]   ;;  %v15442_v46 = vld [vmem:[%s16115_s6 + $0xec] ss:$48 sps:$4 sm:$0xff]  }
 0x548   : > { %11199 = vmatprep.subr.bf16.mxu1 %v15385_v47  ;;  %v15445_v47 = vld [vmem:[%s16115_s6 + $0x6ec] ss:$48 sps:$4 sm:$0xff]  }
 0x54a   : > { %11159 = vmatpush2.bf16.msra.mxu0 %v15380_v63  ;;  %v15440_v63 = vld [vmem:[%s16115_s6 + $0xe8] ss:$48 sps:$4 sm:$0xff]  }
 0x54b   : > { %11200 = vmatpush2.bf16.msra.mxu1 %v15383_v48  ;;  %11160 = vmatprep.subr.bf16.mxu0 %v15388_v54  ;;  %v15443_v48 = vld [vmem:[%s16115_s6 + $0x6e8] ss:$48 sps:$4 sm:$0xff]   ;;  %v15448_v54 = vld [vmem:[%s16115_s6 + $0x8c] ss:$48 sps:$4 sm:$0xff]  }
 0x54c   : > { %11201 = vmatprep.subr.bf16.mxu1 %v15391_v3  ;;  %v15451_v3 = vld [vmem:[%s16115_s6 + $0x68c] ss:$48 sps:$4 sm:$0xff]  }
 0x54e   : > { %11161 = vmatpush2.bf16.msra.mxu0 %v15386_v6  ;;  %v15446_v6 = vld [vmem:[%s16115_s6 + $0x88] ss:$48 sps:$4 sm:$0xff]  }
 0x54f   : > { %11202 = vmatpush2.bf16.msra.mxu1 %v15389_v56  ;;  %11162 = vmatprep.subr.bf16.mxu0 %v15394_v57  ;;  %v15449_v56 = vld [vmem:[%s16115_s6 + $0x688] ss:$48 sps:$4 sm:$0xff]   ;;  %v15454_v57 = vld [vmem:[%s16115_s6 + $0x2c] ss:$48 sps:$4 sm:$0xff]  }
 0x550   : > { %11203 = vmatprep.subr.bf16.mxu1 %v15397_v60  ;;  %v15457_v60 = vld [vmem:[%s16115_s6 + $0x62c] ss:$48 sps:$4 sm:$0xff]  }
 0x552   : > { %11163 = vmatpush2.bf16.msra.mxu0 %v15392_v61  ;;  %v15452_v61 = vld [vmem:[%s16115_s6 + $0x28] ss:$48 sps:$4 sm:$0xff]  }
 0x553   : > { %11204 = vmatpush2.bf16.msra.mxu1 %v15395_v18  ;;  %11164 = vmatprep.subr.bf16.mxu0 %v15400_v16  ;;  %v15455_v18 = vld [vmem:[%s16115_s6 + $0x628] ss:$48 sps:$4 sm:$0xff]   ;;  %v15460_v16 = vld [vmem:[%s16115_s6 + $0x5cc] ss:$48 sps:$4 sm:$0xff]  }
 0x554   : > { %11205 = vmatprep.subr.bf16.mxu1 %v15403_v23  ;;  %v15463_v23 = vld [vmem:[%s16115_s6 + $0xbcc] ss:$48 sps:$4 sm:$0xff]  }
 0x556   : > { %11165 = vmatpush2.bf16.msra.mxu0 %v15398_v29  ;;  %v15458_v29 = vld [vmem:[%s16115_s6 + $0x5c8] ss:$48 sps:$4 sm:$0xff]  }
 0x557   : > { %11206 = vmatpush2.bf16.msra.mxu1 %v15401_v4  ;;  %11166 = vmatprep.subr.bf16.mxu0 %v15406_v25  ;;  %v15461_v4 = vld [vmem:[%s16115_s6 + $0xbc8] ss:$48 sps:$4 sm:$0xff]   ;;  %v15466_v25 = vld [vmem:[%s16115_s6 + $0x56c] ss:$48 sps:$4 sm:$0xff]  }
 0x558   : > { %11207 = vmatprep.subr.bf16.mxu1 %v15409_v31  ;;  %v15469_v31 = vld [vmem:[%s16115_s6 + $0xb6c] ss:$48 sps:$4 sm:$0xff]  }
 0x55a   : > { %11167 = vmatpush2.bf16.msra.mxu0 %v15404_v36  ;;  %v15464_v36 = vld [vmem:[%s16115_s6 + $0x568] ss:$48 sps:$4 sm:$0xff]  }
 0x55b   : > { %11208 = vmatpush2.bf16.msra.mxu1 %v15407_v7  ;;  %11218 = vmatprep.subr.bf16.mxu0 %v15412_v8  ;;  %v15467_v7 = vld [vmem:[%s16115_s6 + $0xb68] ss:$48 sps:$4 sm:$0xff]   ;;  %v15472_v8 = vld [vmem:[%s16115_s6 + $0x50c] ss:$48 sps:$4 sm:$0xff]  }
 0x55c   : > { %11259 = vmatprep.subr.bf16.mxu1 %v15415_v11  ;;  %v15475_v11 = vld [vmem:[%s16115_s6 + $0xb0c] ss:$48 sps:$4 sm:$0xff]  }
 0x55d   : > { %v10924_v37 = vpop.f32.mrf.mxu0  ;;  %11169 = vmatmul.mubr.bf16.vlgmr.msra.gmra.mxu0 %v16458_v1 }
 0x55e   : > { %v10965_v26 = vpop.f32.mrf.mxu1  ;;  %11210 = vmatmul.mubr.bf16.vlgmr.msra.gmra.mxu1 %v16460_v2  ;;  %11219 = vmatpush1.bf16.msra.mxu0 %v15410_v32  ;;  %v15470_v32 = vld [vmem:[%s16115_s6 + $0x508] ss:$48 sps:$4 sm:$0xff]  }
 0x55f   : > { %v17652_v17 = vadd.f32 %v10965_v26, %v10924_v37  ;;  %11260 = vmatpush1.bf16.msra.mxu1 %v15413_v12  ;;  %v10926_v27 = vpop.f32.mrf.mxu0  ;;  %11220 = vmatprep.subr.bf16.mxu0 %v15418_v14  ;;  %v15473_v12 = vld [vmem:[%s16115_s6 + $0xb08] ss:$48 sps:$4 sm:$0xff]   ;;  %v15478_v14 = vld [vmem:[%s16115_s6 + $0x4ac] ss:$48 sps:$4 sm:$0xff]  }
 0x560   : > { %v10967_v52 = vpop.f32.mrf.mxu1  ;;  %11261 = vmatprep.subr.bf16.mxu1 %v15421_v15  ;;  %11250 = vmatprep.mubr.bf16.mxu0 %v16191_v50  ;;  %v15433_v50 = vld [vmem:[%s16115_s6 + $0x7ac] ss:$48 sps:$4 sm:$0xff]   ;;  %v15476_v37 = vld [vmem:[%s16115_s6 + $0x4a8] ss:$48 sps:$4 sm:$0xff]  }
 0x561   : > { %v17658_v40 = vadd.f32 %v10967_v52, %v10926_v27  ;;  %11291 = vmatprep.mubr.bf16.mxu1 %v16195_v53  ;;  %v10928_v55 = vpop.f32.mrf.mxu0  ;;  %v15428_v53 = vld [vmem:[%s16115_s6 + $0x1a8] ss:$48 sps:$4 sm:$0xff]   ;;  %v15481_v15 = vld [vmem:[%s16115_s6 + $0xaac] ss:$48 sps:$4 sm:$0xff]  }
 0x562   : > { %v10969_v28 = vpop.f32.mrf.mxu1  ;;  %11221 = vmatpush1.bf16.msra.mxu0 %v15416_v19  ;;  %v15479_v26 = vld [vmem:[%s16115_s6 + $0xaa8] ss:$48 sps:$4 sm:$0xff]   ;;  %v15484_v19 = vld [vmem:[%s16115_s6 + $0x44c] ss:$48 sps:$4 sm:$0xff]  }
 0x563   : > { %11262 = vmatpush1.bf16.msra.mxu1 %v15419_v20  ;;  %v10929_v62 = vpop.f32.mrf.mxu0  ;;  %11222 = vmatprep.subr.bf16.mxu0 %v15424_v34  ;;  %v15487_v20 = vld [vmem:[%s16115_s6 + $0xa4c] ss:$48 sps:$4 sm:$0xff]   ;;  %v15482_v27 = vld [vmem:[%s16115_s6 + $0x448] ss:$48 sps:$4 sm:$0xff]  }
 0x564   : > { %v10970_v42 = vpop.f32.mrf.mxu1  ;;  %11263 = vmatprep.subr.bf16.mxu1 %v15427_v59  ;;  %v15485_v52 = vld [vmem:[%s16115_s6 + $0xa48] ss:$48 sps:$4 sm:$0xff]   ;;  %v15490_v34 = vld [vmem:[%s16115_s6 + $0x3ec] ss:$48 sps:$4 sm:$0xff]  }
 0x565   : > { %v15493_v59 = vld [vmem:[%s16115_s6 + $0x9ec] ss:$48 sps:$4 sm:$0xff]   ;;  %v15488_v55 = vld [vmem:[%s16115_s6 + $0x3e8] ss:$48 sps:$4 sm:$0xff]  }
 0x566   : > { %11223 = vmatpush1.bf16.msra.mxu0 %v15422_v13  ;;  %v15491_v28 = vld [vmem:[%s16115_s6 + $0x9e8] ss:$48 sps:$4 sm:$0xff]   ;;  %v15496_v13 = vld [vmem:[%s16115_s6 + $0x38c] ss:$48 sps:$4 sm:$0xff]  }
 0x567   : > { %11264 = vmatpush1.bf16.msra.mxu1 %v15425_v0  ;;  %11224 = vmatprep.subr.bf16.mxu0 %v15430_v5  ;;  %v15499_v0 = vld [vmem:[%s16115_s6 + $0x98c] ss:$48 sps:$4 sm:$0xff]   ;;  %v15494_v62 = vld [vmem:[%s16115_s6 + $0x388] ss:$48 sps:$4 sm:$0xff]  }
 0x568   : > { %11265 = vmatprep.subr.bf16.mxu1 %v15433_v50  ;;  %v15497_v42 = vld [vmem:[%s16115_s6 + $0x988] ss:$48 sps:$4 sm:$0xff]   ;;  %v15502_v5 = vld [vmem:[%s16115_s6 + $0x32c] ss:$48 sps:$4 sm:$0xff]  }
 0x569   : > { %v15505_v50 = vld [vmem:[%s16115_s6 + $0x92c] ss:$48 sps:$4 sm:$0xff]  }
 0x56a   : > { %11225 = vmatpush1.bf16.msra.mxu0 %v15428_v53  ;;  %v15500_v53 = vld [vmem:[%s16115_s6 + $0x328] ss:$48 sps:$4 sm:$0xff]  }
 0x56b   : > { %11266 = vmatpush1.bf16.msra.mxu1 %v15431_v39  ;;  %11226 = vmatprep.subr.bf16.mxu0 %v15436_v35  ;;  %v15503_v39 = vld [vmem:[%s16115_s6 + $0x928] ss:$48 sps:$4 sm:$0xff]   ;;  %v15508_v35 = vld [vmem:[%s16115_s6 + $0xecc] ss:$48 sps:$4 sm:$0xff]  }
 0x56c   : > { %11267 = vmatprep.subr.bf16.mxu1 %v15439_v58  ;;  %v15511_v58 = vld [vmem:[%s16115_s6 + $0x14cc] ss:$48 sps:$4 sm:$0xff]  }
 0x56e   : > { %11227 = vmatpush1.bf16.msra.mxu0 %v15434_v24  ;;  %v15506_v24 = vld [vmem:[%s16115_s6 + $0xec8] ss:$48 sps:$4 sm:$0xff]  }
 0x56f   : > { %11268 = vmatpush1.bf16.msra.mxu1 %v15437_v45  ;;  %11228 = vmatprep.subr.bf16.mxu0 %v15442_v46  ;;  %v15509_v45 = vld [vmem:[%s16115_s6 + $0x14c8] ss:$48 sps:$4 sm:$0xff]   ;;  %v15514_v46 = vld [vmem:[%s16115_s6 + $0xe6c] ss:$48 sps:$4 sm:$0xff]  }
 0x570   : > { %11269 = vmatprep.subr.bf16.mxu1 %v15445_v47  ;;  %v15517_v47 = vld [vmem:[%s16115_s6 + $0x146c] ss:$48 sps:$4 sm:$0xff]  }
 0x572   : > { %11229 = vmatpush1.bf16.msra.mxu0 %v15440_v63 }
 0x573   : > { %11270 = vmatpush1.bf16.msra.mxu1 %v15443_v48  ;;  %11230 = vmatprep.subr.bf16.mxu0 %v15448_v54 }
 0x574   : > { %11271 = vmatprep.subr.bf16.mxu1 %v15451_v3  ;;  %v15512_v3 = vld [vmem:[%s16115_s6 + $0xe68] ss:$48 sps:$4 sm:$0xff]  }
 0x576   : > { %11231 = vmatpush1.bf16.msra.mxu0 %v15446_v6  ;;  %v15515_v6 = vld [vmem:[%s16115_s6 + $0x1468] ss:$48 sps:$4 sm:$0xff]  }
 0x577   : > { %11272 = vmatpush1.bf16.msra.mxu1 %v15449_v56  ;;  %11232 = vmatprep.subr.bf16.mxu0 %v15454_v57 }
 0x578   : > { %11273 = vmatprep.subr.bf16.mxu1 %v15457_v60  ;;  %v15520_v60 = vld [vmem:[%s16115_s6 + $0xe0c] ss:$48 sps:$4 sm:$0xff]  }
 0x57a   : > { %11233 = vmatpush1.bf16.msra.mxu0 %v15452_v61  ;;  %v15523_v61 = vld [vmem:[%s16115_s6 + $0x140c] ss:$48 sps:$4 sm:$0xff]  }
 0x57b   : > { %11274 = vmatpush1.bf16.msra.mxu1 %v15455_v18  ;;  %11234 = vmatprep.subr.bf16.mxu0 %v15460_v16 }
 0x57c   : > { %11275 = vmatprep.subr.bf16.mxu1 %v15463_v23  ;;  %v15518_v23 = vld [vmem:[%s16115_s6 + $0xe08] ss:$48 sps:$4 sm:$0xff]  }
 0x57e   : > { %11235 = vmatpush2.bf16.msra.mxu0 %v15458_v29  ;;  %v15521_v29 = vld [vmem:[%s16115_s6 + $0x1408] ss:$48 sps:$4 sm:$0xff]  }
 0x57f   : > { %11276 = vmatpush2.bf16.msra.mxu1 %v15461_v4  ;;  %11236 = vmatprep.subr.bf16.mxu0 %v15466_v25 }
 0x580   : > { %11277 = vmatprep.subr.bf16.mxu1 %v15469_v31  ;;  %v15527_v31 = vld [vmem:[%s16115_s6 + $0x13a8] ss:$48 sps:$4 sm:$0xff]  }
 0x582   : > { %11237 = vmatpush2.bf16.msra.mxu0 %v15464_v36  ;;  %v15532_v36 = vld [vmem:[%s16115_s6 + $0xd4c] ss:$48 sps:$4 sm:$0xff]  }
 0x583   : > { %11278 = vmatpush2.bf16.msra.mxu1 %v15467_v7  ;;  %11238 = vmatprep.subr.bf16.mxu0 %v15472_v8  ;;  %v15535_v7 = vld [vmem:[%s16115_s6 + $0x134c] ss:$48 sps:$4 sm:$0xff]   ;;  %v15530_v8 = vld [vmem:[%s16115_s6 + $0xd48] ss:$48 sps:$4 sm:$0xff]  }
 0x584   : > { %11279 = vmatprep.subr.bf16.mxu1 %v15475_v11  ;;  %v15533_v11 = vld [vmem:[%s16115_s6 + $0x1348] ss:$48 sps:$4 sm:$0xff]  }
 0x586   : > { %11239 = vmatpush2.bf16.msra.mxu0 %v15470_v32  ;;  %v15538_v32 = vld [vmem:[%s16115_s6 + $0xcec] ss:$48 sps:$4 sm:$0xff]  }
 0x587   : > { %11280 = vmatpush2.bf16.msra.mxu1 %v15473_v12  ;;  %11240 = vmatprep.subr.bf16.mxu0 %v15478_v14  ;;  %v15541_v12 = vld [vmem:[%s16115_s6 + $0x12ec] ss:$48 sps:$4 sm:$0xff]   ;;  %v15536_v14 = vld [vmem:[%s16115_s6 + $0xce8] ss:$48 sps:$4 sm:$0xff]  }
 0x588   : > { %11281 = vmatprep.subr.bf16.mxu1 %v15481_v15  ;;  %v15539_v15 = vld [vmem:[%s16115_s6 + $0x12e8] ss:$48 sps:$4 sm:$0xff]  }
 0x58a   : > { %11241 = vmatpush2.bf16.msra.mxu0 %v15476_v37  ;;  %v15544_v37 = vld [vmem:[%s16115_s6 + $0xc8c] ss:$48 sps:$4 sm:$0xff]  }
 0x58b   : > { %11282 = vmatpush2.bf16.msra.mxu1 %v15479_v26  ;;  %11242 = vmatprep.subr.bf16.mxu0 %v15484_v19  ;;  %v15547_v26 = vld [vmem:[%s16115_s6 + $0x128c] ss:$48 sps:$4 sm:$0xff]   ;;  %v15542_v19 = vld [vmem:[%s16115_s6 + $0xc88] ss:$48 sps:$4 sm:$0xff]  }
 0x58c   : > { %11283 = vmatprep.subr.bf16.mxu1 %v15487_v20  ;;  %v15545_v20 = vld [vmem:[%s16115_s6 + $0x1288] ss:$48 sps:$4 sm:$0xff]  }
 0x58e   : > { %11243 = vmatpush2.bf16.msra.mxu0 %v15482_v27  ;;  %v15550_v27 = vld [vmem:[%s16115_s6 + $0xc2c] ss:$48 sps:$4 sm:$0xff]  }
 0x58f   : > { %11284 = vmatpush2.bf16.msra.mxu1 %v15485_v52  ;;  %11244 = vmatprep.subr.bf16.mxu0 %v15490_v34  ;;  %v15553_v52 = vld [vmem:[%s16115_s6 + $0x122c] ss:$48 sps:$4 sm:$0xff]   ;;  %v15548_v34 = vld [vmem:[%s16115_s6 + $0xc28] ss:$48 sps:$4 sm:$0xff]  }
 0x590   : > { %11285 = vmatprep.subr.bf16.mxu1 %v15493_v59  ;;  %v15551_v59 = vld [vmem:[%s16115_s6 + $0x1228] ss:$48 sps:$4 sm:$0xff]  }
 0x592   : > { %11245 = vmatpush2.bf16.msra.mxu0 %v15488_v55  ;;  %v15556_v55 = vld [vmem:[%s16115_s6 + $0x11cc] ss:$48 sps:$4 sm:$0xff]  }
 0x593   : > { %11286 = vmatpush2.bf16.msra.mxu1 %v15491_v28  ;;  %11246 = vmatprep.subr.bf16.mxu0 %v15496_v13  ;;  %v15559_v28 = vld [vmem:[%s16115_s6 + $0x17cc] ss:$48 sps:$4 sm:$0xff]   ;;  %v15554_v13 = vld [vmem:[%s16115_s6 + $0x11c8] ss:$48 sps:$4 sm:$0xff]  }
 0x594   : > { %11287 = vmatprep.subr.bf16.mxu1 %v15499_v0  ;;  %v15557_v0 = vld [vmem:[%s16115_s6 + $0x17c8] ss:$48 sps:$4 sm:$0xff]  }
 0x596   : > { %11247 = vmatpush2.bf16.msra.mxu0 %v15494_v62  ;;  %v15562_v62 = vld [vmem:[%s16115_s6 + $0x116c] ss:$48 sps:$4 sm:$0xff]  }
 0x597   : > { %11288 = vmatpush2.bf16.msra.mxu1 %v15497_v42  ;;  %11248 = vmatprep.subr.bf16.mxu0 %v15502_v5  ;;  %v15565_v42 = vld [vmem:[%s16115_s6 + $0x176c] ss:$48 sps:$4 sm:$0xff]   ;;  %v15560_v5 = vld [vmem:[%s16115_s6 + $0x1168] ss:$48 sps:$4 sm:$0xff]  }
 0x598   : > { %11289 = vmatprep.subr.bf16.mxu1 %v15505_v50  ;;  %v15563_v50 = vld [vmem:[%s16115_s6 + $0x1768] ss:$48 sps:$4 sm:$0xff]  }
 0x59a   : > { %11249 = vmatpush2.bf16.msra.mxu0 %v15500_v53  ;;  %v15568_v53 = vld [vmem:[%s16115_s6 + $0x110c] ss:$48 sps:$4 sm:$0xff]  }
 0x59b   : > { %11290 = vmatpush2.bf16.msra.mxu1 %v15503_v39  ;;  %11300 = vmatprep.subr.bf16.mxu0 %v15508_v35  ;;  %v15571_v39 = vld [vmem:[%s16115_s6 + $0x170c] ss:$48 sps:$4 sm:$0xff]   ;;  %v15566_v35 = vld [vmem:[%s16115_s6 + $0x1108] ss:$48 sps:$4 sm:$0xff]  }
 0x59c   : > { %11341 = vmatprep.subr.bf16.mxu1 %v15511_v58  ;;  %v15569_v58 = vld [vmem:[%s16115_s6 + $0x1708] ss:$48 sps:$4 sm:$0xff]  }
 0x59d   : > { %v11006_v63 = vpop.f32.mrf.mxu0  ;;  %11251 = vmatmul.mubr.bf16.vlgmr.msra.gmra.mxu0 %v16218_v9 }
 0x59e   : > { %v11047_v48 = vpop.f32.mrf.mxu1  ;;  %11292 = vmatmul.mubr.bf16.vlgmr.msra.gmra.mxu1 %v16220_v10  ;;  %v11007_v54 = vadd.f32 %v11006_v63, %v17652_v17  ;;  %11301 = vmatpush1.bf16.msra.mxu0 %v15506_v24  ;;  %v15574_v24 = vld [vmem:[%s16115_s6 + $0x10ac] ss:$48 sps:$4 sm:$0xff]  }
 0x59f   : > { %11342 = vmatpush1.bf16.msra.mxu1 %v15509_v45  ;;  %v11008_v56 = vpop.f32.mrf.mxu0  ;;  %11302 = vmatprep.subr.bf16.mxu0 %v15514_v46  ;;  %v15577_v45 = vld [vmem:[%s16115_s6 + $0x16ac] ss:$48 sps:$4 sm:$0xff]   ;;  %v15572_v46 = vld [vmem:[%s16115_s6 + $0x10a8] ss:$48 sps:$4 sm:$0xff]  }
 0x5a0   : > { %v11049_v57 = vpop.f32.mrf.mxu1  ;;  %11343 = vmatprep.subr.bf16.mxu1 %v15517_v47  ;;  %v17729_v18 = vadd.f32 %v11047_v48, %v11007_v54  ;;  %v11009_v9 = vadd.f32 %v11008_v56, %v17658_v40  ;;  %11332 = vmatprep.mubr.bf16.mxu0 %v16251_v38  ;;  %v15526_v38 = vld [vmem:[%s16115_s6 + $0xdac] ss:$48 sps:$4 sm:$0xff]   ;;  %v15524_v40 = vld [vmem:[%s16115_s6 + $0xda8] ss:$48 sps:$4 sm:$0xff]  }
 0x5a1   : > { %11373 = vmatprep.mubr.bf16.mxu1 %v16255_v41  ;;  %v11010_v10 = vpop.f32.mrf.mxu0  ;;  %v15529_v41 = vld [vmem:[%s16115_s6 + $0x13ac] ss:$48 sps:$4 sm:$0xff]   ;;  %v15575_v47 = vld [vmem:[%s16115_s6 + $0x16a8] ss:$48 sps:$4 sm:$0xff]  }
 0x5a2   : > { %v11051_v17 = vpop.f32.mrf.mxu1  ;;  %v17734_v16 = vadd.f32 %v11049_v57, %v11009_v9  ;;  %11303 = vmatpush1.bf16.msra.mxu0 %v15512_v3  ;;  %v15580_v63 = vld [vmem:[%s16115_s6 + $0x104c] ss:$48 sps:$4 sm:$0xff]   ;;  %v15578_v54 = vld [vmem:[%s16115_s6 + $0x1048] ss:$48 sps:$4 sm:$0xff]  }
 0x5a3   : > { %11344 = vmatpush1.bf16.msra.mxu1 %v15515_v6  ;;  %v11011_v4 = vpop.f32.mrf.mxu0  ;;  %11304 = vmatprep.subr.bf16.mxu0 %v15520_v60  ;;  %v15583_v48 = vld [vmem:[%s16115_s6 + $0x164c] ss:$48 sps:$4 sm:$0xff]   ;;  %v15581_v3 = vld [vmem:[%s16115_s6 + $0x1648] ss:$48 sps:$4 sm:$0xff]  }
 0x5a4   : > { %v11052_v25 = vpop.f32.mrf.mxu1  ;;  %11345 = vmatprep.subr.bf16.mxu1 %v15523_v61  ;;  %v15586_v6 = vld [vmem:[%s16115_s6 + $0xfec] ss:$48 sps:$4 sm:$0xff]   ;;  %v15584_v57 = vld [vmem:[%s16115_s6 + $0xfe8] ss:$48 sps:$4 sm:$0xff]  }
 0x5a5   : > { %v15589_v56 = vld [vmem:[%s16115_s6 + $0x15ec] ss:$48 sps:$4 sm:$0xff]   ;;  %v15587_v60 = vld [vmem:[%s16115_s6 + $0x15e8] ss:$48 sps:$4 sm:$0xff]  }
 0x5a6   : > { %11305 = vmatpush1.bf16.msra.mxu0 %v15518_v23  ;;  %v15592_v61 = vld [vmem:[%s16115_s6 + $0xf8c] ss:$48 sps:$4 sm:$0xff]   ;;  %v15590_v10 = vld [vmem:[%s16115_s6 + $0xf88] ss:$48 sps:$4 sm:$0xff]  }
 0x5a7   : > { %11346 = vmatpush1.bf16.msra.mxu1 %v15521_v29  ;;  %11306 = vmatprep.subr.bf16.mxu0 %v15526_v38  ;;  %v15595_v9 = vld [vmem:[%s16115_s6 + $0x158c] ss:$48 sps:$4 sm:$0xff]   ;;  %v15593_v17 = vld [vmem:[%s16115_s6 + $0x1588] ss:$48 sps:$4 sm:$0xff]  }
 0x5a8   : > { %11347 = vmatprep.subr.bf16.mxu1 %v15529_v41  ;;  %v15598_v23 = vld [vmem:[%s16115_s6 + $0xf2c] ss:$48 sps:$4 sm:$0xff]   ;;  %v15596_v4 = vld [vmem:[%s16115_s6 + $0xf28] ss:$48 sps:$4 sm:$0xff]  }
 0x5a9   : > { %v15601_v29 = vld [vmem:[%s16115_s6 + $0x152c] ss:$48 sps:$4 sm:$0xff]   ;;  %v15599_v25 = vld [vmem:[%s16115_s6 + $0x1528] ss:$48 sps:$4 sm:$0xff]  }
 0x5aa   : > { %11307 = vmatpush1.bf16.msra.mxu0 %v15524_v40  ;;  %v15604_v38 = vld [vmem:[%s16115_s6 + $0x1acc] ss:$48 sps:$4 sm:$0xff]   ;;  %v15602_v40 = vld [vmem:[%s16115_s6 + $0x1ac8] ss:$48 sps:$4 sm:$0xff]  }
 0x5ab   : > { %11348 = vmatpush1.bf16.msra.mxu1 %v15527_v31  ;;  %11308 = vmatprep.subr.bf16.mxu0 %v15532_v36  ;;  %v15607_v41 = vld [vmem:[%s16115_s6 + $0x20cc] ss:$48 sps:$4 sm:$0xff]   ;;  %v15605_v31 = vld [vmem:[%s16115_s6 + $0x20c8] ss:$48 sps:$4 sm:$0xff]  }
 0x5ac   : > { %11349 = vmatprep.subr.bf16.mxu1 %v15535_v7  ;;  %v15610_v36 = vld [vmem:[%s16115_s6 + $0x1a6c] ss:$48 sps:$4 sm:$0xff]  }
 0x5ad   : > { %v15613_v7 = vld [vmem:[%s16115_s6 + $0x206c] ss:$48 sps:$4 sm:$0xff]  }
 0x5ae   : > { %11309 = vmatpush1.bf16.msra.mxu0 %v15530_v8 }
 0x5af   : > { %11350 = vmatpush1.bf16.msra.mxu1 %v15533_v11  ;;  %11310 = vmatprep.subr.bf16.mxu0 %v15538_v32  ;;  %v15608_v32 = vld [vmem:[%s16115_s6 + $0x1a68] ss:$48 sps:$4 sm:$0xff]  }
 0x5b0   : > { %11351 = vmatprep.subr.bf16.mxu1 %v15541_v12  ;;  %v15611_v12 = vld [vmem:[%s16115_s6 + $0x2068] ss:$48 sps:$4 sm:$0xff]  }
 0x5b2   : > { %11311 = vmatpush1.bf16.msra.mxu0 %v15536_v14 }
 0x5b3   : > { %11352 = vmatpush1.bf16.msra.mxu1 %v15539_v15  ;;  %11312 = vmatprep.subr.bf16.mxu0 %v15544_v37  ;;  %v15616_v37 = vld [vmem:[%s16115_s6 + $0x1a0c] ss:$48 sps:$4 sm:$0xff]  }
 0x5b4   : > { %11353 = vmatprep.subr.bf16.mxu1 %v15547_v26  ;;  %v15619_v26 = vld [vmem:[%s16115_s6 + $0x200c] ss:$48 sps:$4 sm:$0xff]  }
 0x5b6   : > { %11313 = vmatpush1.bf16.msra.mxu0 %v15542_v19  ;;  %v15614_v19 = vld [vmem:[%s16115_s6 + $0x1a08] ss:$48 sps:$4 sm:$0xff]  }
 0x5b7   : > { %11354 = vmatpush1.bf16.msra.mxu1 %v15545_v20  ;;  %11314 = vmatprep.subr.bf16.mxu0 %v15550_v27  ;;  %v15617_v20 = vld [vmem:[%s16115_s6 + $0x2008] ss:$48 sps:$4 sm:$0xff]  }
 0x5b8   : > { %11355 = vmatprep.subr.bf16.mxu1 %v15553_v52 }
 0x5ba   : > { %11315 = vmatpush1.bf16.msra.mxu0 %v15548_v34  ;;  %v15622_v34 = vld [vmem:[%s16115_s6 + $0x19ac] ss:$48 sps:$4 sm:$0xff]  }
 0x5bb   : > { %11356 = vmatpush1.bf16.msra.mxu1 %v15551_v59  ;;  %11316 = vmatprep.subr.bf16.mxu0 %v15556_v55  ;;  %v15623_v59 = vld [vmem:[%s16115_s6 + $0x1fa8] ss:$48 sps:$4 sm:$0xff]   ;;  %v15628_v55 = vld [vmem:[%s16115_s6 + $0x194c] ss:$48 sps:$4 sm:$0xff]  }
 0x5bc   : > { %11357 = vmatprep.subr.bf16.mxu1 %v15559_v28  ;;  %v15631_v28 = vld [vmem:[%s16115_s6 + $0x1f4c] ss:$48 sps:$4 sm:$0xff]  }
 0x5be   : > { %11317 = vmatpush2.bf16.msra.mxu0 %v15554_v13  ;;  %v15626_v13 = vld [vmem:[%s16115_s6 + $0x1948] ss:$48 sps:$4 sm:$0xff]  }
 0x5bf   : > { %11358 = vmatpush2.bf16.msra.mxu1 %v15557_v0  ;;  %11318 = vmatprep.subr.bf16.mxu0 %v15562_v62  ;;  %v15629_v0 = vld [vmem:[%s16115_s6 + $0x1f48] ss:$48 sps:$4 sm:$0xff]   ;;  %v15634_v62 = vld [vmem:[%s16115_s6 + $0x18ec] ss:$48 sps:$4 sm:$0xff]  }
 0x5c0   : > { %11359 = vmatprep.subr.bf16.mxu1 %v15565_v42  ;;  %v15637_v42 = vld [vmem:[%s16115_s6 + $0x1eec] ss:$48 sps:$4 sm:$0xff]  }
 0x5c2   : > { %11319 = vmatpush2.bf16.msra.mxu0 %v15560_v5  ;;  %v15632_v5 = vld [vmem:[%s16115_s6 + $0x18e8] ss:$48 sps:$4 sm:$0xff]  }
 0x5c3   : > { %11360 = vmatpush2.bf16.msra.mxu1 %v15563_v50  ;;  %11320 = vmatprep.subr.bf16.mxu0 %v15568_v53  ;;  %v15635_v50 = vld [vmem:[%s16115_s6 + $0x1ee8] ss:$48 sps:$4 sm:$0xff]   ;;  %v15640_v53 = vld [vmem:[%s16115_s6 + $0x188c] ss:$48 sps:$4 sm:$0xff]  }
 0x5c4   : > { %11361 = vmatprep.subr.bf16.mxu1 %v15571_v39  ;;  %v15643_v39 = vld [vmem:[%s16115_s6 + $0x1e8c] ss:$48 sps:$4 sm:$0xff]  }
 0x5c6   : > { %11321 = vmatpush2.bf16.msra.mxu0 %v15566_v35  ;;  %v15638_v35 = vld [vmem:[%s16115_s6 + $0x1888] ss:$48 sps:$4 sm:$0xff]  }
 0x5c7   : > { %11362 = vmatpush2.bf16.msra.mxu1 %v15569_v58  ;;  %11322 = vmatprep.subr.bf16.mxu0 %v15574_v24  ;;  %v15641_v58 = vld [vmem:[%s16115_s6 + $0x1e88] ss:$48 sps:$4 sm:$0xff]   ;;  %v15646_v24 = vld [vmem:[%s16115_s6 + $0x182c] ss:$48 sps:$4 sm:$0xff]  }
 0x5c8   : > { %11363 = vmatprep.subr.bf16.mxu1 %v15577_v45  ;;  %v15649_v45 = vld [vmem:[%s16115_s6 + $0x1e2c] ss:$48 sps:$4 sm:$0xff]  }
 0x5ca   : > { %11323 = vmatpush2.bf16.msra.mxu0 %v15572_v46  ;;  %v15644_v46 = vld [vmem:[%s16115_s6 + $0x1828] ss:$48 sps:$4 sm:$0xff]  }
 0x5cb   : > { %11364 = vmatpush2.bf16.msra.mxu1 %v15575_v47  ;;  %11324 = vmatprep.subr.bf16.mxu0 %v15580_v63  ;;  %v15647_v47 = vld [vmem:[%s16115_s6 + $0x1e28] ss:$48 sps:$4 sm:$0xff]   ;;  %v15652_v63 = vld [vmem:[%s16115_s6 + $0x1dcc] ss:$48 sps:$4 sm:$0xff]  }
 0x5cc   : > { %11365 = vmatprep.subr.bf16.mxu1 %v15583_v48  ;;  %v15655_v48 = vld [vmem:[%s16115_s6 + $0x23cc] ss:$48 sps:$4 sm:$0xff]  }
 0x5ce   : > { %11325 = vmatpush2.bf16.msra.mxu0 %v15578_v54  ;;  %v15650_v54 = vld [vmem:[%s16115_s6 + $0x1dc8] ss:$48 sps:$4 sm:$0xff]  }
 0x5cf   : > { %11366 = vmatpush2.bf16.msra.mxu1 %v15581_v3  ;;  %11326 = vmatprep.subr.bf16.mxu0 %v15586_v6  ;;  %v15653_v3 = vld [vmem:[%s16115_s6 + $0x23c8] ss:$48 sps:$4 sm:$0xff]   ;;  %v15658_v6 = vld [vmem:[%s16115_s6 + $0x1d6c] ss:$48 sps:$4 sm:$0xff]  }
 0x5d0   : > { %11367 = vmatprep.subr.bf16.mxu1 %v15589_v56  ;;  %v15661_v56 = vld [vmem:[%s16115_s6 + $0x236c] ss:$48 sps:$4 sm:$0xff]  }
 0x5d2   : > { %11327 = vmatpush2.bf16.msra.mxu0 %v15584_v57  ;;  %v15656_v57 = vld [vmem:[%s16115_s6 + $0x1d68] ss:$48 sps:$4 sm:$0xff]  }
 0x5d3   : > { %11368 = vmatpush2.bf16.msra.mxu1 %v15587_v60  ;;  %11328 = vmatprep.subr.bf16.mxu0 %v15592_v61  ;;  %v15659_v60 = vld [vmem:[%s16115_s6 + $0x2368] ss:$48 sps:$4 sm:$0xff]   ;;  %v15664_v61 = vld [vmem:[%s16115_s6 + $0x1d0c] ss:$48 sps:$4 sm:$0xff]  }
 0x5d4   : > { %11369 = vmatprep.subr.bf16.mxu1 %v15595_v9  ;;  %v15667_v9 = vld [vmem:[%s16115_s6 + $0x230c] ss:$48 sps:$4 sm:$0xff]  }
 0x5d6   : > { %11329 = vmatpush2.bf16.msra.mxu0 %v15590_v10  ;;  %v15662_v10 = vld [vmem:[%s16115_s6 + $0x1d08] ss:$48 sps:$4 sm:$0xff]  }
 0x5d7   : > { %11370 = vmatpush2.bf16.msra.mxu1 %v15593_v17  ;;  %11330 = vmatprep.subr.bf16.mxu0 %v15598_v23  ;;  %v15665_v17 = vld [vmem:[%s16115_s6 + $0x2308] ss:$48 sps:$4 sm:$0xff]   ;;  %v15670_v23 = vld [vmem:[%s16115_s6 + $0x1cac] ss:$48 sps:$4 sm:$0xff]  }
 0x5d8   : > { %11371 = vmatprep.subr.bf16.mxu1 %v15601_v29  ;;  %v15673_v29 = vld [vmem:[%s16115_s6 + $0x22ac] ss:$48 sps:$4 sm:$0xff]  }
 0x5da   : > { %11331 = vmatpush2.bf16.msra.mxu0 %v15596_v4  ;;  %v15668_v4 = vld [vmem:[%s16115_s6 + $0x1ca8] ss:$48 sps:$4 sm:$0xff]  }
 0x5db   : > { %11372 = vmatpush2.bf16.msra.mxu1 %v15599_v25  ;;  %11382 = vmatprep.subr.bf16.mxu0 %v15604_v38  ;;  %v15671_v25 = vld [vmem:[%s16115_s6 + $0x22a8] ss:$48 sps:$4 sm:$0xff]   ;;  %v15676_v38 = vld [vmem:[%s16115_s6 + $0x1c4c] ss:$48 sps:$4 sm:$0xff]  }
 0x5dc   : > { %11423 = vmatprep.subr.bf16.mxu1 %v15607_v41  ;;  %v15679_v41 = vld [vmem:[%s16115_s6 + $0x224c] ss:$48 sps:$4 sm:$0xff]  }
 0x5dd   : > { %v17796_v8 = vpop.f32.mrf.mxu0  ;;  %11333 = vmatmul.mubr.bf16.vlgmr.msra.gmra.mxu0 %v16298_v21 }
 0x5de   : > { %v17798_v11 = vpop.f32.mrf.mxu1  ;;  %11374 = vmatmul.mubr.bf16.vlgmr.msra.gmra.mxu1 %v16300_v22  ;;  %11383 = vmatpush1.bf16.msra.mxu0 %v15602_v40  ;;  %v15674_v40 = vld [vmem:[%s16115_s6 + $0x1c48] ss:$48 sps:$4 sm:$0xff]  }
 0x5df   : > { %11424 = vmatpush1.bf16.msra.mxu1 %v15605_v31  ;;  %v17804_v14 = vpop.f32.mrf.mxu0  ;;  %11384 = vmatprep.subr.bf16.mxu0 %v15610_v36  ;;  %v15677_v31 = vld [vmem:[%s16115_s6 + $0x2248] ss:$48 sps:$4 sm:$0xff]   ;;  %v15682_v36 = vld [vmem:[%s16115_s6 + $0x1bec] ss:$48 sps:$4 sm:$0xff]  }
 0x5e0   : > { %v17806_v15 = vpop.f32.mrf.mxu1  ;;  %11425 = vmatprep.subr.bf16.mxu1 %v15613_v7  ;;  %11414 = vmatprep.mubr.bf16.mxu0 %v16311_v30  ;;  %v15625_v30 = vld [vmem:[%s16115_s6 + $0x1fac] ss:$48 sps:$4 sm:$0xff]  }
 0x5e1   : > { %11455 = vmatprep.mubr.bf16.mxu1 %v16315_v33  ;;  %v11092_v21 = vpop.f32.mrf.mxu0  ;;  %v15620_v33 = vld [vmem:[%s16115_s6 + $0x19a8] ss:$48 sps:$4 sm:$0xff]   ;;  %v15685_v7 = vld [vmem:[%s16115_s6 + $0x21ec] ss:$48 sps:$4 sm:$0xff]  }
 0x5e2   : > { %v11133_v22 = vpop.f32.mrf.mxu1  ;;  %11385 = vmatpush1.bf16.msra.mxu0 %v15608_v32  ;;  %v15680_v32 = vld [vmem:[%s16115_s6 + $0x1be8] ss:$48 sps:$4 sm:$0xff]  }
 0x5e3   : > { %11426 = vmatpush1.bf16.msra.mxu1 %v15611_v12  ;;  %v11093_v27 = vpop.f32.mrf.mxu0  ;;  %11386 = vmatprep.subr.bf16.mxu0 %v15616_v37  ;;  %v15683_v12 = vld [vmem:[%s16115_s6 + $0x21e8] ss:$48 sps:$4 sm:$0xff]   ;;  %v15688_v37 = vld [vmem:[%s16115_s6 + $0x1b8c] ss:$48 sps:$4 sm:$0xff]  }
 0x5e4   : > { %v11134_v52 = vpop.f32.mrf.mxu1  ;;  %11427 = vmatprep.subr.bf16.mxu1 %v15619_v26  ;;  %v15691_v26 = vld [vmem:[%s16115_s6 + $0x218c] ss:$48 sps:$4 sm:$0xff]   ;;  %v15686_v21 = vld [vmem:[%s16115_s6 + $0x1b88] ss:$48 sps:$4 sm:$0xff]  }
 0x5e5   : > { %v15689_v22 = vld [vmem:[%s16115_s6 + $0x2188] ss:$48 sps:$4 sm:$0xff]  }
 0x5e6   : > { %11387 = vmatpush1.bf16.msra.mxu0 %v15614_v19  ;;  %v15694_v19 = vld [vmem:[%s16115_s6 + $0x1b2c] ss:$48 sps:$4 sm:$0xff]   ;;  %v15692_v27 = vld [vmem:[%s16115_s6 + $0x1b28] ss:$48 sps:$4 sm:$0xff]  }
 0x5e7   : > { %11428 = vmatpush1.bf16.msra.mxu1 %v15617_v20  ;;  %11388 = vmatprep.subr.bf16.mxu0 %v15622_v34  ;;  %v15697_v20 = vld [vmem:[%s16115_s6 + $0x212c] ss:$48 sps:$4 sm:$0xff]   ;;  %v15695_v52 = vld [vmem:[%s16115_s6 + $0x2128] ss:$48 sps:$4 sm:$0xff]  }
 0x5e8   : > { %11429 = vmatprep.subr.bf16.mxu1 %v15625_v30  ;;  %v15700_v34 = vld [vmem:[%s16115_s6 + $0x26cc] ss:$48 sps:$4 sm:$0xff]  }
 0x5e9   : > { %v15703_v30 = vld [vmem:[%s16115_s6 + $0x2ccc] ss:$48 sps:$4 sm:$0xff]  }
 0x5ea   : > { %11389 = vmatpush1.bf16.msra.mxu0 %v15620_v33  ;;  %v11089_v33 = vadd.f32 %v17796_v8, %v17729_v18  ;;  %v15704_v8 = vld [vmem:[%s16115_s6 + $0x2668] ss:$48 sps:$4 sm:$0xff]  }
 0x5eb   : > { %11430 = vmatpush1.bf16.msra.mxu1 %v15623_v59  ;;  %11390 = vmatprep.subr.bf16.mxu0 %v15628_v55  ;;  %v11091_v59 = vadd.f32 %v17804_v14, %v17734_v16  ;;  %v15698_v55 = vld [vmem:[%s16115_s6 + $0x26c8] ss:$48 sps:$4 sm:$0xff]  }
 0x5ec   : > { %11431 = vmatprep.subr.bf16.mxu1 %v15631_v28  ;;  %v15701_v28 = vld [vmem:[%s16115_s6 + $0x2cc8] ss:$48 sps:$4 sm:$0xff]  }
 0x5ed   : > { %v11132_v18 = vadd.f32 %v17806_v15, %v11091_v59  ;;  %v15707_v14 = vld [vmem:[%s16115_s6 + $0x2c68] ss:$48 sps:$4 sm:$0xff]   ;;  %v15769_v59 = vld [vmem:[%s16115_s6 + $0x2eac] ss:$48 sps:$4 sm:$0xff]  }
 0x5ee   : > { %11391 = vmatpush1.bf16.msra.mxu0 %v15626_v13  ;;  %v15706_v13 = vld [vmem:[%s16115_s6 + $0x266c] ss:$48 sps:$4 sm:$0xff]  }
 0x5ef   : > { %11432 = vmatpush1.bf16.msra.mxu1 %v15629_v0  ;;  %11392 = vmatprep.subr.bf16.mxu0 %v15634_v62  ;;  %v15709_v0 = vld [vmem:[%s16115_s6 + $0x2c6c] ss:$48 sps:$4 sm:$0xff]   ;;  %v11130_v62 = vadd.f32 %v17798_v11, %v11089_v33 }
 0x5f0   : > { %11433 = vmatprep.subr.bf16.mxu1 %v15637_v42  ;;  %v15712_v11 = vld [vmem:[%s16115_s6 + $0x260c] ss:$48 sps:$4 sm:$0xff]  }
 0x5f1   : > { %v15766_v33 = vld [vmem:[%s16115_s6 + $0x28ac] ss:$48 sps:$4 sm:$0xff]  }
 0x5f2   : > { %11393 = vmatpush1.bf16.msra.mxu0 %v15632_v5 }
 0x5f3   : > { %11434 = vmatpush1.bf16.msra.mxu1 %v15635_v50  ;;  %11394 = vmatprep.subr.bf16.mxu0 %v15640_v53  ;;  %v326_v50 = vld [vmem:[#allocation2 + $0x28] sm:$0xff] }
 0x5f4   : > { %11435 = vmatprep.subr.bf16.mxu1 %v15643_v39 }
 0x5f6   : > { %11395 = vmatpush1.bf16.msra.mxu0 %v15638_v35  ;;  %v15715_v35 = vld [vmem:[%s16115_s6 + $0x2c0c] ss:$48 sps:$4 sm:$0xff]  }
 0x5f7   : > { %11436 = vmatpush1.bf16.msra.mxu1 %v15641_v58  ;;  %11396 = vmatprep.subr.bf16.mxu0 %v15646_v24 }
 0x5f8   : > { %11437 = vmatprep.subr.bf16.mxu1 %v15649_v45 }
 0x5fa   : > { %11397 = vmatpush1.bf16.msra.mxu0 %v15644_v46 }
 0x5fb   : > { %11438 = vmatpush1.bf16.msra.mxu1 %v15647_v47  ;;  %11398 = vmatprep.subr.bf16.mxu0 %v15652_v63  ;;  %v15710_v47 = vld [vmem:[%s16115_s6 + $0x2608] ss:$48 sps:$4 sm:$0xff]  }
 0x5fc   : > { %11439 = vmatprep.subr.bf16.mxu1 %v15655_v48  ;;  %v15713_v63 = vld [vmem:[%s16115_s6 + $0x2c08] ss:$48 sps:$4 sm:$0xff]  }
 0x5fe   : > { %11399 = vmatpush2.bf16.msra.mxu0 %v15650_v54 }
 0x5ff   : > { %11440 = vmatpush2.bf16.msra.mxu1 %v15653_v3  ;;  %11400 = vmatprep.subr.bf16.mxu0 %v15658_v6  ;;  %v15716_v6 = vld [vmem:[%s16115_s6 + $0x25a8] ss:$48 sps:$4 sm:$0xff]  }
 0x600   : > { %11441 = vmatprep.subr.bf16.mxu1 %v15661_v56  ;;  %v15719_v56 = vld [vmem:[%s16115_s6 + $0x2ba8] ss:$48 sps:$4 sm:$0xff]  }
 0x602   : > { %11401 = vmatpush2.bf16.msra.mxu0 %v15656_v57  ;;  %v15724_v57 = vld [vmem:[%s16115_s6 + $0x254c] ss:$48 sps:$4 sm:$0xff]  }
 0x603   : > { %11442 = vmatpush2.bf16.msra.mxu1 %v15659_v60  ;;  %11402 = vmatprep.subr.bf16.mxu0 %v15664_v61  ;;  %v15727_v60 = vld [vmem:[%s16115_s6 + $0x2b4c] ss:$48 sps:$4 sm:$0xff]   ;;  %v15722_v61 = vld [vmem:[%s16115_s6 + $0x2548] ss:$48 sps:$4 sm:$0xff]  }
 0x604   : > { %11443 = vmatprep.subr.bf16.mxu1 %v15667_v9  ;;  %v15725_v9 = vld [vmem:[%s16115_s6 + $0x2b48] ss:$48 sps:$4 sm:$0xff]  }
 0x606   : > { %11403 = vmatpush2.bf16.msra.mxu0 %v15662_v10  ;;  %v15730_v10 = vld [vmem:[%s16115_s6 + $0x24ec] ss:$48 sps:$4 sm:$0xff]  }
 0x607   : > { %11444 = vmatpush2.bf16.msra.mxu1 %v15665_v17  ;;  %11404 = vmatprep.subr.bf16.mxu0 %v15670_v23  ;;  %v15733_v17 = vld [vmem:[%s16115_s6 + $0x2aec] ss:$48 sps:$4 sm:$0xff]   ;;  %v15728_v23 = vld [vmem:[%s16115_s6 + $0x24e8] ss:$48 sps:$4 sm:$0xff]  }
 0x608   : > { %11445 = vmatprep.subr.bf16.mxu1 %v15673_v29  ;;  %v15731_v29 = vld [vmem:[%s16115_s6 + $0x2ae8] ss:$48 sps:$4 sm:$0xff]  }
 0x60a   : > { %11405 = vmatpush2.bf16.msra.mxu0 %v15668_v4  ;;  %v15736_v4 = vld [vmem:[%s16115_s6 + $0x248c] ss:$48 sps:$4 sm:$0xff]  }
 0x60b   : > { %11446 = vmatpush2.bf16.msra.mxu1 %v15671_v25  ;;  %11406 = vmatprep.subr.bf16.mxu0 %v15676_v38  ;;  %v15739_v25 = vld [vmem:[%s16115_s6 + $0x2a8c] ss:$48 sps:$4 sm:$0xff]   ;;  %v15734_v38 = vld [vmem:[%s16115_s6 + $0x2488] ss:$48 sps:$4 sm:$0xff]  }
 0x60c   : > { %11447 = vmatprep.subr.bf16.mxu1 %v15679_v41  ;;  %v15737_v41 = vld [vmem:[%s16115_s6 + $0x2a88] ss:$48 sps:$4 sm:$0xff]  }
 0x60e   : > { %11407 = vmatpush2.bf16.msra.mxu0 %v15674_v40  ;;  %v15742_v40 = vld [vmem:[%s16115_s6 + $0x242c] ss:$48 sps:$4 sm:$0xff]  }
 0x60f   : > { %11448 = vmatpush2.bf16.msra.mxu1 %v15677_v31  ;;  %11408 = vmatprep.subr.bf16.mxu0 %v15682_v36  ;;  %v15745_v31 = vld [vmem:[%s16115_s6 + $0x2a2c] ss:$48 sps:$4 sm:$0xff]   ;;  %v15740_v36 = vld [vmem:[%s16115_s6 + $0x2428] ss:$48 sps:$4 sm:$0xff]  }
 0x610   : > { %11449 = vmatprep.subr.bf16.mxu1 %v15685_v7  ;;  %v15743_v7 = vld [vmem:[%s16115_s6 + $0x2a28] ss:$48 sps:$4 sm:$0xff]  }
 0x612   : > { %11409 = vmatpush2.bf16.msra.mxu0 %v15680_v32  ;;  %v15748_v32 = vld [vmem:[%s16115_s6 + $0x29cc] ss:$48 sps:$4 sm:$0xff]  }
 0x613   : > { %11450 = vmatpush2.bf16.msra.mxu1 %v15683_v12  ;;  %11410 = vmatprep.subr.bf16.mxu0 %v15688_v37  ;;  %v15751_v12 = vld [vmem:[%s16115_s6 + $0x2fcc] ss:$48 sps:$4 sm:$0xff]   ;;  %v15746_v37 = vld [vmem:[%s16115_s6 + $0x29c8] ss:$48 sps:$4 sm:$0xff]  }
 0x614   : > { %11451 = vmatprep.subr.bf16.mxu1 %v15691_v26  ;;  %v15749_v26 = vld [vmem:[%s16115_s6 + $0x2fc8] ss:$48 sps:$4 sm:$0xff]  }
 0x616   : > { %11411 = vmatpush2.bf16.msra.mxu0 %v15686_v21  ;;  %v15754_v21 = vld [vmem:[%s16115_s6 + $0x296c] ss:$48 sps:$4 sm:$0xff]  }
 0x617   : > { %11452 = vmatpush2.bf16.msra.mxu1 %v15689_v22  ;;  %11412 = vmatprep.subr.bf16.mxu0 %v15694_v19  ;;  %v15757_v22 = vld [vmem:[%s16115_s6 + $0x2f6c] ss:$48 sps:$4 sm:$0xff]   ;;  %v15752_v19 = vld [vmem:[%s16115_s6 + $0x2968] ss:$48 sps:$4 sm:$0xff]  }
 0x618   : > { %11453 = vmatprep.subr.bf16.mxu1 %v15697_v20  ;;  %v15755_v20 = vld [vmem:[%s16115_s6 + $0x2f68] ss:$48 sps:$4 sm:$0xff]  }
 0x61a   : > { %11413 = vmatpush2.bf16.msra.mxu0 %v15692_v27  ;;  %v15760_v27 = vld [vmem:[%s16115_s6 + $0x290c] ss:$48 sps:$4 sm:$0xff]  }
 0x61b   : > { %11454 = vmatpush2.bf16.msra.mxu1 %v15695_v52  ;;  %11464 = vmatprep.subr.bf16.mxu0 %v15700_v34  ;;  %v15763_v52 = vld [vmem:[%s16115_s6 + $0x2f0c] ss:$48 sps:$4 sm:$0xff]   ;;  %v15758_v34 = vld [vmem:[%s16115_s6 + $0x2908] ss:$48 sps:$4 sm:$0xff]  }
 0x61c   : > { %11505 = vmatprep.subr.bf16.mxu1 %v15703_v30  ;;  %v15761_v30 = vld [vmem:[%s16115_s6 + $0x2f08] ss:$48 sps:$4 sm:$0xff]  }
 0x61d   : > { %v11170_v42 = vpop.f32.mrf.mxu0  ;;  %11415 = vmatmul.mubr.bf16.vlgmr.msra.gmra.mxu0 %v16380_v43 }
 0x61e   : > { %v11211_v5 = vpop.f32.mrf.mxu1  ;;  %11456 = vmatmul.mubr.bf16.vlgmr.msra.gmra.mxu1 %v16382_v44  ;;  %v11171_v16 = vadd.f32 %v11170_v42, %v11130_v62  ;;  %11465 = vmatpush1.bf16.msra.mxu0 %v15698_v55  ;;  %v327_v44 = vld [vmem:[#allocation2 + $0x48] sm:$0xff] }
 0x61f   : > { %11506 = vmatpush1.bf16.msra.mxu1 %v15701_v28  ;;  %v11172_v53 = vpop.f32.mrf.mxu0  ;;  %11466 = vmatprep.subr.bf16.mxu0 %v15706_v13  ;;  %v15764_v55 = vld [vmem:[%s16115_s6 + $0x28a8] ss:$48 sps:$4 sm:$0xff]   ;;  %v15772_v13 = vld [vmem:[%s16115_s6 + $0x284c] ss:$48 sps:$4 sm:$0xff]  }
 0x620   : > { %v11213_v39 = vpop.f32.mrf.mxu1  ;;  %11507 = vmatprep.subr.bf16.mxu1 %v15709_v0  ;;  %v11212_v58 = vadd.f32 %v11211_v5, %v11171_v16  ;;  %v11173_v43 = vadd.f32 %v11172_v53, %v11132_v18  ;;  %11496 = vmatprep.mubr.bf16.mxu0 %v16388_v49  ;;  %v15718_v49 = vld [vmem:[%s16115_s6 + $0x25ac] ss:$48 sps:$4 sm:$0xff]   ;;  %v15767_v28 = vld [vmem:[%s16115_s6 + $0x2ea8] ss:$48 sps:$4 sm:$0xff]  }
 0x621   : > { %11537 = vmatprep.mubr.bf16.mxu1 %v16390_v51  ;;  %v11174_v15 = vpop.f32.mrf.mxu0  ;;  %v15721_v51 = vld [vmem:[%s16115_s6 + $0x2bac] ss:$48 sps:$4 sm:$0xff]   ;;  %v15770_v62 = vld [vmem:[%s16115_s6 + $0x2848] ss:$48 sps:$4 sm:$0xff]  }
 0x622   : > { %v11215_v24 = vpop.f32.mrf.mxu1  ;;  %v11554_v45 = vadd.f32 %v11212_v58, %v326_v50  ;;  %v11214_v46 = vadd.f32 %v11213_v39, %v11173_v43  ;;  %11467 = vmatpush1.bf16.msra.mxu0 %v15704_v8  ;;  %v15775_v0 = vld [vmem:[%s16115_s6 + $0x2e4c] ss:$48 sps:$4 sm:$0xff]   ;;  %v15773_v42 = vld [vmem:[%s16115_s6 + $0x2e48] ss:$48 sps:$4 sm:$0xff]  }
 0x623   : > { %11508 = vmatpush1.bf16.msra.mxu1 %v15707_v14  ;;  %v11175_v48 = vpop.f32.mrf.mxu0  ;;  %11468 = vmatprep.subr.bf16.mxu0 %v15712_v11  ;;  %v15778_v5 = vld [vmem:[%s16115_s6 + $0x27ec] ss:$48 sps:$4 sm:$0xff]   ;;  %v15776_v16 = vld [vmem:[%s16115_s6 + $0x27e8] ss:$48 sps:$4 sm:$0xff]  }
 0x624   : > { %v11216_v54 = vpop.f32.mrf.mxu1  ;;  %11509 = vmatprep.subr.bf16.mxu1 %v15715_v35  ;;  %11566 = vst [vmem:[#allocation2 + $0x28] sm:$0xff] %v11554_v45  ;;  %v11555_v3 = vadd.f32 %v11214_v46, %v327_v44  ;;  %v15781_v18 = vld [vmem:[%s16115_s6 + $0x2dec] ss:$48 sps:$4 sm:$0xff]   ;;  %v15779_v8 = vld [vmem:[%s16115_s6 + $0x2de8] ss:$48 sps:$4 sm:$0xff]  }
 0x625   : > { %v15784_v14 = vld [vmem:[%s16115_s6 + $0x278c] ss:$48 sps:$4 sm:$0xff]   ;;  %v15782_v53 = vld [vmem:[%s16115_s6 + $0x2788] ss:$48 sps:$4 sm:$0xff]  }
 0x626   : > { %11567 = vst [vmem:[#allocation2 + $0x48] sm:$0xff] %v11555_v3  ;;  %11469 = vmatpush1.bf16.msra.mxu0 %v15710_v47  ;;  %v15787_v50 = vld [vmem:[%s16115_s6 + $0x2d8c] ss:$48 sps:$4 sm:$0xff]   ;;  %v15785_v39 = vld [vmem:[%s16115_s6 + $0x2d88] ss:$48 sps:$4 sm:$0xff]  }
 0x627   : > { %11510 = vmatpush1.bf16.msra.mxu1 %v15713_v63  ;;  %11470 = vmatprep.subr.bf16.mxu0 %v15718_v49  ;;  %v15790_v11 = vld [vmem:[%s16115_s6 + $0x272c] ss:$48 sps:$4 sm:$0xff]   ;;  %v15788_v58 = vld [vmem:[%s16115_s6 + $0x2728] ss:$48 sps:$4 sm:$0xff]  }
 0x628   : > { %11511 = vmatprep.subr.bf16.mxu1 %v15721_v51  ;;  %v15793_v35 = vld [vmem:[%s16115_s6 + $0x2d2c] ss:$48 sps:$4 sm:$0xff]   ;;  %v15791_v43 = vld [vmem:[%s16115_s6 + $0x2d28] ss:$48 sps:$4 sm:$0xff]  }
 0x62a   : > { %11471 = vmatpush1.bf16.msra.mxu0 %v15716_v6 }
 0x62b   : > { %11512 = vmatpush1.bf16.msra.mxu1 %v15719_v56  ;;  %11472 = vmatprep.subr.bf16.mxu0 %v15724_v57 }
 0x62c   : > { %11513 = vmatprep.subr.bf16.mxu1 %v15727_v60 }
 0x62e   : > { %11473 = vmatpush1.bf16.msra.mxu0 %v15722_v61 }
 0x62f   : > { %11514 = vmatpush1.bf16.msra.mxu1 %v15725_v9  ;;  %11474 = vmatprep.subr.bf16.mxu0 %v15730_v10 }
 0x630   : > { %11515 = vmatprep.subr.bf16.mxu1 %v15733_v17 }
 0x632   : > { %11475 = vmatpush1.bf16.msra.mxu0 %v15728_v23 }
 0x633   : > { %11516 = vmatpush1.bf16.msra.mxu1 %v15731_v29  ;;  %11476 = vmatprep.subr.bf16.mxu0 %v15736_v4 }
 0x634   : > { %11517 = vmatprep.subr.bf16.mxu1 %v15739_v25 }
 0x636   : > { %11477 = vmatpush1.bf16.msra.mxu0 %v15734_v38 }
 0x637   : > { %11518 = vmatpush1.bf16.msra.mxu1 %v15737_v41  ;;  %11478 = vmatprep.subr.bf16.mxu0 %v15742_v40 }
 0x638   : > { %11519 = vmatprep.subr.bf16.mxu1 %v15745_v31 }
 0x63a   : > { %11479 = vmatpush1.bf16.msra.mxu0 %v15740_v36 }
 0x63b   : > { %11520 = vmatpush1.bf16.msra.mxu1 %v15743_v7  ;;  %11480 = vmatprep.subr.bf16.mxu0 %v15748_v32 }
 0x63c   : > { %11521 = vmatprep.subr.bf16.mxu1 %v15751_v12 }
 0x63e   : > { %11481 = vmatpush2.bf16.msra.mxu0 %v15746_v37 }
 0x63f   : > { %11522 = vmatpush2.bf16.msra.mxu1 %v15749_v26  ;;  %11482 = vmatprep.subr.bf16.mxu0 %v15754_v21 }
 0x640   : > { %11523 = vmatprep.subr.bf16.mxu1 %v15757_v22  ;;  %v328_v22 = vld [vmem:[#allocation2 + $0x10] sm:$0xff] }
 0x642   : > { %11483 = vmatpush2.bf16.msra.mxu0 %v15752_v19 }
 0x643   : > { %11524 = vmatpush2.bf16.msra.mxu1 %v15755_v20  ;;  %11484 = vmatprep.subr.bf16.mxu0 %v15760_v27 }
 0x644   : > { %11525 = vmatprep.subr.bf16.mxu1 %v15763_v52 }
 0x646   : > { %11485 = vmatpush2.bf16.msra.mxu0 %v15758_v34  ;;  %v329_v34 = vld [vmem:[#allocation2 + $0x40] sm:$0xff] }
 0x647   : > { %11526 = vmatpush2.bf16.msra.mxu1 %v15761_v30  ;;  %11486 = vmatprep.subr.bf16.mxu0 %v15766_v33 }
 0x648   : > { %11527 = vmatprep.subr.bf16.mxu1 %v15769_v59 }
 0x64a   : > { %11487 = vmatpush2.bf16.msra.mxu0 %v15764_v55 }
 0x64b   : > { %11528 = vmatpush2.bf16.msra.mxu1 %v15767_v28  ;;  %11488 = vmatprep.subr.bf16.mxu0 %v15772_v13 }
 0x64c   : > { %11529 = vmatprep.subr.bf16.mxu1 %v15775_v0 }
 0x64e   : > { %11489 = vmatpush2.bf16.msra.mxu0 %v15770_v62 }
 0x64f   : > { %11530 = vmatpush2.bf16.msra.mxu1 %v15773_v42  ;;  %11490 = vmatprep.subr.bf16.mxu0 %v15778_v5 }
 0x650   : > { %11531 = vmatprep.subr.bf16.mxu1 %v15781_v18 }
 0x652   : > { %11491 = vmatpush2.bf16.msra.mxu0 %v15776_v16 }
 0x653   : > { %11532 = vmatpush2.bf16.msra.mxu1 %v15779_v8  ;;  %11492 = vmatprep.subr.bf16.mxu0 %v15784_v14 }
 0x654   : > { %11533 = vmatprep.subr.bf16.mxu1 %v15787_v50 }
 0x656   : > { %11493 = vmatpush2.bf16.msra.mxu0 %v15782_v53 }
 0x657   : > { %11534 = vmatpush2.bf16.msra.mxu1 %v15785_v39  ;;  %11494 = vmatprep.subr.bf16.mxu0 %v15790_v11 }
 0x658   : > { %11535 = vmatprep.subr.bf16.mxu1 %v15793_v35 }
 0x65a   : > { %11495 = vmatpush2.bf16.msra.mxu0 %v15788_v58 }
 0x65b   : > { %11536 = vmatpush2.bf16.msra.mxu1 %v15791_v43 }
 0x65d   : > { %v11252_v44 = vpop.f32.mrf.mxu0  ;;  %11497 = vmatmul.mubr.bf16.vlgmr.msra.gmra.mxu0 %v16458_v1 }
 0x65e   : > { %v11293_v15 = vpop.f32.mrf.mxu1  ;;  %11538 = vmatmul.mubr.bf16.vlgmr.msra.gmra.mxu1 %v16460_v2 }
 0x65f   : > { %v11294_v24 = vadd.f32 %v11293_v15, %v11252_v44  ;;  %v11254_v45 = vpop.f32.mrf.mxu0 }
 0x660   : > { %v11295_v46 = vpop.f32.mrf.mxu1 }
 0x661   : > { %v11296_v47 = vadd.f32 %v11295_v46, %v11254_v45  ;;  %v11256_v63 = vpop.f32.mrf.mxu0 }
 0x662   : > { %v11297_v48 = vpop.f32.mrf.mxu1 }
 0x663   : > { %v11257_v54 = vpop.f32.mrf.mxu0 }
 0x664   : > { %v11298_v49 = vpop.f32.mrf.mxu1 }
 0x69d   : > { %v11334_v51 = vpop.f32.mrf.mxu0 }
 0x69e   : > { %v11375_v3 = vpop.f32.mrf.mxu1  ;;  %v11335_v6 = vadd.f32 %v11334_v51, %v11294_v24 }
 0x69f   : > { %v11336_v56 = vpop.f32.mrf.mxu0 }
 0x6a0   : > { %v11377_v57 = vpop.f32.mrf.mxu1  ;;  %v11376_v60 = vadd.f32 %v11375_v3, %v11335_v6  ;;  %v11337_v61 = vadd.f32 %v11336_v56, %v11296_v47 }
 0x6a1   : > { %v11338_v9 = vpop.f32.mrf.mxu0 }
 0x6a2   : > { %v11379_v10 = vpop.f32.mrf.mxu1  ;;  %v11378_v1 = vadd.f32 %v11377_v57, %v11337_v61 }
 0x6a3   : > { %v11339_v17 = vpop.f32.mrf.mxu0 }
 0x6a4   : > { %v11380_v2 = vpop.f32.mrf.mxu1 }
 0x6dd   : > { %v11416_v23 = vpop.f32.mrf.mxu0 }
 0x6de   : > { %v11457_v29 = vpop.f32.mrf.mxu1  ;;  %v11417_v36 = vadd.f32 %v11416_v23, %v11376_v60 }
 0x6df   : > { %v11418_v4 = vpop.f32.mrf.mxu0 }
 0x6e0   : > { %v11459_v25 = vpop.f32.mrf.mxu1  ;;  %v11419_v7 = vadd.f32 %v11418_v4, %v11378_v1  ;;  %v11458_v32 = vadd.f32 %v11457_v29, %v11417_v36 }
 0x6e1   : > { %v11420_v38 = vpop.f32.mrf.mxu0 }
 0x6e2   : > { %v11461_v41 = vpop.f32.mrf.mxu1  ;;  %v11460_v26 = vadd.f32 %v11459_v25, %v11419_v7 }
 0x6e3   : > { %v11421_v40 = vpop.f32.mrf.mxu0 }
 0x6e4   : > { %v11462_v31 = vpop.f32.mrf.mxu1 }
 0x71d   : > { %v11498_v12 = vpop.f32.mrf.mxu0 }
 0x71e   : > { %v11539_v37 = vpop.f32.mrf.mxu1  ;;  %v11499_v21 = vadd.f32 %v11498_v12, %v11458_v32 }
 0x71f   : > { %v11500_v19 = vpop.f32.mrf.mxu0 }
 0x720   : > { %v11541_v20 = vpop.f32.mrf.mxu1  ;;  %v11540_v27 = vadd.f32 %v11539_v37, %v11499_v21  ;;  %v11501_v52 = vadd.f32 %v11500_v19, %v11460_v26 }
 0x721   : > { %v11502_v30 = vpop.f32.mrf.mxu0 }
 0x722   : > { %v11543_v33 = vpop.f32.mrf.mxu1  ;;  %v11556_v59 = vadd.f32 %v11540_v27, %v328_v22  ;;  %v11542_v55 = vadd.f32 %v11541_v20, %v11501_v52  ;;  %11573 = sbr.rel (%p13377_p8) target bundleno = 1851 (0x73b), region = 48 }
 0x723   : > { %v11503_v28 = vpop.f32.mrf.mxu0 }
 0x724   : > { %v11544_v13 = vpop.f32.mrf.mxu1  ;;  %11568 = vst [vmem:[#allocation2 + $0x10] sm:$0xff] %v11556_v59  ;;  %v11557_v0 = vadd.f32 %v11542_v55, %v329_v34 }
 0x726   : > { %11569 = vst [vmem:[#allocation2 + $0x40] sm:$0xff] %v11557_v0 }
 0x727   : > { %v11590_v62 = vlaneseq  ;;  %v11574_v5 = vld [vmem:[#allocation2 + $0x30] sm:$0xff]  ;;  %v11575_v8 = vld [vmem:[#allocation2] sm:$0xff]  ;;  %v11576_v50 = vld [vmem:[#allocation2 + $0x58] sm:$0xff] }
 0x728   : > { %v11586_v18 = vld [vmem:[%s239_s15] sm:$0xff]  ;;  %v11577_v11 = vld [vmem:[#allocation2 + $0x18] sm:$0xff]  ;;  %v11587_v2 = vld [vmem:[%s239_s15 + $0x8] sm:$0xf] }
 0x729   : > { %v11591_v42 = vshrl.u32 %v11590_v62, 7  ;;  %v11578_v35 = vld [vmem:[#allocation2 + $0x50] sm:$0xff]  ;;  %v11579_v63 = vld [vmem:[#allocation2 + $0x20] sm:$0xff]  ;;  %v11580_v48 = vld [vmem:[#allocation2 + $0x8] sm:$0xff] }
 0x72a   : > { %v11581_v54 = vld [vmem:[#allocation2 + $0x38] sm:$0xff]  ;;  %v11582_v38 = vld [vmem:[#allocation2 + $0x28] sm:$0xff] }
 0x72b   : > { %v11592_v16 = vsub.s32 0, %v11591_v42  ;;  %v11596_v14 = vsub.s32 1, %v11591_v42  ;;  %v11600_v53 = vsub.s32 2, %v11591_v42  ;;  %v11604_v39 = vsub.s32 3, %v11591_v42  ;;  %v11583_v41 = vld [vmem:[#allocation2 + $0x48] sm:$0xff]  ;;  %v11584_v32 = vld [vmem:[#allocation2 + $0x10] sm:$0xff] }
 0x72c   : > { %v11608_v58 = vsub.s32 4, %v11591_v42  ;;  %v11612_v43 = vsub.s32 5, %v11591_v42  ;;  %v11616_v44 = vsub.s32 6, %v11591_v42  ;;  %v11620_v15 = vsub.s32 7, %v11591_v42 }
 0x72d   : > { %v11593_v24 = vrot.slane %v11586_v18, %v11592_v16  ;;  %v11597_v45 = vrot.slane %v11586_v18, %v11596_v14  ;;  %v11601_v46 = vrot.slane %v11586_v18, %v11600_v53  ;;  %v11605_v47 = vrot.slane %v11586_v18, %v11604_v39  ;;  %v11585_v12 = vld [vmem:[#allocation2 + $0x40] sm:$0xff] }
 0x72e   : > { %v11609_v49 = vrot.slane %v11586_v18, %v11608_v58  ;;  %v11613_v51 = vrot.slane %v11586_v18, %v11612_v43  ;;  %v11617_v3 = vrot.slane %v11586_v18, %v11616_v44  ;;  %v11621_v6 = vrot.slane %v11586_v18, %v11620_v15 }
 0x72f   : > { %v11650_v56 = vadd.f32 %v11593_v24, %v11574_v5  ;;  %v11651_v57 = vadd.f32 %v11597_v45, %v11575_v8  ;;  %v11652_v60 = vadd.f32 %v11601_v46, %v11576_v50  ;;  %v11653_v61 = vadd.f32 %v11605_v47, %v11577_v11 }
 0x730   : > { %v11654_v9 = vadd.f32 %v11609_v49, %v11578_v35  ;;  %v11655_v10 = vadd.f32 %v11613_v51, %v11579_v63  ;;  %v11656_v1 = vadd.f32 %v11617_v3, %v11580_v48  ;;  %v11657_v17 = vadd.f32 %v11621_v6, %v11581_v54 }
 0x731   : > { %v11662_v23 = vmax.f32 %v11650_v56, 0.0  ;;  %v11663_v29 = vmax.f32 %v11651_v57, 0.0  ;;  %v11664_v4 = vmax.f32 %v11652_v60, 0.0  ;;  %v11665_v25 = vmax.f32 %v11653_v61, 0.0 }
 0x732   : > { %v11666_v40 = vmax.f32 %v11654_v9, 0.0  ;;  %v11667_v31 = vmax.f32 %v11655_v10, 0.0  ;;  %v11668_v36 = vmax.f32 %v11656_v1, 0.0  ;;  %v11669_v7 = vmax.f32 %v11657_v17, 0.0 }
 0x733   : > { %11674 = vst [vmem:[%s16139_s20] sm:$0xff] %v11662_v23  ;;  %11675 = vst [vmem:[%s16139_s20 + $0x8] sm:$0xff] %v11663_v29  ;;  %v11625_v37 = vrot.slane %v11587_v2, %v11592_v16  ;;  %v11629_v26 = vrot.slane %v11587_v2, %v11596_v14  ;;  %v11633_v21 = vrot.slane %v11587_v2, %v11600_v53 }
 0x734   : > { %11676 = vst [vmem:[%s16139_s20 + $0x10] sm:$0xff] %v11664_v4  ;;  %11677 = vst [vmem:[%s16139_s20 + $0x18] sm:$0xff] %v11665_v25  ;;  %v11637_v22 = vrot.slane %v11587_v2, %v11604_v39 }
 0x735   : > { %11678 = vst [vmem:[%s16139_s20 + $0x20] sm:$0xff] %v11666_v40  ;;  %11679 = vst [vmem:[%s16139_s20 + $0x28] sm:$0xff] %v11667_v31  ;;  %v11658_v19 = vadd.f32 %v11625_v37, %v11582_v38  ;;  %v11659_v20 = vadd.f32 %v11629_v26, %v11583_v41  ;;  %v11660_v27 = vadd.f32 %v11633_v21, %v11584_v32 }
 0x736   : > { %11680 = vst [vmem:[%s16139_s20 + $0x30] sm:$0xff] %v11668_v36  ;;  %11681 = vst [vmem:[%s16139_s20 + $0x38] sm:$0xff] %v11669_v7  ;;  %v11661_v52 = vadd.f32 %v11637_v22, %v11585_v12 }
 0x737   : > { %v11670_v34 = vmax.f32 %v11658_v19, 0.0  ;;  %v11671_v30 = vmax.f32 %v11659_v20, 0.0  ;;  %v11672_v33 = vmax.f32 %v11660_v27, 0.0 }
 0x738   : > { %v11673_v59 = vmax.f32 %v11661_v52, 0.0 }
 0x739   : > { %11682 = vst [vmem:[%s16139_s20 + $0x40] sm:$0xff] %v11670_v34  ;;  %11683 = vst [vmem:[%s16139_s20 + $0x48] sm:$0xff] %v11671_v30 }
 0x73a   : > { %11684 = vst [vmem:[%s16139_s20 + $0x50] sm:$0xff] %v11672_v33  ;;  %11685 = vst [vmem:[%s16139_s20 + $0x58] sm:$0xff] %v11673_v59 }
 0x73b PF: > { %s19_s22 = sadd.s32 1, %s15944_s22   ;;  %s18011_s18 = sld [smem:[#allocation9_spill]] }
 0x73c   : > { %p16_p1 = scmp.ge.s32.totalorder %s19_s22, 10   ;;  %s18012_s20 = sld [smem:[#allocation10_spill]] }
 0x73d   : > { %s18013_s24 = sld [smem:[#allocation11_spill]]  ;;  %s18014_s12 = smov %s15908_s13 }
 0x73e   : > { %s18015_s13 = smov %s15912_s14  ;;  %s18016_s14 = smov %s16089_s4 }
 0x73f   : > { %s18017_s15 = smov %s15920_s16  ;;  %s18018_s16 = smov %s15924_s17 }
 0x740   : > { %s18019_s17 = smov %s16059_s7  ;;  %s18020_s19 = smov %s15940_s21 }
 0x741   :  { %18 = sbr.rel (!%p16_p1) target bundleno = 12 (0xc), region = 96 }
 0x743   : > { %s18021_s21 = smov %s18013_s24 }
 0x746   :  { %11716 = vsyncpa [#allocation4], 1 }
 0x747   :  { %11718 = vsyncpa [#allocation4 + $0x1], 1 }
 0x748   :  { %11719 = vsyncpa [#allocation6], 1 }
 0x749   :  { %11721 = vsyncpa [#allocation6 + $0x1], 1 }

</bundles_post_ra>
